<compile_context>
chip_gen: v7x
topology: tpu7x:2x2x1
jax: 0.10.0
libtpu: 0.0.40
codegen_flags: <defaults>
</compile_context>

<pallas_src>
import jax
import jax.numpy as jnp
from jax.experimental import pallas as pl
from jax.experimental.pallas import tpu as pltpu


def make_resblock_kernel(H, W, WP, CP):
    L = H * WP                   # flattened output rows per image (incl. pad cols)
    PF = (H + 3) * WP            # padded-flattened input/intermediate length
    RES_OFF = WP + 1             # flat offset of padded coord (h+1, w+1) vs (h, w)
    TAIL = PF - RES_OFF - L      # bottom halo rows of the intermediate
    GAP = WP - W                 # pad columns per image row (>= 2)

    def kernel(x_ref, w0_ref, b0_ref, w1_ref, b1_ref, out_ref,
               relu_scr, slab_scr, ypad_scr):
        # ---- relu(x) once, cast to bf16 for the MXU (hoisted out of the taps) ----
        relu_scr[...] = jnp.maximum(x_ref[0], 0.0).astype(jnp.bfloat16)

        # ---- conv0: im2col slab (L, 9*CP), then one big-K MXU matmul ----
        for dh in range(3):
            for dw in range(3):
                tap = 3 * dh + dw
                off = dh * WP + dw
                slab_scr[:, pl.ds(tap * CP, CP)] = relu_scr[pl.ds(off, L), :]

        acc0 = jnp.dot(slab_scr[...], w0_ref[...],
                       preferred_element_type=jnp.float32)
        y = jnp.maximum(acc0 + b0_ref[...], 0.0).astype(jnp.bfloat16)

        # ---- build zero-padded intermediate in VMEM ----
        # interior first (fully overwritten every step) ...
        ypad_scr[pl.ds(RES_OFF, L), :] = y
        # ... then zero only the halo rows ...
        ypad_scr[pl.ds(0, RES_OFF), :] = jnp.zeros((RES_OFF, CP), jnp.bfloat16)
        ypad_scr[pl.ds(RES_OFF + L, TAIL), :] = jnp.zeros((TAIL, CP), jnp.bfloat16)
        # ... and the pad-column gaps between image rows (replaces the old
        # full-width mask multiply + mask HBM input).  Gap k covers padded
        # columns [W+1, WP) of row k plus column 0 of row k+1 — one small
        # contiguous store per image row.
        gap_zeros = jnp.zeros((GAP, CP), jnp.bfloat16)
        for k in range(H + 1):
            ypad_scr[pl.ds(k * WP + W + 1, GAP), :] = gap_zeros

        # ---- conv1: im2col slab from the padded intermediate, one matmul ----
        for dh in range(3):
            for dw in range(3):
                tap = 3 * dh + dw
                off = dh * WP + dw
                slab_scr[:, pl.ds(tap * CP, CP)] = ypad_scr[pl.ds(off, L), :]

        acc1 = jnp.dot(slab_scr[...], w1_ref[...],
                       preferred_element_type=jnp.float32)

        # residual uses the ORIGINAL (un-relu'd, f32) input
        residual = x_ref[0, pl.ds(RES_OFF, L), :]
        out_ref[0] = acc1 + b1_ref[...] + residual

    return kernel


def residual_block(x_nchw, w0, b0, w1, b1):
    """w0, w1: (3, 3, Cin, Cout) HWIO; b0, b1: (C,). Input/output: NCHW."""
    N, C, H, W = x_nchw.shape
    CP = ((max(C, 128) + 127) // 128) * 128      # lane-dense channel padding
    WP = ((W + 2 + 7) // 8) * 8                  # padded width, sublane aligned
    L = H * WP
    PF = (H + 3) * WP

    # ---- layout prep (wrapper): NHWC, spatial zero-pad, channel pad, flatten ----
    # TODO(synk): keep NHWC / this flattened layout across the surrounding model
    # to avoid the NCHW<->NHWC transposes costing extra HBM round trips.
    x_nhwc = jnp.transpose(x_nchw, (0, 2, 3, 1)).astype(jnp.float32)
    xpad = jnp.pad(x_nhwc, ((0, 0), (1, 2), (1, WP - W - 1), (0, CP - C)))
    xflat = xpad.reshape(N, PF, CP)              # f32 (exact residual)

    def prep_w(w):
        # (3,3,C,C) HWIO -> zero-pad channels -> stacked (9*CP, CP) bf16
        wpad = jnp.pad(w.astype(jnp.float32),
                       ((0, 0), (0, 0), (0, CP - C), (0, CP - C)))
        return wpad.reshape(9 * CP, CP).astype(jnp.bfloat16)

    w0f = prep_w(w0)
    w1f = prep_w(w1)
    b0r = jnp.pad(b0.astype(jnp.float32), (0, CP - C)).reshape(1, CP)
    b1r = jnp.pad(b1.astype(jnp.float32), (0, CP - C)).reshape(1, CP)

    kernel = make_resblock_kernel(H, W, WP, CP)
    out_flat = pl.pallas_call(
        kernel,
        out_shape=jax.ShapeDtypeStruct((N, L, CP), jnp.float32),
        grid=(N,),
        in_specs=[
            pl.BlockSpec((1, PF, CP), lambda b: (b, 0, 0)),   # x (padded, flat, f32)
            pl.BlockSpec((9 * CP, CP), lambda b: (0, 0)),     # w0 stacked (bf16)
            pl.BlockSpec((1, CP), lambda b: (0, 0)),          # b0
            pl.BlockSpec((9 * CP, CP), lambda b: (0, 0)),     # w1 stacked (bf16)
            pl.BlockSpec((1, CP), lambda b: (0, 0)),          # b1
        ],
        out_specs=pl.BlockSpec((1, L, CP), lambda b: (b, 0, 0)),
        scratch_shapes=[
            pltpu.VMEM((PF, CP), jnp.bfloat16),        # relu(x), padded
            pltpu.VMEM((L, 9 * CP), jnp.bfloat16),     # im2col slab (reused)
            pltpu.VMEM((PF, CP), jnp.bfloat16),        # padded intermediate y
        ],
        compiler_params=pltpu.CompilerParams(
            dimension_semantics=("parallel",)),
    )(xflat, w0f, b0r, w1f, b1r)

    # drop pad columns / pad channels, back to NCHW
    out = out_flat.reshape(N, H, WP, CP)[:, :, :W, :C]
    return jnp.transpose(out, (0, 3, 1, 2))


def ref_forward(x_nchw, w0, b0, w1, b1):
    """Pure-JAX reference matching the PyTorch module semantics."""
    x = jnp.transpose(x_nchw, (0, 2, 3, 1))  # NHWC

    def conv(y, w, b):
        return jax.lax.conv_general_dilated(
            y, w, window_strides=(1, 1), padding='SAME',
            dimension_numbers=('NHWC', 'HWIO', 'NHWC'),
            precision=jax.lax.Precision.HIGHEST) + b

    h = conv(jax.nn.relu(x), w0, b0)
    h = conv(jax.nn.relu(h), w1, b1)
    out = h + x
    return jnp.transpose(out, (0, 3, 1, 2))


if __name__ == "__main__":
    key = jax.random.PRNGKey(0)
    N, C, H, W = 2, 4, 16, 16
    k1, k2, k3, k4, k5 = jax.random.split(key, 5)

    x = jax.random.normal(k1, (N, C, H, W), jnp.float32)
    # deterministic synthetic parameters (shapes match nn.Conv2d(C, C, 3, padding=1))
    w0 = jax.random.normal(k2, (3, 3, C, C), jnp.float32) * 0.1   # HWIO
    b0 = jax.random.normal(k3, (C,), jnp.float32) * 0.1
    w1 = jax.random.normal(k4, (3, 3, C, C), jnp.float32) * 0.1
    b1 = jax.random.normal(k5, (C,), jnp.float32) * 0.1

    out = residual_block(x, w0, b0, w1, b1)
    out = jax.block_until_ready(out)

    ref = ref_forward(x, w0, b0, w1, b1)
    assert out.shape == (N, C, H, W), out.shape
    # tolerance accounts for bf16 MXU inputs (f32 accumulation, f32 residual)
    if not jnp.allclose(out, ref, atol=3e-2, rtol=2e-2):
        raise AssertionError("Pallas kernel output does not match reference")

    print("KERNEL_OK")
</pallas_src>

<mosaic_0001>
module attributes {stable_mosaic.version = 11 : i64} {
  func.func @kernel(%arg0: i32, %arg1: memref<1x456x128xf32, #tpu.memory_space<vmem>>, %arg2: memref<1152x128xbf16, #tpu.memory_space<vmem>>, %arg3: memref<1x128xf32, #tpu.memory_space<vmem>>, %arg4: memref<1152x128xbf16, #tpu.memory_space<vmem>>, %arg5: memref<1x128xf32, #tpu.memory_space<vmem>>, %arg6: memref<1x384x128xf32, #tpu.memory_space<vmem>>, %arg7: memref<456x128xbf16, #tpu.memory_space<vmem>>, %arg8: memref<384x1152xbf16, #tpu.memory_space<vmem>>, %arg9: memref<456x128xbf16, #tpu.memory_space<vmem>>) attributes {dimension_semantics = [#tpu.dimension_semantics<parallel>], iteration_bounds = array<i64: 2>, scalar_prefetch = 0 : i64, scratch_operands = 3 : i64, tpu.core_type = #tpu.core_type<tc>, window_params = [{transform_indices = @transform_0, window_bounds = array<i64: 1, 456, 128>}, {pipeline_mode = #tpu.pipeline_mode<synchronous>, transform_indices = @transform_1, window_bounds = array<i64: 1152, 128>}, {pipeline_mode = #tpu.pipeline_mode<synchronous>, transform_indices = @transform_2, window_bounds = array<i64: 1, 128>}, {pipeline_mode = #tpu.pipeline_mode<synchronous>, transform_indices = @transform_3, window_bounds = array<i64: 1152, 128>}, {pipeline_mode = #tpu.pipeline_mode<synchronous>, transform_indices = @transform_4, window_bounds = array<i64: 1, 128>}, {transform_indices = @transform_5, window_bounds = array<i64: 1, 384, 128>}]} {
    %c0 = arith.constant 0 : index
    %c0_0 = arith.constant 0 : index
    %c0_1 = arith.constant 0 : index
    %0 = vector.load %arg1[%c0, %c0_0, %c0_1] : memref<1x456x128xf32, #tpu.memory_space<vmem>>, vector<1x456x128xf32>
    %1 = vector.shape_cast %0 : vector<1x456x128xf32> to vector<456x128xf32>
    %cst = arith.constant 0.000000e+00 : f32
    %2 = vector.broadcast %cst : f32 to vector<456x128xf32>
    %3 = arith.maximumf %1, %2 : vector<456x128xf32>
    %4 = arith.truncf %3 : vector<456x128xf32> to vector<456x128xbf16>
    %c0_2 = arith.constant 0 : index
    %c0_3 = arith.constant 0 : index
    %5 = vector.load %arg7[%c0_2, %c0_3] : memref<456x128xbf16, #tpu.memory_space<vmem>>, vector<456x128xbf16>
    tpu.vector_store %arg7[%c0_2, %c0_3], %4 {strides = array<i32>} : memref<456x128xbf16, #tpu.memory_space<vmem>>, vector<456x128xbf16>,
    %c0_4 = arith.constant 0 : index
    %c0_5 = arith.constant 0 : index
    %6 = vector.load %arg7[%c0_4, %c0_5] : memref<456x128xbf16, #tpu.memory_space<vmem>>, vector<384x128xbf16>
    %c0_6 = arith.constant 0 : index
    %c0_7 = arith.constant 0 : index
    %7 = vector.load %arg8[%c0_6, %c0_7] : memref<384x1152xbf16, #tpu.memory_space<vmem>>, vector<384x128xbf16>
    tpu.vector_store %arg8[%c0_6, %c0_7], %6 {strides = array<i32>} : memref<384x1152xbf16, #tpu.memory_space<vmem>>, vector<384x128xbf16>,
    %c1 = arith.constant 1 : index
    %c0_8 = arith.constant 0 : index
    %8 = vector.load %arg7[%c1, %c0_8] : memref<456x128xbf16, #tpu.memory_space<vmem>>, vector<384x128xbf16>
    %c0_9 = arith.constant 0 : index
    %c128 = arith.constant 128 : index
    %9 = vector.load %arg8[%c0_9, %c128] : memref<384x1152xbf16, #tpu.memory_space<vmem>>, vector<384x128xbf16>
    tpu.vector_store %arg8[%c0_9, %c128], %8 {strides = array<i32>} : memref<384x1152xbf16, #tpu.memory_space<vmem>>, vector<384x128xbf16>,
    %c2 = arith.constant 2 : index
    %c0_10 = arith.constant 0 : index
    %10 = vector.load %arg7[%c2, %c0_10] : memref<456x128xbf16, #tpu.memory_space<vmem>>, vector<384x128xbf16>
    %c0_11 = arith.constant 0 : index
    %c256 = arith.constant 256 : index
    %11 = vector.load %arg8[%c0_11, %c256] : memref<384x1152xbf16, #tpu.memory_space<vmem>>, vector<384x128xbf16>
    tpu.vector_store %arg8[%c0_11, %c256], %10 {strides = array<i32>} : memref<384x1152xbf16, #tpu.memory_space<vmem>>, vector<384x128xbf16>,
    %c24 = arith.constant 24 : index
    %c0_12 = arith.constant 0 : index
    %12 = vector.load %arg7[%c24, %c0_12] : memref<456x128xbf16, #tpu.memory_space<vmem>>, vector<384x128xbf16>
    %c0_13 = arith.constant 0 : index
    %c384 = arith.constant 384 : index
    %13 = vector.load %arg8[%c0_13, %c384] : memref<384x1152xbf16, #tpu.memory_space<vmem>>, vector<384x128xbf16>
    tpu.vector_store %arg8[%c0_13, %c384], %12 {strides = array<i32>} : memref<384x1152xbf16, #tpu.memory_space<vmem>>, vector<384x128xbf16>,
    %c25 = arith.constant 25 : index
    %c0_14 = arith.constant 0 : index
    %14 = vector.load %arg7[%c25, %c0_14] : memref<456x128xbf16, #tpu.memory_space<vmem>>, vector<384x128xbf16>
    %c0_15 = arith.constant 0 : index
    %c512 = arith.constant 512 : index
    %15 = vector.load %arg8[%c0_15, %c512] : memref<384x1152xbf16, #tpu.memory_space<vmem>>, vector<384x128xbf16>
    tpu.vector_store %arg8[%c0_15, %c512], %14 {strides = array<i32>} : memref<384x1152xbf16, #tpu.memory_space<vmem>>, vector<384x128xbf16>,
    %c26 = arith.constant 26 : index
    %c0_16 = arith.constant 0 : index
    %16 = vector.load %arg7[%c26, %c0_16] : memref<456x128xbf16, #tpu.memory_space<vmem>>, vector<384x128xbf16>
    %c0_17 = arith.constant 0 : index
    %c640 = arith.constant 640 : index
    %17 = vector.load %arg8[%c0_17, %c640] : memref<384x1152xbf16, #tpu.memory_space<vmem>>, vector<384x128xbf16>
    tpu.vector_store %arg8[%c0_17, %c640], %16 {strides = array<i32>} : memref<384x1152xbf16, #tpu.memory_space<vmem>>, vector<384x128xbf16>,
    %c48 = arith.constant 48 : index
    %c0_18 = arith.constant 0 : index
    %18 = vector.load %arg7[%c48, %c0_18] : memref<456x128xbf16, #tpu.memory_space<vmem>>, vector<384x128xbf16>
    %c0_19 = arith.constant 0 : index
    %c768 = arith.constant 768 : index
    %19 = vector.load %arg8[%c0_19, %c768] : memref<384x1152xbf16, #tpu.memory_space<vmem>>, vector<384x128xbf16>
    tpu.vector_store %arg8[%c0_19, %c768], %18 {strides = array<i32>} : memref<384x1152xbf16, #tpu.memory_space<vmem>>, vector<384x128xbf16>,
    %c49 = arith.constant 49 : index
    %c0_20 = arith.constant 0 : index
    %20 = vector.load %arg7[%c49, %c0_20] : memref<456x128xbf16, #tpu.memory_space<vmem>>, vector<384x128xbf16>
    %c0_21 = arith.constant 0 : index
    %c896 = arith.constant 896 : index
    %21 = vector.load %arg8[%c0_21, %c896] : memref<384x1152xbf16, #tpu.memory_space<vmem>>, vector<384x128xbf16>
    tpu.vector_store %arg8[%c0_21, %c896], %20 {strides = array<i32>} : memref<384x1152xbf16, #tpu.memory_space<vmem>>, vector<384x128xbf16>,
    %c50 = arith.constant 50 : index
    %c0_22 = arith.constant 0 : index
    %22 = vector.load %arg7[%c50, %c0_22] : memref<456x128xbf16, #tpu.memory_space<vmem>>, vector<384x128xbf16>
    %c0_23 = arith.constant 0 : index
    %c1024 = arith.constant 1024 : index
    %23 = vector.load %arg8[%c0_23, %c1024] : memref<384x1152xbf16, #tpu.memory_space<vmem>>, vector<384x128xbf16>
    tpu.vector_store %arg8[%c0_23, %c1024], %22 {strides = array<i32>} : memref<384x1152xbf16, #tpu.memory_space<vmem>>, vector<384x128xbf16>,
    %c0_24 = arith.constant 0 : index
    %c0_25 = arith.constant 0 : index
    %24 = vector.load %arg8[%c0_24, %c0_25] : memref<384x1152xbf16, #tpu.memory_space<vmem>>, vector<384x1152xbf16>
    %c0_26 = arith.constant 0 : index
    %c0_27 = arith.constant 0 : index
    %25 = vector.load %arg2[%c0_26, %c0_27] : memref<1152x128xbf16, #tpu.memory_space<vmem>>, vector<1152x128xbf16>
    %cst_28 = arith.constant dense<0.000000e+00> : vector<384x128xf32>
    %26 = tpu.matmul %24, %25, %cst_28 {dimension_numbers = #tpu.dot_dimension_numbers<[1], [0], [0], [1], [0, 0, 1, 1], [], []>} : vector<384x1152xbf16>, vector<1152x128xbf16>, vector<384x128xf32> -> vector<384x128xf32>
    %c0_29 = arith.constant 0 : index
    %c0_30 = arith.constant 0 : index
    %27 = vector.load %arg3[%c0_29, %c0_30] : memref<1x128xf32, #tpu.memory_space<vmem>>, vector<1x128xf32>
    %28 = vector.broadcast %27 : vector<1x128xf32> to vector<384x128xf32>
    %29 = arith.addf %26, %28 : vector<384x128xf32>
    %cst_31 = arith.constant 0.000000e+00 : f32
    %30 = vector.broadcast %cst_31 : f32 to vector<384x128xf32>
    %31 = arith.maximumf %29, %30 : vector<384x128xf32>
    %32 = arith.truncf %31 : vector<384x128xf32> to vector<384x128xbf16>
    %c25_32 = arith.constant 25 : index
    %c0_33 = arith.constant 0 : index
    %33 = vector.load %arg9[%c25_32, %c0_33] : memref<456x128xbf16, #tpu.memory_space<vmem>>, vector<384x128xbf16>
    tpu.vector_store %arg9[%c25_32, %c0_33], %32 {strides = array<i32>} : memref<456x128xbf16, #tpu.memory_space<vmem>>, vector<384x128xbf16>,
    %cst_34 = arith.constant 0.000000e+00 : bf16
    %34 = vector.broadcast %cst_34 : bf16 to vector<25x128xbf16>
    %c0_35 = arith.constant 0 : index
    %c0_36 = arith.constant 0 : index
    %35 = vector.load %arg9[%c0_35, %c0_36] : memref<456x128xbf16, #tpu.memory_space<vmem>>, vector<25x128xbf16>
    tpu.vector_store %arg9[%c0_35, %c0_36], %34 {strides = array<i32>} : memref<456x128xbf16, #tpu.memory_space<vmem>>, vector<25x128xbf16>,
    %cst_37 = arith.constant 0.000000e+00 : bf16
    %36 = vector.broadcast %cst_37 : bf16 to vector<47x128xbf16>
    %c409 = arith.constant 409 : index
    %c0_38 = arith.constant 0 : index
    %37 = vector.load %arg9[%c409, %c0_38] : memref<456x128xbf16, #tpu.memory_space<vmem>>, vector<47x128xbf16>
    tpu.vector_store %arg9[%c409, %c0_38], %36 {strides = array<i32>} : memref<456x128xbf16, #tpu.memory_space<vmem>>, vector<47x128xbf16>,
    %cst_39 = arith.constant 0.000000e+00 : bf16
    %38 = vector.broadcast %cst_39 : bf16 to vector<8x128xbf16>
    %c17 = arith.constant 17 : index
    %c0_40 = arith.constant 0 : index
    %39 = vector.load %arg9[%c17, %c0_40] : memref<456x128xbf16, #tpu.memory_space<vmem>>, vector<8x128xbf16>
    tpu.vector_store %arg9[%c17, %c0_40], %38 {strides = array<i32>} : memref<456x128xbf16, #tpu.memory_space<vmem>>, vector<8x128xbf16>,
    %c41 = arith.constant 41 : index
    %c0_41 = arith.constant 0 : index
    %40 = vector.load %arg9[%c41, %c0_41] : memref<456x128xbf16, #tpu.memory_space<vmem>>, vector<8x128xbf16>
    tpu.vector_store %arg9[%c41, %c0_41], %38 {strides = array<i32>} : memref<456x128xbf16, #tpu.memory_space<vmem>>, vector<8x128xbf16>,
    %c65 = arith.constant 65 : index
    %c0_42 = arith.constant 0 : index
    %41 = vector.load %arg9[%c65, %c0_42] : memref<456x128xbf16, #tpu.memory_space<vmem>>, vector<8x128xbf16>
    tpu.vector_store %arg9[%c65, %c0_42], %38 {strides = array<i32>} : memref<456x128xbf16, #tpu.memory_space<vmem>>, vector<8x128xbf16>,
    %c89 = arith.constant 89 : index
    %c0_43 = arith.constant 0 : index
    %42 = vector.load %arg9[%c89, %c0_43] : memref<456x128xbf16, #tpu.memory_space<vmem>>, vector<8x128xbf16>
    tpu.vector_store %arg9[%c89, %c0_43], %38 {strides = array<i32>} : memref<456x128xbf16, #tpu.memory_space<vmem>>, vector<8x128xbf16>,
    %c113 = arith.constant 113 : index
    %c0_44 = arith.constant 0 : index
    %43 = vector.load %arg9[%c113, %c0_44] : memref<456x128xbf16, #tpu.memory_space<vmem>>, vector<8x128xbf16>
    tpu.vector_store %arg9[%c113, %c0_44], %38 {strides = array<i32>} : memref<456x128xbf16, #tpu.memory_space<vmem>>, vector<8x128xbf16>,
    %c137 = arith.constant 137 : index
    %c0_45 = arith.constant 0 : index
    %44 = vector.load %arg9[%c137, %c0_45] : memref<456x128xbf16, #tpu.memory_space<vmem>>, vector<8x128xbf16>
    tpu.vector_store %arg9[%c137, %c0_45], %38 {strides = array<i32>} : memref<456x128xbf16, #tpu.memory_space<vmem>>, vector<8x128xbf16>,
    %c161 = arith.constant 161 : index
    %c0_46 = arith.constant 0 : index
    %45 = vector.load %arg9[%c161, %c0_46] : memref<456x128xbf16, #tpu.memory_space<vmem>>, vector<8x128xbf16>
    tpu.vector_store %arg9[%c161, %c0_46], %38 {strides = array<i32>} : memref<456x128xbf16, #tpu.memory_space<vmem>>, vector<8x128xbf16>,
    %c185 = arith.constant 185 : index
    %c0_47 = arith.constant 0 : index
    %46 = vector.load %arg9[%c185, %c0_47] : memref<456x128xbf16, #tpu.memory_space<vmem>>, vector<8x128xbf16>
    tpu.vector_store %arg9[%c185, %c0_47], %38 {strides = array<i32>} : memref<456x128xbf16, #tpu.memory_space<vmem>>, vector<8x128xbf16>,
    %c209 = arith.constant 209 : index
    %c0_48 = arith.constant 0 : index
    %47 = vector.load %arg9[%c209, %c0_48] : memref<456x128xbf16, #tpu.memory_space<vmem>>, vector<8x128xbf16>
    tpu.vector_store %arg9[%c209, %c0_48], %38 {strides = array<i32>} : memref<456x128xbf16, #tpu.memory_space<vmem>>, vector<8x128xbf16>,
    %c233 = arith.constant 233 : index
    %c0_49 = arith.constant 0 : index
    %48 = vector.load %arg9[%c233, %c0_49] : memref<456x128xbf16, #tpu.memory_space<vmem>>, vector<8x128xbf16>
    tpu.vector_store %arg9[%c233, %c0_49], %38 {strides = array<i32>} : memref<456x128xbf16, #tpu.memory_space<vmem>>, vector<8x128xbf16>,
    %c257 = arith.constant 257 : index
    %c0_50 = arith.constant 0 : index
    %49 = vector.load %arg9[%c257, %c0_50] : memref<456x128xbf16, #tpu.memory_space<vmem>>, vector<8x128xbf16>
    tpu.vector_store %arg9[%c257, %c0_50], %38 {strides = array<i32>} : memref<456x128xbf16, #tpu.memory_space<vmem>>, vector<8x128xbf16>,
    %c281 = arith.constant 281 : index
    %c0_51 = arith.constant 0 : index
    %50 = vector.load %arg9[%c281, %c0_51] : memref<456x128xbf16, #tpu.memory_space<vmem>>, vector<8x128xbf16>
    tpu.vector_store %arg9[%c281, %c0_51], %38 {strides = array<i32>} : memref<456x128xbf16, #tpu.memory_space<vmem>>, vector<8x128xbf16>,
    %c305 = arith.constant 305 : index
    %c0_52 = arith.constant 0 : index
    %51 = vector.load %arg9[%c305, %c0_52] : memref<456x128xbf16, #tpu.memory_space<vmem>>, vector<8x128xbf16>
    tpu.vector_store %arg9[%c305, %c0_52], %38 {strides = array<i32>} : memref<456x128xbf16, #tpu.memory_space<vmem>>, vector<8x128xbf16>,
    %c329 = arith.constant 329 : index
    %c0_53 = arith.constant 0 : index
    %52 = vector.load %arg9[%c329, %c0_53] : memref<456x128xbf16, #tpu.memory_space<vmem>>, vector<8x128xbf16>
    tpu.vector_store %arg9[%c329, %c0_53], %38 {strides = array<i32>} : memref<456x128xbf16, #tpu.memory_space<vmem>>, vector<8x128xbf16>,
    %c353 = arith.constant 353 : index
    %c0_54 = arith.constant 0 : index
    %53 = vector.load %arg9[%c353, %c0_54] : memref<456x128xbf16, #tpu.memory_space<vmem>>, vector<8x128xbf16>
    tpu.vector_store %arg9[%c353, %c0_54], %38 {strides = array<i32>} : memref<456x128xbf16, #tpu.memory_space<vmem>>, vector<8x128xbf16>,
    %c377 = arith.constant 377 : index
    %c0_55 = arith.constant 0 : index
    %54 = vector.load %arg9[%c377, %c0_55] : memref<456x128xbf16, #tpu.memory_space<vmem>>, vector<8x128xbf16>
    tpu.vector_store %arg9[%c377, %c0_55], %38 {strides = array<i32>} : memref<456x128xbf16, #tpu.memory_space<vmem>>, vector<8x128xbf16>,
    %c401 = arith.constant 401 : index
    %c0_56 = arith.constant 0 : index
    %55 = vector.load %arg9[%c401, %c0_56] : memref<456x128xbf16, #tpu.memory_space<vmem>>, vector<8x128xbf16>
    tpu.vector_store %arg9[%c401, %c0_56], %38 {strides = array<i32>} : memref<456x128xbf16, #tpu.memory_space<vmem>>, vector<8x128xbf16>,
    %c0_57 = arith.constant 0 : index
    %c0_58 = arith.constant 0 : index
    %56 = vector.load %arg9[%c0_57, %c0_58] : memref<456x128xbf16, #tpu.memory_space<vmem>>, vector<384x128xbf16>
    %c0_59 = arith.constant 0 : index
    %c0_60 = arith.constant 0 : index
    %57 = vector.load %arg8[%c0_59, %c0_60] : memref<384x1152xbf16, #tpu.memory_space<vmem>>, vector<384x128xbf16>
    tpu.vector_store %arg8[%c0_59, %c0_60], %56 {strides = array<i32>} : memref<384x1152xbf16, #tpu.memory_space<vmem>>, vector<384x128xbf16>,
    %c1_61 = arith.constant 1 : index
    %c0_62 = arith.constant 0 : index
    %58 = vector.load %arg9[%c1_61, %c0_62] : memref<456x128xbf16, #tpu.memory_space<vmem>>, vector<384x128xbf16>
    %c0_63 = arith.constant 0 : index
    %c128_64 = arith.constant 128 : index
    %59 = vector.load %arg8[%c0_63, %c128_64] : memref<384x1152xbf16, #tpu.memory_space<vmem>>, vector<384x128xbf16>
    tpu.vector_store %arg8[%c0_63, %c128_64], %58 {strides = array<i32>} : memref<384x1152xbf16, #tpu.memory_space<vmem>>, vector<384x128xbf16>,
    %c2_65 = arith.constant 2 : index
    %c0_66 = arith.constant 0 : index
    %60 = vector.load %arg9[%c2_65, %c0_66] : memref<456x128xbf16, #tpu.memory_space<vmem>>, vector<384x128xbf16>
    %c0_67 = arith.constant 0 : index
    %c256_68 = arith.constant 256 : index
    %61 = vector.load %arg8[%c0_67, %c256_68] : memref<384x1152xbf16, #tpu.memory_space<vmem>>, vector<384x128xbf16>
    tpu.vector_store %arg8[%c0_67, %c256_68], %60 {strides = array<i32>} : memref<384x1152xbf16, #tpu.memory_space<vmem>>, vector<384x128xbf16>,
    %c24_69 = arith.constant 24 : index
    %c0_70 = arith.constant 0 : index
    %62 = vector.load %arg9[%c24_69, %c0_70] : memref<456x128xbf16, #tpu.memory_space<vmem>>, vector<384x128xbf16>
    %c0_71 = arith.constant 0 : index
    %c384_72 = arith.constant 384 : index
    %63 = vector.load %arg8[%c0_71, %c384_72] : memref<384x1152xbf16, #tpu.memory_space<vmem>>, vector<384x128xbf16>
    tpu.vector_store %arg8[%c0_71, %c384_72], %62 {strides = array<i32>} : memref<384x1152xbf16, #tpu.memory_space<vmem>>, vector<384x128xbf16>,
    %c25_73 = arith.constant 25 : index
    %c0_74 = arith.constant 0 : index
    %64 = vector.load %arg9[%c25_73, %c0_74] : memref<456x128xbf16, #tpu.memory_space<vmem>>, vector<384x128xbf16>
    %c0_75 = arith.constant 0 : index
    %c512_76 = arith.constant 512 : index
    %65 = vector.load %arg8[%c0_75, %c512_76] : memref<384x1152xbf16, #tpu.memory_space<vmem>>, vector<384x128xbf16>
    tpu.vector_store %arg8[%c0_75, %c512_76], %64 {strides = array<i32>} : memref<384x1152xbf16, #tpu.memory_space<vmem>>, vector<384x128xbf16>,
    %c26_77 = arith.constant 26 : index
    %c0_78 = arith.constant 0 : index
    %66 = vector.load %arg9[%c26_77, %c0_78] : memref<456x128xbf16, #tpu.memory_space<vmem>>, vector<384x128xbf16>
    %c0_79 = arith.constant 0 : index
    %c640_80 = arith.constant 640 : index
    %67 = vector.load %arg8[%c0_79, %c640_80] : memref<384x1152xbf16, #tpu.memory_space<vmem>>, vector<384x128xbf16>
    tpu.vector_store %arg8[%c0_79, %c640_80], %66 {strides = array<i32>} : memref<384x1152xbf16, #tpu.memory_space<vmem>>, vector<384x128xbf16>,
    %c48_81 = arith.constant 48 : index
    %c0_82 = arith.constant 0 : index
    %68 = vector.load %arg9[%c48_81, %c0_82] : memref<456x128xbf16, #tpu.memory_space<vmem>>, vector<384x128xbf16>
    %c0_83 = arith.constant 0 : index
    %c768_84 = arith.constant 768 : index
    %69 = vector.load %arg8[%c0_83, %c768_84] : memref<384x1152xbf16, #tpu.memory_space<vmem>>, vector<384x128xbf16>
    tpu.vector_store %arg8[%c0_83, %c768_84], %68 {strides = array<i32>} : memref<384x1152xbf16, #tpu.memory_space<vmem>>, vector<384x128xbf16>,
    %c49_85 = arith.constant 49 : index
    %c0_86 = arith.constant 0 : index
    %70 = vector.load %arg9[%c49_85, %c0_86] : memref<456x128xbf16, #tpu.memory_space<vmem>>, vector<384x128xbf16>
    %c0_87 = arith.constant 0 : index
    %c896_88 = arith.constant 896 : index
    %71 = vector.load %arg8[%c0_87, %c896_88] : memref<384x1152xbf16, #tpu.memory_space<vmem>>, vector<384x128xbf16>
    tpu.vector_store %arg8[%c0_87, %c896_88], %70 {strides = array<i32>} : memref<384x1152xbf16, #tpu.memory_space<vmem>>, vector<384x128xbf16>,
    %c50_89 = arith.constant 50 : index
    %c0_90 = arith.constant 0 : index
    %72 = vector.load %arg9[%c50_89, %c0_90] : memref<456x128xbf16, #tpu.memory_space<vmem>>, vector<384x128xbf16>
    %c0_91 = arith.constant 0 : index
    %c1024_92 = arith.constant 1024 : index
    %73 = vector.load %arg8[%c0_91, %c1024_92] : memref<384x1152xbf16, #tpu.memory_space<vmem>>, vector<384x128xbf16>
    tpu.vector_store %arg8[%c0_91, %c1024_92], %72 {strides = array<i32>} : memref<384x1152xbf16, #tpu.memory_space<vmem>>, vector<384x128xbf16>,
    %c0_93 = arith.constant 0 : index
    %c0_94 = arith.constant 0 : index
    %74 = vector.load %arg8[%c0_93, %c0_94] : memref<384x1152xbf16, #tpu.memory_space<vmem>>, vector<384x1152xbf16>
    %c0_95 = arith.constant 0 : index
    %c0_96 = arith.constant 0 : index
    %75 = vector.load %arg4[%c0_95, %c0_96] : memref<1152x128xbf16, #tpu.memory_space<vmem>>, vector<1152x128xbf16>
    %cst_97 = arith.constant dense<0.000000e+00> : vector<384x128xf32>
    %76 = tpu.matmul %74, %75, %cst_97 {dimension_numbers = #tpu.dot_dimension_numbers<[1], [0], [0], [1], [0, 0, 1, 1], [], []>} : vector<384x1152xbf16>, vector<1152x128xbf16>, vector<384x128xf32> -> vector<384x128xf32>
    %c0_98 = arith.constant 0 : index
    %c25_99 = arith.constant 25 : index
    %c0_100 = arith.constant 0 : index
    %77 = vector.load %arg1[%c0_98, %c25_99, %c0_100] : memref<1x456x128xf32, #tpu.memory_space<vmem>>, vector<1x384x128xf32>
    %78 = vector.shape_cast %77 : vector<1x384x128xf32> to vector<384x128xf32>
    %c0_101 = arith.constant 0 : index
    %c0_102 = arith.constant 0 : index
    %79 = vector.load %arg5[%c0_101, %c0_102] : memref<1x128xf32, #tpu.memory_space<vmem>>, vector<1x128xf32>
    %80 = vector.broadcast %79 : vector<1x128xf32> to vector<384x128xf32>
    %81 = arith.addf %76, %80 : vector<384x128xf32>
    %82 = arith.addf %81, %78 : vector<384x128xf32>
    %c0_103 = arith.constant 0 : index
    %c0_104 = arith.constant 0 : index
    %c0_105 = arith.constant 0 : index
    %83 = vector.load %arg6[%c0_103, %c0_104, %c0_105] : memref<1x384x128xf32, #tpu.memory_space<vmem>>, vector<1x384x128xf32>
    %84 = vector.shape_cast %83 : vector<1x384x128xf32> to vector<384x128xf32>
    %85 = vector.shape_cast %82 : vector<384x128xf32> to vector<1x384x128xf32>
    tpu.vector_store %arg6[%c0_103, %c0_104, %c0_105], %85 {strides = array<i32>} : memref<1x384x128xf32, #tpu.memory_space<vmem>>, vector<1x384x128xf32>,
    return
  }
  func.func @transform_0(%arg0: i32) -> (i32, i32, i32) {
    %c0_i32 = arith.constant 0 : i32
    %c0_i32_0 = arith.constant 0 : i32
    %c0_i32_1 = arith.constant 0 : i32
    return %arg0, %c0_i32, %c0_i32_0 : i32, i32, i32
  }
  func.func @transform_1(%arg0: i32) -> (i32, i32) {
    %c0_i32 = arith.constant 0 : i32
    %c0_i32_0 = arith.constant 0 : i32
    %c0_i32_1 = arith.constant 0 : i32
    return %c0_i32, %c0_i32_0 : i32, i32
  }
  func.func @transform_2(%arg0: i32) -> (i32, i32) {
    %c0_i32 = arith.constant 0 : i32
    %c0_i32_0 = arith.constant 0 : i32
    %c0_i32_1 = arith.constant 0 : i32
    return %c0_i32, %c0_i32_0 : i32, i32
  }
  func.func @transform_3(%arg0: i32) -> (i32, i32) {
    %c0_i32 = arith.constant 0 : i32
    %c0_i32_0 = arith.constant 0 : i32
    %c0_i32_1 = arith.constant 0 : i32
    return %c0_i32, %c0_i32_0 : i32, i32
  }
  func.func @transform_4(%arg0: i32) -> (i32, i32) {
    %c0_i32 = arith.constant 0 : i32
    %c0_i32_0 = arith.constant 0 : i32
    %c0_i32_1 = arith.constant 0 : i32
    return %c0_i32, %c0_i32_0 : i32, i32
  }
  func.func @transform_5(%arg0: i32) -> (i32, i32, i32) {
    %c0_i32 = arith.constant 0 : i32
    %c0_i32_0 = arith.constant 0 : i32
    %c0_i32_1 = arith.constant 0 : i32
    return %arg0, %c0_i32, %c0_i32_0 : i32, i32, i32
  }
}

</mosaic_0001>

<bundles_post_ra>
// kernel: tpu_custom_call.1
= control target key start
LH: loop header
LB: loop body
LE: loop exit
PB: predicated region body
PF: predicated region fallthrough
CT: control target
= control target key end

     0   :  { %10 = vsyncpa [#allocation6], 0  ;;  %s15308_s0 = inlined_call_operand.hbm [shape: f32[2,456,128], index: 0, kind: input, shape index: {}]   ;;  %s15309_s1 = inlined_call_operand.hbm [shape: bf16[1152,128], index: 1, kind: input, shape index: {}]   ;;  %s15310_s2 = inlined_call_operand.vmem [shape: f32[1,128], index: 2, kind: input, shape index: {}]   ;;  %s15311_s3 = inlined_call_operand.hbm [shape: bf16[1152,128], index: 3, kind: input, shape index: {}]   ;;  %s15312_s4 = inlined_call_operand.vmem [shape: f32[1,128], index: 4, kind: input, shape index: {}]   ;;  %s15313_s5 = inlined_call_operand.hbm [shape: f32[2,384,128], index: 5, kind: output, shape index: {}]  }
   0x1   :  { %12 = vsyncpa [#allocation6 + $0x1], 0 }
   0x2   :  { %13 = vsyncpa [#allocation9], 0 }
   0x3   :  { %14 = vsyncpa [#allocation7], 0 }
   0x4   :  { %16 = vsyncpa [#allocation7 + $0x1], 0  ;;  %s13763_s18 = smov 0   ;;  %s13765_s19 = smov 0  }
   0x5   :  { %s13767_s20 = smov 0   ;;  %s13769_s21 = smov 0  }
   0x6 LB: > { %s13784_s22 = sadd.s32 4294967295, %s13720_s21   ;;  %s11028_s23 = sadd.s32 4294967294, %s13720_s21   ;;  %s13720_s21 = sphi %s13769_s21, %s15345_s21   ;;  %s13716_s20 = sphi %s13767_s20, %s15344_s20   ;;  %s13712_s19 = sphi %s13765_s19, %s15343_s19   ;;  %s13708_s18 = sphi %s13763_s18, %s15342_s18  }
   0x7   : > { %p42_p0 = scmp.ne.s32.totalorder %s13712_s19, %s13708_s18  ;;  %p15314_p1 = scmp.eq.s32.totalorder %s13784_s22, 0 }
   0x8   : > { %p156_p3 = scmp.eq.s32.totalorder %s11028_s23, 1  ;;  %p11029_p5 = scmp.ge.s32.totalorder %s13720_s21, 1 }
   0x9   : > { %p13793_p4 = por %p15314_p1, %p42_p0  ;;  %p163_p7 = scmp.lt.s32.totalorder %s13720_s21, 3 }
   0xa   : > { %p13798_p6 = por %p156_p3, %p42_p0  ;;  %s13722_s27 = smov [#allocation8]  }
   0xb   : > { %s15318_s24 = scalar_select %p13793_p4, 1, 0 }
   0xc   : > { %s15319_s25 = scalar_select %p13798_p6, 1, 0 }
   0xd   : > { %p13803_p8 = pnand %p11029_p5, %p163_p7  ;;  %s175_s28 = sshll.u32 %s13722_s27, 4  ;;  %s13807_s28 = int_to_ptr.vmem [resolvable:$true] %s175_s28 }
   0xe   : > { %s13723_s30 = smov [#allocation10]   ;;  %s13564_s9 = scalar_lea.hbm %s15309_s1, 9216 }
   0xf   : > { %p12904_p9 = pneg %p13803_p8  ;;  %s191_s6 = sshll.u32 %s13723_s30, 4  ;;  %s13818_s6 = int_to_ptr.vmem [resolvable:$true] %s191_s6 }
  0x10   : > { %p13565_p12 = scmp.ne.s32.totalorder %s15309_s1, %s13564_s9  ;;  %p13571_p5 = scmp.lt.u32.totalorder %s13564_s9, %s15309_s1 }
  0x11   : > { %p13814_p11 = pnand %p12904_p9, %p15314_p1 }
  0x13   : > { %p13566_p13 = pneg %p13814_p11 }
  0x15   : > { %p13567_p0 = pnand %p13566_p13, %p13565_p12 }
  0x17   : > { %p13568_p3 = pneg %p13567_p0 }
  0x19   : > { %p13573_p7 = pnand %p13571_p5, %p13568_p3 }
  0x1b   : > { %13576 = shalt.err (!%p13573_p7)
}
  0x1c   : > { %s13577_s14 = scalar_lea.vmem %s13807_s28, 9216  ;;  %p13585_p2 = scmp.lt.s32.totalorder %s13807_s28, %s13807_s28 }
  0x1d   : > { %p13578_p9 = scmp.ne.s32.totalorder %s13807_s28, %s13577_s14  ;;  %p13586_p12 = scmp.lt.s32.totalorder %s13577_s14, %s13577_s14 }
  0x1f   : > { %p13580_p10 = pnand %p13578_p9, %p13566_p13  ;;  %p13587_p0 = por %p13586_p12, %p13585_p2 }
  0x21   : > { %p13581_p1 = pneg %p13580_p10 }
  0x23   : > { %p13588_p6 = pnand %p13587_p0, %p13581_p1 }
  0x25   : > { %13591 = shalt.err (!%p13588_p6)
}
  0x26   : > { %s13724_s15 = smov 64   ;;  %s13725_s16 = smov 4  }
  0x27   : > { %12907 = dma.hbm_to_vmem [thread:$0]  (!%p13814_p11), %s15309_s1, 9216, %s13807_s28, [#allocation9], %s13724_s15, %s13724_s15, %s13725_s16  }
  0x28   : > { %s13592_s7 = scalar_lea.hbm %s15311_s3, 9216 }
  0x29   : > { %p13593_p2 = scmp.ne.s32.totalorder %s15311_s3, %s13592_s7  ;;  %p13599_p10 = scmp.lt.u32.totalorder %s13592_s7, %s15311_s3 }
  0x2b   : > { %p13595_p1 = pnand %p13593_p2, %p13566_p13 }
  0x2d   : > { %p13596_p6 = pneg %p13595_p1 }
  0x2f   : > { %p13601_p3 = pnand %p13599_p10, %p13596_p6 }
  0x31   : > { %13604 = shalt.err (!%p13601_p3)
}
  0x32   : > { %s13605_s28 = scalar_lea.vmem %s13818_s6, 9216  ;;  %p13613_p12 = scmp.lt.s32.totalorder %s13818_s6, %s13818_s6 }
  0x33   : > { %p13606_p5 = scmp.ne.s32.totalorder %s13818_s6, %s13605_s28  ;;  %p13614_p0 = scmp.lt.s32.totalorder %s13605_s28, %s13605_s28 }
  0x35   : > { %p13608_p7 = pnand %p13606_p5, %p13566_p13  ;;  %p13615_p2 = por %p13614_p0, %p13613_p12 }
  0x37   : > { %p13609_p9 = pneg %p13608_p7 }
  0x39   : > { %p13616_p1 = pnand %p13615_p2, %p13609_p9 }
  0x3b   : > { %13619 = shalt.err (!%p13616_p1)
}
  0x3c   : > { %12910 = dma.hbm_to_vmem [thread:$0]  (!%p13814_p11), %s15311_s3, 9216, %s13818_s6, [#allocation9], %s13724_s15, %s13724_s15, %s13725_s16  }
  0x3d   : > { %s13873_s14 = sadd.s32 1, %s13720_s21   ;;  %s29_s29 = sadd.s32 1, %s13716_s20 }
  0x3e   : > { %s26_s17 = ssub.s32 %s13720_s21, %s13873_s14  ;;  %p36_p13 = scmp.ne.s32.totalorder %s13716_s20, %s13712_s19 }
  0x3f   : > { %p27_p6 = scmp.eq.s32.totalorder %s26_s17, 0  ;;  %p37_p10 = scmp.eq.s32.totalorder %s13720_s21, 0 }
  0x40   : > { %p15322_p3 = scmp.eq.s32.totalorder %s13784_s22, 1  ;;  %p12921_p7 = scmp.lt.s32.totalorder %s13720_s21, 2 }
  0x41   : > { %s13889_s27 = scalar_select %p27_p6, %s13716_s20, %s29_s29  }
  0x42   : > { %p13883_p5 = por %p15322_p3, %p36_p13  ;;  %p38_p9 = por %p37_p10, %p36_p13 }
  0x43   : > { %s208_s30 = sand.u32 1, %s13716_s20   ;;  %s12888_s6 = smul.u32 7296, %s13720_s21 }
  0x44   : > { %s15323_s23 = scalar_select %p13883_p5, 1, 0 }
  0x45   : > { %s12887_s7 = smul.u32 456, %s208_s30  ;;  %p13893_p11 = pnand %p12921_p7, %p38_p9 }
  0x46   : > { %s13900_s9 = scalar_lea.hbm %s15308_s0, %s12888_s6  ;;  %s13904_s28 = scalar_lea.sflag [#allocation6], %s208_s30 }
  0x47   : > { %s212_s10 = scalar_lea.vmem [#allocation5], %s12887_s7  ;;  %s13620_s12 = scalar_lea.hbm %s13900_s9, 7296 }
  0x48   : > { %s219_s11 = sshll.u32 %s212_s10, 4  ;;  %p13621_p12 = scmp.ne.s32.totalorder %s13900_s9, %s13620_s12  ;;  %s13902_s11 = int_to_ptr.vmem [resolvable:$true] %s219_s11 }
  0x49   : > { %p13622_p0 = pneg %p13893_p11  ;;  %s13625_s17 = scalar_lea.hbm %s15308_s0, 14592 }
  0x4a   : > { %p13626_p13 = scmp.lt.u32.totalorder %s13900_s9, %s15308_s0  ;;  %p13627_p6 = scmp.lt.u32.totalorder %s13625_s17, %s13620_s12 }
  0x4b   : > { %p13623_p2 = pnand %p13622_p0, %p13621_p12  ;;  %p13629_p3 = scmp.lt.u32.totalorder %s13620_s12, %s13900_s9 }
  0x4c   : > { %p13628_p10 = por %p13627_p6, %p13626_p13 }
  0x4d   : > { %p13624_p1 = pneg %p13623_p2 }
  0x4e   : > { %p13630_p7 = por %p13629_p3, %p13628_p10 }
  0x50   : > { %p13631_p9 = pnand %p13630_p7, %p13624_p1 }
  0x52   : > { %13634 = shalt.err (!%p13631_p9)
}
  0x53   : > { %s13635_s30 = scalar_lea.vmem %s13902_s11, 7296  ;;  %s13726_s7 = smov [#allocation5]  }
  0x54   : > { %p13636_p12 = scmp.ne.s32.totalorder %s13902_s11, %s13635_s30  ;;  %s13640_s8 = sshll.u32 %s13726_s7, 4  ;;  %s13641_s8 = int_to_ptr.vmem [resolvable:$false] %s13640_s8 }
  0x55   : > { %s13642_s10 = scalar_lea.vmem %s13641_s8, 14592  ;;  %p13643_p4 = scmp.lt.s32.totalorder %s13902_s11, %s13641_s8 }
  0x56   : > { %p13638_p2 = pnand %p13636_p12, %p13622_p0  ;;  %p13644_p13 = scmp.lt.s32.totalorder %s13642_s10, %s13635_s30 }
  0x58   : > { %p13639_p5 = pneg %p13638_p2  ;;  %p13645_p6 = por %p13644_p13, %p13643_p4 }
  0x5a   : > { %p13646_p10 = pnand %p13645_p6, %p13639_p5 }
  0x5c   : > { %13649 = shalt.err (!%p13646_p10)
}
  0x5d   : > { %s13727_s12 = smov 128   ;;  %s13728_s13 = smov 8  }
  0x5e   : > { %12914 = dma.hbm_to_vmem [thread:$0]  (!%p13893_p11), %s13900_s9, 7296, %s13902_s11, %s13904_s28, %s13727_s12, %s13727_s12, %s13728_s13  }
  0x5f   : > { %231 = sbr.rel (%p13803_p8) target bundleno = 2022 (0x7e6), region = 40 }
  0x66   : > { %s13935_s29 = sand.u32 1, %s13712_s19   ;;  %p15325_p4 = scmp.ne.s32.totalorder %s15318_s24, 0 }
  0x67   : > { %s12889_s17 = smul.u32 456, %s13935_s29  ;;  %s234_s6 = scalar_lea.sflag [#allocation6], %s13935_s29 }
  0x69   : > { %s13939_s16 = scalar_lea.vmem [#allocation5], %s12889_s17 }
  0x6a   : > { %13695 = dma.done.wait (%p15325_p4), %s234_s6, 7296  }
  0x6b   : > { %13697 = vsyncadd (%p15325_p4), %s234_s6, 4294960000  ;;  %p15326_p5 = scmp.eq.s32.totalorder %s13784_s22, 0 }
  0x6d   : > { %13699 = dma.done.wait (%p15326_p5), [#allocation9], 18432   ;;  %p15327_p8 = pmov %p15326_p5 }
  0x6e   : > { %v13729_v0 = vmov 0   ;;  %v12966_v1 = vld [vmem:[#allocation8] sm:$0xff]   ;;  %v12967_v2 = vld [vmem:[#allocation8 + $0x8] sm:$0xff]   ;;  %v12968_v3 = vld [vmem:[#allocation8 + $0x10] sm:$0xff]   ;;  %vm1061_vm0 = vsmask.f32 7424 }
  0x6f   : > { %13701 = vsyncadd (%p15327_p8), [#allocation9], 4294948864  ;;  %6035 = vst [vmem:[#allocation4] sm:$0xf] %v13729_v0  ;;  %4177 = vmatprep.subr.bf16.mxu0 %v13729_v0  ;;  %v12969_v4 = vld [vmem:[#allocation8 + $0x18] sm:$0xff]   ;;  %v12970_v5 = vld [vmem:[#allocation8 + $0x20] sm:$0xff]  }
  0x70   : > { %6036 = vst [vmem:[#allocation4 + $0x4] sm:$0xf] %v13729_v0  ;;  %6037 = vst [vmem:[#allocation4 + $0x8] sm:$0xf] %v13729_v0  ;;  %4178 = vmatpush1.bf16.msra.mxu0 %v12966_v1  ;;  %v273_v6 = vld [vmem:[%s13939_s16] sm:$0xff]  ;;  %v274_v7 = vld [vmem:[%s13939_s16 + $0x8] sm:$0xff] }
  0x71   : > { %6044 = vst [vmem:[#allocation4 + $0xd0] sm:$0xf] %v13729_v0  ;;  %6045 = vst [vmem:[#allocation4 + $0xd4] sm:$0xf] %v13729_v0  ;;  %4179 = vmatprep.subr.bf16.mxu0 %v13729_v0  ;;  %v275_v8 = vld [vmem:[%s13939_s16 + $0x10] sm:$0xff]  ;;  %v276_v9 = vld [vmem:[%s13939_s16 + $0x18] sm:$0xff] }
  0x72   : > { %6046 = vst [vmem:[#allocation4 + $0xd8] sm:$0xf] %v13729_v0  ;;  %v330_v10 = vmax.f32 %v273_v6, 0.0  ;;  %v331_v11 = vmax.f32 %v274_v7, 0.0  ;;  %v12971_v12 = vld [vmem:[#allocation8 + $0x28] sm:$0xff]   ;;  %v332_v13 = vmax.f32 %v275_v8, 0.0 }
  0x73   : > { %v333_v14 = vmax.f32 %v276_v9, 0.0  ;;  %v277_v15 = vld [vmem:[%s13939_s16 + $0x20] sm:$0xff]  ;;  %v278_v17 = vld [vmem:[%s13939_s16 + $0x28] sm:$0xff]  ;;  %v279_v21 = vld [vmem:[%s13939_s16 + $0x30] sm:$0xff]  ;;  %vm1478_vm1 = vcmask 1046528   ;;  %vm5977_vm2 = vcmask 1043456  }
  0x74   : > { %4180 = vmatpush1.bf16.msra.mxu0 %v12967_v2  ;;  %v11843_v16 = vpack.c.bf16 %v331_v11, %v330_v10  ;;  %v334_v18 = vmax.f32 %v277_v15, 0.0  ;;  %v335_v20 = vmax.f32 %v278_v17, 0.0  ;;  %v280_v22 = vld [vmem:[%s13939_s16 + $0x38] sm:$0xff]  ;;  %v336_v23 = vmax.f32 %v279_v21, 0.0  ;;  %v281_v25 = vld [vmem:[%s13939_s16 + $0x40] sm:$0xff]  ;;  %v282_v26 = vld [vmem:[%s13939_s16 + $0x48] sm:$0xff] }
  0x75   : > { %4181 = vmatprep.subr.bf16.mxu0 %v13729_v0  ;;  %v11848_v19 = vpack.c.bf16 %v333_v14, %v332_v13  ;;  %v337_v24 = vmax.f32 %v280_v22, 0.0  ;;  %v12972_v27 = vld [vmem:[#allocation8 + $0x30] sm:$0xff]   ;;  %v338_v29 = vmax.f32 %v281_v25, 0.0  ;;  %v339_v30 = vmax.f32 %v282_v26, 0.0  ;;  %v283_v31 = vld [vmem:[%s13939_s16 + $0x50] sm:$0xff]  ;;  %v286_v38 = vld [vmem:[%s13939_s16 + $0x68] sm:$0xff] }
  0x76   : > { %11844 = vst [vmem:[#allocation2] sm:$0xff] %v11843_v16   ;;  %v11853_v28 = vpack.c.bf16 %v335_v20, %v334_v18  ;;  %v284_v33 = vld [vmem:[%s13939_s16 + $0x58] sm:$0xff]  ;;  %v340_v34 = vmax.f32 %v283_v31, 0.0  ;;  %v285_v37 = vld [vmem:[%s13939_s16 + $0x60] sm:$0xff]  ;;  %v343_v40 = vmax.f32 %v286_v38, 0.0  ;;  %v287_v41 = vld [vmem:[%s13939_s16 + $0x70] sm:$0xff] }
  0x77   : > { %11980 = vst [vmem:[#allocation2 + $0x8] sm:$0xff] %v11848_v19   ;;  %v11858_v32 = vpack.c.bf16 %v337_v24, %v336_v23  ;;  %v11863_v35 = vpack.c.bf16 %v339_v30, %v338_v29  ;;  %v341_v36 = vmax.f32 %v284_v33, 0.0  ;;  %v342_v39 = vmax.f32 %v285_v37, 0.0  ;;  %v288_v42 = vld [vmem:[%s13939_s16 + $0x78] sm:$0xff]  ;;  %v12973_v43 = vld [vmem:[#allocation8 + $0x38] sm:$0xff]   ;;  %v12974_v58 = vld [vmem:[#allocation8 + $0x40] sm:$0xff]  }
  0x78   : > { %4182 = vmatpush1.bf16.msra.mxu0 %v12968_v3  ;;  %11981 = vst [vmem:[#allocation2 + $0x10] sm:$0xff] %v11853_v28   ;;  %v344_v45 = vmax.f32 %v287_v41, 0.0  ;;  %v345_v46 = vmax.f32 %v288_v42, 0.0  ;;  %v289_v47 = vld [vmem:[%s13939_s16 + $0x80] sm:$0xff]  ;;  %v290_v49 = vld [vmem:[%s13939_s16 + $0x88] sm:$0xff]  ;;  %v12975_v63 = vld [vmem:[#allocation8 + $0x48] sm:$0xff]  }
  0x79   : > { %4183 = vmatprep.subr.bf16.mxu0 %v13729_v0  ;;  %11982 = vst [vmem:[#allocation2 + $0x18] sm:$0xff] %v11858_v32   ;;  %11983 = vst [vmem:[#allocation2 + $0x20] sm:$0xff] %v11863_v35   ;;  %v11868_v44 = vpack.c.bf16 %v341_v36, %v340_v34  ;;  %v11873_v48 = vpack.c.bf16 %v343_v40, %v342_v39  ;;  %v346_v50 = vmax.f32 %v289_v47, 0.0  ;;  %v347_v53 = vmax.f32 %v290_v49, 0.0  ;;  %v12976_v2 = vld [vmem:[#allocation8 + $0x50] sm:$0xff]   ;;  %v12977_v3 = vld [vmem:[#allocation8 + $0x58] sm:$0xff]  }
  0x7a   : > { %v11878_v52 = vpack.c.bf16 %v345_v46, %v344_v45  ;;  %v292_v6 = vld [vmem:[%s13939_s16 + $0x98] sm:$0xff]  ;;  %v293_v9 = vld [vmem:[%s13939_s16 + $0xa0] sm:$0xff]  ;;  %v294_v11 = vld [vmem:[%s13939_s16 + $0xa8] sm:$0xff]  ;;  %vm5978_vm3 = vsmask.f32 7938  ;;  %vm6030_vm8 = vcmask 1040384  }
  0x7b   : > { %11984 = vst [vmem:[#allocation2 + $0x28] sm:$0xff] %v11868_v44   ;;  %11985 = vst [vmem:[#allocation2 + $0x30] sm:$0xff] %v11873_v48   ;;  %v11883_v57 = vpack.c.bf16 %v347_v53, %v346_v50  ;;  %v349_v8 = vmax.f32 %v292_v6, 0.0  ;;  %v12979_v10 = vld [vmem:[#allocation8 + $0x68] sm:$0xff]   ;;  %v351_v14 = vmax.f32 %v294_v11, 0.0  ;;  %v297_v21 = vld [vmem:[%s13939_s16 + $0xc0] sm:$0xff] }
  0x7c   : > { %4184 = vmatpush1.bf16.msra.mxu0 %v12969_v4  ;;  %11986 = vst [vmem:[#allocation2 + $0x38] sm:$0xff] %v11878_v52   ;;  %v291_v4 = vld [vmem:[%s13939_s16 + $0x90] sm:$0xff]  ;;  %v296_v16 = vld [vmem:[%s13939_s16 + $0xb8] sm:$0xff]  ;;  %v298_v22 = vld [vmem:[%s13939_s16 + $0xc8] sm:$0xff]  ;;  %v354_v24 = vmax.f32 %v297_v21, 0.0  ;;  %s12890_s8 = smul.u32 384, %s13935_s29 }
  0x7d   : > { %4185 = vmatprep.subr.bf16.mxu0 %v13729_v0  ;;  %v12982_v51 = vld [vmem:[#allocation2] sm:$0xff]   ;;  %11987 = vst [vmem:[#allocation2 + $0x40] sm:$0xff] %v11883_v57   ;;  %v348_v7 = vmax.f32 %v291_v4, 0.0  ;;  %v353_v18 = vmax.f32 %v296_v16, 0.0  ;;  %v355_v25 = vmax.f32 %v298_v22, 0.0  ;;  %v12980_v28 = vld [vmem:[#allocation8 + $0x70] sm:$0xff]   ;;  %vm14252_vm4 = vmand %vm5977_vm2, %vm5978_vm3 }
  0x7e   : > { %v13981_v54 = vld [vmem:[#allocation2 + $0x8] sm:$0xff]   ;;  %v1063_v55 = vshrl.u32 %v12982_v51, 16  ;;  %v1065_v56 = vshll.u32 %v12982_v51, 16  ;;  %v295_v15 = vld [vmem:[%s13939_s16 + $0xb0] sm:$0xff]  ;;  %v302_v33 = vld [vmem:[%s13939_s16 + $0xe8] sm:$0xff]  ;;  %s15077_s10 = scalar_lea.vmem [#allocation11], %s12890_s8 }
  0x7f   : > { %v1070_v59 = vshll.u32 %v13981_v54, 16  ;;  %v11888_v13 = vpack.c.bf16 %v349_v8, %v348_v7  ;;  %v352_v17 = vmax.f32 %v295_v15, 0.0  ;;  %v12986_v19 = vld [vmem:[#allocation2 + $0x10] sm:$0xff]   ;;  %v299_v26 = vld [vmem:[%s13939_s16 + $0xd0] sm:$0xff]  ;;  %v11903_v32 = vpack.c.bf16 %v355_v25, %v354_v24  ;;  %v304_v40 = vld [vmem:[%s13939_s16 + $0xf8] sm:$0xff]  ;;  %s12891_s12 = smul.u32 6144, %s13784_s22 }
  0x80   : > { %4186 = vmatpush1.bf16.msra.mxu0 %v12970_v5  ;;  %v1067_v60 = vrot.slane %v1065_v56, 1  ;;  %v12978_v5 = vld [vmem:[#allocation8 + $0x60] sm:$0xff]   ;;  %v356_v29 = vmax.f32 %v299_v26, 0.0  ;;  %v301_v31 = vld [vmem:[%s13939_s16 + $0xe0] sm:$0xff]  ;;  %v1074_v35 = vshrl.u32 %v13981_v54, 16  ;;  %v1078_v36 = vshll.u32 %v12986_v19, 16 }
  0x81   : > { %4187 = vmatprep.subr.bf16.mxu0 %v13729_v0  ;;  %v13985_v61 = vrot.slane %v1070_v59, 1  ;;  %11988 = vst [vmem:[#allocation2 + $0x48] sm:$0xff] %v11888_v13   ;;  %v11898_v23 = vpack.c.bf16 %v353_v18, %v352_v17  ;;  %v358_v34 = vmax.f32 %v301_v31, 0.0  ;;  %v359_v38 = vmax.f32 %v302_v33, 0.0  ;;  %v303_v39 = vld [vmem:[%s13939_s16 + $0xf0] sm:$0xff]  ;;  %11991 = vst [vmem:[#allocation2 + $0x60] sm:$0xff] %v11903_v32   ;;  %s15259_s6 = scalar_lea.hbm %s15313_s5, %s12891_s12 }
  0x82   : > { %v1068_v62 = vor.u32 %v1067_v60, %v1063_v55  ;;  %v360_v41 = vmax.f32 %v303_v39, 0.0  ;;  %v361_v42 = vmax.f32 %v304_v40, 0.0  ;;  %v306_v44 = vld [vmem:[%s13939_s16 + $0x108] sm:$0xff]  ;;  %v1080_v51 = vrot.slane %v1078_v36, 1  ;;  %v12984_v54 = vld [vmem:[#allocation2] sm:$0xff]   ;;  %v14020_v6 = vld [vmem:[#allocation2 + $0x28] sm:$0xff]  }
  0x83   : > { %11990 = vst [vmem:[#allocation2 + $0x58] sm:$0xff] %v11898_v23   ;;  %v11913_v45 = vpack.c.bf16 %v359_v38, %v358_v34  ;;  %v363_v47 = vmax.f32 %v306_v44, 0.0  ;;  %v12981_v48 = vld [vmem:[#allocation8 + $0x78] sm:$0xff]   ;;  %v1076_v50 = vor.u32 %v1074_v35, %v13985_v61  ;;  %v12989_v52 = vld [vmem:[#allocation2 + $0x18] sm:$0xff]   ;;  %v1082_v57 = vshrl.u32 %v12986_v19, 16  ;;  %v12988_v59 = vld [vmem:[#allocation8 + $0x88] sm:$0xff]  }
  0x84   : > { %4188 = vmatpush1.bf16.msra.mxu0 %v12971_v12  ;;  %v1073_v1 = vsel %vm1061_vm0, %v1068_v62, %v13985_v61  ;;  %v350_v12 = vmax.f32 %v293_v9, 0.0  ;;  %v11918_v49 = vpack.c.bf16 %v361_v42, %v360_v41  ;;  %v12985_v55 = vld [vmem:[#allocation8 + $0x80] sm:$0xff]   ;;  %v12991_v62 = vld [vmem:[#allocation2 + $0x20] sm:$0xff]   ;;  %v1090_v4 = vshrl.u32 %v12989_v52, 16  ;;  %v12996_v8 = vld [vmem:[#allocation8 + $0x98] sm:$0xff]   ;;  %s10936_s13 = sshll.u32 %s15077_s10, 4  ;;  %s15262_s13 = int_to_ptr.vmem [resolvable:$true] %s10936_s13 }
  0x85   : > { %4189 = vmatprep.subr.bf16.mxu0 %v13729_v0  ;;  %4209 = vmatprep.mubr.bf16.mxu0 %v1073_v1  ;;  %11993 = vst [vmem:[#allocation2 + $0x70] sm:$0xff] %v11913_v45   ;;  %v1081_v56 = vsel %vm1061_vm0, %v1076_v50, %v1080_v51  ;;  %v1084_v60 = vor.u32 %v1082_v57, %v1080_v51  ;;  %v12987_v1 = vld [vmem:[#allocation2 + $0x8] sm:$0xff]   ;;  %v12990_v13 = vld [vmem:[#allocation2 + $0x10] sm:$0xff]   ;;  %v1102_v15 = vshll.u32 %v14020_v6, 16  ;;  %v311_v19 = vld [vmem:[%s13939_s16 + $0x130] sm:$0xff]  ;;  %v1098_v25 = vshrl.u32 %v12991_v62, 16 }
  0x86   : > { %v11893_v20 = vpack.c.bf16 %v351_v14, %v350_v12  ;;  %11994 = vst [vmem:[#allocation2 + $0x78] sm:$0xff] %v11918_v49   ;;  %v308_v9 = vld [vmem:[%s13939_s16 + $0x118] sm:$0xff]  ;;  %v13001_v14 = vld [vmem:[#allocation8 + $0xa0] sm:$0xff]   ;;  %v309_v17 = vld [vmem:[%s13939_s16 + $0x120] sm:$0xff]  ;;  %v368_v23 = vmax.f32 %v311_v19, 0.0  ;;  %v1106_v44 = vshrl.u32 %v14020_v6, 16 }
  0x87   : > { %v365_v12 = vmax.f32 %v308_v9, 0.0  ;;  %v310_v18 = vld [vmem:[%s13939_s16 + $0x128] sm:$0xff]  ;;  %v312_v22 = vld [vmem:[%s13939_s16 + $0x138] sm:$0xff]  ;;  %v1104_v32 = vrot.slane %v1102_v15, 1  ;;  %v315_v36 = vld [vmem:[%s13939_s16 + $0x150] sm:$0xff]  ;;  %s13650_s24 = scalar_lea.vmem %s15262_s13, 6144 }
  0x88   : > { %4190 = vmatpush1.bf16.msra.mxu0 %v12972_v27  ;;  %v300_v27 = vld [vmem:[%s13939_s16 + $0xd8] sm:$0xff]  ;;  %11989 = vst [vmem:[#allocation2 + $0x50] sm:$0xff] %v11893_v20   ;;  %v366_v20 = vmax.f32 %v309_v17, 0.0  ;;  %v367_v21 = vmax.f32 %v310_v18, 0.0  ;;  %v369_v26 = vmax.f32 %v312_v22, 0.0  ;;  %v12997_v33 = vld [vmem:[#allocation2 + $0x30] sm:$0xff]   ;;  %p13651_p11 = scmp.ne.s32.totalorder %s15262_s13, %s13650_s24 }
  0x89   : > { %4191 = vmatprep.subr.bf16.mxu0 %v13729_v0  ;;  %v357_v30 = vmax.f32 %v300_v27, 0.0  ;;  %v313_v27 = vld [vmem:[%s13939_s16 + $0x140] sm:$0xff]  ;;  %v13004_v34 = vld [vmem:[#allocation8 + $0xa8] sm:$0xff]   ;;  %v372_v39 = vmax.f32 %v315_v36, 0.0  ;;  %v12992_v41 = vld [vmem:[#allocation2 + $0x18] sm:$0xff]   ;;  %v1110_v50 = vshll.u32 %v12997_v33, 16 }
  0x8a   : > { %v11938_v35 = vpack.c.bf16 %v369_v26, %v368_v23  ;;  %v317_v45 = vld [vmem:[%s13939_s16 + $0x160] sm:$0xff]  ;;  %v12995_v57 = vld [vmem:[#allocation2 + $0x20] sm:$0xff]   ;;  %v13033_v23 = vld [vmem:[#allocation8 + $0xe0] sm:$0xff]   ;;  %vm5494_vm5 = vsmask.f32 256  ;;  %p15339_p0 = scmp.ne.s32.totalorder %s15323_s23, 0 }
  0x8b   : > { %v11908_v37 = vpack.c.bf16 %v357_v30, %v356_v29  ;;  %v11933_v29 = vpack.c.bf16 %v367_v21, %v366_v20  ;;  %v370_v30 = vmax.f32 %v313_v27, 0.0  ;;  %v12998_v6 = vld [vmem:[#allocation2 + $0x28] sm:$0xff]   ;;  %v13028_v20 = vld [vmem:[#allocation8 + $0xd8] sm:$0xff]   ;;  %vm5495_vm6 = vsmask.f32 4368  ;;  %vm14353_vm9 = vmand %vm6030_vm8, %vm5494_vm5  ;;  %s13730_s26 = smov [#allocation11]  }
  0x8c   : > { %4192 = vmatpush1.bf16.msra.mxu0 %v12973_v43  ;;  %v305_v43 = vld [vmem:[%s13939_s16 + $0x100] sm:$0xff]  ;;  %11998 = vst [vmem:[#allocation2 + $0x98] sm:$0xff] %v11938_v35   ;;  %vm14336_vm7 = vmor %vm5494_vm5, %vm5495_vm6  ;;  %p13652_p1 = pnand %p13651_p11, %p15339_p0  ;;  %s13654_s15 = sshll.u32 %s13730_s26, 4  ;;  %s13655_s15 = int_to_ptr.vmem [resolvable:$false] %s13654_s15 }
  0x8d   : > { %4193 = vmatprep.subr.bf16.mxu0 %v13729_v0  ;;  %11992 = vst [vmem:[#allocation2 + $0x68] sm:$0xff] %v11908_v37   ;;  %v362_v46 = vmax.f32 %v305_v43, 0.0  ;;  %v316_v37 = vld [vmem:[%s13939_s16 + $0x158] sm:$0xff]  ;;  %11997 = vst [vmem:[#allocation2 + $0x90] sm:$0xff] %v11933_v29   ;;  %v321_v9 = vld [vmem:[%s13939_s16 + $0x180] sm:$0xff]  ;;  %s13656_s9 = scalar_lea.vmem %s13655_s15, 12288  ;;  %p13657_p7 = scmp.lt.s32.totalorder %s15262_s13, %s13655_s15 }
  0x8e   : > { %v373_v40 = vmax.f32 %v316_v37, 0.0  ;;  %v13005_v18 = vld [vmem:[#allocation2 + $0x48] sm:$0xff]   ;;  %v13000_v21 = vld [vmem:[#allocation2 + $0x30] sm:$0xff]   ;;  %p13653_p3 = pneg %p13652_p1  ;;  %p13658_p9 = scmp.lt.s32.totalorder %s13656_s9, %s13650_s24 }
  0x8f   : > { %v11923_v53 = vpack.c.bf16 %v363_v47, %v362_v46  ;;  %v318_v46 = vld [vmem:[%s13939_s16 + $0x168] sm:$0xff]  ;;  %v13009_v47 = vld [vmem:[#allocation8 + $0xb0] sm:$0xff]   ;;  %v1134_v26 = vshll.u32 %v13005_v18, 16 }
  0x90   : > { %4194 = vmatpush1.bf16.msra.mxu0 %v12974_v58  ;;  %v1086_v58 = vshll.u32 %v12989_v52, 16  ;;  %v11948_v43 = vpack.c.bf16 %v373_v40, %v372_v39  ;;  %v375_v51 = vmax.f32 %v318_v46, 0.0  ;;  %v13007_v27 = vld [vmem:[#allocation2 + $0x50] sm:$0xff]   ;;  %v13041_v35 = vld [vmem:[#allocation8 + $0xf0] sm:$0xff]   ;;  %v13006_v39 = vld [vmem:[#allocation2 + $0x40] sm:$0xff]   ;;  %p13659_p12 = por %p13658_p9, %p13657_p7 }
  0x91   : > { %4195 = vmatprep.subr.bf16.mxu0 %v13729_v0  ;;  %11995 = vst [vmem:[#allocation2 + $0x80] sm:$0xff] %v11923_v53   ;;  %v13012_v53 = vld [vmem:[#allocation8 + $0xb8] sm:$0xff]   ;;  %v13008_v46 = vld [vmem:[#allocation2 + $0x48] sm:$0xff]  }
  0x92   : > { %v1088_v61 = vrot.slane %v1086_v58, 1  ;;  %12000 = vst [vmem:[#allocation2 + $0xa8] sm:$0xff] %v11948_v43   ;;  %v13017_v58 = vld [vmem:[#allocation8 + $0xc0] sm:$0xff]   ;;  %v13013_v43 = vld [vmem:[#allocation2 + $0x60] sm:$0xff]   ;;  %p13660_p2 = pnand %p13659_p12, %p13653_p3 }
  0x94   : > { %4196 = vmatpush1.bf16.msra.mxu0 %v12975_v63  ;;  %v12993_v63 = vld [vmem:[#allocation8 + $0x90] sm:$0xff]  }
  0x95   : > { %4197 = vmatprep.subr.bf16.mxu0 %v13729_v0 }
  0x98   : > { %4198 = vmatpush1.bf16.msra.mxu0 %v12976_v2  ;;  %v307_v2 = vld [vmem:[%s13939_s16 + $0x110] sm:$0xff] }
  0x99   : > { %4199 = vmatprep.subr.bf16.mxu0 %v13729_v0  ;;  %v364_v7 = vmax.f32 %v307_v2, 0.0 }
  0x9b   : > { %v11928_v16 = vpack.c.bf16 %v365_v12, %v364_v7  ;;  %v13025_v12 = vld [vmem:[#allocation8 + $0xd0] sm:$0xff]  }
  0x9c   : > { %4200 = vmatpush1.bf16.msra.mxu0 %v12977_v3  ;;  %v1089_v3 = vsel %vm1061_vm0, %v1084_v60, %v1088_v61  ;;  %v1114_v60 = vshrl.u32 %v12997_v33, 16  ;;  %v1142_v33 = vshll.u32 %v13007_v27, 16 }
  0x9d   : > { %4201 = vmatprep.subr.bf16.mxu0 %v13729_v0  ;;  %11996 = vst [vmem:[#allocation2 + $0x88] sm:$0xff] %v11928_v16  }
  0x9e   : > { %v1144_v37 = vrot.slane %v1142_v33, 1 }
  0xa0   : > { %4202 = vmatpush1.bf16.msra.mxu0 %v12978_v5  ;;  %v1094_v5 = vshll.u32 %v12991_v62, 16  ;;  %v13002_v62 = vld [vmem:[#allocation2 + $0x40] sm:$0xff]  }
  0xa1   : > { %4203 = vmatprep.subr.bf16.mxu0 %v13729_v0 }
  0xa2   : > { %v1096_v11 = vrot.slane %v1094_v5, 1  ;;  %v320_v5 = vld [vmem:[%s13939_s16 + $0x178] sm:$0xff] }
  0xa3   : > { %v377_v7 = vmax.f32 %v320_v5, 0.0 }
  0xa4   : > { %4204 = vmatpush1.bf16.msra.mxu0 %v12979_v10  ;;  %v1092_v10 = vor.u32 %v1090_v4, %v1088_v61  ;;  %v1100_v42 = vor.u32 %v1098_v25, %v1096_v11  ;;  %v1130_v25 = vshrl.u32 %v13002_v62, 16 }
  0xa5   : > { %4205 = vmatprep.subr.bf16.mxu0 %v13729_v0 }
  0xa6   : > { %v1097_v24 = vsel %vm1061_vm0, %v1092_v10, %v1096_v11  ;;  %v1105_v49 = vsel %vm1061_vm0, %v1100_v42, %v1104_v32  ;;  %v322_v10 = vld [vmem:[%s13939_s16 + $0x188] sm:$0xff]  ;;  %v1126_v11 = vshll.u32 %v13002_v62, 16 }
  0xa7   : > { %v379_v15 = vmax.f32 %v322_v10, 0.0 }
  0xa8   : > { %4206 = vmatpush1.bf16.msra.mxu0 %v12980_v28  ;;  %v314_v28 = vld [vmem:[%s13939_s16 + $0x148] sm:$0xff]  ;;  %v1128_v19 = vrot.slane %v1126_v11, 1  ;;  %v13019_v11 = vld [vmem:[#allocation2 + $0x68] sm:$0xff]  }
  0xa9   : > { %4207 = vmatprep.subr.bf16.mxu0 %v13729_v0  ;;  %v371_v31 = vmax.f32 %v314_v28, 0.0  ;;  %v13036_v28 = vld [vmem:[#allocation8 + $0xe8] sm:$0xff]  }
  0xaa   : > { %v1132_v29 = vor.u32 %v1130_v25, %v1128_v19  ;;  %v13024_v25 = vld [vmem:[#allocation2 + $0x78] sm:$0xff]  }
  0xab   : > { %v11943_v38 = vpack.c.bf16 %v371_v31, %v370_v30  ;;  %v1136_v30 = vrot.slane %v1134_v26, 1  ;;  %v13003_v31 = vld [vmem:[#allocation2 + $0x38] sm:$0xff]  }
  0xac   : > { %4208 = vmatpush1.bf16.msra.mxu0 %v12981_v48  ;;  %v374_v48 = vmax.f32 %v317_v45, 0.0 }
  0xad   : > { %4402 = vmatprep.subr.bf16.mxu0 %v13729_v0  ;;  %11999 = vst [vmem:[#allocation2 + $0xa0] sm:$0xff] %v11943_v38   ;;  %v1137_v36 = vsel %vm1061_vm0, %v1132_v29, %v1136_v30  ;;  %v13044_v38 = vld [vmem:[#allocation8 + $0xf8] sm:$0xff]   ;;  %v13031_v29 = vld [vmem:[#allocation2 + $0x98] sm:$0xff]  }
  0xae   : > { %v11953_v52 = vpack.c.bf16 %v375_v51, %v374_v48 }
  0xaf   : > { %4210 = vmatmul.mubr.bf16.vlgmr.msra.gmra.mrb[0].mxu0 %v12984_v54  ;;  %v1108_v54 = vor.u32 %v1106_v44, %v1104_v32  ;;  %v1138_v32 = vshrl.u32 %v13005_v18, 16  ;;  %v13022_v18 = vld [vmem:[#allocation2 + $0x70] sm:$0xff]  }
  0xb0   : > { %4403 = vmatpush1.bf16.msra.mxu0 %v12985_v55  ;;  %4217 = vmatprep.mubr.bf16.mxu0 %v1081_v56  ;;  %v1112_v55 = vrot.slane %v1110_v50, 1  ;;  %v12999_v56 = vld [vmem:[#allocation2 + $0x38] sm:$0xff]   ;;  %12001 = vst [vmem:[#allocation2 + $0xb0] sm:$0xff] %v11953_v52   ;;  %v13015_v50 = vld [vmem:[#allocation2 + $0x68] sm:$0xff]  }
  0xb1   : > { %4404 = vmatprep.subr.bf16.mxu0 %v13729_v0  ;;  %v1118_v61 = vshll.u32 %v12999_v56, 16  ;;  %v1140_v40 = vor.u32 %v1138_v32, %v1136_v30  ;;  %v1170_v62 = vshrl.u32 %v13015_v50, 16  ;;  %v13027_v32 = vld [vmem:[#allocation2 + $0x80] sm:$0xff]  }
  0xb3   : > { %v1120_v4 = vrot.slane %v1118_v61, 1  ;;  %v1145_v44 = vsel %vm1061_vm0, %v1140_v40, %v1144_v37 }
  0xb4   : > { %4405 = vmatpush1.bf16.msra.mxu0 %v12988_v59  ;;  %v1113_v59 = vsel %vm1061_vm0, %v1108_v54, %v1112_v55 }
  0xb5   : > { %4406 = vmatprep.subr.bf16.mxu0 %v13729_v0 }
  0xb7   : > { %4218 = vmatmul.mubr.bf16.gmra.mrb[4].mxu0 %v12987_v1  ;;  %v13020_v1 = vld [vmem:[#allocation8 + $0xc8] sm:$0xff]  }
  0xb8   : > { %4225 = vmatprep.mubr.bf16.mxu0 %v1089_v3  ;;  %4407 = vmatpush1.bf16.msra.mxu0 %v12993_v63  ;;  %v319_v63 = vld [vmem:[%s13939_s16 + $0x170] sm:$0xff]  ;;  %v1116_v3 = vor.u32 %v1114_v60, %v1112_v55  ;;  %v1162_v55 = vshrl.u32 %v13013_v43, 16 }
  0xb9   : > { %4408 = vmatprep.subr.bf16.mxu0 %v13729_v0  ;;  %v376_v2 = vmax.f32 %v319_v63, 0.0  ;;  %v13014_v60 = vld [vmem:[#allocation2 + $0x58] sm:$0xff]  }
  0xba   : > { %v1121_v16 = vsel %vm1061_vm0, %v1116_v3, %v1120_v4 }
  0xbc   : > { %4409 = vmatpush1.bf16.msra.mxu0 %v12996_v8  ;;  %v1122_v8 = vshrl.u32 %v12999_v56, 16  ;;  %v1166_v56 = vshll.u32 %v13015_v50, 16  ;;  %v13039_v50 = vld [vmem:[#allocation2 + $0xb0] sm:$0xff]  }
  0xbd   : > { %4410 = vmatprep.subr.bf16.mxu0 %v13729_v0 }
  0xbe   : > { %v1124_v22 = vor.u32 %v1122_v8, %v1120_v4  ;;  %v13016_v4 = vld [vmem:[#allocation2 + $0x60] sm:$0xff]  }
  0xbf   : > { %4226 = vmatmul.mubr.bf16.gmra.mrb[8].mxu0 %v12990_v13  ;;  %v11958_v13 = vpack.c.bf16 %v377_v7, %v376_v2  ;;  %v13023_v8 = vld [vmem:[#allocation2 + $0x80] sm:$0xff]  }
  0xc0   : > { %4233 = vmatprep.mubr.bf16.mxu0 %v1097_v24  ;;  %4411 = vmatpush1.bf16.msra.mxu0 %v13001_v14  ;;  %v378_v14 = vmax.f32 %v321_v9, 0.0  ;;  %v1129_v24 = vsel %vm1061_vm0, %v1124_v22, %v1128_v19  ;;  %v13029_v22 = vld [vmem:[#allocation2 + $0x90] sm:$0xff]  }
  0xc1   : > { %4412 = vmatprep.subr.bf16.mxu0 %v13729_v0  ;;  %12002 = vst [vmem:[#allocation2 + $0xb8] sm:$0xff] %v11958_v13  }
  0xc2   : > { %v11963_v17 = vpack.c.bf16 %v379_v15, %v378_v14  ;;  %v1190_v14 = vshll.u32 %v13023_v8, 16  ;;  %v13026_v15 = vld [vmem:[#allocation2 + $0x88] sm:$0xff]  }
  0xc4   : > { %4413 = vmatpush1.bf16.msra.mxu0 %v13004_v34  ;;  %12003 = vst [vmem:[#allocation2 + $0xc0] sm:$0xff] %v11963_v17   ;;  %v13010_v34 = vld [vmem:[#allocation2 + $0x58] sm:$0xff]   ;;  %v1192_v17 = vrot.slane %v1190_v14, 1  ;;  %v13047_v14 = vld [vmem:[#allocation2 + $0xc] sm:$0xff]  }
  0xc5   : > { %4414 = vmatprep.subr.bf16.mxu0 %v13729_v0  ;;  %v1150_v42 = vshll.u32 %v13010_v34, 16  ;;  %v1154_v48 = vshrl.u32 %v13010_v34, 16  ;;  %v1210_v34 = vshrl.u32 %v13029_v22, 16 }
  0xc7   : > { %4234 = vmatmul.mubr.bf16.gmra.mrb[12].mxu0 %v12992_v41  ;;  %v1146_v41 = vshrl.u32 %v13007_v27, 16  ;;  %v1152_v45 = vrot.slane %v1150_v42, 1  ;;  %v1202_v27 = vshrl.u32 %v13026_v15, 16 }
  0xc8   : > { %4241 = vmatprep.mubr.bf16.mxu0 %v1105_v49  ;;  %4415 = vmatpush1.bf16.msra.mxu0 %v13009_v47  ;;  %v1158_v49 = vshll.u32 %v13013_v43, 16  ;;  %v13037_v43 = vld [vmem:[#allocation2 + $0xa8] sm:$0xff]  }
  0xc9   : > { %4416 = vmatprep.subr.bf16.mxu0 %v13729_v0  ;;  %v1148_v47 = vor.u32 %v1146_v41, %v1144_v37  ;;  %v1156_v54 = vor.u32 %v1154_v48, %v1152_v45  ;;  %v1218_v41 = vshrl.u32 %v13031_v29, 16 }
  0xca   : > { %v1160_v52 = vrot.slane %v1158_v49, 1  ;;  %v1230_v49 = vshll.u32 %v13037_v43, 16 }
  0xcb   : > { %v1153_v51 = vsel %vm1061_vm0, %v1148_v47, %v1152_v45 }
  0xcc   : > { %4417 = vmatpush1.bf16.msra.mxu0 %v13012_v53  ;;  %v13011_v53 = vld [vmem:[#allocation2 + $0x50] sm:$0xff]   ;;  %v1164_v61 = vor.u32 %v1162_v55, %v1160_v52  ;;  %v1234_v55 = vshrl.u32 %v13037_v43, 16 }
  0xcd   : > { %4418 = vmatprep.subr.bf16.mxu0 %v13729_v0  ;;  %v13062_v43 = vld [vmem:[#allocation2 + $0x34] sm:$0xff]  }
  0xcf   : > { %4242 = vmatmul.mubr.bf16.gmra.mrb[16].mxu0 %v12995_v57  ;;  %v13018_v57 = vld [vmem:[#allocation2 + $0x70] sm:$0xff]  }
  0xd0   : > { %4249 = vmatprep.mubr.bf16.mxu0 %v1113_v59  ;;  %4419 = vmatpush1.bf16.msra.mxu0 %v13017_v58  ;;  %v1161_v58 = vsel %vm1061_vm0, %v1156_v54, %v1160_v52  ;;  %v1168_v59 = vrot.slane %v1166_v56, 1  ;;  %v1174_v63 = vshll.u32 %v13018_v57, 16  ;;  %v1232_v52 = vrot.slane %v1230_v49, 1  ;;  %v13064_v49 = vld [vmem:[#allocation2 + $0x3c] sm:$0xff]  }
  0xd1   : > { %4420 = vmatprep.subr.bf16.mxu0 %v13729_v0  ;;  %v1238_v56 = vshll.u32 %v13039_v50, 16 }
  0xd2   : > { %v1169_v2 = vsel %vm1061_vm0, %v1164_v61, %v1168_v59  ;;  %v1176_v3 = vrot.slane %v1174_v63, 1  ;;  %v1172_v5 = vor.u32 %v1170_v62, %v1168_v59  ;;  %v1236_v61 = vor.u32 %v1234_v55, %v1232_v52  ;;  %v323_v55 = vld [vmem:[%s13939_s16 + $0x190] sm:$0xff] }
  0xd3   : > { %v1240_v59 = vrot.slane %v1238_v56, 1  ;;  %v1242_v62 = vshrl.u32 %v13039_v50, 16  ;;  %v13065_v50 = vld [vmem:[#allocation2 + $0x38] sm:$0xff]   ;;  %v324_v56 = vld [vmem:[%s13939_s16 + $0x198] sm:$0xff] }
  0xd4   : > { %4421 = vmatpush1.bf16.msra.mxu0 %v13020_v1  ;;  %v13021_v1 = vld [vmem:[#allocation2 + $0x78] sm:$0xff]   ;;  %v1177_v9 = vsel %vm1061_vm0, %v1172_v5, %v1176_v3 }
  0xd5   : > { %4422 = vmatprep.subr.bf16.mxu0 %v13729_v0  ;;  %v1182_v7 = vshll.u32 %v13021_v1, 16  ;;  %v1186_v13 = vshrl.u32 %v13021_v1, 16  ;;  %v13045_v1 = vld [vmem:[#allocation2 + $0xc0] ss:$0 sps:$4 sm:$0x11]   ;;  %v1244_v5 = vor.u32 %v1242_v62, %v1240_v59 }
  0xd7   : > { %4250 = vmatmul.mubr.bf16.gmra.mrb[20].mxu0 %v12998_v6  ;;  %v1178_v6 = vshrl.u32 %v13018_v57, 16  ;;  %v1184_v10 = vrot.slane %v1182_v7, 1  ;;  %v13042_v57 = vld [vmem:[#allocation2 + $0xb8] sm:$0xff]   ;;  %v1254_v7 = vshll.u32 %v13045_v1, 16 }
  0xd8   : > { %4257 = vmatprep.mubr.bf16.mxu0 %v1121_v16  ;;  %4423 = vmatpush1.bf16.msra.mxu0 %v13025_v12  ;;  %v1246_v63 = vshll.u32 %v13042_v57, 16 }
  0xd9   : > { %4424 = vmatprep.subr.bf16.mxu0 %v13729_v0  ;;  %v1180_v12 = vor.u32 %v1178_v6, %v1176_v3  ;;  %v1188_v19 = vor.u32 %v1186_v13, %v1184_v10  ;;  %v1250_v6 = vshrl.u32 %v13042_v57, 16  ;;  %v13046_v13 = vld [vmem:[#allocation2 + $0xb8] sm:$0xff]   ;;  %v380_v57 = vmax.f32 %v323_v55, 0.0  ;;  %v13103_v55 = vld [vmem:[#allocation2 + $0xa8] sm:$0xff]  }
  0xda   : > { %v1248_v3 = vrot.slane %v1246_v63, 1 }
  0xdb   : > { %v1185_v16 = vsel %vm1061_vm0, %v1180_v12, %v1184_v10 }
  0xdc   : > { %4425 = vmatpush1.bf16.msra.mxu0 %v13028_v20  ;;  %v1194_v20 = vshrl.u32 %v13023_v8, 16  ;;  %v1249_v8 = vsel %vm1061_vm0, %v1244_v5, %v1248_v3  ;;  %v1252_v10 = vor.u32 %v1250_v6, %v1248_v3  ;;  %v13070_v3 = vld [vmem:[#allocation2 + $0x4c] sm:$0xff]  }
  0xdd   : > { %4426 = vmatprep.subr.bf16.mxu0 %v13729_v0  ;;  %v13106_v6 = vld [vmem:[#allocation8 + $0x170] sm:$0xff]  }
  0xde   : > { %v1196_v26 = vor.u32 %v1194_v20, %v1192_v17  ;;  %v13051_v20 = vld [vmem:[#allocation2 + $0x14] sm:$0xff]  }
  0xdf   : > { %4258 = vmatmul.mubr.bf16.gmra.mrb[24].mxu0 %v13000_v21  ;;  %v1198_v21 = vshll.u32 %v13026_v15, 16  ;;  %v13048_v15 = vld [vmem:[#allocation2] sm:$0xfe]  }
  0xe0   : > { %4265 = vmatprep.mubr.bf16.mxu0 %v1129_v24  ;;  %4427 = vmatpush1.bf16.msra.mxu0 %v13033_v23  ;;  %v1193_v23 = vsel %vm1061_vm0, %v1188_v19, %v1192_v17  ;;  %v1479_v17 = vrot.slane %v13048_v15, 1  ;;  %v13050_v19 = vld [vmem:[#allocation8 + $0x100] sm:$0xff]  }
  0xe1   : > { %4428 = vmatprep.subr.bf16.mxu0 %v13729_v0  ;;  %v1200_v24 = vrot.slane %v1198_v21, 1  ;;  %v13052_v21 = vld [vmem:[#allocation2 + $0x10] sm:$0xff]   ;;  %v13076_v15 = vld [vmem:[#allocation2 + $0x58] sm:$0xff]  }
  0xe3   : > { %v1201_v30 = vsel %vm1061_vm0, %v1196_v26, %v1200_v24  ;;  %v1204_v33 = vor.u32 %v1202_v27, %v1200_v24  ;;  %v13053_v24 = vld [vmem:[#allocation8 + $0x108] sm:$0xff]   ;;  %v13055_v26 = vld [vmem:[#allocation2 + $0x18] sm:$0xff]   ;;  %v13058_v27 = vld [vmem:[#allocation8 + $0x110] sm:$0xff]  }
  0xe4   : > { %4429 = vmatpush1.bf16.msra.mxu0 %v13036_v28  ;;  %v1206_v28 = vshll.u32 %v13029_v22, 16 }
  0xe5   : > { %4430 = vmatprep.subr.bf16.mxu0 %v13729_v0 }
  0xe7   : > { %4266 = vmatmul.mubr.bf16.gmra.mrb[28].mxu0 %v13003_v31  ;;  %v1208_v31 = vrot.slane %v1206_v28, 1 }
  0xe8   : > { %4273 = vmatprep.mubr.bf16.mxu0 %v1137_v36  ;;  %4431 = vmatpush1.bf16.msra.mxu0 %v13041_v35  ;;  %v1214_v35 = vshll.u32 %v13031_v29, 16  ;;  %v13034_v36 = vld [vmem:[#allocation2 + $0xa0] sm:$0xff]   ;;  %v1484_v29 = vrot.slane %v13055_v26, 1  ;;  %v13083_v26 = vld [vmem:[#allocation2 + $0x74] sm:$0xff]  }
  0xe9   : > { %4432 = vmatprep.subr.bf16.mxu0 %v13729_v0  ;;  %v1209_v37 = vsel %vm1061_vm0, %v1204_v33, %v1208_v31  ;;  %v1212_v40 = vor.u32 %v1210_v34, %v1208_v31  ;;  %v1222_v42 = vshll.u32 %v13034_v36, 16  ;;  %v1226_v48 = vshrl.u32 %v13034_v36, 16  ;;  %v13056_v31 = vld [vmem:[#allocation2 + $0x24] sm:$0xff]   ;;  %v13066_v33 = vld [vmem:[#allocation8 + $0x120] sm:$0xff]  }
  0xea   : > { %v13069_v36 = vld [vmem:[#allocation8 + $0x128] sm:$0xff]  }
  0xeb   : > { %v1224_v45 = vrot.slane %v1222_v42, 1  ;;  %v13077_v42 = vld [vmem:[#allocation8 + $0x138] sm:$0xff]  }
  0xec   : > { %4433 = vmatpush1.bf16.msra.mxu0 %v13044_v38  ;;  %v1216_v38 = vrot.slane %v1214_v35, 1 }
  0xed   : > { %4627 = vmatprep.subr.bf16.mxu0 %v13729_v0  ;;  %v1228_v54 = vor.u32 %v1226_v48, %v1224_v45  ;;  %v13085_v48 = vld [vmem:[#allocation8 + $0x148] sm:$0xff]  }
  0xee   : > { %v1220_v47 = vor.u32 %v1218_v41, %v1216_v38 }
  0xef   : > { %4274 = vmatmul.mubr.bf16.gmra.mrb[32].mxu0 %v13006_v39  ;;  %v13030_v39 = vld [vmem:[#allocation2 + $0x88] sm:$0xff]  }
  0xf0   : > { %4281 = vmatprep.mubr.bf16.mxu0 %v1145_v44  ;;  %v1217_v44 = vsel %vm1061_vm0, %v1212_v40, %v1216_v38  ;;  %v13060_v38 = vld [vmem:[#allocation2 + $0x28] sm:$0xff]  }
  0xf1   : > { %v1488_v41 = vrot.slane %v13060_v38, 1  ;;  %v13091_v38 = vld [vmem:[#allocation2 + $0x8c] sm:$0xff]  }
  0xf7   : > { %4282 = vmatmul.mubr.bf16.gmra.mrb[36].mxu0 %v13008_v46  ;;  %v13032_v46 = vld [vmem:[#allocation2 + $0x90] sm:$0xff]  }
  0xf8   : > { %4289 = vmatprep.mubr.bf16.mxu0 %v1153_v51  ;;  %v1225_v51 = vsel %vm1061_vm0, %v1220_v47, %v1224_v45  ;;  %v13082_v45 = vld [vmem:[#allocation8 + $0x140] sm:$0xff]  }
  0xff   : > { %4290 = vmatmul.mubr.bf16.gmra.mrb[40].mxu0 %v13011_v53  ;;  %v13035_v53 = vld [vmem:[#allocation2 + $0x98] sm:$0xff]  }
 0x100   : > { %4297 = vmatprep.mubr.bf16.mxu0 %v1161_v58  ;;  %v1233_v58 = vsel %vm1061_vm0, %v1228_v54, %v1232_v52  ;;  %v13093_v54 = vld [vmem:[#allocation8 + $0x158] sm:$0xff]  }
 0x107   : > { %4298 = vmatmul.mubr.bf16.gmra.mrb[44].mxu0 %v13014_v60  ;;  %v13038_v60 = vld [vmem:[#allocation2 + $0xa0] sm:$0xff]  }
 0x108   : > { %4305 = vmatprep.mubr.bf16.mxu0 %v1169_v2  ;;  %v1241_v2 = vsel %vm1061_vm0, %v1236_v61, %v1240_v59  ;;  %v13067_v59 = vld [vmem:[#allocation2 + $0x44] sm:$0xff]   ;;  %v13098_v61 = vld [vmem:[#allocation8 + $0x160] sm:$0xff]  }
 0x10f   : > { %4306 = vmatmul.mubr.bf16.gmra.mrb[48].mxu0 %v13016_v4  ;;  %v13040_v4 = vld [vmem:[#allocation2 + $0xa8] sm:$0xff]  }
 0x110   : > { %4313 = vmatprep.mubr.bf16.mxu0 %v1177_v9  ;;  %v1256_v9 = vrot.slane %v1254_v7, 1 }
 0x112   : > { %v1257_v12 = vsel %vm1061_vm0, %v1252_v10, %v1256_v9  ;;  %v13072_v9 = vld [vmem:[#allocation2 + $0x54] sm:$0xff]  }
 0x117   : > { %4314 = vmatmul.mubr.bf16.gmra.mrb[52].mxu0 %v13019_v11  ;;  %v13043_v11 = vld [vmem:[#allocation2 + $0xb0] sm:$0xff]  }
 0x118   : > { %4321 = vmatprep.mubr.bf16.mxu0 %v1185_v16  ;;  %v13049_v16 = vld [vmem:[#allocation2 + $0x8] sm:$0xff]  }
 0x11f   : > { %4322 = vmatmul.mubr.bf16.gmra.mrb[56].mxu0 %v13022_v18  ;;  %v1480_v18 = vrot.slane %v13049_v16, 1  ;;  %v1500_v16 = vrot.slane %v13076_v15, 1 }
 0x120   : > { %4329 = vmatprep.mubr.bf16.mxu0 %v1193_v23  ;;  %v1482_v23 = vrot.slane %v13052_v21, 1 }
 0x121   : > { %v1481_v22 = vsel %vm1478_vm1, %v1479_v17, %v1480_v18 }
 0x122   : > { %v1483_v28 = vsel %vm1478_vm1, %v1480_v18, %v1482_v23  ;;  %v1485_v34 = vsel %vm1478_vm1, %v1482_v23, %v1484_v29  ;;  %v13078_v18 = vld [vmem:[#allocation2 + $0x64] sm:$0xff]  }
 0x123   : > { %v13081_v23 = vld [vmem:[#allocation2 + $0x68] sm:$0xff]  }
 0x127   : > { %4330 = vmatmul.mubr.bf16.gmra.mrb[60].mxu0 %v13024_v25  ;;  %v13054_v25 = vld [vmem:[#allocation2 + $0x1c] sm:$0xff]  }
 0x128   : > { %4337 = vmatprep.mubr.bf16.mxu0 %v1201_v30  ;;  %v13061_v30 = vld [vmem:[#allocation8 + $0x118] sm:$0xff]  }
 0x12f   : > { %4338 = vmatmul.mubr.bf16.gmra.mrb[64].mxu0 %v13027_v32  ;;  %v13057_v32 = vld [vmem:[#allocation2 + $0x20] sm:$0xff]  }
 0x130   : > { %4345 = vmatprep.mubr.bf16.mxu0 %v1209_v37  ;;  %v1486_v35 = vrot.slane %v13057_v32, 1  ;;  %v13059_v37 = vld [vmem:[#allocation2 + $0x2c] sm:$0xff]  }
 0x132   : > { %v1487_v40 = vsel %vm1478_vm1, %v1484_v29, %v1486_v35 }
 0x137   : > { %4346 = vmatmul.mubr.bf16.gmra.mrb[68].mxu0 %v13030_v39  ;;  %v13074_v39 = vld [vmem:[#allocation8 + $0x130] sm:$0xff]  }
 0x138   : > { %4353 = vmatprep.mubr.bf16.mxu0 %v1217_v44  ;;  %v13063_v44 = vld [vmem:[#allocation2 + $0x30] sm:$0xff]  }
 0x139   : > { %v1490_v47 = vrot.slane %v13063_v44, 1 }
 0x13b   : > { %v1491_v52 = vsel %vm1478_vm1, %v1488_v41, %v1490_v47 }
 0x13f   : > { %4354 = vmatmul.mubr.bf16.gmra.mrb[72].mxu0 %v13032_v46  ;;  %v1489_v46 = vsel %vm1478_vm1, %v1486_v35, %v1488_v41  ;;  %v13089_v35 = vld [vmem:[#allocation2 + $0x80] sm:$0xff]  }
 0x140   : > { %4361 = vmatprep.mubr.bf16.mxu0 %v1225_v51  ;;  %v13090_v51 = vld [vmem:[#allocation8 + $0x150] sm:$0xff]  }
 0x147   : > { %4362 = vmatmul.mubr.bf16.gmra.mrb[76].mxu0 %v13035_v53  ;;  %v1492_v53 = vrot.slane %v13065_v50, 1  ;;  %v13099_v50 = vld [vmem:[#allocation2 + $0xa4] sm:$0xff]  }
 0x148   : > { %4369 = vmatprep.mubr.bf16.mxu0 %v1233_v58  ;;  %v381_v58 = vmax.f32 %v324_v56, 0.0  ;;  %v1520_v56 = vrot.slane %v13103_v55, 1 }
 0x149   : > { %v1493_v63 = vsel %vm1478_vm1, %v1490_v47, %v1492_v53  ;;  %v13097_v47 = vld [vmem:[#allocation2 + $0x98] sm:$0xff]  }
 0x14a   : > { %v11968_v62 = vpack.c.bf16 %v381_v58, %v380_v57  ;;  %v13104_v58 = vld [vmem:[#allocation2 + $0xb4] sm:$0xff]  }
 0x14c   : > { %12004 = vst [vmem:[#allocation2 + $0xc8] sm:$0xff] %v11968_v62   ;;  %v13107_v62 = vld [vmem:[#allocation2 + $0xbc] sm:$0xff]  }
 0x14f   : > { %4370 = vmatmul.mubr.bf16.gmra.mrb[80].mxu0 %v13038_v60  ;;  %v13068_v60 = vld [vmem:[#allocation2 + $0x40] sm:$0xff]  }
 0x150   : > { %4377 = vmatprep.mubr.bf16.mxu0 %v1241_v2  ;;  %v1494_v1 = vrot.slane %v13068_v60, 1  ;;  %v13101_v2 = vld [vmem:[#allocation8 + $0x168] sm:$0xff]  }
 0x152   : > { %v1495_v5 = vsel %vm1478_vm1, %v1492_v53, %v1494_v1 }
 0x157   : > { %4378 = vmatmul.mubr.bf16.gmra.mrb[84].mxu0 %v13040_v4  ;;  %v13071_v4 = vld [vmem:[#allocation2 + $0x48] sm:$0xff]  }
 0x158   : > { %4385 = vmatprep.mubr.bf16.mxu0 %v1249_v8  ;;  %v1496_v7 = vrot.slane %v13071_v4, 1  ;;  %v13109_v8 = vld [vmem:[#allocation8 + $0x178] sm:$0xff]   ;;  %v13111_v4 = vld [vmem:[#allocation2 + $0xc0] ss:$0 sps:$4 sm:$0x11]  }
 0x15a   : > { %v1497_v10 = vsel %vm1478_vm1, %v1494_v1, %v1496_v7 }
 0x15f   : > { %4386 = vmatmul.mubr.bf16.gmra.mrb[88].mxu0 %v13043_v11  ;;  %v13073_v11 = vld [vmem:[#allocation2 + $0x50] sm:$0xff]  }
 0x160   : > { %4393 = vmatprep.mubr.bf16.mxu0 %v1257_v12  ;;  %v1498_v12 = vrot.slane %v13073_v11, 1 }
 0x162   : > { %v1501_v17 = vsel %vm1478_vm1, %v1498_v12, %v1500_v16 }
 0x167   : > { %4394 = vmatmul.mubr.bf16.gmra.mrb[92].mxu0 %v13046_v13  ;;  %v13075_v13 = vld [vmem:[#allocation2 + $0x5c] sm:$0xff]  }
 0x168   : > { %4434 = vmatprep.mubr.bf16.mxu0 %v13047_v14  ;;  %v1499_v14 = vsel %vm1478_vm1, %v1496_v7, %v1498_v12  ;;  %v13113_v7 = vld [vmem:[#allocation2 + $0x14] sm:$0xff]  }
 0x169   : > { %v2381_v12 = vrot.slane %v13113_v7, 1 }
 0x16f   : > { %4435 = vmatmul.mubr.bf16.vlgmr.msra.gmra.mrb[0].mxu0 %v1481_v22  ;;  %v13080_v22 = vld [vmem:[#allocation2 + $0x6c] sm:$0xff]  }
 0x170   : > { %4628 = vmatpush1.bf16.msra.mxu0 %v13050_v19  ;;  %4442 = vmatprep.mubr.bf16.mxu0 %v13051_v20  ;;  %v13079_v19 = vld [vmem:[#allocation2 + $0x60] sm:$0xff]  }
 0x171   : > { %4629 = vmatprep.subr.bf16.mxu0 %v13729_v0  ;;  %v1502_v20 = vrot.slane %v13079_v19, 1 }
 0x173   : > { %v1503_v21 = vsel %vm1478_vm1, %v1500_v16, %v1502_v20 }
 0x174   : > { %4630 = vmatpush1.bf16.msra.mxu0 %v13053_v24  ;;  %v1504_v24 = vrot.slane %v13081_v23, 1 }
 0x175   : > { %4631 = vmatprep.subr.bf16.mxu0 %v13729_v0 }
 0x177   : > { %4443 = vmatmul.mubr.bf16.gmra.mrb[4].mxu0 %v1483_v28 }
 0x178   : > { %4450 = vmatprep.mubr.bf16.mxu0 %v13054_v25  ;;  %4632 = vmatpush1.bf16.msra.mxu0 %v13058_v27  ;;  %v1505_v25 = vsel %vm1478_vm1, %v1502_v20, %v1504_v24  ;;  %v13084_v27 = vld [vmem:[#allocation2 + $0x70] sm:$0xff]  }
 0x179   : > { %4633 = vmatprep.subr.bf16.mxu0 %v13729_v0  ;;  %v1506_v28 = vrot.slane %v13084_v27, 1 }
 0x17b   : > { %v1507_v29 = vsel %vm1478_vm1, %v1504_v24, %v1506_v28  ;;  %v13116_v24 = vld [vmem:[#allocation8 + $0x180] sm:$0xff]  }
 0x17c   : > { %4634 = vmatpush1.bf16.msra.mxu0 %v13061_v30  ;;  %v13086_v30 = vld [vmem:[#allocation2 + $0x7c] sm:$0xff]  }
 0x17d   : > { %4635 = vmatprep.subr.bf16.mxu0 %v13729_v0 }
 0x17f   : > { %4451 = vmatmul.mubr.bf16.gmra.mrb[8].mxu0 %v1485_v34  ;;  %v13088_v34 = vld [vmem:[#allocation2 + $0x84] sm:$0xff]  }
 0x180   : > { %4458 = vmatprep.mubr.bf16.mxu0 %v13056_v31  ;;  %4636 = vmatpush1.bf16.msra.mxu0 %v13066_v33  ;;  %v13087_v31 = vld [vmem:[#allocation2 + $0x78] sm:$0xff]  }
 0x181   : > { %4637 = vmatprep.subr.bf16.mxu0 %v13729_v0  ;;  %v1508_v32 = vrot.slane %v13087_v31, 1  ;;  %v13119_v31 = vld [vmem:[#allocation8 + $0x188] sm:$0xff]  }
 0x183   : > { %v1509_v33 = vsel %vm1478_vm1, %v1506_v28, %v1508_v32  ;;  %v13120_v28 = vld [vmem:[#allocation2 + $0x24] sm:$0xff]  }
 0x184   : > { %4638 = vmatpush1.bf16.msra.mxu0 %v13069_v36  ;;  %v1510_v36 = vrot.slane %v13089_v35, 1 }
 0x185   : > { %4639 = vmatprep.subr.bf16.mxu0 %v13729_v0 }
 0x187   : > { %4459 = vmatmul.mubr.bf16.gmra.mrb[12].mxu0 %v1487_v40 }
 0x188   : > { %4466 = vmatprep.mubr.bf16.mxu0 %v13059_v37  ;;  %4640 = vmatpush1.bf16.msra.mxu0 %v13074_v39  ;;  %v1511_v37 = vsel %vm1478_vm1, %v1508_v32, %v1510_v36  ;;  %v13092_v39 = vld [vmem:[#allocation2 + $0x88] sm:$0xff]  }
 0x189   : > { %4641 = vmatprep.subr.bf16.mxu0 %v13729_v0  ;;  %v1512_v40 = vrot.slane %v13092_v39, 1  ;;  %v13121_v32 = vld [vmem:[#allocation2 + $0x24] sm:$0xff]   ;;  %v13122_v39 = vld [vmem:[#allocation2 + $0x2c] sm:$0xff]  }
 0x18b   : > { %v1513_v41 = vsel %vm1478_vm1, %v1510_v36, %v1512_v40  ;;  %v1988_v36 = vshll.u32 %v13121_v32, 16 }
 0x18c   : > { %4642 = vmatpush1.bf16.msra.mxu0 %v13077_v42  ;;  %v13094_v42 = vld [vmem:[#allocation2 + $0x94] sm:$0xff]  }
 0x18d   : > { %4643 = vmatprep.subr.bf16.mxu0 %v13729_v0 }
 0x18f   : > { %4467 = vmatmul.mubr.bf16.gmra.mrb[16].mxu0 %v1489_v46  ;;  %v13096_v46 = vld [vmem:[#allocation2 + $0x9c] sm:$0xff]  }
 0x190   : > { %4474 = vmatprep.mubr.bf16.mxu0 %v13062_v43  ;;  %4644 = vmatpush1.bf16.msra.mxu0 %v13082_v45  ;;  %v13095_v43 = vld [vmem:[#allocation2 + $0x90] sm:$0xff]  }
 0x191   : > { %4645 = vmatprep.subr.bf16.mxu0 %v13729_v0  ;;  %v1514_v44 = vrot.slane %v13095_v43, 1  ;;  %v13127_v43 = vld [vmem:[#allocation8 + $0x198] sm:$0xff]  }
 0x193   : > { %v1515_v45 = vsel %vm1478_vm1, %v1512_v40, %v1514_v44 }
 0x194   : > { %4646 = vmatpush1.bf16.msra.mxu0 %v13085_v48  ;;  %v1516_v48 = vrot.slane %v13097_v47, 1 }
 0x195   : > { %4647 = vmatprep.subr.bf16.mxu0 %v13729_v0 }
 0x197   : > { %4475 = vmatmul.mubr.bf16.gmra.mrb[20].mxu0 %v1491_v52 }
 0x198   : > { %4482 = vmatprep.mubr.bf16.mxu0 %v13064_v49  ;;  %4648 = vmatpush1.bf16.msra.mxu0 %v13090_v51  ;;  %v1517_v49 = vsel %vm1478_vm1, %v1514_v44, %v1516_v48  ;;  %v13100_v51 = vld [vmem:[#allocation2 + $0xa0] sm:$0xff]   ;;  %v2387_v44 = vrot.slane %v13122_v39, 1 }
 0x199   : > { %4649 = vmatprep.subr.bf16.mxu0 %v13729_v0  ;;  %v1518_v52 = vrot.slane %v13100_v51, 1 }
 0x19b   : > { %v1519_v53 = vsel %vm1478_vm1, %v1516_v48, %v1518_v52  ;;  %v1521_v57 = vsel %vm1478_vm1, %v1518_v52, %v1520_v56  ;;  %v13132_v48 = vld [vmem:[#allocation8 + $0x1a0] sm:$0xff]  }
 0x19c   : > { %4650 = vmatpush1.bf16.msra.mxu0 %v13093_v54  ;;  %v13102_v54 = vld [vmem:[#allocation2 + $0xac] sm:$0xff]  }
 0x19d   : > { %4651 = vmatprep.subr.bf16.mxu0 %v13729_v0 }
 0x19f   : > { %4483 = vmatmul.mubr.bf16.gmra.mrb[24].mxu0 %v1493_v63  ;;  %v13108_v63 = vld [vmem:[#allocation2 + $0xb8] sm:$0xff]  }
 0x1a0   : > { %4490 = vmatprep.mubr.bf16.mxu0 %v13067_v59  ;;  %4652 = vmatpush1.bf16.msra.mxu0 %v13098_v61  ;;  %v13105_v59 = vld [vmem:[#allocation2 + $0xb0] sm:$0xff]   ;;  %v1524_v1 = vrot.slane %v13108_v63, 1 }
 0x1a1   : > { %4653 = vmatprep.subr.bf16.mxu0 %v13729_v0  ;;  %v1522_v60 = vrot.slane %v13105_v59, 1  ;;  %v13140_v59 = vld [vmem:[#allocation8 + $0x1b0] sm:$0xff]  }
 0x1a3   : > { %v1523_v61 = vsel %vm1478_vm1, %v1520_v56, %v1522_v60 }
 0x1a4   : > { %4654 = vmatpush1.bf16.msra.mxu0 %v13101_v2  ;;  %v1525_v2 = vsel %vm1478_vm1, %v1522_v60, %v1524_v1 }
 0x1a5   : > { %4655 = vmatprep.subr.bf16.mxu0 %v13729_v0 }
 0x1a7   : > { %4491 = vmatmul.mubr.bf16.gmra.mrb[28].mxu0 %v1495_v5  ;;  %v13114_v5 = vld [vmem:[#allocation2 + $0xc] sm:$0xff]  }
 0x1a8   : > { %4498 = vmatprep.mubr.bf16.mxu0 %v13070_v3  ;;  %4656 = vmatpush1.bf16.msra.mxu0 %v13106_v6  ;;  %v13110_v3 = vld [vmem:[#allocation2 + $0xc4] sm:$0xff]   ;;  %v13112_v6 = vld [vmem:[#allocation2 + $0xc] sm:$0xfe]  }
 0x1a9   : > { %4657 = vmatprep.subr.bf16.mxu0 %v13729_v0  ;;  %v2380_v11 = vrot.slane %v13112_v6, 1 }
 0x1ac   : > { %4658 = vmatpush1.bf16.msra.mxu0 %v13109_v8  ;;  %v1526_v8 = vrot.slane %v13111_v4, 1 }
 0x1ad   : > { %4852 = vmatprep.subr.bf16.mxu0 %v13729_v0 }
 0x1af   : > { %4499 = vmatmul.mubr.bf16.gmra.mrb[32].mxu0 %v1497_v10  ;;  %v1967_v10 = vshll.u32 %v13114_v5, 16 }
 0x1b0   : > { %4506 = vmatprep.mubr.bf16.mxu0 %v13072_v9  ;;  %v13115_v9 = vld [vmem:[#allocation2 + $0x14] sm:$0xff]  }
 0x1b1   : > { %v1969_v15 = vrot.slane %v1967_v10, 1  ;;  %v1972_v16 = vshll.u32 %v13115_v9, 16  ;;  %v13130_v10 = vld [vmem:[#allocation2 + $0x44] sm:$0xff]  }
 0x1b3   : > { %v1974_v20 = vrot.slane %v1972_v16, 1  ;;  %v13173_v16 = vld [vmem:[#allocation8 + $0x210] sm:$0xff]  }
 0x1b7   : > { %4507 = vmatmul.mubr.bf16.gmra.mrb[36].mxu0 %v1499_v14  ;;  %v1965_v14 = vshrl.u32 %v13114_v5, 16 }
 0x1b8   : > { %4514 = vmatprep.mubr.bf16.mxu0 %v13075_v13  ;;  %v1527_v13 = vsel %vm1478_vm1, %v1524_v1, %v1526_v8  ;;  %v13129_v1 = vld [vmem:[#allocation2 + $0x3c] sm:$0xff]  }
 0x1b9   : > { %v1970_v19 = vor.u32 %v1969_v15, %v1965_v14  ;;  %v2012_v7 = vshll.u32 %v13129_v1, 16  ;;  %v13148_v8 = vld [vmem:[#allocation8 + $0x1c0] sm:$0xff]   ;;  %v13131_v14 = vld [vmem:[#allocation2 + $0x44] sm:$0xff]  }
 0x1ba   : > { %v13151_v15 = vld [vmem:[#allocation8 + $0x1c8] sm:$0xff]  }
 0x1bb   : > { %v1975_v23 = vsel %vm1061_vm0, %v1970_v19, %v1974_v20  ;;  %v2016_v19 = vshrl.u32 %v13129_v1, 16 }
 0x1bf   : > { %4515 = vmatmul.mubr.bf16.gmra.mrb[40].mxu0 %v1501_v17  ;;  %v2382_v17 = vsel %vm1478_vm1, %v2380_v11, %v2381_v12  ;;  %v13171_v11 = vld [vmem:[#allocation8 + $0x208] sm:$0xff]  }
 0x1c0   : > { %4522 = vmatprep.mubr.bf16.mxu0 %v13078_v18  ;;  %v13117_v18 = vld [vmem:[#allocation2 + $0x1c] sm:$0xff]  }
 0x1c7   : > { %4523 = vmatmul.mubr.bf16.gmra.mrb[44].mxu0 %v1503_v21  ;;  %v13118_v21 = vld [vmem:[#allocation2 + $0x1c] sm:$0xff]  }
 0x1c8   : > { %4530 = vmatprep.mubr.bf16.mxu0 %v13080_v22  ;;  %v2383_v22 = vrot.slane %v13117_v18, 1  ;;  %v1984_v35 = vshrl.u32 %v13118_v21, 16 }
 0x1ca   : > { %v2384_v27 = vsel %vm1478_vm1, %v2381_v12, %v2383_v22 }
 0x1cf   : > { %4531 = vmatmul.mubr.bf16.gmra.mrb[48].mxu0 %v1505_v25  ;;  %v1976_v25 = vshrl.u32 %v13115_v9, 16 }
 0x1d0   : > { %4538 = vmatprep.mubr.bf16.mxu0 %v13083_v26  ;;  %v1980_v26 = vshll.u32 %v13118_v21, 16  ;;  %v13156_v21 = vld [vmem:[#allocation8 + $0x1d0] sm:$0xff]  }
 0x1d7   : > { %4539 = vmatmul.mubr.bf16.gmra.mrb[52].mxu0 %v1507_v29  ;;  %v1978_v29 = vor.u32 %v1976_v25, %v1974_v20  ;;  %v2020_v20 = vshll.u32 %v13131_v14, 16 }
 0x1d8   : > { %4546 = vmatprep.mubr.bf16.mxu0 %v13086_v30  ;;  %v1982_v30 = vrot.slane %v1980_v26, 1 }
 0x1d9   : > { %v2022_v26 = vrot.slane %v2020_v20, 1  ;;  %v13197_v20 = vld [vmem:[#allocation2 + $0x38] sm:$0xff]  }
 0x1da   : > { %v1986_v40 = vor.u32 %v1984_v35, %v1982_v30 }
 0x1df   : > { %4547 = vmatmul.mubr.bf16.gmra.mrb[56].mxu0 %v1509_v33  ;;  %v2385_v33 = vrot.slane %v13120_v28, 1  ;;  %v13159_v28 = vld [vmem:[#allocation8 + $0x1d8] sm:$0xff]  }
 0x1e0   : > { %4554 = vmatprep.mubr.bf16.mxu0 %v13088_v34  ;;  %v1983_v34 = vsel %vm1061_vm0, %v1978_v29, %v1982_v30  ;;  %v13178_v29 = vld [vmem:[#allocation8 + $0x220] sm:$0xff]  }
 0x1e7   : > { %4555 = vmatmul.mubr.bf16.gmra.mrb[60].mxu0 %v1511_v37  ;;  %v13124_v37 = vld [vmem:[#allocation8 + $0x190] sm:$0xff]  }
 0x1e8   : > { %4562 = vmatprep.mubr.bf16.mxu0 %v13091_v38  ;;  %v2386_v38 = vsel %vm1478_vm1, %v2383_v22, %v2385_v33 }
 0x1ef   : > { %4563 = vmatmul.mubr.bf16.gmra.mrb[64].mxu0 %v1513_v41  ;;  %v1990_v41 = vrot.slane %v1988_v36, 1  ;;  %v13136_v36 = vld [vmem:[#allocation2 + $0x54] sm:$0xff]  }
 0x1f0   : > { %4570 = vmatprep.mubr.bf16.mxu0 %v13094_v42  ;;  %v13123_v42 = vld [vmem:[#allocation2 + $0x2c] sm:$0xff]  }
 0x1f1   : > { %v1996_v47 = vshll.u32 %v13123_v42, 16 }
 0x1f3   : > { %v1998_v52 = vrot.slane %v1996_v47, 1  ;;  %v13175_v47 = vld [vmem:[#allocation8 + $0x1f0] sm:$0xff]  }
 0x1f7   : > { %4571 = vmatmul.mubr.bf16.gmra.mrb[68].mxu0 %v1515_v45  ;;  %v1991_v45 = vsel %vm1061_vm0, %v1986_v40, %v1990_v41  ;;  %v13137_v40 = vld [vmem:[#allocation2 + $0x54] sm:$0xff]  }
 0x1f8   : > { %4578 = vmatprep.mubr.bf16.mxu0 %v13096_v46  ;;  %v1992_v46 = vshrl.u32 %v13121_v32, 16  ;;  %v2024_v32 = vshrl.u32 %v13131_v14, 16  ;;  %v2040_v1 = vshrl.u32 %v13137_v40, 16  ;;  %v13144_v14 = vld [vmem:[#allocation2 + $0x6c] sm:$0xff]  }
 0x1fa   : > { %v1994_v51 = vor.u32 %v1992_v46, %v1990_v41  ;;  %v13167_v41 = vld [vmem:[#allocation8 + $0x1e8] sm:$0xff]   ;;  %v2036_v46 = vshll.u32 %v13137_v40, 16 }
 0x1fc   : > { %v1999_v56 = vsel %vm1061_vm0, %v1994_v51, %v1998_v52  ;;  %v13186_v51 = vld [vmem:[#allocation2 + $0x18] sm:$0xfe]  }
 0x1ff   : > { %4579 = vmatmul.mubr.bf16.gmra.mrb[72].mxu0 %v1517_v49  ;;  %v2388_v49 = vsel %vm1478_vm1, %v2385_v33, %v2387_v44 }
 0x200   : > { %4586 = vmatprep.mubr.bf16.mxu0 %v13099_v50  ;;  %v13125_v50 = vld [vmem:[#allocation2 + $0x34] sm:$0xff]  }
 0x201   : > { %v2389_v55 = vrot.slane %v13125_v50, 1  ;;  %v13185_v50 = vld [vmem:[#allocation8 + $0x238] sm:$0xff]  }
 0x203   : > { %v2390_v60 = vsel %vm1478_vm1, %v2387_v44, %v2389_v55 }
 0x207   : > { %4587 = vmatmul.mubr.bf16.gmra.mrb[76].mxu0 %v1519_v53  ;;  %v13126_v53 = vld [vmem:[#allocation2 + $0x34] sm:$0xff]  }
 0x208   : > { %4594 = vmatprep.mubr.bf16.mxu0 %v13102_v54  ;;  %v13135_v54 = vld [vmem:[#allocation8 + $0x1a8] sm:$0xff]   ;;  %v2008_v6 = vshrl.u32 %v13126_v53, 16 }
 0x20f   : > { %4595 = vmatmul.mubr.bf16.gmra.mrb[80].mxu0 %v1521_v57  ;;  %v2000_v57 = vshrl.u32 %v13123_v42, 16  ;;  %v13183_v42 = vld [vmem:[#allocation8 + $0x230] sm:$0xff]  }
 0x210   : > { %4602 = vmatprep.mubr.bf16.mxu0 %v13104_v58  ;;  %v2004_v58 = vshll.u32 %v13126_v53, 16 }
 0x212   : > { %v2006_v63 = vrot.slane %v2004_v58, 1 }
 0x214   : > { %v2010_v12 = vor.u32 %v2008_v6, %v2006_v63 }
 0x217   : > { %4603 = vmatmul.mubr.bf16.gmra.mrb[84].mxu0 %v1523_v61  ;;  %v13128_v61 = vld [vmem:[#allocation2 + $0x3c] sm:$0xff]  }
 0x218   : > { %4610 = vmatprep.mubr.bf16.mxu0 %v13107_v62  ;;  %v2002_v62 = vor.u32 %v2000_v57, %v1998_v52  ;;  %v2391_v4 = vrot.slane %v13128_v61, 1  ;;  %v13187_v52 = vld [vmem:[#allocation2 + $0x20] sm:$0xff]   ;;  %v13190_v57 = vld [vmem:[#allocation2 + $0x28] sm:$0xff]  }
 0x219   : > { %v3284_v61 = vrot.slane %v13190_v57, 1 }
 0x21a   : > { %v2007_v5 = vsel %vm1061_vm0, %v2002_v62, %v2006_v63  ;;  %v2392_v9 = vsel %vm1478_vm1, %v2389_v55, %v2391_v4  ;;  %v13139_v55 = vld [vmem:[#allocation2 + $0x5c] sm:$0xff]  }
 0x21f   : > { %4611 = vmatmul.mubr.bf16.gmra.mrb[88].mxu0 %v1525_v2  ;;  %v13143_v2 = vld [vmem:[#allocation8 + $0x1b8] sm:$0xff]  }
 0x220   : > { %4618 = vmatprep.mubr.bf16.mxu0 %v13110_v3  ;;  %v13169_v3 = vld [vmem:[#allocation8 + $0x200] sm:$0xff]  }
 0x221   : > { %12071 = vmatprep.subr.bf16.mxu1 %v13169_v3 }
 0x222   : > { %12072 = vmatpush3.bf16.msra.mxu1 %v13169_v3 }
 0x223   : > { %12073 = vmatprep.subr.bf16.mxu1 %v13171_v11 }
 0x226   : > { %12074 = vmatpush3.bf16.msra.mxu1 %v13171_v11  ;;  %v2048_v11 = vshrl.u32 %v13139_v55, 16 }
 0x227   : > { %4619 = vmatmul.mubr.bf16.gmra.mrb[92].mxu0 %v1527_v13  ;;  %v2014_v13 = vrot.slane %v2012_v7, 1  ;;  %12075 = vmatprep.subr.bf16.mxu1 %v13173_v16 }
 0x228   : > { %4659 = vmatprep.mubr.bf16.mxu0 %v2382_v17  ;;  %v2393_v17 = vrot.slane %v13130_v10, 1 }
 0x229   : > { %v2015_v18 = vsel %vm1061_vm0, %v2010_v12, %v2014_v13  ;;  %v2018_v25 = vor.u32 %v2016_v19, %v2014_v13  ;;  %v13196_v19 = vld [vmem:[#allocation2 + $0x30] sm:$0xff]  }
 0x22a   : > { %v2394_v22 = vsel %vm1478_vm1, %v2391_v4, %v2393_v17  ;;  %12076 = vmatpush3.bf16.msra.mxu1 %v13173_v16 }
 0x22f   : > { %4660 = vmatmul.mubr.bf16.vlgmr.msra.gmra.mrb[0].mxu0 %v1975_v23  ;;  %v13133_v23 = vld [vmem:[#allocation2 + $0x4c] sm:$0xff]  }
 0x230   : > { %4853 = vmatpush1.bf16.msra.mxu0 %v13116_v24  ;;  %4667 = vmatprep.mubr.bf16.mxu0 %v2384_v27  ;;  %v13176_v24 = vld [vmem:[#allocation8 + $0x218] sm:$0xff]   ;;  %v2395_v30 = vrot.slane %v13133_v23, 1 }
 0x231   : > { %4854 = vmatprep.subr.bf16.mxu0 %v13729_v0  ;;  %v13134_v27 = vld [vmem:[#allocation2 + $0x4c] sm:$0xff]   ;;  %12077 = vmatprep.subr.bf16.mxu1 %v13176_v24 }
 0x232   : > { %12078 = vmatpush3.bf16.msra.mxu1 %v13176_v24  ;;  %v2028_v33 = vshll.u32 %v13134_v27, 16  ;;  %v2396_v35 = vsel %vm1478_vm1, %v2393_v17, %v2395_v30  ;;  %v13145_v17 = vld [vmem:[#allocation2 + $0x6c] sm:$0xff]   ;;  %v3286_v24 = vrot.slane %v13196_v19, 1 }
 0x233   : > { %12079 = vmatprep.subr.bf16.mxu1 %v13178_v29  ;;  %v2060_v23 = vshll.u32 %v13145_v17, 16 }
 0x234   : > { %4855 = vmatpush1.bf16.msra.mxu0 %v13119_v31  ;;  %v2023_v31 = vsel %vm1061_vm0, %v2018_v25, %v2022_v26  ;;  %v2030_v39 = vrot.slane %v2028_v33, 1 }
 0x235   : > { %4856 = vmatprep.subr.bf16.mxu0 %v13729_v0 }
 0x236   : > { %12080 = vmatpush3.bf16.msra.mxu1 %v13178_v29 }
 0x237   : > { %4668 = vmatmul.mubr.bf16.gmra.mrb[4].mxu0 %v1983_v34  ;;  %v13164_v34 = vld [vmem:[#allocation8 + $0x1e0] sm:$0xff]  }
 0x238   : > { %4675 = vmatprep.mubr.bf16.mxu0 %v2386_v38  ;;  %4857 = vmatpush1.bf16.msra.mxu0 %v13124_v37  ;;  %v13180_v37 = vld [vmem:[#allocation8 + $0x228] sm:$0xff]   ;;  %v2026_v38 = vor.u32 %v2024_v32, %v2022_v26  ;;  %v13146_v26 = vld [vmem:[#allocation2 + $0x74] sm:$0xff]  }
 0x239   : > { %4858 = vmatprep.subr.bf16.mxu0 %v13729_v0  ;;  %12081 = vmatprep.subr.bf16.mxu1 %v13180_v37  ;;  %v13147_v32 = vld [vmem:[#allocation2 + $0x74] sm:$0xff]   ;;  %v2405_v33 = vrot.slane %v13146_v26, 1  ;;  %v13161_v26 = vld [vmem:[#allocation2 + $0x9c] sm:$0xff]  }
 0x23a   : > { %12082 = vmatpush3.bf16.msra.mxu1 %v13180_v37  ;;  %v2031_v44 = vsel %vm1061_vm0, %v2026_v38, %v2030_v39  ;;  %v13149_v38 = vld [vmem:[#allocation2 + $0x7c] sm:$0xff]  }
 0x23b   : > { %12083 = vmatprep.subr.bf16.mxu1 %v13183_v42 }
 0x23c   : > { %4859 = vmatpush1.bf16.msra.mxu0 %v13127_v43  ;;  %v2397_v43 = vrot.slane %v13136_v36, 1  ;;  %v2068_v36 = vshll.u32 %v13147_v32, 16 }
 0x23d   : > { %4860 = vmatprep.subr.bf16.mxu0 %v13729_v0 }
 0x23e   : > { %12084 = vmatpush3.bf16.msra.mxu1 %v13183_v42  ;;  %v2070_v40 = vrot.slane %v2068_v36, 1  ;;  %v2407_v42 = vrot.slane %v13149_v38, 1 }
 0x23f   : > { %4676 = vmatmul.mubr.bf16.gmra.mrb[8].mxu0 %v1991_v45  ;;  %v2032_v45 = vshrl.u32 %v13134_v27, 16  ;;  %12085 = vmatprep.subr.bf16.mxu1 %v13185_v50  ;;  %v3288_v27 = vrot.slane %v13197_v20, 1 }
 0x240   : > { %4683 = vmatprep.mubr.bf16.mxu0 %v2388_v49  ;;  %4861 = vmatpush1.bf16.msra.mxu0 %v13132_v48  ;;  %v2398_v48 = vsel %vm1478_vm1, %v2395_v30, %v2397_v43  ;;  %v13138_v49 = vld [vmem:[#allocation2 + $0x5c] sm:$0xff]  }
 0x241   : > { %4862 = vmatprep.subr.bf16.mxu0 %v13729_v0  ;;  %v2034_v53 = vor.u32 %v2032_v45, %v2030_v39  ;;  %v2399_v58 = vrot.slane %v13138_v49, 1  ;;  %v3289_v29 = vsel %vm1478_vm1, %v3286_v24, %v3288_v27  ;;  %v2408_v49 = vsel %vm1478_vm1, %v2405_v33, %v2407_v42 }
 0x242   : > { %12086 = vmatpush3.bf16.msra.mxu1 %v13185_v50  ;;  %v13152_v50 = vld [vmem:[#allocation2 + $0x84] sm:$0xff]  }
 0x243   : > { %9701 = vmatprep.subr.bf16.mxu1 %v13729_v0  ;;  %v2400_v4 = vsel %vm1478_vm1, %v2397_v43, %v2399_v58  ;;  %v13202_v43 = vld [vmem:[#allocation2 + $0x40] sm:$0xff]   ;;  %v2409_v57 = vrot.slane %v13152_v50, 1  ;;  %v13166_v50 = vld [vmem:[#allocation2 + $0xac] sm:$0xff]  }
 0x244   : > { %4863 = vmatpush1.bf16.msra.mxu0 %v13135_v54  ;;  %v2038_v54 = vrot.slane %v2036_v46, 1  ;;  %v2072_v46 = vshrl.u32 %v13147_v32, 16  ;;  %v2108_v32 = vshll.u32 %v13161_v26, 16 }
 0x245   : > { %4864 = vmatprep.subr.bf16.mxu0 %v13729_v0 }
 0x246   : > { %v2039_v63 = vsel %vm1061_vm0, %v2034_v53, %v2038_v54  ;;  %v2042_v6 = vor.u32 %v2040_v1, %v2038_v54  ;;  %v2074_v54 = vor.u32 %v2072_v46, %v2070_v40 }
 0x247   : > { %4684 = vmatmul.mubr.bf16.gmra.mrb[12].mxu0 %v1999_v56  ;;  %v13181_v56 = vld [vmem:[#allocation8 + $0x1f8] sm:$0xff]  }
 0x248   : > { %4691 = vmatprep.mubr.bf16.mxu0 %v2390_v60  ;;  %4865 = vmatpush1.bf16.msra.mxu0 %v13140_v59  ;;  %v3281_v59 = vrot.slane %v13186_v51, 1  ;;  %v3282_v60 = vrot.slane %v13187_v52, 1 }
 0x249   : > { %4866 = vmatprep.subr.bf16.mxu0 %v13729_v0 }
 0x24a   : > { %v3283_v62 = vsel %vm1478_vm1, %v3281_v59, %v3282_v60  ;;  %v3285_v3 = vsel %vm1478_vm1, %v3282_v60, %v3284_v61 }
 0x24b   : > { %12087 = vmatprep.mubr.bf16.mxu1 %v3283_v62  ;;  %v13154_v62 = vld [vmem:[#allocation2 + $0x8c] sm:$0xff]  }
 0x24c   : > { %4867 = vmatpush1.bf16.msra.mxu0 %v13143_v2  ;;  %v2044_v2 = vshll.u32 %v13139_v55, 16  ;;  %12088 = vmatmul.mubr.bf16.vlgmr.msra.gmra.mrb[0].mxu1 %v3285_v3  ;;  %v2411_v3 = vrot.slane %v13154_v62, 1 }
 0x24d   : > { %4868 = vmatprep.subr.bf16.mxu0 %v13729_v0 }
 0x24e   : > { %v2046_v7 = vrot.slane %v2044_v2, 1  ;;  %v13155_v2 = vld [vmem:[#allocation2 + $0x8c] sm:$0xff]  }
 0x24f   : > { %4692 = vmatmul.mubr.bf16.gmra.mrb[16].mxu0 %v2007_v5  ;;  %v13141_v5 = vld [vmem:[#allocation2 + $0x64] sm:$0xff]   ;;  %v2096_v20 = vshrl.u32 %v13155_v2, 16 }
 0x250   : > { %4699 = vmatprep.mubr.bf16.mxu0 %v2392_v9  ;;  %4869 = vmatpush1.bf16.msra.mxu0 %v13148_v8  ;;  %v13142_v8 = vld [vmem:[#allocation2 + $0x64] sm:$0xff]   ;;  %v2401_v9 = vrot.slane %v13141_v5, 1  ;;  %v2047_v10 = vsel %vm1061_vm0, %v2042_v6, %v2046_v7  ;;  %v13209_v5 = vld [vmem:[#allocation2 + $0x58] sm:$0xff]  }
 0x251   : > { %4870 = vmatprep.subr.bf16.mxu0 %v13729_v0  ;;  %v2052_v12 = vshll.u32 %v13142_v8, 16 }
 0x252   : > { %v2402_v13 = vsel %vm1478_vm1, %v2399_v58, %v2401_v9 }
 0x253   : > { %v2054_v16 = vrot.slane %v2052_v12, 1  ;;  %v3296_v12 = vrot.slane %v13209_v5, 1  ;;  %v2128_v5 = vshrl.u32 %v13166_v50, 16 }
 0x254   : > { %4871 = vmatpush1.bf16.msra.mxu0 %v13151_v15  ;;  %v2050_v15 = vor.u32 %v2048_v11, %v2046_v7  ;;  %v13157_v11 = vld [vmem:[#allocation2 + $0x94] sm:$0xff]  }
 0x255   : > { %4872 = vmatprep.subr.bf16.mxu0 %v13729_v0 }
 0x257   : > { %4700 = vmatmul.mubr.bf16.gmra.mrb[20].mxu0 %v2015_v18  ;;  %v2403_v18 = vrot.slane %v13144_v14, 1 }
 0x258   : > { %4707 = vmatprep.mubr.bf16.mxu0 %v2394_v22  ;;  %4873 = vmatpush1.bf16.msra.mxu0 %v13156_v21  ;;  %v2055_v21 = vsel %vm1061_vm0, %v2050_v15, %v2054_v16  ;;  %v2056_v22 = vshrl.u32 %v13142_v8, 16  ;;  %v2092_v8 = vshll.u32 %v13155_v2, 16  ;;  %v13170_v2 = vld [vmem:[#allocation2 + $0xb4] sm:$0xff]  }
 0x259   : > { %4874 = vmatprep.subr.bf16.mxu0 %v13729_v0  ;;  %v2404_v25 = vsel %vm1478_vm1, %v2401_v9, %v2403_v18  ;;  %v2406_v37 = vsel %vm1478_vm1, %v2403_v18, %v2405_v33  ;;  %v2413_v18 = vrot.slane %v13157_v11, 1  ;;  %v13174_v11 = vld [vmem:[#allocation2 + $0xbc] sm:$0xff]  }
 0x25a   : > { %v2058_v30 = vor.u32 %v2056_v22, %v2054_v16  ;;  %v2094_v16 = vrot.slane %v2092_v8, 1  ;;  %v13172_v8 = vld [vmem:[#allocation2 + $0xbc] sm:$0xff]  }
 0x25b   : > { %v2414_v22 = vsel %vm1478_vm1, %v2411_v3, %v2413_v18 }
 0x25c   : > { %4875 = vmatpush1.bf16.msra.mxu0 %v13159_v28  ;;  %v3287_v28 = vsel %vm1478_vm1, %v3284_v61, %v3286_v24  ;;  %v2410_v61 = vsel %vm1478_vm1, %v2407_v42, %v2409_v57  ;;  %v2098_v24 = vor.u32 %v2096_v20, %v2094_v16  ;;  %v13177_v20 = vld [vmem:[#allocation2 + $0xc4] sm:$0xff]  }
 0x25d   : > { %4876 = vmatprep.subr.bf16.mxu0 %v13729_v0  ;;  %12091 = vmatprep.mubr.bf16.mxu1 %v3287_v28  ;;  %v13214_v28 = vld [vmem:[#allocation2 + $0x60] sm:$0xff]  }
 0x25e   : > { %12092 = vmatmul.mubr.bf16.gmra.mrb[4].mxu1 %v3289_v29  ;;  %v13215_v29 = vld [vmem:[#allocation2 + $0x68] sm:$0xff]   ;;  %v3298_v33 = vrot.slane %v13214_v28, 1  ;;  %v2144_v28 = vshrl.u32 %v13174_v11, 16 }
 0x25f   : > { %4708 = vmatmul.mubr.bf16.gmra.mrb[24].mxu0 %v2023_v31  ;;  %v2062_v31 = vrot.slane %v2060_v23, 1  ;;  %v13160_v23 = vld [vmem:[#allocation2 + $0x9c] sm:$0xff]   ;;  %v3300_v36 = vrot.slane %v13215_v29, 1 }
 0x260   : > { %4715 = vmatprep.mubr.bf16.mxu0 %v2396_v35  ;;  %4877 = vmatpush1.bf16.msra.mxu0 %v13164_v34  ;;  %v2064_v35 = vshrl.u32 %v13145_v17, 16  ;;  %v13158_v17 = vld [vmem:[#allocation2 + $0x94] sm:$0xff]  }
 0x261   : > { %4878 = vmatprep.subr.bf16.mxu0 %v13729_v0  ;;  %v2063_v34 = vsel %vm1061_vm0, %v2058_v30, %v2062_v31  ;;  %v3301_v38 = vsel %vm1478_vm1, %v3298_v33, %v3300_v36 }
 0x262   : > { %v2066_v39 = vor.u32 %v2064_v35, %v2062_v31  ;;  %v2104_v31 = vshrl.u32 %v13158_v17, 16  ;;  %v13162_v35 = vld [vmem:[#allocation2 + $0xa4] sm:$0xff]  }
 0x263   : > { %v2417_v42 = vrot.slane %v13162_v35, 1 }
 0x264   : > { %4879 = vmatpush1.bf16.msra.mxu0 %v13167_v41  ;;  %v13150_v41 = vld [vmem:[#allocation2 + $0x7c] sm:$0xff]   ;;  %v2071_v45 = vsel %vm1061_vm0, %v2066_v39, %v2070_v40  ;;  %v2110_v40 = vrot.slane %v2108_v32, 1 }
 0x265   : > { %4880 = vmatprep.subr.bf16.mxu0 %v13729_v0  ;;  %v2080_v59 = vshrl.u32 %v13150_v41, 16 }
 0x267   : > { %4716 = vmatmul.mubr.bf16.gmra.mrb[28].mxu0 %v2031_v44  ;;  %v13203_v44 = vld [vmem:[#allocation2 + $0x48] sm:$0xff]  }
 0x268   : > { %4723 = vmatprep.mubr.bf16.mxu0 %v2398_v48  ;;  %4881 = vmatpush1.bf16.msra.mxu0 %v13175_v47  ;;  %v2076_v47 = vshll.u32 %v13150_v41, 16  ;;  %v3290_v48 = vrot.slane %v13202_v43, 1  ;;  %v3292_v51 = vrot.slane %v13203_v44, 1  ;;  %v13163_v41 = vld [vmem:[#allocation2 + $0xa4] sm:$0xff]   ;;  %v2112_v44 = vshrl.u32 %v13161_v26, 16 }
 0x269   : > { %4882 = vmatprep.subr.bf16.mxu0 %v13729_v0 }
 0x26a   : > { %v3291_v52 = vsel %vm1478_vm1, %v3288_v27, %v3290_v48  ;;  %v3293_v53 = vsel %vm1478_vm1, %v3290_v48, %v3292_v51  ;;  %v2078_v55 = vrot.slane %v2076_v47, 1  ;;  %v2415_v27 = vrot.slane %v13160_v23, 1  ;;  %v13165_v47 = vld [vmem:[#allocation2 + $0xac] sm:$0xff]   ;;  %v13179_v23 = vld [vmem:[#allocation2 + $0xc4] sm:$0xff]  }
 0x26b   : > { %12095 = vmatprep.mubr.bf16.mxu1 %v3291_v52  ;;  %v2114_v48 = vor.u32 %v2112_v44, %v2110_v40  ;;  %v13220_v52 = vld [vmem:[#allocation2 + $0x70] sm:$0xff]   ;;  %v2148_v29 = vshll.u32 %v13179_v23, 16  ;;  %v2152_v44 = vshrl.u32 %v13179_v23, 16  ;;  %v13195_v23 = vld [vmem:[#allocation2 + $0x28] sm:$0xff]  }
 0x26c   : > { %4883 = vmatpush1.bf16.msra.mxu0 %v13181_v56  ;;  %v13153_v56 = vld [vmem:[#allocation2 + $0x84] sm:$0xff]   ;;  %12096 = vmatmul.mubr.bf16.gmra.mrb[8].mxu1 %v3293_v53  ;;  %v2079_v58 = vsel %vm1061_vm0, %v2074_v54, %v2078_v55  ;;  %v2418_v46 = vsel %vm1478_vm1, %v2415_v27, %v2417_v42  ;;  %v13221_v53 = vld [vmem:[#allocation2 + $0x78] sm:$0xff]  }
 0x26d   : > { %v2084_v60 = vshll.u32 %v13153_v56, 16  ;;  %v2088_v7 = vshrl.u32 %v13153_v56, 16  ;;  %v2124_v56 = vshll.u32 %v13166_v50, 16  ;;  %v2150_v35 = vrot.slane %v2148_v29, 1 }
 0x26f   : > { %4724 = vmatmul.mubr.bf16.gmra.mrb[32].mxu0 %v2039_v63  ;;  %v2082_v63 = vor.u32 %v2080_v59, %v2078_v55  ;;  %v2086_v1 = vrot.slane %v2084_v60, 1  ;;  %v2120_v55 = vshrl.u32 %v13163_v41, 16  ;;  %v13168_v59 = vld [vmem:[#allocation2 + $0xb4] sm:$0xff]   ;;  %v3304_v60 = vrot.slane %v13221_v53, 1 }
 0x270   : > { %4731 = vmatprep.mubr.bf16.mxu0 %v2400_v4  ;;  %v13208_v4 = vld [vmem:[#allocation2 + $0x50] sm:$0xff]   ;;  %v2154_v53 = vor.u32 %v2152_v44, %v2150_v35  ;;  %v13251_v44 = vld [vmem:[#allocation2 + $0xc8] sm:$0xff]  }
 0x271   : > { %v2087_v6 = vsel %vm1061_vm0, %v2082_v63, %v2086_v1  ;;  %v3294_v9 = vrot.slane %v13208_v4, 1  ;;  %v2090_v15 = vor.u32 %v2088_v7, %v2086_v1  ;;  %v2126_v1 = vrot.slane %v2124_v56, 1 }
 0x273   : > { %v3297_v14 = vsel %vm1478_vm1, %v3294_v9, %v3296_v12  ;;  %v2095_v19 = vsel %vm1061_vm0, %v2090_v15, %v2094_v16  ;;  %v2136_v16 = vshrl.u32 %v13170_v2, 16 }
 0x277   : > { %4732 = vmatmul.mubr.bf16.gmra.mrb[36].mxu0 %v2047_v10  ;;  %v2412_v10 = vsel %vm1478_vm1, %v2409_v57, %v2411_v3  ;;  %v3302_v57 = vrot.slane %v13220_v52, 1  ;;  %v2421_v3 = vrot.slane %v13168_v59, 1 }
 0x278   : > { %4739 = vmatprep.mubr.bf16.mxu0 %v2402_v13  ;;  %v3295_v13 = vsel %vm1478_vm1, %v3292_v51, %v3294_v9  ;;  %v2419_v51 = vrot.slane %v13165_v47, 1  ;;  %v2130_v9 = vor.u32 %v2128_v5, %v2126_v1 }
 0x279   : > { %12099 = vmatprep.mubr.bf16.mxu1 %v3295_v13  ;;  %v3305_v62 = vsel %vm1478_vm1, %v3302_v57, %v3304_v60  ;;  %v13226_v13 = vld [vmem:[#allocation2 + $0x80] sm:$0xff]  }
 0x27a   : > { %12100 = vmatmul.mubr.bf16.gmra.mrb[12].mxu1 %v3297_v14  ;;  %v2422_v7 = vsel %vm1478_vm1, %v2419_v51, %v2421_v3  ;;  %v13227_v14 = vld [vmem:[#allocation2 + $0x88] sm:$0xff]  }
 0x27f   : > { %4740 = vmatmul.mubr.bf16.gmra.mrb[40].mxu0 %v2055_v21  ;;  %v2100_v21 = vshll.u32 %v13158_v17, 16  ;;  %v2140_v17 = vshll.u32 %v13174_v11, 16 }
 0x280   : > { %4747 = vmatprep.mubr.bf16.mxu0 %v2404_v25 }
 0x281   : > { %v2102_v25 = vrot.slane %v2100_v21, 1  ;;  %v3308_v21 = vrot.slane %v13227_v14, 1  ;;  %v2142_v26 = vrot.slane %v2140_v17, 1  ;;  %v13198_v14 = vld [vmem:[#allocation2 + $0x38] sm:$0xff]  }
 0x283   : > { %v2103_v30 = vsel %vm1061_vm0, %v2098_v24, %v2102_v25  ;;  %v2106_v39 = vor.u32 %v2104_v31, %v2102_v25  ;;  %v13182_v31 = vld [vmem:[#allocation2 + $0xcc] ss:$0 sps:$4 sm:$0x11]  }
 0x285   : > { %v2111_v43 = vsel %vm1061_vm0, %v2106_v39, %v2110_v40  ;;  %v13232_v40 = vld [vmem:[#allocation2 + $0x90] sm:$0xff]  }
 0x287   : > { %4748 = vmatmul.mubr.bf16.gmra.mrb[44].mxu0 %v2063_v34  ;;  %v2416_v34 = vsel %vm1478_vm1, %v2413_v18, %v2415_v27  ;;  %v3306_v18 = vrot.slane %v13226_v13, 1  ;;  %v2425_v27 = vrot.slane %v13177_v20, 1 }
 0x288   : > { %4755 = vmatprep.mubr.bf16.mxu0 %v2406_v37  ;;  %v3299_v37 = vsel %vm1478_vm1, %v3296_v12, %v3298_v33  ;;  %v2423_v12 = vrot.slane %v13172_v8, 1  ;;  %v13188_v33 = vld [vmem:[#allocation2 + $0x18] sm:$0xff]  }
 0x289   : > { %12103 = vmatprep.mubr.bf16.mxu1 %v3299_v37  ;;  %v3309_v24 = vsel %vm1478_vm1, %v3306_v18, %v3308_v21  ;;  %v13184_v37 = vld [vmem:[#allocation2 + $0xcc] ss:$0 sps:$4 sm:$0x11]   ;;  %v2868_v39 = vshll.u32 %v13188_v33, 16  ;;  %v2866_v47 = vshrl.u32 %v13188_v33, 16 }
 0x28a   : > { %12104 = vmatmul.mubr.bf16.gmra.mrb[16].mxu1 %v3301_v38  ;;  %v2426_v32 = vsel %vm1478_vm1, %v2423_v12, %v2425_v27  ;;  %v13189_v38 = vld [vmem:[#allocation2 + $0x20] sm:$0xff]  }
 0x28f   : > { %4756 = vmatmul.mubr.bf16.gmra.mrb[48].mxu0 %v2071_v45  ;;  %v2116_v45 = vshll.u32 %v13163_v41, 16 }
 0x290   : > { %4763 = vmatprep.mubr.bf16.mxu0 %v2408_v49 }
 0x291   : > { %v2118_v49 = vrot.slane %v2116_v45, 1  ;;  %v2156_v45 = vshll.u32 %v13184_v37, 16 }
 0x293   : > { %v2119_v54 = vsel %vm1061_vm0, %v2114_v48, %v2118_v49  ;;  %v2122_v63 = vor.u32 %v2120_v55, %v2118_v49  ;;  %v2870_v48 = vrot.slane %v2868_v39, 1  ;;  %v2873_v49 = vshll.u32 %v13189_v38, 16 }
 0x295   : > { %v2127_v4 = vsel %vm1061_vm0, %v2122_v63, %v2126_v1  ;;  %v2871_v55 = vor.u32 %v2870_v48, %v2866_v47  ;;  %v2875_v56 = vrot.slane %v2873_v49, 1  ;;  %v13194_v1 = vld [vmem:[#allocation2 + $0x30] sm:$0xff]  }
 0x296   : > { %v2889_v8 = vshll.u32 %v13194_v1, 16  ;;  %v2893_v17 = vshrl.u32 %v13194_v1, 16 }
 0x297   : > { %4764 = vmatmul.mubr.bf16.gmra.mrb[52].mxu0 %v2079_v58  ;;  %v2420_v58 = vsel %vm1478_vm1, %v2417_v42, %v2419_v51  ;;  %v13233_v42 = vld [vmem:[#allocation2 + $0x98] sm:$0xff]   ;;  %v2876_v59 = vsel %vm1061_vm0, %v2871_v55, %v2875_v56 }
 0x298   : > { %4771 = vmatprep.mubr.bf16.mxu0 %v2410_v61  ;;  %v3303_v61 = vsel %vm1478_vm1, %v3300_v36, %v3302_v57  ;;  %v2427_v36 = vrot.slane %v13182_v31, 1  ;;  %v3312_v50 = vrot.slane %v13233_v42, 1  ;;  %v13192_v57 = vld [vmem:[#allocation2 + $0x28] sm:$0xff]   ;;  %v2891_v13 = vrot.slane %v2889_v8, 1  ;;  %v13201_v42 = vld [vmem:[#allocation2 + $0x38] sm:$0xff]  }
 0x299   : > { %12107 = vmatprep.mubr.bf16.mxu1 %v3303_v61  ;;  %v2881_v61 = vshll.u32 %v13192_v57, 16 }
 0x29a   : > { %12108 = vmatmul.mubr.bf16.gmra.mrb[20].mxu1 %v3305_v62 }
 0x29b   : > { %v2883_v63 = vrot.slane %v2881_v61, 1 }
 0x29f   : > { %4772 = vmatmul.mubr.bf16.gmra.mrb[56].mxu0 %v2087_v6  ;;  %v2132_v6 = vshll.u32 %v13170_v2, 16  ;;  %v13238_v2 = vld [vmem:[#allocation2 + $0xa0] sm:$0xff]  }
 0x2a0   : > { %4779 = vmatprep.mubr.bf16.mxu0 %v2412_v10  ;;  %v3314_v5 = vrot.slane %v13238_v2, 1  ;;  %v13205_v2 = vld [vmem:[#allocation2 + $0x40] sm:$0xff]  }
 0x2a1   : > { %v2134_v10 = vrot.slane %v2132_v6, 1 }
 0x2a3   : > { %v2135_v15 = vsel %vm1061_vm0, %v2130_v9, %v2134_v10  ;;  %v2138_v25 = vor.u32 %v2136_v16, %v2134_v10  ;;  %v3315_v10 = vsel %vm1478_vm1, %v3312_v50, %v3314_v5 }
 0x2a7   : > { %4780 = vmatmul.mubr.bf16.gmra.mrb[60].mxu0 %v2095_v19  ;;  %v2424_v19 = vsel %vm1478_vm1, %v2421_v3, %v2423_v12  ;;  %v13191_v3 = vld [vmem:[#allocation2 + $0x18] sm:$0xff]  }
 0x2a8   : > { %4787 = vmatprep.mubr.bf16.mxu0 %v2414_v22  ;;  %v3307_v22 = vsel %vm1478_vm1, %v3304_v60, %v3306_v18  ;;  %v2877_v60 = vshrl.u32 %v13189_v38, 16  ;;  %v2897_v18 = vshll.u32 %v13198_v14, 16 }
 0x2a9   : > { %12111 = vmatprep.mubr.bf16.mxu1 %v3307_v22  ;;  %v13244_v22 = vld [vmem:[#allocation2 + $0xb0] sm:$0xff]  }
 0x2aa   : > { %12112 = vmatmul.mubr.bf16.gmra.mrb[24].mxu1 %v3309_v24  ;;  %v2879_v62 = vor.u32 %v2877_v60, %v2875_v56  ;;  %v2899_v20 = vrot.slane %v2897_v18, 1  ;;  %v13245_v24 = vld [vmem:[#allocation2 + $0xb8] sm:$0xff]   ;;  %v328_v60 = vld [vmem:[%s13939_s16 + $0x1b8] sm:$0xff] }
 0x2ab   : > { %v3320_v29 = vrot.slane %v13245_v24, 1  ;;  %v385_v1 = vmax.f32 %v328_v60, 0.0 }
 0x2ac   : > { %v2884_v6 = vsel %vm1061_vm0, %v2879_v62, %v2883_v63 }
 0x2af   : > { %4788 = vmatmul.mubr.bf16.gmra.mrb[64].mxu0 %v2103_v30  ;;  %v2143_v30 = vsel %vm1061_vm0, %v2138_v25, %v2142_v26  ;;  %v3318_v25 = vrot.slane %v13244_v22, 1 }
 0x2b0   : > { %4795 = vmatprep.mubr.bf16.mxu0 %v2416_v34  ;;  %v2146_v34 = vor.u32 %v2144_v28, %v2142_v26 }
 0x2b1   : > { %v3321_v31 = vsel %vm1478_vm1, %v3318_v25, %v3320_v29 }
 0x2b2   : > { %v2151_v41 = vsel %vm1061_vm0, %v2146_v34, %v2150_v35  ;;  %v13204_v34 = vld [vmem:[#allocation2 + $0x48] sm:$0xff]   ;;  %v13199_v35 = vld [vmem:[#allocation2 + $0x30] sm:$0xff]  }
 0x2b3   : > { %v2913_v38 = vshll.u32 %v13204_v34, 16 }
 0x2b7   : > { %4796 = vmatmul.mubr.bf16.gmra.mrb[68].mxu0 %v2111_v43  ;;  %v2428_v43 = vsel %vm1478_vm1, %v2425_v27, %v2427_v36  ;;  %v2901_v27 = vshrl.u32 %v13198_v14, 16 }
 0x2b8   : > { %4803 = vmatprep.mubr.bf16.mxu0 %v2418_v46  ;;  %v3310_v46 = vrot.slane %v13232_v40, 1  ;;  %v2915_v40 = vrot.slane %v2913_v38, 1  ;;  %v13265_v38 = vld [vmem:[#allocation10 + $0x28] sm:$0xff]  }
 0x2ba   : > { %v3311_v51 = vsel %vm1478_vm1, %v3308_v21, %v3310_v46  ;;  %v3313_v52 = vsel %vm1478_vm1, %v3310_v46, %v3312_v50  ;;  %v13200_v21 = vld [vmem:[#allocation2 + $0x40] sm:$0xff]   ;;  %v326_v46 = vld [vmem:[%s13939_s16 + $0x1a8] sm:$0xff] }
 0x2bb   : > { %12115 = vmatprep.mubr.bf16.mxu1 %v3311_v51  ;;  %v2905_v28 = vshll.u32 %v13200_v21, 16  ;;  %v2909_v37 = vshrl.u32 %v13200_v21, 16  ;;  %v383_v49 = vmax.f32 %v326_v46, 0.0  ;;  %v2917_v51 = vshrl.u32 %v13204_v34, 16  ;;  %v13213_v34 = vld [vmem:[#allocation2 + $0x58] sm:$0xff]  }
 0x2bc   : > { %12116 = vmatmul.mubr.bf16.gmra.mrb[28].mxu1 %v3313_v52 }
 0x2bd   : > { %12119 = vmatprep.mubr.bf16.mxu1 %v3315_v10  ;;  %v2907_v33 = vrot.slane %v2905_v28, 1  ;;  %v2919_v62 = vor.u32 %v2917_v51, %v2915_v40  ;;  %v13219_v51 = vld [vmem:[#allocation2 + $0x68] sm:$0xff]  }
 0x2bf   : > { %4804 = vmatmul.mubr.bf16.gmra.mrb[72].mxu0 %v2119_v54  ;;  %v2158_v54 = vrot.slane %v2156_v45, 1  ;;  %v2911_v39 = vor.u32 %v2909_v37, %v2907_v33  ;;  %v325_v45 = vld [vmem:[%s13939_s16 + $0x1a0] sm:$0xff] }
 0x2c0   : > { %4811 = vmatprep.mubr.bf16.mxu0 %v2420_v58  ;;  %v382_v48 = vmax.f32 %v325_v45, 0.0 }
 0x2c1   : > { %v2159_v58 = vsel %vm1061_vm0, %v2154_v53, %v2158_v54  ;;  %v2916_v50 = vsel %vm1061_vm0, %v2911_v39, %v2915_v40  ;;  %v3324_v53 = vrot.slane %v13251_v44, 1 }
 0x2c2   : > { %v11973_v55 = vpack.c.bf16 %v383_v49, %v382_v48 }
 0x2c4   : > { %12005 = vst [vmem:[#allocation2 + $0xd0] sm:$0xff] %v11973_v55  }
 0x2c7   : > { %4812 = vmatmul.mubr.bf16.gmra.mrb[76].mxu0 %v2127_v4  ;;  %v13239_v4 = vld [vmem:[#allocation2 + $0xa8] sm:$0xff]  }
 0x2c8   : > { %4819 = vmatprep.mubr.bf16.mxu0 %v2422_v7  ;;  %v2885_v7 = vshrl.u32 %v13192_v57, 16  ;;  %v3316_v9 = vrot.slane %v13239_v4, 1  ;;  %v13252_v57 = vld [vmem:[#allocation10] sm:$0xff]  }
 0x2c9   : > { %9702 = vmatpush1.bf16.msra.mxu1 %v13252_v57 }
 0x2ca   : > { %v3317_v11 = vsel %vm1478_vm1, %v3314_v5, %v3316_v9  ;;  %v2887_v12 = vor.u32 %v2885_v7, %v2883_v63  ;;  %9703 = vmatprep.subr.bf16.mxu1 %v13729_v0  ;;  %v13255_v7 = vld [vmem:[#allocation10 + $0x8] sm:$0xff]  }
 0x2cb   : > { %12120 = vmatmul.mubr.bf16.gmra.mrb[32].mxu1 %v3317_v11  ;;  %v13258_v11 = vld [vmem:[#allocation2 + $0xd0] sm:$0xff]  }
 0x2cc   : > { %v2892_v16 = vsel %vm1061_vm0, %v2887_v12, %v2891_v13  ;;  %v13207_v12 = vld [vmem:[#allocation2 + $0x48] sm:$0xff]  }
 0x2cd   : > { %9704 = vmatpush1.bf16.msra.mxu1 %v13255_v7 }
 0x2ce   : > { %9705 = vmatprep.subr.bf16.mxu1 %v13729_v0 }
 0x2cf   : > { %4820 = vmatmul.mubr.bf16.gmra.mrb[80].mxu0 %v2135_v15  ;;  %v13193_v15 = vld [vmem:[#allocation2 + $0x20] sm:$0xff]  }
 0x2d0   : > { %4827 = vmatprep.mubr.bf16.mxu0 %v2424_v19  ;;  %v2895_v19 = vor.u32 %v2893_v17, %v2891_v13  ;;  %v3326_v13 = vrot.slane %v13258_v11, 1 }
 0x2d2   : > { %v2900_v26 = vsel %vm1061_vm0, %v2895_v19, %v2899_v20  ;;  %v3327_v18 = vsel %vm1478_vm1, %v3324_v53, %v3326_v13 }
 0x2d7   : > { %4828 = vmatmul.mubr.bf16.gmra.mrb[84].mxu0 %v2143_v30  ;;  %v3319_v30 = vsel %vm1478_vm1, %v3316_v9, %v3318_v25  ;;  %v13212_v9 = vld [vmem:[#allocation2 + $0x60] sm:$0xff]   ;;  %v13211_v25 = vld [vmem:[#allocation2 + $0x50] sm:$0xff]  }
 0x2d8   : > { %4835 = vmatprep.mubr.bf16.mxu0 %v2426_v32  ;;  %12123 = vmatprep.mubr.bf16.mxu1 %v3319_v30  ;;  %v2903_v32 = vor.u32 %v2901_v27, %v2899_v20  ;;  %v13260_v20 = vld [vmem:[#allocation10 + $0x10] sm:$0xff]   ;;  %v2941_v27 = vshrl.u32 %v13212_v9, 16 }
 0x2d9   : > { %12124 = vmatmul.mubr.bf16.gmra.mrb[36].mxu1 %v3321_v31 }
 0x2da   : > { %v2908_v36 = vsel %vm1061_vm0, %v2903_v32, %v2907_v33  ;;  %9706 = vmatpush1.bf16.msra.mxu1 %v13260_v20  ;;  %v13218_v32 = vld [vmem:[#allocation2 + $0x70] sm:$0xff]   ;;  %v13264_v33 = vld [vmem:[#allocation10 + $0x20] sm:$0xff]   ;;  %v13269_v20 = vld [vmem:[#allocation10 + $0x48] sm:$0xff]  }
 0x2db   : > { %9707 = vmatprep.subr.bf16.mxu1 %v13729_v0  ;;  %v2953_v37 = vshll.u32 %v13218_v32, 16  ;;  %v2957_v45 = vshrl.u32 %v13218_v32, 16 }
 0x2dd   : > { %v2955_v40 = vrot.slane %v2953_v37, 1  ;;  %v13272_v37 = vld [vmem:[#allocation10 + $0x60] sm:$0xff]  }
 0x2df   : > { %4836 = vmatmul.mubr.bf16.gmra.mrb[88].mxu0 %v2151_v41  ;;  %v13206_v41 = vld [vmem:[#allocation2 + $0x50] sm:$0xff]   ;;  %v2959_v48 = vor.u32 %v2957_v45, %v2955_v40 }
 0x2e0   : > { %4843 = vmatprep.mubr.bf16.mxu0 %v2428_v43  ;;  %v13250_v43 = vld [vmem:[#allocation2 + $0xc0] sm:$0xff]   ;;  %v2921_v52 = vshll.u32 %v13206_v41, 16 }
 0x2e1   : > { %v3322_v47 = vrot.slane %v13250_v43, 1  ;;  %v13217_v43 = vld [vmem:[#allocation2 + $0x60] sm:$0xff]  }
 0x2e2   : > { %v2923_v63 = vrot.slane %v2921_v52, 1 }
 0x2e3   : > { %v3323_v54 = vsel %vm1478_vm1, %v3320_v29, %v3322_v47  ;;  %v3325_v56 = vsel %vm1478_vm1, %v3322_v47, %v3324_v53  ;;  %v13263_v29 = vld [vmem:[#allocation10 + $0x18] sm:$0xff]  }
 0x2e4   : > { %12127 = vmatprep.mubr.bf16.mxu1 %v3323_v54  ;;  %v2924_v5 = vsel %vm1061_vm0, %v2919_v62, %v2923_v63  ;;  %9708 = vmatpush1.bf16.msra.mxu1 %v13263_v29  ;;  %v13267_v47 = vld [vmem:[#allocation10 + $0x38] sm:$0xff]  }
 0x2e5   : > { %12128 = vmatmul.mubr.bf16.gmra.mrb[40].mxu1 %v3325_v56  ;;  %9709 = vmatprep.subr.bf16.mxu1 %v13729_v0 }
 0x2e6   : > { %12131 = vmatprep.mubr.bf16.mxu1 %v3327_v18 }
 0x2e7   : > { %4844 = vmatmul.mubr.bf16.gmra.mrb[92].mxu0 %v2159_v58  ;;  %v327_v58 = vld [vmem:[%s13939_s16 + $0x1b0] sm:$0xff] }
 0x2e8   : > { %4884 = vmatprep.mubr.bf16.mxu0 %v2876_v59  ;;  %v13210_v59 = vld [vmem:[#allocation2 + $0x58] sm:$0xff]   ;;  %v384_v61 = vmax.f32 %v327_v58, 0.0  ;;  %9710 = vmatpush1.bf16.msra.mxu1 %v13264_v33  ;;  %v13228_v58 = vld [vmem:[#allocation2 + $0x88] sm:$0xff]  }
 0x2e9   : > { %v2929_v4 = vshll.u32 %v13210_v59, 16  ;;  %9711 = vmatprep.subr.bf16.mxu1 %v13729_v0 }
 0x2eb   : > { %v2931_v8 = vrot.slane %v2929_v4, 1 }
 0x2ec   : > { %9712 = vmatpush1.bf16.msra.mxu1 %v13265_v38  ;;  %v6049_v38 = vld [vmem:[#allocation4 + $0x8] sm:$0xf] }
 0x2ed   : > { %9713 = vmatprep.subr.bf16.mxu1 %v13729_v0 }
 0x2ef   : > { %4885 = vmatmul.mubr.bf16.vlgmr.msra.gmra.mrb[0].mxu0 %v13191_v3  ;;  %v11978_v3 = vpack.c.bf16 %v385_v1, %v384_v61  ;;  %v13223_v61 = vld [vmem:[#allocation2 + $0x70] sm:$0xff]  }
 0x2f0   : > { %4892 = vmatprep.mubr.bf16.mxu0 %v2884_v6  ;;  %v2925_v6 = vshrl.u32 %v13206_v41, 16  ;;  %v13222_v41 = vld [vmem:[#allocation2 + $0x78] sm:$0xff]  }
 0x2f1   : > { %12006 = vst [vmem:[#allocation2 + $0xd8] sm:$0xff] %v11978_v3   ;;  %v2961_v46 = vshll.u32 %v13222_v41, 16  ;;  %v2965_v53 = vshrl.u32 %v13222_v41, 16 }
 0x2f2   : > { %v2927_v10 = vor.u32 %v2925_v6, %v2923_v63  ;;  %v13225_v6 = vld [vmem:[#allocation2 + $0x78] sm:$0xff]  }
 0x2f3   : > { %v2963_v49 = vrot.slane %v2961_v46, 1  ;;  %v13274_v46 = vld [vmem:[#allocation10 + $0x200] sm:$0xff]  }
 0x2f4   : > { %v2932_v14 = vsel %vm1061_vm0, %v2927_v10, %v2931_v8  ;;  %12135 = vmatprep.subr.bf16.mxu0 %v13274_v46 }
 0x2f5   : > { %v2964_v52 = vsel %vm1061_vm0, %v2959_v48, %v2963_v49  ;;  %v2967_v56 = vor.u32 %v2965_v53, %v2963_v49  ;;  %12136 = vmatpush3.bf16.msra.mxu0 %v13274_v46  ;;  %v13237_v53 = vld [vmem:[#allocation2 + $0x98] sm:$0xff]  }
 0x2f7   : > { %4893 = vmatmul.mubr.bf16.gmra.mrb[4].mxu0 %v13193_v15  ;;  %v2933_v15 = vshrl.u32 %v13210_v59, 16 }
 0x2f8   : > { %4900 = vmatprep.mubr.bf16.mxu0 %v2892_v16  ;;  %v2937_v16 = vshll.u32 %v13212_v9, 16  ;;  %v13259_v17 = vld [vmem:[#allocation2 + $0xd8] ss:$0 sps:$4 sm:$0x11]  }
 0x2f9   : > { %v3328_v19 = vrot.slane %v13259_v17, 1  ;;  %v2935_v21 = vor.u32 %v2933_v15, %v2931_v8  ;;  %v2981_v8 = vshrl.u32 %v13228_v58, 16 }
 0x2fa   : > { %v2939_v22 = vrot.slane %v2937_v16, 1 }
 0x2fb   : > { %v3329_v24 = vsel %vm1478_vm1, %v3326_v13, %v3328_v19  ;;  %v13268_v13 = vld [vmem:[#allocation10 + $0x40] sm:$0xff]  }
 0x2fc   : > { %12132 = vmatmul.mubr.bf16.gmra.mrb[44].mxu1 %v3329_v24  ;;  %v2943_v30 = vor.u32 %v2941_v27, %v2939_v22  ;;  %v13270_v27 = vld [vmem:[#allocation10 + $0x50] sm:$0xff]  }
 0x2ff   : > { %4901 = vmatmul.mubr.bf16.gmra.mrb[8].mxu0 %v13195_v23  ;;  %v13216_v23 = vld [vmem:[#allocation2 + $0x68] sm:$0xff]  }
 0x300   : > { %4908 = vmatprep.mubr.bf16.mxu0 %v2900_v26  ;;  %v2940_v26 = vsel %vm1061_vm0, %v2935_v21, %v2939_v22  ;;  %v2945_v28 = vshll.u32 %v13216_v23, 16 }
 0x302   : > { %v2947_v31 = vrot.slane %v2945_v28, 1 }
 0x307   : > { %4909 = vmatmul.mubr.bf16.gmra.mrb[12].mxu0 %v13199_v35  ;;  %v2948_v35 = vsel %vm1061_vm0, %v2943_v30, %v2947_v31 }
 0x308   : > { %4916 = vmatprep.mubr.bf16.mxu0 %v2908_v36  ;;  %v2949_v36 = vshrl.u32 %v13216_v23, 16 }
 0x30a   : > { %v2951_v39 = vor.u32 %v2949_v36, %v2947_v31  ;;  %v13271_v31 = vld [vmem:[#allocation10 + $0x58] sm:$0xff]  }
 0x30c   : > { %v2956_v44 = vsel %vm1061_vm0, %v2951_v39, %v2955_v40  ;;  %v6050_v40 = vsel %vm14252_vm4, 0, %v6049_v38  ;;  %v13249_v38 = vld [vmem:[#allocation2 + $0xb8] sm:$0xff]  }
 0x30d   : > { %6051 = vst [vmem:[#allocation4 + $0x8] sm:$0xf] %v6050_v40  ;;  %v13294_v40 = vld [vmem:[#allocation10 + $0x238] sm:$0xff]  }
 0x30f   : > { %4917 = vmatmul.mubr.bf16.gmra.mrb[16].mxu0 %v13201_v42  ;;  %v13266_v42 = vld [vmem:[#allocation10 + $0x30] sm:$0xff]  }
 0x310   : > { %4924 = vmatprep.mubr.bf16.mxu0 %v2916_v50  ;;  %9714 = vmatpush1.bf16.msra.mxu1 %v13266_v42  ;;  %v13224_v50 = vld [vmem:[#allocation2 + $0x80] sm:$0xff]  }
 0x311   : > { %9715 = vmatprep.subr.bf16.mxu1 %v13729_v0  ;;  %v2969_v54 = vshll.u32 %v13224_v50, 16  ;;  %v2973_v1 = vshrl.u32 %v13224_v50, 16 }
 0x313   : > { %v2971_v57 = vrot.slane %v2969_v54, 1  ;;  %v13275_v54 = vld [vmem:[#allocation10 + $0x70] sm:$0xff]  }
 0x314   : > { %9716 = vmatpush1.bf16.msra.mxu1 %v13267_v47  ;;  %v13273_v47 = vld [vmem:[#allocation10 + $0x68] sm:$0xff]  }
 0x315   : > { %9717 = vmatprep.subr.bf16.mxu1 %v13729_v0  ;;  %v2972_v63 = vsel %vm1061_vm0, %v2967_v56, %v2971_v57  ;;  %v2975_v3 = vor.u32 %v2973_v1, %v2971_v57 }
 0x317   : > { %4925 = vmatmul.mubr.bf16.gmra.mrb[20].mxu0 %v13205_v2  ;;  %v2977_v2 = vshll.u32 %v13228_v58, 16 }
 0x318   : > { %4932 = vmatprep.mubr.bf16.mxu0 %v2924_v5  ;;  %v13230_v5 = vld [vmem:[#allocation2 + $0x90] sm:$0xff]   ;;  %9718 = vmatpush1.bf16.msra.mxu1 %v13268_v13 }
 0x319   : > { %v2979_v4 = vrot.slane %v2977_v2, 1  ;;  %v2985_v9 = vshll.u32 %v13230_v5, 16  ;;  %v2989_v17 = vshrl.u32 %v13230_v5, 16  ;;  %9719 = vmatprep.subr.bf16.mxu1 %v13729_v0  ;;  %v13241_v5 = vld [vmem:[#allocation2 + $0xa0] sm:$0xff]  }
 0x31b   : > { %v2980_v7 = vsel %vm1061_vm0, %v2975_v3, %v2979_v4  ;;  %v2983_v10 = vor.u32 %v2981_v8, %v2979_v4  ;;  %v2987_v11 = vrot.slane %v2985_v9, 1  ;;  %v13246_v3 = vld [vmem:[#allocation2 + $0xb8] sm:$0xff]   ;;  %v13282_v4 = vld [vmem:[#allocation10 + $0x218] sm:$0xff]  }
 0x31c   : > { %9720 = vmatpush1.bf16.msra.mxu1 %v13269_v20  ;;  %v3025_v9 = vshll.u32 %v13246_v3, 16  ;;  %v13287_v20 = vld [vmem:[#allocation10 + $0x228] sm:$0xff]  }
 0x31d   : > { %v2988_v16 = vsel %vm1061_vm0, %v2983_v10, %v2987_v11  ;;  %v2991_v23 = vor.u32 %v2989_v17, %v2987_v11  ;;  %9721 = vmatprep.subr.bf16.mxu1 %v13729_v0  ;;  %v13248_v17 = vld [vmem:[#allocation2 + $0xc0] sm:$0xff]  }
 0x31f   : > { %4933 = vmatmul.mubr.bf16.gmra.mrb[24].mxu0 %v13207_v12  ;;  %v14228_v55 = vpop.f32.mrb[0].mxu1  ;;  %v13234_v12 = vld [vmem:[#allocation2 + $0x98] sm:$0xff]  }
 0x320   : > { %4940 = vmatprep.mubr.bf16.mxu0 %v2932_v14  ;;  %v14230_v59 = vpop.f32.mrb[1].mxu1  ;;  %v13229_v14 = vld [vmem:[#allocation2 + $0x80] sm:$0xff]   ;;  %v2993_v18 = vshll.u32 %v13234_v12, 16  ;;  %v2997_v29 = vshrl.u32 %v13234_v12, 16  ;;  %9722 = vmatpush1.bf16.msra.mxu1 %v13270_v27  ;;  %v13285_v12 = vld [vmem:[#allocation10 + $0x220] sm:$0xff]  }
 0x321   : > { %v14232_v60 = vpop.f32.mrb[2].mxu1  ;;  %9723 = vmatprep.subr.bf16.mxu1 %v13729_v0 }
 0x322   : > { %v14234_v62 = vpop.f32.mrb[3].mxu1  ;;  %v2995_v24 = vrot.slane %v2993_v18, 1  ;;  %v13243_v18 = vld [vmem:[#allocation2 + $0xa8] sm:$0xff]  }
 0x324   : > { %v2996_v28 = vsel %vm1061_vm0, %v2991_v23, %v2995_v24  ;;  %v2999_v32 = vor.u32 %v2997_v29, %v2995_v24  ;;  %9724 = vmatpush1.bf16.msra.mxu1 %v13271_v31  ;;  %v3029_v24 = vshrl.u32 %v13246_v3, 16  ;;  %v13247_v29 = vld [vmem:[#allocation2 + $0xb0] sm:$0xff]  }
 0x325   : > { %9725 = vmatprep.subr.bf16.mxu1 %v13729_v0 }
 0x327   : > { %4941 = vmatmul.mubr.bf16.gmra.mrb[28].mxu0 %v13211_v25  ;;  %v13236_v25 = vld [vmem:[#allocation2 + $0xa0] sm:$0xff]  }
 0x328   : > { %4948 = vmatprep.mubr.bf16.mxu0 %v2940_v26  ;;  %v13231_v26 = vld [vmem:[#allocation2 + $0x88] sm:$0xff]   ;;  %v3001_v30 = vshll.u32 %v13236_v25, 16  ;;  %v3005_v42 = vshrl.u32 %v13236_v25, 16  ;;  %9726 = vmatpush1.bf16.msra.mxu1 %v13272_v37  ;;  %v3033_v25 = vshll.u32 %v13248_v17, 16  ;;  %v13256_v37 = vld [vmem:[#allocation2 + $0xd0] sm:$0xff]  }
 0x329   : > { %9727 = vmatprep.subr.bf16.mxu1 %v13729_v0 }
 0x32a   : > { %v3003_v33 = vrot.slane %v3001_v30, 1  ;;  %v3035_v27 = vrot.slane %v3033_v25, 1  ;;  %v13289_v30 = vld [vmem:[#allocation10 + $0x230] sm:$0xff]  }
 0x32c   : > { %v3004_v41 = vsel %vm1061_vm0, %v2999_v32, %v3003_v33  ;;  %v3007_v49 = vor.u32 %v3005_v42, %v3003_v33  ;;  %9728 = vmatpush1.bf16.msra.mxu1 %v13273_v47  ;;  %v3037_v32 = vshrl.u32 %v13248_v17, 16 }
 0x32d   : > { %9729 = vmatprep.subr.bf16.mxu1 %v13729_v0 }
 0x32f   : > { %4949 = vmatmul.mubr.bf16.gmra.mrb[32].mxu0 %v13213_v34  ;;  %v13240_v34 = vld [vmem:[#allocation2 + $0xa8] sm:$0xff]  }
 0x330   : > { %4956 = vmatprep.mubr.bf16.mxu0 %v2948_v35  ;;  %v13235_v35 = vld [vmem:[#allocation2 + $0x90] sm:$0xff]   ;;  %v3013_v57 = vshrl.u32 %v13240_v34, 16  ;;  %9730 = vmatpush1.bf16.msra.mxu1 %v13275_v54  ;;  %v13254_v54 = vld [vmem:[#allocation2 + $0xc0] sm:$0xff]  }
 0x331   : > { %v14238_v15 = vpop.f32.mrb[4].mxu1  ;;  %9731 = vmatprep.subr.bf16.mxu1 %v13729_v0 }
 0x332   : > { %v14242_v19 = vpop.f32.mrb[5].mxu1 }
 0x333   : > { %v14244_v21 = vpop.f32.mrb[6].mxu1 }
 0x334   : > { %v14246_v22 = vpop.f32.mrb[7].mxu1 }
 0x337   : > { %4957 = vmatmul.mubr.bf16.gmra.mrb[36].mxu0 %v13217_v43  ;;  %v3009_v43 = vshll.u32 %v13240_v34, 16  ;;  %v3039_v34 = vor.u32 %v3037_v32, %v3035_v27 }
 0x338   : > { %4964 = vmatprep.mubr.bf16.mxu0 %v2956_v44 }
 0x339   : > { %v3011_v50 = vrot.slane %v3009_v43, 1  ;;  %v3049_v43 = vshll.u32 %v13256_v37, 16 }
 0x33b   : > { %v3012_v56 = vsel %vm1061_vm0, %v3007_v49, %v3011_v50  ;;  %v3015_v1 = vor.u32 %v3013_v57, %v3011_v50  ;;  %v3053_v57 = vshrl.u32 %v13256_v37, 16 }
 0x33f   : > { %4965 = vmatmul.mubr.bf16.gmra.mrb[40].mxu0 %v13219_v51  ;;  %v14256_v39 = vpop.f32.mrb[8].mxu1  ;;  %v13242_v51 = vld [vmem:[#allocation2 + $0xb0] sm:$0xff]  }
 0x340   : > { %4972 = vmatprep.mubr.bf16.mxu0 %v2964_v52  ;;  %v14261_v44 = vpop.f32.mrb[9].mxu1  ;;  %v13276_v52 = vld [vmem:[#allocation10 + $0x208] sm:$0xff]   ;;  %v3017_v58 = vshll.u32 %v13242_v51, 16  ;;  %v3021_v8 = vshrl.u32 %v13242_v51, 16  ;;  %v3051_v51 = vrot.slane %v3049_v43, 1 }
 0x341   : > { %v14264_v45 = vpop.f32.mrb[10].mxu1  ;;  %12137 = vmatprep.subr.bf16.mxu0 %v13276_v52 }
 0x342   : > { %v14266_v48 = vpop.f32.mrb[11].mxu1  ;;  %12138 = vmatpush3.bf16.msra.mxu0 %v13276_v52  ;;  %v3019_v2 = vrot.slane %v3017_v58, 1  ;;  %v13261_v52 = vld [vmem:[#allocation2 + $0xd8] ss:$0 sps:$4 sm:$0x11]  }
 0x343   : > { %v3057_v58 = vshll.u32 %v13261_v52, 16 }
 0x347   : > { %4973 = vmatmul.mubr.bf16.gmra.mrb[44].mxu0 %v13223_v61  ;;  %v13278_v61 = vld [vmem:[#allocation10 + $0x210] sm:$0xff]  }
 0x348   : > { %4980 = vmatprep.mubr.bf16.mxu0 %v2972_v63  ;;  %v13277_v63 = vld [vmem:[#allocation10 + $0x78] sm:$0xff]   ;;  %12139 = vmatprep.subr.bf16.mxu0 %v13278_v61 }
 0x349   : > { %9732 = vmatpush1.bf16.msra.mxu1 %v13277_v63  ;;  %12140 = vmatpush3.bf16.msra.mxu0 %v13278_v61  ;;  %v3055_v61 = vor.u32 %v3053_v57, %v3051_v51  ;;  %v3059_v63 = vrot.slane %v3057_v58, 1 }
 0x34a   : > { %9926 = vmatprep.subr.bf16.mxu1 %v13729_v0  ;;  %12141 = vmatprep.subr.bf16.mxu0 %v13282_v4 }
 0x34d   : > { %12142 = vmatpush3.bf16.msra.mxu0 %v13282_v4 }
 0x34e   : > { %12143 = vmatprep.subr.bf16.mxu0 %v13285_v12 }
 0x34f   : > { %4981 = vmatmul.mubr.bf16.gmra.mrb[48].mxu0 %v13225_v6  ;;  %v14272_v6 = vpop.f32.mrb[12].mxu1 }
 0x350   : > { %4988 = vmatprep.mubr.bf16.mxu0 %v2980_v7  ;;  %v3020_v7 = vsel %vm1061_vm0, %v3015_v1, %v3019_v2  ;;  %v14275_v10 = vpop.f32.mrb[13].mxu1  ;;  %v13257_v1 = vld [vmem:[#allocation2 + $0xc8] sm:$0xff]  }
 0x351   : > { %v14277_v11 = vpop.f32.mrb[14].mxu1  ;;  %12144 = vmatpush3.bf16.msra.mxu0 %v13285_v12 }
 0x352   : > { %v14279_v13 = vpop.f32.mrb[15].mxu1  ;;  %12145 = vmatprep.subr.bf16.mxu0 %v13287_v20 }
 0x355   : > { %12146 = vmatpush3.bf16.msra.mxu0 %v13287_v20  ;;  %v14317_v20 = vld [vmem:[%s15310_s2] ss:$0 sm:$0xff] }
 0x356   : > { %12147 = vmatprep.subr.bf16.mxu0 %v13289_v30 }
 0x357   : > { %4989 = vmatmul.mubr.bf16.gmra.mrb[52].mxu0 %v13229_v14  ;;  %v3023_v14 = vor.u32 %v3021_v8, %v3019_v2  ;;  %v3060_v2 = vsel %vm1061_vm0, %v3055_v61, %v3059_v63  ;;  %v13262_v8 = vld [vmem:[#allocation2 + $0xd0] sm:$0xff]  }
 0x358   : > { %4996 = vmatprep.mubr.bf16.mxu0 %v2988_v16  ;;  %v3027_v16 = vrot.slane %v3025_v9, 1 }
 0x359   : > { %12148 = vmatpush3.bf16.msra.mxu0 %v13289_v30 }
 0x35a   : > { %v3028_v23 = vsel %vm1061_vm0, %v3023_v14, %v3027_v16  ;;  %12149 = vmatprep.subr.bf16.mxu0 %v13294_v40 }
 0x35d   : > { %v14284_v46 = vpop.f32.mrb[16].mxu1  ;;  %12150 = vmatpush3.bf16.msra.mxu0 %v13294_v40 }
 0x35e   : > { %v14286_v47 = vpop.f32.mrb[17].mxu1 }
 0x35f   : > { %4997 = vmatmul.mubr.bf16.gmra.mrb[56].mxu0 %v13231_v26  ;;  %v3031_v26 = vor.u32 %v3029_v24, %v3027_v16  ;;  %v14288_v49 = vpop.f32.mrb[18].mxu1 }
 0x360   : > { %5004 = vmatprep.mubr.bf16.mxu0 %v2996_v28  ;;  %v13253_v28 = vld [vmem:[#allocation2 + $0xc8] sm:$0xff]  }
 0x361   : > { %v3036_v31 = vsel %vm1061_vm0, %v3031_v26, %v3035_v27  ;;  %v3041_v33 = vshll.u32 %v13253_v28, 16  ;;  %v3045_v42 = vshrl.u32 %v13253_v28, 16 }
 0x367   : > { %5005 = vmatmul.mubr.bf16.gmra.mrb[60].mxu0 %v13235_v35  ;;  %v3043_v35 = vrot.slane %v3041_v33, 1 }
 0x368   : > { %5012 = vmatprep.mubr.bf16.mxu0 %v3004_v41 }
 0x369   : > { %v3044_v41 = vsel %vm1061_vm0, %v3039_v34, %v3043_v35  ;;  %v3047_v50 = vor.u32 %v3045_v42, %v3043_v35 }
 0x36f   : > { %5013 = vmatmul.mubr.bf16.gmra.mrb[64].mxu0 %v13237_v53  ;;  %v14290_v53 = vpop.f32.mrb[19].mxu1 }
 0x370   : > { %5020 = vmatprep.mubr.bf16.mxu0 %v3012_v56  ;;  %v3052_v56 = vsel %vm1061_vm0, %v3047_v50, %v3051_v51  ;;  %v14294_v3 = vpop.f32.mrb[20].mxu1 }
 0x371   : > { %v14296_v4 = vpop.f32.mrb[21].mxu1 }
 0x377   : > { %5021 = vmatmul.mubr.bf16.gmra.mrb[68].mxu0 %v13241_v5  ;;  %v14298_v5 = vpop.f32.mrb[22].mxu1 }
 0x378   : > { %5028 = vmatprep.mubr.bf16.mxu0 %v3020_v7  ;;  %v14300_v7 = vpop.f32.mrb[23].mxu1 }
 0x37d   : > { %v14302_v9 = vpop.f32.mrb[24].mxu1 }
 0x37e   : > { %v14304_v12 = vpop.f32.mrb[25].mxu1 }
 0x37f   : > { %5029 = vmatmul.mubr.bf16.gmra.mrb[72].mxu0 %v13243_v18  ;;  %v14306_v14 = vpop.f32.mrb[26].mxu1 }
 0x380   : > { %5036 = vmatprep.mubr.bf16.mxu0 %v3028_v23  ;;  %v14308_v16 = vpop.f32.mrb[27].mxu1 }
 0x387   : > { %5037 = vmatmul.mubr.bf16.gmra.mrb[76].mxu0 %v13247_v29 }
 0x388   : > { %5044 = vmatprep.mubr.bf16.mxu0 %v3036_v31 }
 0x38f   : > { %5045 = vmatmul.mubr.bf16.gmra.mrb[80].mxu0 %v13249_v38  ;;  %v14310_v17 = vpop.f32.mrb[28].mxu1 }
 0x390   : > { %5052 = vmatprep.mubr.bf16.mxu0 %v3044_v41  ;;  %v14312_v18 = vpop.f32.mrb[29].mxu1 }
 0x391   : > { %v14319_v23 = vpop.f32.mrb[30].mxu1 }
 0x392   : > { %v14321_v24 = vpop.f32.mrb[31].mxu1 }
 0x397   : > { %5053 = vmatmul.mubr.bf16.gmra.mrb[84].mxu0 %v13254_v54 }
 0x398   : > { %5060 = vmatprep.mubr.bf16.mxu0 %v3052_v56 }
 0x39e   : > { %v14329_v56 = vpop.f32.mrb[32].mxu1 }
 0x39f   : > { %5061 = vmatmul.mubr.bf16.gmra.mrb[88].mxu0 %v13257_v1  ;;  %v14332_v58 = vpop.f32.mrb[33].mxu1 }
 0x3a0   : > { %5068 = vmatprep.mubr.bf16.mxu0 %v3060_v2 }
 0x3a7   : > { %5069 = vmatmul.mubr.bf16.gmra.mrb[92].mxu0 %v13262_v8 }
 0x3c2   : > { %v4886_v25 = vpop.f32.mrb[0].mxu0 }
 0x3c3   : > { %v12215_v26 = vadd.f32 %v14317_v20, %v4886_v25  ;;  %v4888_v27 = vpop.f32.mrb[1].mxu0  ;;  %v14341_v25 = vpop.f32.mrb[34].mxu1 }
 0x3c4   : > { %v4889_v28 = vpop.f32.mrb[2].mxu0 }
 0x3c5   : > { %v5112_v29 = vadd.f32 %v12215_v26, %v14230_v59  ;;  %v12216_v30 = vadd.f32 %v14317_v20, %v4889_v28  ;;  %v4891_v31 = vpop.f32.mrb[3].mxu0 }
 0x3c7   : > { %v5302_v32 = vmax.f32 %v5112_v29, 0.0  ;;  %v5115_v33 = vadd.f32 %v12216_v30, %v14234_v62  ;;  %v5980_v62 = vld [vmem:[#allocation4 + $0xc] sm:$0xf]  ;;  %v14345_v30 = vpop.f32.mrb[35].mxu1 }
 0x3c9   : > { %v11792_v34 = vpack.c.bf16 %v5302_v32, %v5302_v32  ;;  %v5303_v35 = vmax.f32 %v5115_v33, 0.0 }
 0x3ca   : > { %v4894_v37 = vpop.f32.mrb[4].mxu0 }
 0x3cb   : > { %v5498_v38 = vshrl.u32 %v11792_v34, 16  ;;  %v11793_v40 = vpack.c.bf16 %v5303_v35, %v5303_v35  ;;  %v12217_v41 = vadd.f32 %v14317_v20, %v4894_v37  ;;  %v4896_v42 = vpop.f32.mrb[5].mxu0  ;;  %v5501_v51 = vshll.u32 %v11792_v34, 16 }
 0x3cc   : > { %v4897_v43 = vpop.f32.mrb[6].mxu0 }
 0x3cd   : > { %v5500_v50 = vrot.slane %v5498_v38, 7  ;;  %v5506_v59 = vshrl.u32 %v11793_v40, 16  ;;  %v5120_v52 = vadd.f32 %v12217_v41, %v14228_v55  ;;  %v4899_v54 = vpop.f32.mrb[7].mxu0  ;;  %v12218_v57 = vadd.f32 %v14317_v20, %v4897_v43 }
 0x3ce   : > { %v5509_v1 = vshll.u32 %v11793_v40, 16 }
 0x3cf   : > { %v5503_v61 = vor.u32 %v5501_v51, %v5500_v50  ;;  %v5508_v63 = vrot.slane %v5506_v59, 7  ;;  %v5304_v2 = vmax.f32 %v5120_v52, 0.0  ;;  %v5123_v55 = vadd.f32 %v12218_v57, %v14232_v60  ;;  %v13374_v59 = vld [vmem:[#allocation10 + $0x100] sm:$0xff]  }
 0x3d0   : > { %v5504_v26 = vrot.slane %v5500_v50, 4 }
 0x3d1   : > { %v5981_v27 = vsel %vm14252_vm4, %v5503_v61, %v5980_v62  ;;  %v5511_v28 = vor.u32 %v5509_v1, %v5508_v63  ;;  %v11794_v29 = vpack.c.bf16 %v5304_v2, %v5304_v2  ;;  %v5305_v31 = vmax.f32 %v5123_v55, 0.0 }
 0x3d2   : > { %5982 = vst [vmem:[#allocation4 + $0xc] sm:$0xf] %v5981_v27  ;;  %v4902_v32 = vpop.f32.mrb[8].mxu0  ;;  %v5513_v52 = vrot.slane %v5508_v63, 4 }
 0x3d3   : > { %v5512_v33 = vsel %vm14336_vm7, %v5504_v26, %v5511_v28  ;;  %v5515_v34 = vshrl.u32 %v11794_v29, 16  ;;  %v12219_v35 = vadd.f32 %v14317_v20, %v4902_v32  ;;  %v4904_v60 = vpop.f32.mrb[9].mxu0  ;;  %v11795_v37 = vpack.c.bf16 %v5305_v31, %v5305_v31 }
 0x3d4   : > { %5983 = vst [vmem:[#allocation4 + $0x10] sm:$0xf] %v5512_v33  ;;  %v4905_v38 = vpop.f32.mrb[10].mxu0  ;;  %v5518_v41 = vshll.u32 %v11794_v29, 16 }
 0x3d5   : > { %v5517_v40 = vrot.slane %v5515_v34, 7  ;;  %v12220_v42 = vadd.f32 %v14317_v20, %v4905_v38  ;;  %v5128_v43 = vadd.f32 %v12219_v35, %v14242_v19  ;;  %v4907_v50 = vpop.f32.mrb[11].mxu0  ;;  %v5524_v51 = vshrl.u32 %v11795_v37, 16 }
 0x3d6   : > { %v5527_v1 = vshll.u32 %v11795_v37, 16  ;;  %v14367_v50 = vpop.f32.mrb[36].mxu1 }
 0x3d7   : > { %v5520_v54 = vor.u32 %v5518_v41, %v5517_v40  ;;  %v5306_v62 = vmax.f32 %v5128_v43, 0.0  ;;  %v5131_v57 = vadd.f32 %v12220_v42, %v14246_v22  ;;  %v5526_v61 = vrot.slane %v5524_v51, 7 }
 0x3d8   : > { %v5522_v28 = vrot.slane %v5517_v40, 4 }
 0x3d9   : > { %v6038_v2 = vld [vmem:[#allocation4 + $0xc] sm:$0x1]  ;;  %v5521_v55 = vsel %vm14336_vm7, %v5513_v52, %v5520_v54  ;;  %v11796_v26 = vpack.c.bf16 %v5306_v62, %v5306_v62  ;;  %v5307_v19 = vmax.f32 %v5131_v57, 0.0  ;;  %v5529_v29 = vor.u32 %v5527_v1, %v5526_v61  ;;  %v13279_v57 = vld [vmem:[#allocation4] sm:$0xff]   ;;  %v14369_v1 = vpop.f32.mrb[37].mxu1 }
 0x3da   : > { %v6039_v27 = vsel %vm14353_vm9, 0, %v6038_v2  ;;  %5984 = vst [vmem:[#allocation4 + $0x14] sm:$0xf] %v5521_v55  ;;  %v4910_v31 = vpop.f32.mrb[12].mxu0  ;;  %v5531_v42 = vrot.slane %v5526_v61, 4  ;;  %v14372_v55 = vpop.f32.mrb[38].mxu1 }
 0x3db   : > { %6040 = vst [vmem:[#allocation4 + $0xc] sm:$0x1] %v6039_v27  ;;  %v5533_v63 = vshrl.u32 %v11796_v26, 16  ;;  %v11797_v32 = vpack.c.bf16 %v5307_v19, %v5307_v19  ;;  %v12221_v22 = vadd.f32 %v14317_v20, %v4910_v31  ;;  %v4912_v33 = vpop.f32.mrb[13].mxu0  ;;  %v5530_v34 = vsel %vm14336_vm7, %v5522_v28, %v5529_v29  ;;  %v14376_v28 = vpop.f32.mrb[39].mxu1 }
 0x3dc   : > { %v4913_v35 = vpop.f32.mrb[14].mxu0  ;;  %5985 = vst [vmem:[#allocation4 + $0x18] sm:$0xf] %v5530_v34  ;;  %v5536_v37 = vshll.u32 %v11796_v26, 16 }
 0x3dd   : > { %v5535_v60 = vrot.slane %v5533_v63, 7  ;;  %v5542_v38 = vshrl.u32 %v11797_v32, 16  ;;  %v5136_v41 = vadd.f32 %v12221_v22, %v14238_v15  ;;  %v4915_v40 = vpop.f32.mrb[15].mxu0  ;;  %v12222_v43 = vadd.f32 %v14317_v20, %v4913_v35 }
 0x3de   : > { %v5545_v54 = vshll.u32 %v11797_v32, 16  ;;  %v6542_v35 = vshll.u32 %v13279_v57, 16 }
 0x3df   : > { %v5538_v51 = vor.u32 %v5536_v37, %v5535_v60  ;;  %v5544_v52 = vrot.slane %v5542_v38, 7  ;;  %v5308_v62 = vmax.f32 %v5136_v41, 0.0  ;;  %v5139_v2 = vadd.f32 %v12222_v43, %v14244_v21 }
 0x3e0   : > { %v5540_v61 = vrot.slane %v5535_v60, 4 }
 0x3e1   : > { %v6055_v26 = vld [vmem:[#allocation4 + $0x14] sm:$0xf]  ;;  %v5539_v15 = vsel %vm14336_vm7, %v5531_v42, %v5538_v51  ;;  %v5547_v19 = vor.u32 %v5545_v54, %v5544_v52  ;;  %v11798_v27 = vpack.c.bf16 %v5308_v62, %v5308_v62  ;;  %v5309_v63 = vmax.f32 %v5139_v2, 0.0 }
 0x3e2   : > { %v6052_v29 = vld [vmem:[#allocation4 + $0xc] sm:$0x1]  ;;  %v6056_v31 = vsel %vm14252_vm4, 0, %v6055_v26  ;;  %5986 = vst [vmem:[#allocation4 + $0x1c] sm:$0xf] %v5539_v15  ;;  %v4918_v32 = vpop.f32.mrb[16].mxu0 }
 0x3e3   : > { %v6053_v21 = vsel %vm14353_vm9, 0, %v6052_v29  ;;  %6057 = vst [vmem:[#allocation4 + $0x14] sm:$0xf] %v6056_v31  ;;  %v5548_v22 = vsel %vm14336_vm7, %v5540_v61, %v5547_v19  ;;  %v5551_v33 = vshrl.u32 %v11798_v27, 16  ;;  %v4920_v34 = vpop.f32.mrb[17].mxu0  ;;  %v11799_v37 = vpack.c.bf16 %v5309_v63, %v5309_v63 }
 0x3e4   : > { %6054 = vst [vmem:[#allocation4 + $0xc] sm:$0x1] %v6053_v21  ;;  %v6058_v60 = vld [vmem:[#allocation4 + $0x18] sm:$0x1]  ;;  %5987 = vst [vmem:[#allocation4 + $0x20] sm:$0xf] %v5548_v22  ;;  %v12223_v38 = vadd.f32 %v14317_v20, %v4918_v32 }
 0x3e5   : > { %v4921_v41 = vpop.f32.mrb[18].mxu0  ;;  %v5553_v40 = vrot.slane %v5551_v33, 7  ;;  %v5554_v42 = vshll.u32 %v11798_v27, 16  ;;  %v6059_v54 = vsel %vm14353_vm9, 0, %v6058_v60  ;;  %v5560_v62 = vshrl.u32 %v11799_v37, 16 }
 0x3e6   : > { %v12224_v43 = vadd.f32 %v14317_v20, %v4921_v41  ;;  %v4923_v51 = vpop.f32.mrb[19].mxu0  ;;  %v5144_v2 = vadd.f32 %v12223_v38, %v14261_v44  ;;  %v6540_v26 = vshrl.u32 %v13279_v57, 16  ;;  %6060 = vst [vmem:[#allocation4 + $0x18] sm:$0x1] %v6059_v54  ;;  %v5549_v15 = vrot.slane %v5544_v52, 4 }
 0x3e7   : > { %v5556_v61 = vor.u32 %v5554_v42, %v5553_v40  ;;  %v6544_v29 = vrot.slane %v6542_v35, 1  ;;  %v5562_v31 = vrot.slane %v5560_v62, 7  ;;  %v5563_v63 = vshll.u32 %v11799_v37, 16 }
 0x3e8   : > { %v5147_v19 = vadd.f32 %v12224_v43, %v14266_v48  ;;  %v5310_v32 = vmax.f32 %v5144_v2, 0.0  ;;  %v5558_v22 = vrot.slane %v5553_v40, 4 }
 0x3e9   : > { %v5557_v27 = vsel %vm14336_vm7, %v5549_v15, %v5556_v61  ;;  %v5565_v33 = vor.u32 %v5563_v63, %v5562_v31  ;;  %v6545_v41 = vor.u32 %v6544_v29, %v6540_v26  ;;  %v5567_v40 = vrot.slane %v5562_v31, 4 }
 0x3ea   : > { %v5311_v21 = vmax.f32 %v5147_v19, 0.0  ;;  %5988 = vst [vmem:[#allocation4 + $0x24] sm:$0xf] %v5557_v27  ;;  %v11800_v34 = vpack.c.bf16 %v5310_v32, %v5310_v32  ;;  %v4926_v60 = vpop.f32.mrb[20].mxu0  ;;  %v14392_v44 = vld [vmem:[#allocation4 + $0x10] sm:$0xff]  }
 0x3eb   : > { %v6061_v57 = vld [vmem:[#allocation4 + $0x20] sm:$0xf]  ;;  %v12225_v38 = vadd.f32 %v14317_v20, %v4926_v60  ;;  %v4928_v48 = vpop.f32.mrb[21].mxu0  ;;  %v13280_v35 = vld [vmem:[#allocation4 + $0x8] sm:$0xff]   ;;  %v5566_v42 = vsel %vm14336_vm7, %v5558_v22, %v5565_v33  ;;  %v6555_v63 = vshll.u32 %v14392_v44, 16  ;;  %v13284_v33 = vld [vmem:[#allocation10 + $0x80] sm:$0xff]  }
 0x3ec   : > { %v11801_v52 = vpack.c.bf16 %v5311_v21, %v5311_v21  ;;  %v6062_v37 = vsel %vm14252_vm4, 0, %v6061_v57  ;;  %v5569_v43 = vshrl.u32 %v11800_v34, 16  ;;  %v4929_v51 = vpop.f32.mrb[22].mxu0  ;;  %5989 = vst [vmem:[#allocation4 + $0x28] sm:$0xf] %v5566_v42  ;;  %v5572_v54 = vshll.u32 %v11800_v34, 16 }
 0x3ed   : > { %6063 = vst [vmem:[#allocation4 + $0x20] sm:$0xf] %v6062_v37  ;;  %v5152_v2 = vadd.f32 %v12225_v38, %v14256_v39  ;;  %v12226_v15 = vadd.f32 %v14317_v20, %v4929_v51  ;;  %v4931_v61 = vpop.f32.mrb[23].mxu0  ;;  %v6547_v29 = vshll.u32 %v13280_v35, 16  ;;  %v13281_v21 = vld [vmem:[#allocation4] sm:$0xff]   ;;  %v6551_v22 = vshrl.u32 %v13280_v35, 16 }
 0x3ee   : > { %v5578_v62 = vshrl.u32 %v11801_v52, 16  ;;  %v5571_v19 = vrot.slane %v5569_v43, 7  ;;  %v5581_v26 = vshll.u32 %v11801_v52, 16  ;;  %v14403_v48 = vld [vmem:[#allocation4 + $0x18] sm:$0xff]   ;;  %v14405_v39 = vpop.f32.mrb[40].mxu1  ;;  %v6557_v42 = vrot.slane %v6555_v63, 1 }
 0x3ef   : > { %v5312_v27 = vmax.f32 %v5152_v2, 0.0  ;;  %v5155_v31 = vadd.f32 %v12226_v15, %v14264_v45  ;;  %v6549_v57 = vrot.slane %v6547_v29, 1  ;;  %v14410_v2 = vpop.f32.mrb[41].mxu1 }
 0x3f0   : > { %v5580_v32 = vrot.slane %v5578_v62, 7  ;;  %v5574_v60 = vor.u32 %v5572_v54, %v5571_v19  ;;  %v5576_v34 = vrot.slane %v5571_v19, 4  ;;  %v14414_v29 = vpop.f32.mrb[42].mxu1 }
 0x3f1   : > { %v11802_v37 = vpack.c.bf16 %v5312_v27, %v5312_v27  ;;  %v5313_v52 = vmax.f32 %v5155_v31, 0.0  ;;  %v6064_v43 = vld [vmem:[#allocation4 + $0x24] sm:$0x1]  ;;  %v6550_v45 = vsel %vm1061_vm0, %v6545_v41, %v6549_v57  ;;  %v6553_v35 = vor.u32 %v6551_v22, %v6549_v57  ;;  %v14421_v22 = vpop.f32.mrb[43].mxu1 }
 0x3f2   : > { %v5583_v38 = vor.u32 %v5581_v26, %v5580_v32  ;;  %v5575_v51 = vsel %vm14336_vm7, %v5567_v40, %v5574_v60  ;;  %v4934_v62 = vpop.f32.mrb[24].mxu0  ;;  %9733 = vmatprep.mubr.bf16.mxu1 %v6550_v45  ;;  %v13292_v26 = vld [vmem:[#allocation10 + $0x88] sm:$0xff]   ;;  %v6563_v27 = vshll.u32 %v14403_v48, 16  ;;  %v6065_v31 = vsel %vm14353_vm9, 0, %v6064_v43 }
 0x3f3   : > { %5990 = vst [vmem:[#allocation4 + $0x2c] sm:$0xf] %v5575_v51  ;;  %v5587_v15 = vshrl.u32 %v11802_v37, 16  ;;  %v11803_v61 = vpack.c.bf16 %v5313_v52, %v5313_v52  ;;  %v4936_v19 = vpop.f32.mrb[25].mxu0  ;;  %v12227_v40 = vadd.f32 %v14317_v20, %v4934_v62  ;;  %9734 = vmatmul.mubr.bf16.vlgmr.msra.gmra.mrb[48].mxu1 %v13281_v21  ;;  %v6558_v41 = vsel %vm1061_vm0, %v6553_v35, %v6557_v42  ;;  %v13290_v45 = vld [vmem:[#allocation4 + $0x18] sm:$0xfe]  }
 0x3f4   : > { %v5584_v54 = vsel %vm14336_vm7, %v5576_v34, %v5583_v38  ;;  %v4937_v63 = vpop.f32.mrb[26].mxu0  ;;  %v5590_v34 = vshll.u32 %v11802_v37, 16  ;;  %9741 = vmatprep.mubr.bf16.mxu1 %v6558_v41  ;;  %9927 = vmatpush1.bf16.msra.mxu1 %v13284_v33  ;;  %6066 = vst [vmem:[#allocation4 + $0x24] sm:$0x1] %v6065_v31  ;;  %v5585_v51 = vrot.slane %v5580_v32, 4  ;;  %v6559_v62 = vshrl.u32 %v14392_v44, 16 }
 0x3f5   : > { %5991 = vst [vmem:[#allocation4 + $0x30] sm:$0xf] %v5584_v54  ;;  %v5589_v60 = vrot.slane %v5587_v15, 7  ;;  %v5596_v57 = vshrl.u32 %v11803_v61, 16  ;;  %v12228_v38 = vadd.f32 %v14317_v20, %v4937_v63  ;;  %v4939_v52 = vpop.f32.mrb[27].mxu0  ;;  %v5160_v21 = vadd.f32 %v12227_v40, %v14275_v10  ;;  %9928 = vmatprep.subr.bf16.mxu1 %v13729_v0  ;;  %v13300_v15 = vld [vmem:[#allocation10 + $0x90] sm:$0xff]  }
 0x3f6   : > { %v5599_v54 = vshll.u32 %v11803_v61, 16  ;;  %v6561_v63 = vor.u32 %v6559_v62, %v6557_v42  ;;  %v6565_v41 = vrot.slane %v6563_v27, 1  ;;  %v13304_v52 = vld [vmem:[#allocation10 + $0x98] sm:$0xff]  }
 0x3f7   : > { %v5592_v43 = vor.u32 %v5590_v34, %v5589_v60  ;;  %v14427_v35 = vrot.slane %v5596_v57, 7  ;;  %v5163_v37 = vadd.f32 %v12228_v38, %v14279_v13  ;;  %v5314_v19 = vmax.f32 %v5160_v21, 0.0  ;;  %v13286_v57 = vld [vmem:[#allocation4 + $0x8] sm:$0xff]  }
 0x3f8   : > { %v5594_v33 = vrot.slane %v5589_v60, 4  ;;  %9929 = vmatpush1.bf16.msra.mxu1 %v13292_v26  ;;  %v6566_v21 = vsel %vm1061_vm0, %v6561_v63, %v6565_v41 }
 0x3f9   : > { %v5593_v32 = vsel %vm14336_vm7, %v5585_v51, %v5592_v43  ;;  %v5601_v10 = vor.u32 %v5599_v54, %v14427_v35  ;;  %v5315_v44 = vmax.f32 %v5163_v37, 0.0  ;;  %v11804_v31 = vpack.c.bf16 %v5314_v19, %v5314_v19  ;;  %9930 = vmatprep.subr.bf16.mxu1 %v13729_v0 }
 0x3fa   : > { %v6067_v40 = vld [vmem:[#allocation4 + $0x2c] sm:$0xf]  ;;  %5992 = vst [vmem:[#allocation4 + $0x34] sm:$0xf] %v5593_v32  ;;  %v4942_v34 = vpop.f32.mrb[28].mxu0  ;;  %v8757_v43 = vrot.slane %v13290_v45, 1 }
 0x3fb   : > { %v6068_v13 = vsel %vm14252_vm4, 0, %v6067_v40  ;;  %v5602_v61 = vsel %vm14336_vm7, %v5594_v33, %v5601_v10  ;;  %v11805_v27 = vpack.c.bf16 %v5315_v44, %v5315_v44  ;;  %v12229_v60 = vadd.f32 %v14317_v20, %v4942_v34  ;;  %v4944_v38 = vpop.f32.mrb[29].mxu0  ;;  %9742 = vmatmul.mubr.bf16.gmra.mrb[52].mxu1 %v13286_v57  ;;  %v14440_v62 = vld [vmem:[#allocation4 + $0x20] sm:$0xff]  }
 0x3fc   : > { %v6070_v42 = vld [vmem:[#allocation4 + $0x30] sm:$0x1]  ;;  %6069 = vst [vmem:[#allocation4 + $0x2c] sm:$0xf] %v6068_v13  ;;  %5993 = vst [vmem:[#allocation4 + $0x38] sm:$0xf] %v5602_v61  ;;  %9749 = vmatprep.mubr.bf16.mxu1 %v6566_v21  ;;  %9931 = vmatpush1.bf16.msra.mxu1 %v13300_v15 }
 0x3fd   : > { %v5605_v26 = vshrl.u32 %v11804_v31, 16  ;;  %v4945_v51 = vpop.f32.mrb[30].mxu0  ;;  %v5608_v54 = vshll.u32 %v11804_v31, 16  ;;  %v5614_v37 = vshrl.u32 %v11805_v27, 16  ;;  %v5168_v19 = vadd.f32 %v12229_v60, %v14272_v6  ;;  %v14444_v10 = vld [vmem:[#allocation4 + $0x20] sm:$0xff]   ;;  %9932 = vmatprep.subr.bf16.mxu1 %v13729_v0  ;;  %v13311_v13 = vld [vmem:[#allocation10 + $0xa0] sm:$0xff]  }
 0x3fe   : > { %v12230_v32 = vadd.f32 %v14317_v20, %v4945_v51  ;;  %v4947_v33 = vpop.f32.mrb[31].mxu0  ;;  %v5617_v40 = vshll.u32 %v11805_v27, 16  ;;  %v8758_v34 = vrot.slane %v14440_v62, 1  ;;  %v6071_v63 = vsel %vm14353_vm9, 0, %v6070_v42  ;;  %v14454_v61 = vpop.f32.mrb[44].mxu1  ;;  %v13293_v60 = vld [vmem:[#allocation4 + $0x10] sm:$0xff]  }
 0x3ff   : > { %v5607_v44 = vrot.slane %v5605_v26, 7  ;;  %v14450_v45 = vrot.slane %v5614_v37, 7  ;;  %v5316_v31 = vmax.f32 %v5168_v19, 0.0  ;;  %v6571_v57 = vshll.u32 %v14444_v10, 16  ;;  %6072 = vst [vmem:[#allocation4 + $0x30] sm:$0x1] %v6071_v63 }
 0x400   : > { %v5171_v6 = vadd.f32 %v12230_v32, %v14277_v11  ;;  %v5603_v15 = vrot.slane %v14427_v35, 4  ;;  %v8759_v42 = vsel %vm1478_vm1, %v8757_v43, %v8758_v34  ;;  %v6567_v38 = vshrl.u32 %v14403_v48, 16  ;;  %v14461_v26 = vpop.f32.mrb[45].mxu1  ;;  %9933 = vmatpush1.bf16.msra.mxu1 %v13304_v52 }
 0x401   : > { %v5610_v27 = vor.u32 %v5608_v54, %v5607_v44  ;;  %v5612_v51 = vrot.slane %v5607_v44, 4  ;;  %v5619_v11 = vor.u32 %v5617_v40, %v14450_v45  ;;  %v11806_v21 = vpack.c.bf16 %v5316_v31, %v5316_v31  ;;  %12151 = vmatprep.mubr.bf16.mxu0 %v8759_v42  ;;  %9934 = vmatprep.subr.bf16.mxu1 %v13729_v0  ;;  %v14468_v48 = vpop.f32.mrb[46].mxu1 }
 0x402   : > { %v5317_v37 = vmax.f32 %v5171_v6, 0.0  ;;  %v4950_v54 = vpop.f32.mrb[32].mxu0  ;;  %v6569_v19 = vor.u32 %v6567_v38, %v6565_v41  ;;  %v6573_v32 = vrot.slane %v6571_v57, 1  ;;  %v6575_v43 = vshrl.u32 %v14444_v10, 16 }
 0x403   : > { %v5611_v35 = vsel %vm14336_vm7, %v5603_v15, %v5610_v27  ;;  %v6073_v33 = vld [vmem:[#allocation4 + $0x38] sm:$0xf]  ;;  %v5620_v44 = vsel %vm14336_vm7, %v5612_v51, %v5619_v11  ;;  %v5621_v40 = vrot.slane %v14450_v45, 4  ;;  %v5623_v52 = vshrl.u32 %v11806_v21, 16  ;;  %v4952_v31 = vpop.f32.mrb[33].mxu0  ;;  %v13296_v6 = vld [vmem:[#allocation4 + $0x28] sm:$0xff]   ;;  %9750 = vmatmul.mubr.bf16.gmra.mrb[56].mxu1 %v13293_v60 }
 0x404   : > { %5994 = vst [vmem:[#allocation4 + $0x3c] sm:$0xf] %v5611_v35  ;;  %v11807_v63 = vpack.c.bf16 %v5317_v37, %v5317_v37  ;;  %v6074_v41 = vsel %vm14252_vm4, 0, %v6073_v33  ;;  %5995 = vst [vmem:[#allocation4 + $0x40] sm:$0xf] %v5620_v44  ;;  %v12231_v10 = vadd.f32 %v14317_v20, %v4950_v54  ;;  %v4953_v57 = vpop.f32.mrb[34].mxu0  ;;  %v6574_v15 = vsel %vm1061_vm0, %v6569_v19, %v6573_v32 }
 0x405   : > { %6075 = vst [vmem:[#allocation4 + $0x38] sm:$0xf] %v6074_v41  ;;  %v5625_v27 = vrot.slane %v5623_v52, 7  ;;  %v5626_v42 = vshll.u32 %v11806_v21, 16  ;;  %v12232_v45 = vadd.f32 %v14317_v20, %v4953_v57  ;;  %v4955_v51 = vpop.f32.mrb[35].mxu0  ;;  %9757 = vmatprep.mubr.bf16.mxu1 %v6574_v15  ;;  %v14478_v11 = vld [vmem:[#allocation4 + $0x28] sm:$0xff]   ;;  %9935 = vmatpush1.bf16.msra.mxu1 %v13311_v13 }
 0x406   : > { %v5632_v38 = vshrl.u32 %v11807_v63, 16  ;;  %v13315_v37 = vld [vmem:[#allocation10 + $0xa8] sm:$0xff]   ;;  %v5176_v35 = vadd.f32 %v12231_v10, %v14286_v47  ;;  %v8760_v33 = vrot.slane %v13296_v6, 1  ;;  %v14481_v54 = vld [vmem:[#allocation4 + $0x30] sm:$0xff]   ;;  %9936 = vmatprep.subr.bf16.mxu1 %v13729_v0  ;;  %v5635_v21 = vshll.u32 %v11807_v63, 16  ;;  %v13322_v31 = vld [vmem:[#allocation10 + $0xb0] sm:$0xff]  }
 0x407   : > { %v5628_v60 = vor.u32 %v5626_v42, %v5625_v27  ;;  %v5179_v44 = vadd.f32 %v12232_v45, %v14290_v53  ;;  %v14487_v52 = vld [vmem:[#allocation4 + $0x30] sm:$0xff]   ;;  %v8762_v47 = vrot.slane %v14481_v54, 1  ;;  %v6579_v6 = vshll.u32 %v14478_v11, 16  ;;  %v14494_v10 = vpop.f32.mrb[47].mxu1  ;;  %v13298_v45 = vld [vmem:[#allocation4 + $0x18] sm:$0xff]  }
 0x408   : > { %v14484_v19 = vrot.slane %v5632_v38, 7  ;;  %v5318_v41 = vmax.f32 %v5176_v35, 0.0  ;;  %v8761_v13 = vsel %vm1478_vm1, %v8758_v34, %v8760_v33  ;;  %v5630_v63 = vrot.slane %v5625_v27, 4 }
 0x409   : > { %v5629_v57 = vsel %vm14336_vm7, %v5621_v40, %v5628_v60  ;;  %v5319_v15 = vmax.f32 %v5179_v44, 0.0  ;;  %12152 = vmatmul.mubr.bf16.vlgmr.msra.gmra.mrb[96].mxu0 %v8761_v13  ;;  %9937 = vmatpush1.bf16.msra.mxu1 %v13315_v37  ;;  %v8763_v34 = vsel %vm1478_vm1, %v8760_v33, %v8762_v47  ;;  %v6577_v51 = vor.u32 %v6575_v43, %v6573_v32 }
 0x40a   : > { %v5637_v53 = vor.u32 %v5635_v21, %v14484_v19  ;;  %5996 = vst [vmem:[#allocation4 + $0x44] sm:$0xf] %v5629_v57  ;;  %v11808_v62 = vpack.c.bf16 %v5318_v41, %v5318_v41  ;;  %v4958_v38 = vpop.f32.mrb[36].mxu0  ;;  %v6581_v35 = vrot.slane %v6579_v6, 1  ;;  %9938 = vmatprep.subr.bf16.mxu1 %v13729_v0  ;;  %12155 = vmatprep.mubr.bf16.mxu0 %v8763_v34  ;;  %v6587_v33 = vshll.u32 %v14487_v52, 16  ;;  %v13326_v57 = vld [vmem:[#allocation10 + $0xb8] sm:$0xff]  }
 0x40b   : > { %v6076_v42 = vld [vmem:[#allocation4 + $0x3c] sm:$0x1]  ;;  %v11809_v27 = vpack.c.bf16 %v5319_v15, %v5319_v15  ;;  %v12233_v60 = vadd.f32 %v14317_v20, %v4958_v38  ;;  %v4960_v37 = vpop.f32.mrb[37].mxu0  ;;  %9758 = vmatmul.mubr.bf16.gmra.mrb[60].mxu1 %v13298_v45  ;;  %v6583_v15 = vshrl.u32 %v14478_v11, 16 }
 0x40c   : > { %v5638_v40 = vsel %vm14336_vm7, %v5630_v63, %v5637_v53  ;;  %v5641_v21 = vshrl.u32 %v11808_v62, 16  ;;  %v4961_v44 = vpop.f32.mrb[38].mxu0  ;;  %v6582_v41 = vsel %vm1061_vm0, %v6577_v51, %v6581_v35  ;;  %v5644_v53 = vshll.u32 %v11808_v62, 16 }
 0x40d   : > { %5997 = vst [vmem:[#allocation4 + $0x48] sm:$0xf] %v5638_v40  ;;  %v5650_v32 = vshrl.u32 %v11809_v27, 16  ;;  %v5184_v43 = vadd.f32 %v12233_v60, %v14284_v46  ;;  %v12234_v13 = vadd.f32 %v14317_v20, %v4961_v44  ;;  %v4963_v6 = vpop.f32.mrb[39].mxu0  ;;  %9765 = vmatprep.mubr.bf16.mxu1 %v6582_v41  ;;  %9939 = vmatpush1.bf16.msra.mxu1 %v13322_v31  ;;  %v6077_v38 = vsel %vm14353_vm9, 0, %v6076_v42  ;;  %v13333_v40 = vld [vmem:[#allocation10 + $0xc0] sm:$0xff]  }
 0x40e   : > { %v5643_v63 = vrot.slane %v5641_v21, 7  ;;  %9940 = vmatprep.subr.bf16.mxu1 %v13729_v0  ;;  %v5653_v45 = vshll.u32 %v11809_v27, 16  ;;  %6078 = vst [vmem:[#allocation4 + $0x3c] sm:$0x1] %v6077_v38  ;;  %v5639_v60 = vrot.slane %v14484_v19, 4  ;;  %v6585_v37 = vor.u32 %v6583_v15, %v6581_v35 }
 0x40f   : > { %v5652_v34 = vrot.slane %v5650_v32, 7  ;;  %v5320_v51 = vmax.f32 %v5184_v43, 0.0  ;;  %v5187_v46 = vadd.f32 %v12234_v13, %v14288_v49  ;;  %v14516_v21 = vrot.slane %v6587_v33, 1  ;;  %v13301_v43 = vld [vmem:[#allocation4 + $0x20] sm:$0xff]  }
 0x410   : > { %v5646_v31 = vor.u32 %v5644_v53, %v5643_v63  ;;  %v5648_v11 = vrot.slane %v5643_v63, 4  ;;  %v6591_v6 = vshrl.u32 %v14487_v52, 16  ;;  %v13337_v63 = vld [vmem:[#allocation10 + $0xc8] sm:$0xff]  }
 0x411   : > { %v6079_v62 = vld [vmem:[#allocation4 + $0x44] sm:$0xf]  ;;  %v5655_v44 = vor.u32 %v5653_v45, %v5652_v34  ;;  %v11810_v41 = vpack.c.bf16 %v5320_v51, %v5320_v51  ;;  %v5321_v42 = vmax.f32 %v5187_v46, 0.0  ;;  %9941 = vmatpush1.bf16.msra.mxu1 %v13326_v57  ;;  %v6590_v38 = vsel %vm1061_vm0, %v6585_v37, %v14516_v21 }
 0x412   : > { %v6080_v27 = vsel %vm14252_vm4, 0, %v6079_v62  ;;  %v5647_v49 = vsel %vm14336_vm7, %v5639_v60, %v5646_v31  ;;  %v4966_v32 = vpop.f32.mrb[40].mxu0  ;;  %9942 = vmatprep.subr.bf16.mxu1 %v13729_v0  ;;  %v5657_v52 = vrot.slane %v5652_v34, 4  ;;  %v6593_v54 = vor.u32 %v6591_v6, %v14516_v21  ;;  %v14559_v21 = vld [vmem:[%s15310_s2] ss:$0 sm:$0xff] }
 0x413   : > { %6081 = vst [vmem:[#allocation4 + $0x44] sm:$0xf] %v6080_v27  ;;  %5998 = vst [vmem:[#allocation4 + $0x4c] sm:$0xf] %v5647_v49  ;;  %v5656_v19 = vsel %vm14336_vm7, %v5648_v11, %v5655_v44  ;;  %v5659_v35 = vshrl.u32 %v11810_v41, 16  ;;  %v11811_v33 = vpack.c.bf16 %v5321_v42, %v5321_v42  ;;  %v4968_v13 = vpop.f32.mrb[41].mxu0  ;;  %v12235_v53 = vadd.f32 %v14317_v20, %v4966_v32 }
 0x414   : > { %v6082_v57 = vld [vmem:[#allocation4 + $0x48] sm:$0x1]  ;;  %5999 = vst [vmem:[#allocation4 + $0x50] sm:$0xf] %v5656_v19  ;;  %v4969_v15 = vpop.f32.mrb[42].mxu0  ;;  %9766 = vmatmul.mubr.bf16.gmra.mrb[64].mxu1 %v13301_v43  ;;  %v5662_v46 = vshll.u32 %v11810_v41, 16 }
 0x415   : > { %v6083_v45 = vsel %vm14353_vm9, 0, %v6082_v57  ;;  %v5661_v51 = vrot.slane %v5659_v35, 7  ;;  %v5668_v60 = vshrl.u32 %v11811_v33, 16  ;;  %v12236_v31 = vadd.f32 %v14317_v20, %v4969_v15  ;;  %v4971_v62 = vpop.f32.mrb[43].mxu0  ;;  %9773 = vmatprep.mubr.bf16.mxu1 %v6590_v38  ;;  %9943 = vmatpush1.bf16.msra.mxu1 %v13333_v40  ;;  %v13303_v44 = vld [vmem:[#allocation4 + $0x38] sm:$0xff]   ;;  %v13344_v32 = vld [vmem:[#allocation10 + $0xd0] sm:$0xff]  }
 0x416   : > { %6084 = vst [vmem:[#allocation4 + $0x48] sm:$0x1] %v6083_v45  ;;  %v5192_v11 = vadd.f32 %v12235_v53, %v14296_v4  ;;  %9944 = vmatprep.subr.bf16.mxu1 %v13729_v0  ;;  %v5671_v27 = vshll.u32 %v11811_v33, 16  ;;  %v14537_v41 = vld [vmem:[#allocation4 + $0x38] sm:$0xff]   ;;  %v8764_v19 = vrot.slane %v13303_v44, 1  ;;  %v13305_v57 = vld [vmem:[#allocation4 + $0x28] sm:$0xff]  }
 0x417   : > { %v5664_v42 = vor.u32 %v5662_v46, %v5661_v51  ;;  %v14534_v37 = vrot.slane %v5668_v60, 7  ;;  %v5195_v49 = vadd.f32 %v12236_v31, %v14300_v7  ;;  %v5666_v34 = vrot.slane %v5661_v51, 4  ;;  %v13348_v60 = vld [vmem:[#allocation10 + $0xd8] sm:$0xff]  }
 0x418   : > { %v5322_v43 = vmax.f32 %v5192_v11, 0.0  ;;  %v8765_v33 = vsel %vm1478_vm1, %v8762_v47, %v8764_v19  ;;  %v6595_v53 = vshll.u32 %v14537_v41, 16 }
 0x419   : > { %v5665_v40 = vsel %vm14336_vm7, %v5657_v52, %v5664_v42  ;;  %v5673_v4 = vor.u32 %v5671_v27, %v14534_v37  ;;  %v5323_v35 = vmax.f32 %v5195_v49, 0.0  ;;  %9945 = vmatpush1.bf16.msra.mxu1 %v13337_v63  ;;  %12156 = vmatmul.mubr.bf16.gmra.mrb[100].mxu0 %v8765_v33 }
 0x41a   : > { %6000 = vst [vmem:[#allocation4 + $0x54] sm:$0xf] %v5665_v40  ;;  %v11812_v13 = vpack.c.bf16 %v5322_v43, %v5322_v43  ;;  %v4974_v7 = vpop.f32.mrb[44].mxu0  ;;  %v13307_v15 = vld [vmem:[#allocation4 + $0x40] sm:$0xff]   ;;  %9946 = vmatprep.subr.bf16.mxu1 %v13729_v0  ;;  %v6597_v11 = vrot.slane %v6595_v53, 1 }
 0x41b   : > { %v6085_v38 = vld [vmem:[#allocation4 + $0x50] sm:$0xf]  ;;  %v5674_v45 = vsel %vm14336_vm7, %v5666_v34, %v5673_v4  ;;  %v11813_v51 = vpack.c.bf16 %v5323_v35, %v5323_v35  ;;  %v12237_v63 = vadd.f32 %v14317_v20, %v4974_v7  ;;  %v4976_v46 = vpop.f32.mrb[45].mxu0  ;;  %v14562_v43 = vld [vmem:[#allocation4 + $0x40] sm:$0xff]   ;;  %v8766_v4 = vrot.slane %v13307_v15, 1 }
 0x41c   : > { %v6086_v47 = vsel %vm14252_vm4, 0, %v6085_v38  ;;  %6001 = vst [vmem:[#allocation4 + $0x58] sm:$0xf] %v5674_v45  ;;  %v5677_v31 = vshrl.u32 %v11812_v13, 16  ;;  %v5680_v62 = vshll.u32 %v11812_v13, 16  ;;  %v4977_v52 = vpop.f32.mrb[46].mxu0  ;;  %9774 = vmatmul.mubr.bf16.gmra.mrb[68].mxu1 %v13305_v57  ;;  %v6598_v34 = vsel %vm1061_vm0, %v6593_v54, %v6597_v11 }
 0x41d   : > { %v14553_v44 = vld [vmem:[#allocation4 + $0x48] sm:$0xff]   ;;  %6087 = vst [vmem:[#allocation4 + $0x50] sm:$0xf] %v6086_v47  ;;  %v5686_v42 = vshrl.u32 %v11813_v51, 16  ;;  %v5689_v27 = vshll.u32 %v11813_v51, 16  ;;  %v5200_v20 = vadd.f32 %v12237_v63, %v14294_v3  ;;  %v12238_v6 = vadd.f32 %v14559_v21, %v4977_v52  ;;  %v4979_v49 = vpop.f32.mrb[47].mxu0  ;;  %9947 = vmatpush1.bf16.msra.mxu1 %v13344_v32  ;;  %9781 = vmatprep.mubr.bf16.mxu1 %v6598_v34 }
 0x41e   : > { %v5679_v40 = vrot.slane %v5677_v31, 7  ;;  %v8768_v35 = vrot.slane %v14553_v44, 1  ;;  %v14566_v13 = vld [vmem:[#allocation4 + $0x48] sm:$0xff]   ;;  %9948 = vmatprep.subr.bf16.mxu1 %v13729_v0  ;;  %v5675_v57 = vrot.slane %v14534_v37, 4  ;;  %v8767_v32 = vsel %vm1478_vm1, %v8764_v19, %v8766_v4  ;;  %v13309_v47 = vld [vmem:[#allocation4 + $0x30] sm:$0xff]   ;;  %v13359_v34 = vld [vmem:[#allocation10 + $0xe8] sm:$0xff]  }
 0x41f   : > { %v5688_v3 = vrot.slane %v5686_v42, 7  ;;  %v5324_v33 = vmax.f32 %v5200_v20, 0.0  ;;  %v5203_v7 = vadd.f32 %v12238_v6, %v14298_v5  ;;  %12159 = vmatprep.mubr.bf16.mxu0 %v8767_v32  ;;  %v6599_v37 = vshrl.u32 %v14537_v41, 16  ;;  %v13355_v31 = vld [vmem:[#allocation10 + $0xe0] sm:$0xff]  }
 0x420   : > { %v5682_v53 = vor.u32 %v5680_v62, %v5679_v40  ;;  %v8769_v15 = vsel %vm1478_vm1, %v8766_v4, %v8768_v35  ;;  %v5684_v38 = vrot.slane %v5679_v40, 4  ;;  %v6603_v19 = vshll.u32 %v14562_v43, 16 }
 0x421   : > { %v5691_v45 = vor.u32 %v5689_v27, %v5688_v3  ;;  %v11814_v51 = vpack.c.bf16 %v5324_v33, %v5324_v33  ;;  %v5325_v63 = vmax.f32 %v5203_v7, 0.0  ;;  %v6088_v46 = vld [vmem:[#allocation4 + $0x54] sm:$0x1]  ;;  %9949 = vmatpush1.bf16.msra.mxu1 %v13348_v60  ;;  %12160 = vmatmul.mubr.bf16.gmra.mrb[104].mxu0 %v8769_v15  ;;  %v6611_v27 = vshll.u32 %v14566_v13, 16 }
 0x422   : > { %v5683_v5 = vsel %vm14336_vm7, %v5675_v57, %v5682_v53  ;;  %v4982_v54 = vpop.f32.mrb[48].mxu0  ;;  %9950 = vmatprep.subr.bf16.mxu1 %v13729_v0  ;;  %v6601_v41 = vor.u32 %v6599_v37, %v6597_v11  ;;  %v6605_v49 = vrot.slane %v6603_v19, 1  ;;  %v6089_v40 = vsel %vm14353_vm9, 0, %v6088_v46 }
 0x423   : > { %6002 = vst [vmem:[#allocation4 + $0x5c] sm:$0xf] %v5683_v5  ;;  %v5692_v62 = vsel %vm14336_vm7, %v5684_v38, %v5691_v45  ;;  %v5695_v52 = vshrl.u32 %v11814_v51, 16  ;;  %v11815_v42 = vpack.c.bf16 %v5325_v63, %v5325_v63  ;;  %v4984_v60 = vpop.f32.mrb[49].mxu0  ;;  %v12239_v20 = vadd.f32 %v14559_v21, %v4982_v54  ;;  %6090 = vst [vmem:[#allocation4 + $0x54] sm:$0x1] %v6089_v40 }
 0x424   : > { %6003 = vst [vmem:[#allocation4 + $0x60] sm:$0xf] %v5692_v62  ;;  %v4985_v6 = vpop.f32.mrb[50].mxu0  ;;  %9782 = vmatmul.mubr.bf16.gmra.mrb[72].mxu1 %v13309_v47  ;;  %v5698_v33 = vshll.u32 %v11814_v51, 16  ;;  %v5693_v32 = vrot.slane %v5688_v3, 4  ;;  %v6606_v38 = vsel %vm1061_vm0, %v6601_v41, %v6605_v49  ;;  %v6607_v11 = vshrl.u32 %v14562_v43, 16 }
 0x425   : > { %v5697_v4 = vrot.slane %v5695_v52, 7  ;;  %v5704_v7 = vshrl.u32 %v11815_v42, 16  ;;  %v12240_v57 = vadd.f32 %v14559_v21, %v4985_v6  ;;  %v4987_v53 = vpop.f32.mrb[51].mxu0  ;;  %9951 = vmatpush1.bf16.msra.mxu1 %v13355_v31  ;;  %v5208_v15 = vadd.f32 %v12239_v20, %v14304_v12  ;;  %9789 = vmatprep.mubr.bf16.mxu1 %v6606_v38  ;;  %v13365_v43 = vld [vmem:[#allocation10 + $0xf0] sm:$0xff]  }
 0x426   : > { %9952 = vmatprep.subr.bf16.mxu1 %v13729_v0  ;;  %v5707_v46 = vshll.u32 %v11815_v42, 16  ;;  %v6609_v54 = vor.u32 %v6607_v11, %v6605_v49  ;;  %v6613_v47 = vrot.slane %v6611_v27, 1  ;;  %v13312_v42 = vld [vmem:[#allocation4 + $0x38] sm:$0xff]  }
 0x427   : > { %v5700_v45 = vor.u32 %v5698_v33, %v5697_v4  ;;  %v14591_v63 = vrot.slane %v5704_v7, 7  ;;  %v5211_v51 = vadd.f32 %v12240_v57, %v14308_v16  ;;  %v5326_v5 = vmax.f32 %v5208_v15, 0.0  ;;  %v13368_v33 = vld [vmem:[#allocation10 + $0xf8] sm:$0xff]  }
 0x428   : > { %v5702_v12 = vrot.slane %v5697_v4, 4 }
 0x429   : > { %v5701_v3 = vsel %vm14336_vm7, %v5693_v32, %v5700_v45  ;;  %v5709_v37 = vor.u32 %v5707_v46, %v14591_v63  ;;  %v5327_v19 = vmax.f32 %v5211_v51, 0.0  ;;  %9953 = vmatpush1.bf16.msra.mxu1 %v13359_v34  ;;  %v11816_v62 = vpack.c.bf16 %v5326_v5, %v5326_v5 }
 0x42a   : > { %v6091_v31 = vld [vmem:[#allocation4 + $0x5c] sm:$0xf]  ;;  %6004 = vst [vmem:[#allocation4 + $0x64] sm:$0xf] %v5701_v3  ;;  %v4990_v52 = vpop.f32.mrb[52].mxu0  ;;  %9954 = vmatprep.subr.bf16.mxu1 %v13729_v0  ;;  %v6614_v34 = vsel %vm1061_vm0, %v6609_v54, %v6613_v47  ;;  %v14604_v4 = vld [vmem:[#allocation4 + $0x50] sm:$0xff]  }
 0x42b   : > { %v6092_v16 = vsel %vm14252_vm4, 0, %v6091_v31  ;;  %v6094_v60 = vld [vmem:[#allocation4 + $0x60] sm:$0x1]  ;;  %v5710_v27 = vsel %vm14336_vm7, %v5702_v12, %v5709_v37  ;;  %v11817_v20 = vpack.c.bf16 %v5327_v19, %v5327_v19  ;;  %v12241_v6 = vadd.f32 %v14559_v21, %v4990_v52  ;;  %v4992_v41 = vpop.f32.mrb[53].mxu0  ;;  %v14608_v38 = vld [vmem:[#allocation4 + $0x50] sm:$0xff]  }
 0x42c   : > { %6093 = vst [vmem:[#allocation4 + $0x5c] sm:$0xf] %v6092_v16  ;;  %6005 = vst [vmem:[#allocation4 + $0x68] sm:$0xf] %v5710_v27  ;;  %v5713_v49 = vshrl.u32 %v11816_v62, 16  ;;  %v4993_v40 = vpop.f32.mrb[54].mxu0  ;;  %9790 = vmatmul.mubr.bf16.gmra.mrb[76].mxu1 %v13312_v42 }
 0x42d   : > { %v5716_v7 = vshll.u32 %v11816_v62, 16  ;;  %v5722_v57 = vshrl.u32 %v11817_v20, 16  ;;  %v5216_v53 = vadd.f32 %v12241_v6, %v14302_v9  ;;  %v12242_v32 = vadd.f32 %v14559_v21, %v4993_v40  ;;  %v4995_v15 = vpop.f32.mrb[55].mxu0  ;;  %9797 = vmatprep.mubr.bf16.mxu1 %v6614_v34  ;;  %9955 = vmatpush1.bf16.msra.mxu1 %v13365_v43 }
 0x42e   : > { %v5715_v11 = vrot.slane %v5713_v49, 7  ;;  %v5725_v45 = vshll.u32 %v11817_v20, 16  ;;  %v8770_v46 = vrot.slane %v14604_v4, 1  ;;  %v6095_v51 = vsel %vm14353_vm9, 0, %v6094_v60  ;;  %9956 = vmatprep.subr.bf16.mxu1 %v13729_v0  ;;  %v13316_v60 = vld [vmem:[#allocation4 + $0x40] sm:$0xff]  }
 0x42f   : > { %v5724_v5 = vrot.slane %v5722_v57, 7  ;;  %v5328_v54 = vmax.f32 %v5216_v53, 0.0  ;;  %v5219_v9 = vadd.f32 %v12242_v32, %v14306_v14  ;;  %v6619_v3 = vshll.u32 %v14608_v38, 16  ;;  %6096 = vst [vmem:[#allocation4 + $0x60] sm:$0x1] %v6095_v51 }
 0x430   : > { %v5711_v12 = vrot.slane %v14591_v63, 4  ;;  %v5718_v37 = vor.u32 %v5716_v7, %v5715_v11  ;;  %v8771_v19 = vsel %vm1478_vm1, %v8768_v35, %v8770_v46  ;;  %v6615_v43 = vshrl.u32 %v14566_v13, 16 }
 0x431   : > { %v5720_v31 = vrot.slane %v5715_v11, 4  ;;  %v5727_v62 = vor.u32 %v5725_v45, %v5724_v5  ;;  %v11818_v52 = vpack.c.bf16 %v5328_v54, %v5328_v54  ;;  %v5329_v42 = vmax.f32 %v5219_v9, 0.0  ;;  %12163 = vmatprep.mubr.bf16.mxu0 %v8771_v19  ;;  %9957 = vmatpush1.bf16.msra.mxu1 %v13368_v33 }
 0x432   : > { %v5719_v14 = vsel %vm14336_vm7, %v5711_v12, %v5718_v37  ;;  %v4998_v16 = vpop.f32.mrb[56].mxu0  ;;  %v6617_v27 = vor.u32 %v6615_v43, %v6613_v47  ;;  %v6621_v63 = vrot.slane %v6619_v3, 1  ;;  %v6623_v20 = vshrl.u32 %v14608_v38, 16  ;;  %10151 = vmatprep.subr.bf16.mxu1 %v13729_v0 }
 0x433   : > { %v6097_v44 = vld [vmem:[#allocation4 + $0x68] sm:$0xf]  ;;  %6006 = vst [vmem:[#allocation4 + $0x6c] sm:$0xf] %v5719_v14  ;;  %v5728_v35 = vsel %vm14336_vm7, %v5720_v31, %v5727_v62  ;;  %v5729_v13 = vrot.slane %v5724_v5, 4  ;;  %v5731_v6 = vshrl.u32 %v11818_v52, 16  ;;  %v11819_v41 = vpack.c.bf16 %v5329_v42, %v5329_v42 }
 0x434   : > { %v5000_v49 = vpop.f32.mrb[57].mxu0  ;;  %v13318_v40 = vld [vmem:[#allocation4 + $0x58] sm:$0xff]   ;;  %v6098_v34 = vsel %vm14252_vm4, 0, %v6097_v44  ;;  %6007 = vst [vmem:[#allocation4 + $0x70] sm:$0xf] %v5728_v35  ;;  %v12243_v47 = vadd.f32 %v14559_v21, %v4998_v16  ;;  %9798 = vmatmul.mubr.bf16.gmra.mrb[80].mxu1 %v13316_v60  ;;  %v6622_v33 = vsel %vm1061_vm0, %v6617_v27, %v6621_v63  ;;  %v5734_v57 = vshll.u32 %v11818_v52, 16 }
 0x435   : > { %v5001_v4 = vpop.f32.mrb[58].mxu0  ;;  %6099 = vst [vmem:[#allocation4 + $0x68] sm:$0xf] %v6098_v34  ;;  %v5733_v7 = vrot.slane %v5731_v6, 7  ;;  %v5740_v53 = vshrl.u32 %v11819_v41, 16  ;;  %9805 = vmatprep.mubr.bf16.mxu1 %v6622_v33  ;;  %v13321_v38 = vld [vmem:[#allocation4 + $0x58] sm:$0xff]   ;;  %v6625_v27 = vor.u32 %v6623_v20, %v6621_v63 }
 0x436   : > { %v12244_v32 = vadd.f32 %v14559_v21, %v5001_v4  ;;  %v5003_v15 = vpop.f32.mrb[59].mxu0  ;;  %v5224_v11 = vadd.f32 %v12243_v47, %v14312_v18  ;;  %v8772_v45 = vrot.slane %v13318_v40, 1  ;;  %v14633_v51 = vld [vmem:[#allocation4 + $0x60] sm:$0xff]   ;;  %v5743_v9 = vshll.u32 %v11819_v41, 16 }
 0x437   : > { %v5736_v5 = vor.u32 %v5734_v57, %v5733_v7  ;;  %v5742_v54 = vrot.slane %v5740_v53, 7  ;;  %v8774_v19 = vrot.slane %v14633_v51, 1  ;;  %v6627_v43 = vshll.u32 %v13321_v38, 16  ;;  %v14638_v31 = vld [vmem:[#allocation4 + $0x60] sm:$0xff]  }
 0x438   : > { %v5227_v3 = vadd.f32 %v12244_v32, %v14321_v24  ;;  %v5330_v12 = vmax.f32 %v5224_v11, 0.0  ;;  %v8773_v37 = vsel %vm1478_vm1, %v8770_v46, %v8772_v45  ;;  %v5738_v18 = vrot.slane %v5733_v7, 4  ;;  %v13320_v46 = vld [vmem:[#allocation4 + $0x48] sm:$0xff]  }
 0x439   : > { %v5737_v62 = vsel %vm14336_vm7, %v5729_v13, %v5736_v5  ;;  %v5745_v52 = vor.u32 %v5743_v9, %v5742_v54  ;;  %12164 = vmatmul.mubr.bf16.gmra.mrb[108].mxu0 %v8773_v37  ;;  %v8775_v24 = vsel %vm1478_vm1, %v8772_v45, %v8774_v19  ;;  %v6629_v44 = vrot.slane %v6627_v43, 1 }
 0x43a   : > { %v5331_v42 = vmax.f32 %v5227_v3, 0.0  ;;  %v6100_v14 = vld [vmem:[#allocation4 + $0x6c] sm:$0x1]  ;;  %6008 = vst [vmem:[#allocation4 + $0x74] sm:$0xf] %v5737_v62  ;;  %v11820_v16 = vpack.c.bf16 %v5330_v12, %v5330_v12  ;;  %v5006_v60 = vpop.f32.mrb[60].mxu0  ;;  %12167 = vmatprep.mubr.bf16.mxu0 %v8775_v24 }
 0x43b   : > { %v5746_v35 = vsel %vm14336_vm7, %v5738_v18, %v5745_v52  ;;  %v12245_v13 = vadd.f32 %v14559_v21, %v5006_v60  ;;  %v5008_v41 = vpop.f32.mrb[61].mxu0  ;;  %v6630_v34 = vsel %vm1061_vm0, %v6625_v27, %v6629_v44  ;;  %v6635_v47 = vshll.u32 %v14638_v31, 16 }
 0x43c   : > { %v11821_v6 = vpack.c.bf16 %v5331_v42, %v5331_v42  ;;  %6009 = vst [vmem:[#allocation4 + $0x78] sm:$0xf] %v5746_v35  ;;  %v5749_v49 = vshrl.u32 %v11820_v16, 16  ;;  %v5009_v40 = vpop.f32.mrb[62].mxu0  ;;  %9806 = vmatmul.mubr.bf16.gmra.mrb[84].mxu1 %v13320_v46  ;;  %v5752_v57 = vshll.u32 %v11820_v16, 16  ;;  %v6631_v53 = vshrl.u32 %v13321_v38, 16 }
 0x43d   : > { %v5232_v63 = vadd.f32 %v12245_v13, %v14310_v17  ;;  %v12246_v20 = vadd.f32 %v14559_v21, %v5009_v40  ;;  %v5011_v33 = vpop.f32.mrb[63].mxu0  ;;  %9813 = vmatprep.mubr.bf16.mxu1 %v6630_v34  ;;  %v6101_v32 = vsel %vm14353_vm9, 0, %v6100_v14  ;;  %v5747_v9 = vrot.slane %v5742_v54, 4  ;;  %v13323_v16 = vld [vmem:[#allocation4 + $0x50] sm:$0xff]  }
 0x43e   : > { %v5758_v4 = vshrl.u32 %v11821_v6, 16  ;;  %v5751_v7 = vrot.slane %v5749_v49, 7  ;;  %v5761_v11 = vshll.u32 %v11821_v6, 16  ;;  %6102 = vst [vmem:[#allocation4 + $0x6c] sm:$0x1] %v6101_v32  ;;  %v6633_v12 = vor.u32 %v6631_v53, %v6629_v44 }
 0x43f   : > { %v5332_v45 = vmax.f32 %v5232_v63, 0.0  ;;  %v5235_v5 = vadd.f32 %v12246_v20, %v14319_v23  ;;  %v6637_v17 = vrot.slane %v6635_v47, 1  ;;  %v6639_v46 = vshrl.u32 %v14638_v31, 16 }
 0x440   : > { %v5760_v15 = vrot.slane %v5758_v4, 7  ;;  %v5754_v3 = vor.u32 %v5752_v57, %v5751_v7  ;;  %v5756_v43 = vrot.slane %v5751_v7, 4 }
 0x441   : > { %v6103_v37 = vld [vmem:[#allocation4 + $0x74] sm:$0xf]  ;;  %v11822_v18 = vpack.c.bf16 %v5332_v45, %v5332_v45  ;;  %v5333_v52 = vmax.f32 %v5235_v5, 0.0  ;;  %v6638_v6 = vsel %vm1061_vm0, %v6633_v12, %v6637_v17 }
 0x442   : > { %v5763_v62 = vor.u32 %v5761_v11, %v5760_v15  ;;  %v6104_v38 = vsel %vm14252_vm4, 0, %v6103_v37  ;;  %v5755_v42 = vsel %vm14336_vm7, %v5747_v9, %v5754_v3  ;;  %v5014_v14 = vpop.f32.mrb[64].mxu0  ;;  %v5765_v31 = vrot.slane %v5760_v15, 4  ;;  %v13327_v37 = vld [vmem:[#allocation4 + $0x58] sm:$0xff]  }
 0x443   : > { %6105 = vst [vmem:[#allocation4 + $0x74] sm:$0xf] %v6104_v38  ;;  %6010 = vst [vmem:[#allocation4 + $0x7c] sm:$0xf] %v5755_v42  ;;  %v5767_v54 = vshrl.u32 %v11822_v18, 16  ;;  %v11823_v60 = vpack.c.bf16 %v5333_v52, %v5333_v52  ;;  %v5016_v24 = vpop.f32.mrb[65].mxu0  ;;  %v12247_v44 = vadd.f32 %v14559_v21, %v5014_v14 }
 0x444   : > { %v5764_v23 = vsel %vm14336_vm7, %v5756_v43, %v5763_v62  ;;  %v6106_v27 = vld [vmem:[#allocation4 + $0x78] sm:$0x1]  ;;  %v5017_v35 = vpop.f32.mrb[66].mxu0  ;;  %9814 = vmatmul.mubr.bf16.gmra.mrb[88].mxu1 %v13323_v16  ;;  %v5770_v49 = vshll.u32 %v11822_v18, 16  ;;  %v6641_v43 = vor.u32 %v6639_v46, %v6637_v17 }
 0x445   : > { %6011 = vst [vmem:[#allocation4 + $0x80] sm:$0xf] %v5764_v23  ;;  %v6107_v13 = vsel %vm14353_vm9, 0, %v6106_v27  ;;  %v5769_v41 = vrot.slane %v5767_v54, 7  ;;  %v5776_v40 = vshrl.u32 %v11823_v60, 16  ;;  %v12248_v34 = vadd.f32 %v14559_v21, %v5017_v35  ;;  %v5019_v47 = vpop.f32.mrb[67].mxu0  ;;  %9821 = vmatprep.mubr.bf16.mxu1 %v6638_v6 }
 0x446   : > { %6108 = vst [vmem:[#allocation4 + $0x78] sm:$0x1] %v6107_v13  ;;  %v5240_v4 = vadd.f32 %v12247_v44, %v14332_v58  ;;  %v13325_v63 = vld [vmem:[#allocation4 + $0x68] sm:$0xff]   ;;  %v5779_v7 = vshll.u32 %v11823_v60, 16 }
 0x447   : > { %v5772_v20 = vor.u32 %v5770_v49, %v5769_v41  ;;  %v5778_v33 = vrot.slane %v5776_v40, 7  ;;  %v5243_v57 = vadd.f32 %v12248_v34, %v14345_v30  ;;  %v14669_v53 = vld [vmem:[#allocation4 + $0x68] sm:$0xff]   ;;  %v8776_v11 = vrot.slane %v13325_v63, 1 }
 0x448   : > { %v5334_v32 = vmax.f32 %v5240_v4, 0.0  ;;  %v5774_v5 = vrot.slane %v5769_v41, 4  ;;  %v6643_v30 = vshll.u32 %v14669_v53, 16 }
 0x449   : > { %v5773_v45 = vsel %vm14336_vm7, %v5765_v31, %v5772_v20  ;;  %v5781_v9 = vor.u32 %v5779_v7, %v5778_v33  ;;  %v5335_v3 = vmax.f32 %v5243_v57, 0.0  ;;  %v8777_v58 = vsel %vm1478_vm1, %v8774_v19, %v8776_v11 }
 0x44a   : > { %6012 = vst [vmem:[#allocation4 + $0x84] sm:$0xf] %v5773_v45  ;;  %v11824_v15 = vpack.c.bf16 %v5334_v32, %v5334_v32  ;;  %v5022_v12 = vpop.f32.mrb[68].mxu0  ;;  %v13329_v62 = vld [vmem:[#allocation4 + $0x70] sm:$0xff]   ;;  %v5783_v38 = vrot.slane %v5778_v33, 4  ;;  %12168 = vmatmul.mubr.bf16.gmra.mrb[112].mxu0 %v8777_v58  ;;  %v6645_v54 = vrot.slane %v6643_v30, 1 }
 0x44b   : > { %v5782_v52 = vsel %vm14336_vm7, %v5774_v5, %v5781_v9  ;;  %v11825_v42 = vpack.c.bf16 %v5335_v3, %v5335_v3  ;;  %v12249_v14 = vadd.f32 %v14559_v21, %v5022_v12  ;;  %v5024_v16 = vpop.f32.mrb[69].mxu0  ;;  %v8778_v41 = vrot.slane %v13329_v62, 1  ;;  %v13332_v40 = vld [vmem:[#allocation4 + $0x70] sm:$0xff]   ;;  %v13331_v3 = vld [vmem:[#allocation4 + $0x60] sm:$0xff]  }
 0x44c   : > { %v6109_v18 = vld [vmem:[#allocation4 + $0x80] sm:$0xf]  ;;  %6013 = vst [vmem:[#allocation4 + $0x88] sm:$0xf] %v5782_v52  ;;  %v5785_v19 = vshrl.u32 %v11824_v15, 16  ;;  %v5788_v23 = vshll.u32 %v11824_v15, 16  ;;  %9822 = vmatmul.mubr.bf16.gmra.mrb[92].mxu1 %v13327_v37  ;;  %v6646_v13 = vsel %vm1061_vm0, %v6641_v43, %v6645_v54 }
 0x44d   : > { %v6110_v51 = vsel %vm14252_vm4, 0, %v6109_v18  ;;  %v5025_v17 = vpop.f32.mrb[70].mxu0  ;;  %v14682_v60 = vld [vmem:[#allocation4 + $0x78] sm:$0xff]   ;;  %v5794_v24 = vshrl.u32 %v11825_v42, 16  ;;  %v5797_v46 = vshll.u32 %v11825_v42, 16  ;;  %v5248_v27 = vadd.f32 %v12249_v14, %v14329_v56  ;;  %9829 = vmatprep.mubr.bf16.mxu1 %v6646_v13 }
 0x44e   : > { %6111 = vst [vmem:[#allocation4 + $0x80] sm:$0xf] %v6110_v51  ;;  %v12250_v44 = vadd.f32 %v14559_v21, %v5025_v17  ;;  %v5027_v35 = vpop.f32.mrb[71].mxu0  ;;  %v5787_v6 = vrot.slane %v5785_v19, 7  ;;  %v8780_v49 = vrot.slane %v14682_v60, 1  ;;  %v8779_v63 = vsel %vm1478_vm1, %v8776_v11, %v8778_v41  ;;  %v14694_v33 = vld [vmem:[#allocation4 + $0x78] sm:$0xff]  }
 0x44f   : > { %v5796_v34 = vrot.slane %v5794_v24, 7  ;;  %v5336_v47 = vmax.f32 %v5248_v27, 0.0  ;;  %v6647_v20 = vshrl.u32 %v14669_v53, 16  ;;  %12171 = vmatprep.mubr.bf16.mxu0 %v8779_v63  ;;  %v6651_v11 = vshll.u32 %v13332_v40, 16 }
 0x450   : > { %v5251_v31 = vadd.f32 %v12250_v44, %v14341_v25  ;;  %v5790_v4 = vor.u32 %v5788_v23, %v5787_v6  ;;  %v8781_v56 = vsel %vm1478_vm1, %v8778_v41, %v8780_v49  ;;  %v5792_v7 = vrot.slane %v5787_v6, 4 }
 0x451   : > { %v5799_v57 = vor.u32 %v5797_v46, %v5796_v34  ;;  %v11826_v32 = vpack.c.bf16 %v5336_v47, %v5336_v47  ;;  %v6112_v5 = vld [vmem:[#allocation4 + $0x84] sm:$0x1]  ;;  %v6649_v37 = vor.u32 %v6647_v20, %v6645_v54  ;;  %v6653_v62 = vrot.slane %v6651_v11, 1 }
 0x452   : > { %v5337_v45 = vmax.f32 %v5251_v31, 0.0  ;;  %v5791_v25 = vsel %vm14336_vm7, %v5783_v38, %v5790_v4  ;;  %v5030_v9 = vpop.f32.mrb[72].mxu0  ;;  %12172 = vmatmul.mubr.bf16.gmra.mrb[116].mxu0 %v8781_v56  ;;  %v6659_v18 = vshll.u32 %v14694_v33, 16  ;;  %v6113_v52 = vsel %vm14353_vm9, 0, %v6112_v5 }
 0x453   : > { %6014 = vst [vmem:[#allocation4 + $0x8c] sm:$0xf] %v5791_v25  ;;  %v5800_v15 = vsel %vm14336_vm7, %v5792_v7, %v5799_v57  ;;  %v5803_v58 = vshrl.u32 %v11826_v32, 16  ;;  %v5032_v12 = vpop.f32.mrb[73].mxu0  ;;  %v12251_v43 = vadd.f32 %v14559_v21, %v5030_v9  ;;  %v5806_v42 = vshll.u32 %v11826_v32, 16 }
 0x454   : > { %v11827_v53 = vpack.c.bf16 %v5337_v45, %v5337_v45  ;;  %6015 = vst [vmem:[#allocation4 + $0x90] sm:$0xf] %v5800_v15  ;;  %v5033_v30 = vpop.f32.mrb[74].mxu0  ;;  %9830 = vmatmul.mubr.bf16.gmra.mrb[96].mxu1 %v13331_v3  ;;  %6114 = vst [vmem:[#allocation4 + $0x84] sm:$0x1] %v6113_v52  ;;  %v5801_v19 = vrot.slane %v5796_v34, 4  ;;  %v6654_v17 = vsel %vm1061_vm0, %v6649_v37, %v6653_v62 }
 0x455   : > { %v5805_v38 = vrot.slane %v5803_v58, 7  ;;  %v12252_v16 = vadd.f32 %v14559_v21, %v5033_v30  ;;  %v5035_v51 = vpop.f32.mrb[75].mxu0  ;;  %v5256_v23 = vadd.f32 %v12251_v43, %v14369_v1  ;;  %v6655_v54 = vshrl.u32 %v13332_v40, 16  ;;  %9837 = vmatprep.mubr.bf16.mxu1 %v6654_v17  ;;  %v13334_v40 = vld [vmem:[#allocation4 + $0x68] sm:$0xff]  }
 0x456   : > { %v5812_v14 = vshrl.u32 %v11827_v53, 16  ;;  %v5815_v27 = vshll.u32 %v11827_v53, 16  ;;  %v6661_v13 = vrot.slane %v6659_v18, 1  ;;  %v6663_v51 = vshrl.u32 %v14694_v33, 16 }
 0x457   : > { %v5808_v24 = vor.u32 %v5806_v42, %v5805_v38  ;;  %v5259_v44 = vadd.f32 %v12252_v16, %v14376_v28  ;;  %v5338_v35 = vmax.f32 %v5256_v23, 0.0  ;;  %v6657_v6 = vor.u32 %v6655_v54, %v6653_v62 }
 0x458   : > { %v5814_v46 = vrot.slane %v5812_v14, 7  ;;  %v5810_v47 = vrot.slane %v5805_v38, 4 }
 0x459   : > { %v5809_v41 = vsel %vm14336_vm7, %v5801_v19, %v5808_v24  ;;  %v5339_v34 = vmax.f32 %v5259_v44, 0.0  ;;  %v11828_v1 = vpack.c.bf16 %v5338_v35, %v5338_v35  ;;  %v6662_v25 = vsel %vm1061_vm0, %v6657_v6, %v6661_v13 }
 0x45a   : > { %v5817_v31 = vor.u32 %v5815_v27, %v5814_v46  ;;  %v6115_v4 = vld [vmem:[#allocation4 + $0x8c] sm:$0xf]  ;;  %6016 = vst [vmem:[#allocation4 + $0x94] sm:$0xf] %v5809_v41  ;;  %v5038_v63 = vpop.f32.mrb[76].mxu0  ;;  %v13338_v27 = vld [vmem:[#allocation4 + $0x70] sm:$0xff]   ;;  %v6665_v44 = vor.u32 %v6663_v51, %v6661_v13 }
 0x45b   : > { %v6116_v56 = vsel %vm14252_vm4, 0, %v6115_v4  ;;  %v6118_v20 = vld [vmem:[#allocation4 + $0x90] sm:$0x1]  ;;  %v11829_v7 = vpack.c.bf16 %v5339_v34, %v5339_v34  ;;  %v12253_v57 = vadd.f32 %v14559_v21, %v5038_v63  ;;  %v5040_v32 = vpop.f32.mrb[77].mxu0  ;;  %v5821_v45 = vshrl.u32 %v11828_v1, 16  ;;  %v14716_v9 = vld [vmem:[#allocation4 + $0x80] sm:$0xff]  }
 0x45c   : > { %v5818_v28 = vsel %vm14336_vm7, %v5810_v47, %v5817_v31  ;;  %6117 = vst [vmem:[#allocation4 + $0x8c] sm:$0xf] %v6116_v56  ;;  %v5041_v5 = vpop.f32.mrb[78].mxu0  ;;  %9838 = vmatmul.mubr.bf16.gmra.mrb[100].mxu1 %v13334_v40  ;;  %v5824_v3 = vshll.u32 %v11828_v1, 16  ;;  %v14720_v12 = vld [vmem:[#allocation4 + $0x80] sm:$0xff]   ;;  %v8782_v30 = vrot.slane %v14716_v9, 1 }
 0x45d   : > { %6017 = vst [vmem:[#allocation4 + $0x98] sm:$0xf] %v5818_v28  ;;  %v5830_v11 = vshrl.u32 %v11829_v7, 16  ;;  %v5264_v15 = vadd.f32 %v12253_v57, %v14367_v50  ;;  %v12254_v58 = vadd.f32 %v14559_v21, %v5041_v5  ;;  %v5043_v53 = vpop.f32.mrb[79].mxu0  ;;  %9845 = vmatprep.mubr.bf16.mxu1 %v6662_v25  ;;  %v5823_v37 = vrot.slane %v5821_v45, 7 }
 0x45e   : > { %v5833_v43 = vshll.u32 %v11829_v7, 16  ;;  %v6119_v62 = vsel %vm14353_vm9, 0, %v6118_v20  ;;  %v6667_v42 = vshll.u32 %v14720_v12, 16  ;;  %v5819_v50 = vrot.slane %v5814_v46, 4 }
 0x45f   : > { %v5832_v18 = vrot.slane %v5830_v11, 7  ;;  %v5340_v52 = vmax.f32 %v5264_v15, 0.0  ;;  %v5267_v38 = vadd.f32 %v12254_v58, %v14372_v55  ;;  %6120 = vst [vmem:[#allocation4 + $0x90] sm:$0x1] %v6119_v62  ;;  %v5826_v14 = vor.u32 %v5824_v3, %v5823_v37 }
 0x460   : > { %v8783_v16 = vsel %vm1478_vm1, %v8780_v49, %v8782_v30  ;;  %v5828_v19 = vrot.slane %v5823_v37, 4  ;;  %v6669_v35 = vrot.slane %v6667_v42, 1  ;;  %v6671_v46 = vshrl.u32 %v14720_v12, 16 }
 0x461   : > { %v5835_v23 = vor.u32 %v5833_v43, %v5832_v18  ;;  %v11830_v17 = vpack.c.bf16 %v5340_v52, %v5340_v52  ;;  %v5341_v54 = vmax.f32 %v5267_v38, 0.0  ;;  %12175 = vmatprep.mubr.bf16.mxu0 %v8783_v16  ;;  %v5827_v24 = vsel %vm14336_vm7, %v5819_v50, %v5826_v14  ;;  %v14759_v16 = vld [vmem:[%s15310_s2] ss:$0 sm:$0xff] }
 0x462   : > { %v5046_v55 = vpop.f32.mrb[80].mxu0  ;;  %6018 = vst [vmem:[#allocation4 + $0x9c] sm:$0xf] %v5827_v24  ;;  %v5837_v49 = vrot.slane %v5832_v18, 4  ;;  %v6670_v1 = vsel %vm1061_vm0, %v6665_v44, %v6669_v35  ;;  %v6673_v38 = vor.u32 %v6671_v46, %v6669_v35 }
 0x463   : > { %v5836_v60 = vsel %vm14336_vm7, %v5828_v19, %v5835_v23  ;;  %v5839_v33 = vshrl.u32 %v11830_v17, 16  ;;  %v11831_v41 = vpack.c.bf16 %v5341_v54, %v5341_v54  ;;  %v5048_v47 = vpop.f32.mrb[81].mxu0  ;;  %v13340_v31 = vld [vmem:[#allocation4 + $0x88] sm:$0xff]   ;;  %v12255_v4 = vadd.f32 %v14559_v21, %v5046_v55 }
 0x464   : > { %v6121_v6 = vld [vmem:[#allocation4 + $0x98] sm:$0xf]  ;;  %6019 = vst [vmem:[#allocation4 + $0xa0] sm:$0xf] %v5836_v60  ;;  %v5049_v13 = vpop.f32.mrb[82].mxu0  ;;  %9846 = vmatmul.mubr.bf16.gmra.mrb[104].mxu1 %v13338_v27  ;;  %v5842_v40 = vshll.u32 %v11830_v17, 16 }
 0x465   : > { %v6122_v34 = vsel %vm14252_vm4, 0, %v6121_v6  ;;  %v5841_v63 = vrot.slane %v5839_v33, 7  ;;  %v5848_v56 = vshrl.u32 %v11831_v41, 16  ;;  %v12256_v20 = vadd.f32 %v14559_v21, %v5049_v13  ;;  %v5051_v28 = vpop.f32.mrb[83].mxu0  ;;  %9853 = vmatprep.mubr.bf16.mxu1 %v6670_v1  ;;  %v13343_v7 = vld [vmem:[#allocation4 + $0x88] sm:$0xff]  }
 0x466   : > { %6123 = vst [vmem:[#allocation4 + $0x98] sm:$0xf] %v6122_v34  ;;  %v5272_v57 = vadd.f32 %v12255_v4, %v14410_v2  ;;  %v8784_v32 = vrot.slane %v13340_v31, 1  ;;  %v14742_v45 = vld [vmem:[#allocation4 + $0x90] sm:$0xff]   ;;  %v5851_v9 = vshll.u32 %v11831_v41, 16  ;;  %v6675_v53 = vshll.u32 %v13343_v7, 16 }
 0x467   : > { %v5844_v5 = vor.u32 %v5842_v40, %v5841_v63  ;;  %v5850_v25 = vrot.slane %v5848_v56, 7  ;;  %v5275_v3 = vadd.f32 %v12256_v20, %v14421_v22  ;;  %v8786_v58 = vrot.slane %v14742_v45, 1  ;;  %v14747_v21 = vld [vmem:[#allocation4 + $0x90] sm:$0xff]  }
 0x468   : > { %v5342_v11 = vmax.f32 %v5272_v57, 0.0  ;;  %v8785_v15 = vsel %vm1478_vm1, %v8782_v30, %v8784_v32  ;;  %v5846_v2 = vrot.slane %v5841_v63, 4  ;;  %v13342_v30 = vld [vmem:[#allocation4 + $0x78] sm:$0xff]   ;;  %v6677_v42 = vrot.slane %v6675_v53, 1 }
 0x469   : > { %v5845_v12 = vsel %vm14336_vm7, %v5837_v49, %v5844_v5  ;;  %v5853_v37 = vor.u32 %v5851_v9, %v5850_v25  ;;  %v5343_v43 = vmax.f32 %v5275_v3, 0.0  ;;  %12176 = vmatmul.mubr.bf16.gmra.mrb[120].mxu0 %v8785_v15  ;;  %v6124_v62 = vld [vmem:[#allocation4 + $0x9c] sm:$0x1]  ;;  %v8787_v22 = vsel %vm1478_vm1, %v8784_v32, %v8786_v58  ;;  %v13345_v32 = vld [vmem:[#allocation4 + $0x80] sm:$0xff]  }
 0x46a   : > { %6020 = vst [vmem:[#allocation4 + $0xa4] sm:$0xf] %v5845_v12  ;;  %v11832_v18 = vpack.c.bf16 %v5342_v11, %v5342_v11  ;;  %v5054_v52 = vpop.f32.mrb[84].mxu0  ;;  %12179 = vmatprep.mubr.bf16.mxu0 %v8787_v22  ;;  %v6678_v54 = vsel %vm1061_vm0, %v6673_v38, %v6677_v42  ;;  %v6683_v24 = vshll.u32 %v14747_v21, 16  ;;  %v6679_v46 = vshrl.u32 %v13343_v7, 16 }
 0x46b   : > { %v5854_v50 = vsel %vm14336_vm7, %v5846_v2, %v5853_v37  ;;  %v11833_v14 = vpack.c.bf16 %v5343_v43, %v5343_v43  ;;  %v12257_v51 = vadd.f32 %v14759_v16, %v5054_v52  ;;  %v5056_v19 = vpop.f32.mrb[85].mxu0  ;;  %v6125_v33 = vsel %vm14353_vm9, 0, %v6124_v62 }
 0x46c   : > { %6021 = vst [vmem:[#allocation4 + $0xa8] sm:$0xf] %v5854_v50  ;;  %v5857_v23 = vshrl.u32 %v11832_v18, 16  ;;  %v5057_v17 = vpop.f32.mrb[86].mxu0  ;;  %9854 = vmatmul.mubr.bf16.gmra.mrb[108].mxu1 %v13342_v30  ;;  %v5860_v60 = vshll.u32 %v11832_v18, 16  ;;  %v5855_v34 = vrot.slane %v5850_v25, 4  ;;  %v6681_v13 = vor.u32 %v6679_v46, %v6677_v42 }
 0x46d   : > { %v5866_v55 = vshrl.u32 %v11833_v14, 16  ;;  %v5280_v27 = vadd.f32 %v12257_v51, %v14405_v39  ;;  %v12258_v44 = vadd.f32 %v14759_v16, %v5057_v17  ;;  %v5059_v35 = vpop.f32.mrb[87].mxu0  ;;  %9861 = vmatprep.mubr.bf16.mxu1 %v6678_v54  ;;  %v5869_v49 = vshll.u32 %v11833_v14, 16  ;;  %6126 = vst [vmem:[#allocation4 + $0x9c] sm:$0x1] %v6125_v33 }
 0x46e   : > { %v5859_v6 = vrot.slane %v5857_v23, 7  ;;  %v6685_v39 = vrot.slane %v6683_v24, 1  ;;  %v6687_v3 = vshrl.u32 %v14747_v21, 16  ;;  %v13349_v35 = vld [vmem:[#allocation4 + $0x88] sm:$0xff]  }
 0x46f   : > { %v5868_v41 = vrot.slane %v5866_v55, 7  ;;  %v5344_v47 = vmax.f32 %v5280_v27, 0.0  ;;  %v5283_v31 = vadd.f32 %v12258_v44, %v14414_v29 }
 0x470   : > { %v5862_v4 = vor.u32 %v5860_v60, %v5859_v6  ;;  %v5864_v63 = vrot.slane %v5859_v6, 4  ;;  %v6686_v12 = vsel %vm1061_vm0, %v6681_v13, %v6685_v39 }
 0x471   : > { %v6127_v1 = vld [vmem:[#allocation4 + $0xa4] sm:$0xf]  ;;  %v5871_v40 = vor.u32 %v5869_v49, %v5868_v41  ;;  %v11834_v56 = vpack.c.bf16 %v5344_v47, %v5344_v47  ;;  %v5345_v20 = vmax.f32 %v5283_v31, 0.0  ;;  %v5873_v21 = vrot.slane %v5868_v41, 4 }
 0x472   : > { %v6128_v28 = vsel %vm14252_vm4, 0, %v6127_v1  ;;  %v5863_v7 = vsel %vm14336_vm7, %v5855_v34, %v5862_v4  ;;  %v5062_v57 = vpop.f32.mrb[88].mxu0  ;;  %v6689_v47 = vor.u32 %v6687_v3, %v6685_v39 }
 0x473   : > { %6129 = vst [vmem:[#allocation4 + $0xa4] sm:$0xf] %v6128_v28  ;;  %6022 = vst [vmem:[#allocation4 + $0xac] sm:$0xf] %v5863_v7  ;;  %v5872_v29 = vsel %vm14336_vm7, %v5864_v63, %v5871_v40  ;;  %v5875_v5 = vshrl.u32 %v11834_v56, 16  ;;  %v11835_v25 = vpack.c.bf16 %v5345_v20, %v5345_v20  ;;  %v5064_v9 = vpop.f32.mrb[89].mxu0  ;;  %v12259_v15 = vadd.f32 %v14759_v16, %v5062_v57 }
 0x474   : > { %v6130_v11 = vld [vmem:[#allocation4 + $0xa8] sm:$0x1]  ;;  %6023 = vst [vmem:[#allocation4 + $0xb0] sm:$0xf] %v5872_v29  ;;  %v5065_v53 = vpop.f32.mrb[90].mxu0  ;;  %9862 = vmatmul.mubr.bf16.gmra.mrb[112].mxu1 %v13345_v32  ;;  %v5878_v43 = vshll.u32 %v11834_v56, 16 }
 0x475   : > { %v6131_v2 = vsel %vm14353_vm9, 0, %v6130_v11  ;;  %v5877_v37 = vrot.slane %v5875_v5, 7  ;;  %v5884_v62 = vshrl.u32 %v11835_v25, 16  ;;  %v12260_v18 = vadd.f32 %v14759_v16, %v5065_v53  ;;  %v5067_v52 = vpop.f32.mrb[91].mxu0  ;;  %9869 = vmatprep.mubr.bf16.mxu1 %v6686_v12  ;;  %v13347_v30 = vld [vmem:[#allocation4 + $0x98] sm:$0xff]  }
 0x476   : > { %6132 = vst [vmem:[#allocation4 + $0xa8] sm:$0x1] %v6131_v2  ;;  %v5288_v22 = vadd.f32 %v12259_v15, %v14461_v26  ;;  %v5887_v50 = vshll.u32 %v11835_v25, 16  ;;  %v14783_v51 = vld [vmem:[#allocation4 + $0x98] sm:$0xff]   ;;  %v8788_v23 = vrot.slane %v13347_v30, 1 }
 0x477   : > { %v5880_v38 = vor.u32 %v5878_v43, %v5877_v37  ;;  %v5886_v42 = vrot.slane %v5884_v62, 7  ;;  %v5291_v14 = vadd.f32 %v12260_v18, %v14494_v10  ;;  %v5882_v54 = vrot.slane %v5877_v37, 4  ;;  %v13353_v62 = vld [vmem:[#allocation4 + $0x90] sm:$0xff]  }
 0x478   : > { %v5346_v19 = vmax.f32 %v5288_v22, 0.0  ;;  %v8789_v26 = vsel %vm1478_vm1, %v8786_v58, %v8788_v23  ;;  %v6691_v10 = vshll.u32 %v14783_v51, 16 }
 0x479   : > { %v5881_v17 = vsel %vm14336_vm7, %v5873_v21, %v5880_v38  ;;  %v5889_v24 = vor.u32 %v5887_v50, %v5886_v42  ;;  %v5347_v55 = vmax.f32 %v5291_v14, 0.0  ;;  %12180 = vmatmul.mubr.bf16.gmra.mrb[124].mxu0 %v8789_v26  ;;  %v5891_v3 = vrot.slane %v5886_v42, 4 }
 0x47a   : > { %6024 = vst [vmem:[#allocation4 + $0xb4] sm:$0xf] %v5881_v17  ;;  %v11836_v27 = vpack.c.bf16 %v5346_v19, %v5346_v19  ;;  %v5070_v44 = vpop.f32.mrb[92].mxu0  ;;  %v13351_v46 = vld [vmem:[#allocation4 + $0xa0] sm:$0xff]   ;;  %v6693_v4 = vrot.slane %v6691_v10, 1 }
 0x47b   : > { %v6133_v6 = vld [vmem:[#allocation4 + $0xb0] sm:$0xf]  ;;  %v5890_v60 = vsel %vm14336_vm7, %v5882_v54, %v5889_v24  ;;  %v11837_v49 = vpack.c.bf16 %v5347_v55, %v5347_v55  ;;  %v12261_v33 = vadd.f32 %v14759_v16, %v5070_v44  ;;  %v5072_v41 = vpop.f32.mrb[93].mxu0  ;;  %v13354_v39 = vld [vmem:[#allocation4 + $0xa0] sm:$0xff]   ;;  %v8790_v57 = vrot.slane %v13351_v46, 1 }
 0x47c   : > { %v6134_v45 = vsel %vm14252_vm4, 0, %v6133_v6  ;;  %6025 = vst [vmem:[#allocation4 + $0xb8] sm:$0xf] %v5890_v60  ;;  %v5893_v58 = vshrl.u32 %v11836_v27, 16  ;;  %v5896_v31 = vshll.u32 %v11836_v27, 16  ;;  %v5073_v34 = vpop.f32.mrb[94].mxu0  ;;  %9870 = vmatmul.mubr.bf16.gmra.mrb[116].mxu1 %v13349_v35  ;;  %v6694_v7 = vsel %vm1061_vm0, %v6689_v47, %v6693_v4 }
 0x47d   : > { %v14796_v13 = vld [vmem:[#allocation4 + $0xa8] sm:$0xff]   ;;  %6135 = vst [vmem:[#allocation4 + $0xb0] sm:$0xf] %v6134_v45  ;;  %v5902_v1 = vshrl.u32 %v11837_v49, 16  ;;  %v5905_v63 = vshll.u32 %v11837_v49, 16  ;;  %v5296_v40 = vadd.f32 %v12261_v33, %v14454_v61  ;;  %v12262_v56 = vadd.f32 %v14759_v16, %v5073_v34  ;;  %v5075_v20 = vpop.f32.mrb[95].mxu0  ;;  %9877 = vmatprep.mubr.bf16.mxu1 %v6694_v7 }
 0x47e   : > { %v5895_v28 = vrot.slane %v5893_v58, 7  ;;  %v8792_v32 = vrot.slane %v14796_v13, 1  ;;  %v14802_v29 = vld [vmem:[#allocation4 + $0xa8] sm:$0xff]   ;;  %v8791_v61 = vsel %vm1478_vm1, %v8788_v23, %v8790_v57  ;;  %v6699_v18 = vshll.u32 %v13354_v39, 16  ;;  %v13356_v33 = vld [vmem:[#allocation4 + $0x98] sm:$0xff]  }
 0x47f   : > { %v5904_v5 = vrot.slane %v5902_v1, 7  ;;  %v5348_v25 = vmax.f32 %v5296_v40, 0.0  ;;  %v5299_v9 = vadd.f32 %v12262_v56, %v14468_v48  ;;  %12183 = vmatprep.mubr.bf16.mxu0 %v8791_v61  ;;  %v6695_v48 = vshrl.u32 %v14783_v51, 16  ;;  %v6032_v54 = vld [vmem:[#allocation4 + $0xcc] sm:$0x1] }
 0x480   : > { %v5898_v11 = vor.u32 %v5896_v31, %v5895_v28  ;;  %v8793_v16 = vsel %vm1478_vm1, %v8790_v57, %v8792_v32  ;;  %v5900_v15 = vrot.slane %v5895_v28, 4  ;;  %v6707_v30 = vshll.u32 %v14802_v29, 16 }
 0x481   : > { %v5907_v53 = vor.u32 %v5905_v63, %v5904_v5  ;;  %v11838_v12 = vpack.c.bf16 %v5348_v25, %v5348_v25  ;;  %v5349_v2 = vmax.f32 %v5299_v9, 0.0  ;;  %v6136_v37 = vld [vmem:[#allocation4 + $0xb4] sm:$0x1]  ;;  %12184 = vmatmul.mubr.bf16.gmra.mrb[128].mxu0 %v8793_v16  ;;  %v5909_v38 = vrot.slane %v5904_v5, 4 }
 0x482   : > { %v5899_v43 = vsel %vm14336_vm7, %v5891_v3, %v5898_v11  ;;  %v6697_v42 = vor.u32 %v6695_v48, %v6693_v4  ;;  %v6701_v50 = vrot.slane %v6699_v18, 1  ;;  %v6137_v14 = vsel %vm14353_vm9, 0, %v6136_v37 }
 0x483   : > { %6026 = vst [vmem:[#allocation4 + $0xbc] sm:$0xf] %v5899_v43  ;;  %v5908_v52 = vsel %vm14336_vm7, %v5900_v15, %v5907_v53  ;;  %v5911_v21 = vshrl.u32 %v11838_v12, 16  ;;  %v11839_v22 = vpack.c.bf16 %v5349_v2, %v5349_v2  ;;  %v5914_v51 = vshll.u32 %v11838_v12, 16  ;;  %6138 = vst [vmem:[#allocation4 + $0xb4] sm:$0x1] %v6137_v14 }
 0x484   : > { %6027 = vst [vmem:[#allocation4 + $0xc0] sm:$0xf] %v5908_v52  ;;  %9878 = vmatmul.mubr.bf16.gmra.mrb[120].mxu1 %v13353_v62  ;;  %v6703_v17 = vshrl.u32 %v13354_v39, 16  ;;  %v6702_v24 = vsel %vm1061_vm0, %v6697_v42, %v6701_v50  ;;  %v6709_v44 = vrot.slane %v6707_v30, 1  ;;  %v6711_v56 = vshrl.u32 %v14802_v29, 16  ;;  %v13360_v39 = vld [vmem:[#allocation4 + $0xa0] sm:$0xff]  }
 0x485   : > { %v5913_v19 = vrot.slane %v5911_v21, 7  ;;  %v5920_v23 = vshrl.u32 %v11839_v22, 16  ;;  %v5923_v26 = vshll.u32 %v11839_v22, 16  ;;  %9885 = vmatprep.mubr.bf16.mxu1 %v6702_v24  ;;  %v13363_v15 = vld [vmem:[#allocation4 + $0xa8] sm:$0xff]   ;;  %v13371_v30 = vld [vmem:[#allocation4] sm:$0xfe]  }
 0x486   : > { %v6705_v35 = vor.u32 %v6703_v17, %v6701_v50  ;;  %v6713_v28 = vor.u32 %v6711_v56, %v6709_v44  ;;  %v13370_v22 = vld [vmem:[#allocation4 + $0xc] sm:$0xff]   ;;  %v6955_v50 = vrot.slane %v13371_v30, 1  ;;  %v13377_v17 = vld [vmem:[#allocation10 + $0x108] sm:$0xff]   ;;  %v13382_v24 = vld [vmem:[#allocation10 + $0x110] sm:$0xff]  }
 0x487   : > { %v5916_v55 = vor.u32 %v5914_v51, %v5913_v19  ;;  %v5922_v27 = vrot.slane %v5920_v23, 7  ;;  %v5918_v46 = vrot.slane %v5913_v19, 4  ;;  %v13372_v42 = vld [vmem:[#allocation4 + $0x8] sm:$0xff]   ;;  %v13373_v51 = vld [vmem:[#allocation4 + $0x14] sm:$0xff]  }
 0x488   : > { %v6710_v34 = vsel %vm1061_vm0, %v6705_v35, %v6709_v44  ;;  %v6956_v14 = vrot.slane %v13372_v42, 1  ;;  %v13375_v23 = vld [vmem:[#allocation4 + $0x10] sm:$0xff]  }
 0x489   : > { %v5917_v10 = vsel %vm14336_vm7, %v5909_v38, %v5916_v55  ;;  %v5925_v6 = vor.u32 %v5923_v26, %v5922_v27  ;;  %v5927_v60 = vrot.slane %v5922_v27, 4  ;;  %v13376_v55 = vld [vmem:[#allocation4 + $0x1c] sm:$0xff]   ;;  %v13385_v44 = vld [vmem:[#allocation10 + $0x118] sm:$0xff]   ;;  %v13395_v30 = vld [vmem:[#allocation4 + $0x54] sm:$0xff]  }
 0x48a   : > { %v6139_v49 = vld [vmem:[#allocation4 + $0xbc] sm:$0xf]  ;;  %6028 = vst [vmem:[#allocation4 + $0xc4] sm:$0xf] %v5917_v10  ;;  %v13358_v4 = vld [vmem:[#allocation4 + $0xb0] sm:$0xff]   ;;  %v6957_v19 = vsel %vm1478_vm1, %v6955_v50, %v6956_v14 }
 0x48b   : > { %v6140_v41 = vsel %vm14252_vm4, 0, %v6139_v49  ;;  %v6142_v47 = vld [vmem:[#allocation4 + $0xc0] sm:$0x1]  ;;  %v5926_v45 = vsel %vm14336_vm7, %v5918_v46, %v5925_v6  ;;  %v6033_v58 = vsel %vm14353_vm9, %v5927_v60, %v6032_v54  ;;  %v13361_v1 = vld [vmem:[#allocation4 + $0xb0] sm:$0xff]   ;;  %v8794_v63 = vrot.slane %v13358_v4, 1  ;;  %v13378_v26 = vld [vmem:[#allocation4 + $0x18] sm:$0xff]  }
 0x48c   : > { %6141 = vst [vmem:[#allocation4 + $0xbc] sm:$0xf] %v6140_v41  ;;  %v6143_v31 = vsel %vm14353_vm9, 0, %v6142_v47  ;;  %6029 = vst [vmem:[#allocation4 + $0xc8] sm:$0xf] %v5926_v45  ;;  %9886 = vmatmul.mubr.bf16.gmra.mrb[124].mxu1 %v13356_v33  ;;  %v6715_v40 = vshll.u32 %v13361_v1, 16 }
 0x48d   : > { %6034 = vst [vmem:[#allocation4 + $0xcc] sm:$0x1] %v6033_v58  ;;  %6144 = vst [vmem:[#allocation4 + $0xc0] sm:$0x1] %v6143_v31  ;;  %9893 = vmatprep.mubr.bf16.mxu1 %v6710_v34  ;;  %v8795_v8 = vsel %vm1478_vm1, %v8792_v32, %v8794_v63  ;;  %v6719_v16 = vshrl.u32 %v13361_v1, 16  ;;  %v13366_v52 = vld [vmem:[#allocation4 + $0xb0] sm:$0xff]  }
 0x48e   : > { %12187 = vmatprep.mubr.bf16.mxu0 %v8795_v8  ;;  %v6717_v20 = vrot.slane %v6715_v40, 1  ;;  %v6958_v54 = vrot.slane %v13375_v23, 1  ;;  %v6960_v35 = vrot.slane %v13378_v26, 1  ;;  %v13390_v10 = vld [vmem:[#allocation10 + $0x120] sm:$0xff]   ;;  %v13379_v46 = vld [vmem:[#allocation4 + $0x24] sm:$0xff]   ;;  %v13393_v49 = vld [vmem:[#allocation10 + $0x128] sm:$0xff]  }
 0x48f   : > { %v13380_v60 = vld [vmem:[#allocation4 + $0x20] sm:$0xff]   ;;  %v13381_v47 = vld [vmem:[#allocation4 + $0x2c] sm:$0xff]   ;;  %v13384_v4 = vld [vmem:[#allocation4 + $0x34] sm:$0xff]  }
 0x490   : > { %v6718_v9 = vsel %vm1061_vm0, %v6713_v28, %v6717_v20  ;;  %v6721_v53 = vor.u32 %v6719_v16, %v6717_v20  ;;  %v6959_v27 = vsel %vm1478_vm1, %v6956_v14, %v6958_v54  ;;  %v6961_v6 = vsel %vm1478_vm1, %v6958_v54, %v6960_v35  ;;  %v13398_v41 = vld [vmem:[#allocation10 + $0x130] sm:$0xff]   ;;  %v13401_v31 = vld [vmem:[#allocation10 + $0x138] sm:$0xff]   ;;  %v13406_v1 = vld [vmem:[#allocation10 + $0x140] sm:$0xff]  }
 0x491   : > { %v6962_v33 = vrot.slane %v13380_v60, 1  ;;  %v13383_v58 = vld [vmem:[#allocation4 + $0x28] sm:$0xff]   ;;  %v13409_v8 = vld [vmem:[#allocation10 + $0x148] sm:$0xff]   ;;  %v13396_v42 = vld [vmem:[#allocation4 + $0x50] sm:$0xff]  }
 0x492   : > { %v6964_v34 = vrot.slane %v13383_v58, 1  ;;  %v13414_v20 = vld [vmem:[#allocation10 + $0x150] sm:$0xff]   ;;  %v13387_v28 = vld [vmem:[#allocation4 + $0x3c] sm:$0xff]   ;;  %v13407_v58 = vld [vmem:[#allocation4 + $0x70] sm:$0xff]  }
 0x493   : > { %v6145_v57 = vld [vmem:[#allocation4 + $0xc8] sm:$0xf]  ;;  %v14838_v13 = vld [vmem:[#allocation4 + $0xb8] sm:$0xff]   ;;  %v6963_v45 = vsel %vm1478_vm1, %v6960_v35, %v6962_v33  ;;  %v13402_v26 = vld [vmem:[#allocation4 + $0x60] sm:$0xff]  }
 0x494   : > { %v6041_v7 = vld [vmem:[#allocation4 + $0xcc] sm:$0xf]  ;;  %v6146_v25 = vsel %vm14252_vm4, 0, %v6145_v57  ;;  %9894 = vmatmul.mubr.bf16.gmra.mrb[128].mxu1 %v13360_v39  ;;  %v13364_v32 = vld [vmem:[#allocation4 + $0xb8] sm:$0xff]   ;;  %v15317_v29 = vrot.slane %v14838_v13, 1  ;;  %v6965_v40 = vsel %vm1478_vm1, %v6962_v33, %v6964_v34 }
 0x495   : > { %v6042_v5 = vsel %vm14252_vm4, 0, %v6041_v7  ;;  %6147 = vst [vmem:[#allocation4 + $0xc8] sm:$0xf] %v6146_v25  ;;  %9901 = vmatprep.mubr.bf16.mxu1 %v6718_v9  ;;  %v6723_v3 = vshll.u32 %v13364_v32, 16  ;;  %v6727_v62 = vshrl.u32 %v13364_v32, 16  ;;  %v13369_v38 = vld [vmem:[#allocation4 + $0xb8] sm:$0xff]  }
 0x496   : > { %6043 = vst [vmem:[#allocation4 + $0xcc] sm:$0xf] %v6042_v5  ;;  %v13367_v11 = vld [vmem:[#allocation4 + $0xc0] ss:$0 sps:$4 sm:$0x11]   ;;  %v8797_v61 = vsel %vm1478_vm1, %v8794_v63, %v15317_v29  ;;  %v13386_v63 = vld [vmem:[#allocation4 + $0x30] sm:$0xff]  }
 0x497   : > { %v6725_v36 = vrot.slane %v6723_v3, 1  ;;  %12188 = vmatmul.mubr.bf16.gmra.mrb[132].mxu0 %v8797_v61  ;;  %v6731_v37 = vshll.u32 %v13367_v11, 16  ;;  %v6966_v56 = vrot.slane %v13386_v63, 1  ;;  %v13388_v7 = vld [vmem:[#allocation4 + $0x38] sm:$0xff]   ;;  %v13417_v25 = vld [vmem:[#allocation10 + $0x158] sm:$0xff]   ;;  %v13389_v61 = vld [vmem:[#allocation4 + $0x44] sm:$0xff]  }
 0x498   : > { %v6968_v3 = vrot.slane %v13388_v7, 1  ;;  %v13422_v11 = vld [vmem:[#allocation10 + $0x160] sm:$0xff]   ;;  %v13397_v23 = vld [vmem:[#allocation4 + $0x5c] sm:$0xff]   ;;  %v13403_v35 = vld [vmem:[#allocation4 + $0x6c] sm:$0xff]  }
 0x499   : > { %v6726_v2 = vsel %vm1061_vm0, %v6721_v53, %v6725_v36  ;;  %v6729_v48 = vor.u32 %v6727_v62, %v6725_v36  ;;  %v6733_v18 = vrot.slane %v6731_v37, 1  ;;  %v6967_v39 = vsel %vm1478_vm1, %v6964_v34, %v6966_v56  ;;  %v13391_v36 = vld [vmem:[#allocation4 + $0x40] sm:$0xff]   ;;  %v13433_v62 = vld [vmem:[#allocation10 + $0x178] sm:$0xff]   ;;  %v13399_v54 = vld [vmem:[#allocation4 + $0x58] sm:$0xff]  }
 0x49a   : > { %v6969_v16 = vsel %vm1478_vm1, %v6966_v56, %v6968_v3  ;;  %v6970_v53 = vrot.slane %v13391_v36, 1  ;;  %v13412_v7 = vld [vmem:[#allocation4 + $0x80] sm:$0xff]  }
 0x49b   : > { %v6734_v21 = vsel %vm1061_vm0, %v6729_v48, %v6733_v18  ;;  %v13502_v29 = vld [vmem:[#allocation4 + $0x20] sm:$0xff]  }
 0x49c   : > { %9902 = vmatmul.mubr.bf16.gmra.mrb[132].mxu1 %v13363_v15  ;;  %v13425_v15 = vld [vmem:[#allocation10 + $0x168] sm:$0xff]   ;;  %v6971_v37 = vsel %vm1478_vm1, %v6968_v3, %v6970_v53 }
 0x49d   : > { %v6148_v12 = vld [vmem:[#allocation4 + $0xcc] sm:$0x1]  ;;  %9909 = vmatprep.mubr.bf16.mxu1 %v6726_v2 }
 0x49e   : > { %v6149_v43 = vsel %vm14353_vm9, 0, %v6148_v12  ;;  %v13430_v12 = vld [vmem:[#allocation10 + $0x170] sm:$0xff]   ;;  %v13392_v2 = vld [vmem:[#allocation4 + $0x4c] sm:$0xff]  }
 0x49f   : > { %6150 = vst [vmem:[#allocation4 + $0xcc] sm:$0x1] %v6149_v43  ;;  %v13394_v43 = vld [vmem:[#allocation4 + $0x48] sm:$0xff]  }
 0x4a4   : > { %9910 = vmatmul.mubr.bf16.gmra.mrb[136].mxu1 %v13366_v52  ;;  %v6972_v52 = vrot.slane %v13394_v43, 1  ;;  %v13418_v43 = vld [vmem:[#allocation4 + $0x90] sm:$0xff]  }
 0x4a5   : > { %9917 = vmatprep.mubr.bf16.mxu1 %v6734_v21 }
 0x4ac   : > { %9918 = vmatmul.mubr.bf16.gmra.mrb[140].mxu1 %v13369_v38  ;;  %v6973_v38 = vsel %vm1478_vm1, %v6970_v53, %v6972_v52  ;;  %v13415_v53 = vld [vmem:[#allocation4 + $0x88] sm:$0xff]  }
 0x4ad   : > { %9958 = vmatprep.mubr.bf16.mxu1 %v13370_v22 }
 0x4b4   : > { %9959 = vmatmul.mubr.bf16.vlgmr.msra.gmra.mrb[48].mxu1 %v6957_v19 }
 0x4b5   : > { %9966 = vmatprep.mubr.bf16.mxu1 %v13373_v51  ;;  %10152 = vmatpush1.bf16.msra.mxu1 %v13374_v59  ;;  %v6974_v59 = vrot.slane %v13396_v42, 1 }
 0x4b6   : > { %10153 = vmatprep.subr.bf16.mxu1 %v13729_v0 }
 0x4b9   : > { %10154 = vmatpush1.bf16.msra.mxu1 %v13377_v17  ;;  %v6975_v17 = vsel %vm1478_vm1, %v6972_v52, %v6974_v59 }
 0x4ba   : > { %10155 = vmatprep.subr.bf16.mxu1 %v13729_v0 }
 0x4bc   : > { %9967 = vmatmul.mubr.bf16.gmra.mrb[52].mxu1 %v6959_v27 }
 0x4bd   : > { %9974 = vmatprep.mubr.bf16.mxu1 %v13376_v55  ;;  %10156 = vmatpush1.bf16.msra.mxu1 %v13382_v24  ;;  %v6976_v24 = vrot.slane %v13399_v54, 1  ;;  %v13400_v55 = vld [vmem:[#allocation4 + $0x64] sm:$0xff]  }
 0x4be   : > { %10157 = vmatprep.subr.bf16.mxu1 %v13729_v0 }
 0x4bf   : > { %v6977_v27 = vsel %vm1478_vm1, %v6974_v59, %v6976_v24 }
 0x4c1   : > { %10158 = vmatpush1.bf16.msra.mxu1 %v13385_v44  ;;  %v6978_v44 = vrot.slane %v13402_v26, 1 }
 0x4c2   : > { %10159 = vmatprep.subr.bf16.mxu1 %v13729_v0 }
 0x4c4   : > { %9975 = vmatmul.mubr.bf16.gmra.mrb[56].mxu1 %v6961_v6 }
 0x4c5   : > { %9982 = vmatprep.mubr.bf16.mxu1 %v13379_v46  ;;  %10160 = vmatpush1.bf16.msra.mxu1 %v13390_v10  ;;  %v6979_v10 = vsel %vm1478_vm1, %v6976_v24, %v6978_v44  ;;  %v13404_v46 = vld [vmem:[#allocation4 + $0x68] sm:$0xff]  }
 0x4c6   : > { %10161 = vmatprep.subr.bf16.mxu1 %v13729_v0 }
 0x4c9   : > { %10162 = vmatpush1.bf16.msra.mxu1 %v13393_v49 }
 0x4ca   : > { %10163 = vmatprep.subr.bf16.mxu1 %v13729_v0 }
 0x4cc   : > { %9983 = vmatmul.mubr.bf16.gmra.mrb[60].mxu1 %v6963_v45  ;;  %v13405_v45 = vld [vmem:[#allocation4 + $0x74] sm:$0xff]  }
 0x4cd   : > { %9990 = vmatprep.mubr.bf16.mxu1 %v13381_v47  ;;  %10164 = vmatpush1.bf16.msra.mxu1 %v13398_v41  ;;  %v6980_v41 = vrot.slane %v13404_v46, 1 }
 0x4ce   : > { %10165 = vmatprep.subr.bf16.mxu1 %v13729_v0 }
 0x4cf   : > { %v6981_v47 = vsel %vm1478_vm1, %v6978_v44, %v6980_v41 }
 0x4d1   : > { %10166 = vmatpush1.bf16.msra.mxu1 %v13401_v31  ;;  %v6982_v31 = vrot.slane %v13407_v58, 1 }
 0x4d2   : > { %10167 = vmatprep.subr.bf16.mxu1 %v13729_v0 }
 0x4d3   : > { %v6983_v34 = vsel %vm1478_vm1, %v6980_v41, %v6982_v31 }
 0x4d4   : > { %9991 = vmatmul.mubr.bf16.gmra.mrb[64].mxu1 %v6965_v40 }
 0x4d5   : > { %9998 = vmatprep.mubr.bf16.mxu1 %v13384_v4  ;;  %10168 = vmatpush1.bf16.msra.mxu1 %v13406_v1  ;;  %v13408_v4 = vld [vmem:[#allocation4 + $0x7c] sm:$0xff]  }
 0x4d6   : > { %10169 = vmatprep.subr.bf16.mxu1 %v13729_v0  ;;  %v13410_v1 = vld [vmem:[#allocation4 + $0x78] sm:$0xff]  }
 0x4d9   : > { %10170 = vmatpush1.bf16.msra.mxu1 %v13409_v8  ;;  %v6984_v8 = vrot.slane %v13410_v1, 1 }
 0x4da   : > { %10171 = vmatprep.subr.bf16.mxu1 %v13729_v0 }
 0x4dc   : > { %v14864_v57 = vpop.f32.mrb[96].mxu0  ;;  %9999 = vmatmul.mubr.bf16.gmra.mrb[68].mxu1 %v6967_v39  ;;  %v6985_v39 = vsel %vm1478_vm1, %v6982_v31, %v6984_v8 }
 0x4dd   : > { %v14866_v5 = vpop.f32.mrb[97].mxu0  ;;  %10006 = vmatprep.mubr.bf16.mxu1 %v13387_v28  ;;  %10172 = vmatpush1.bf16.msra.mxu1 %v13414_v20  ;;  %v13411_v28 = vld [vmem:[#allocation4 + $0x84] sm:$0xff]  }
 0x4de   : > { %v14868_v9 = vpop.f32.mrb[98].mxu0  ;;  %10173 = vmatprep.subr.bf16.mxu1 %v13729_v0 }
 0x4df   : > { %v14871_v32 = vpop.f32.mrb[99].mxu0 }
 0x4e1   : > { %10174 = vmatpush1.bf16.msra.mxu1 %v13417_v25 }
 0x4e2   : > { %10175 = vmatprep.subr.bf16.mxu1 %v13729_v0 }
 0x4e4   : > { %10007 = vmatmul.mubr.bf16.gmra.mrb[72].mxu1 %v6969_v16 }
 0x4e5   : > { %10014 = vmatprep.mubr.bf16.mxu1 %v13389_v61  ;;  %10176 = vmatpush1.bf16.msra.mxu1 %v13422_v11  ;;  %v6986_v11 = vrot.slane %v13412_v7, 1 }
 0x4e6   : > { %10177 = vmatprep.subr.bf16.mxu1 %v13729_v0 }
 0x4e7   : > { %v6987_v36 = vsel %vm1478_vm1, %v6984_v8, %v6986_v11 }
 0x4e9   : > { %10178 = vmatpush1.bf16.msra.mxu1 %v13425_v15  ;;  %v13413_v15 = vld [vmem:[#allocation4 + $0x8c] sm:$0xff]  }
 0x4ea   : > { %10179 = vmatprep.subr.bf16.mxu1 %v13729_v0 }
 0x4ec   : > { %10015 = vmatmul.mubr.bf16.gmra.mrb[76].mxu1 %v6971_v37  ;;  %v14878_v48 = vpop.f32.mrb[100].mxu0  ;;  %v13416_v37 = vld [vmem:[#allocation4 + $0x94] sm:$0xff]  }
 0x4ed   : > { %10022 = vmatprep.mubr.bf16.mxu1 %v13392_v2  ;;  %10180 = vmatpush1.bf16.msra.mxu1 %v13430_v12  ;;  %v14881_v18 = vpop.f32.mrb[101].mxu0  ;;  %v6988_v12 = vrot.slane %v13415_v53, 1 }
 0x4ee   : > { %10181 = vmatprep.subr.bf16.mxu1 %v13729_v0  ;;  %v14883_v21 = vpop.f32.mrb[102].mxu0 }
 0x4ef   : > { %v14885_v22 = vpop.f32.mrb[103].mxu0  ;;  %v6989_v2 = vsel %vm1478_vm1, %v6986_v11, %v6988_v12 }
 0x4f1   : > { %10182 = vmatpush1.bf16.msra.mxu1 %v13433_v62  ;;  %v6990_v62 = vrot.slane %v13418_v43, 1  ;;  %v13437_v43 = vld [vmem:[#allocation4 + $0xc] sm:$0xff]  }
 0x4f2   : > { %10376 = vmatprep.subr.bf16.mxu1 %v13729_v0 }
 0x4f3   : > { %v6991_v52 = vsel %vm1478_vm1, %v6988_v12, %v6990_v62 }
 0x4f4   : > { %10023 = vmatmul.mubr.bf16.gmra.mrb[80].mxu1 %v6973_v38  ;;  %v14889_v50 = vpop.f32.mrb[104].mxu0  ;;  %v13420_v38 = vld [vmem:[#allocation4 + $0x98] sm:$0xff]  }
 0x4f5   : > { %10030 = vmatprep.mubr.bf16.mxu1 %v13395_v30  ;;  %v14891_v14 = vpop.f32.mrb[105].mxu0  ;;  %v13419_v30 = vld [vmem:[#allocation4 + $0x9c] sm:$0xff]   ;;  %v6992_v54 = vrot.slane %v13420_v38, 1  ;;  %v13438_v38 = vld [vmem:[#allocation4 + $0x14] sm:$0xff]  }
 0x4f6   : > { %v14893_v19 = vpop.f32.mrb[106].mxu0 }
 0x4f7   : > { %v14895_v51 = vpop.f32.mrb[107].mxu0  ;;  %v6993_v24 = vsel %vm1478_vm1, %v6990_v62, %v6992_v54  ;;  %v13436_v62 = vld [vmem:[#allocation4 + $0x14] sm:$0xff]  }
 0x4fc   : > { %10031 = vmatmul.mubr.bf16.gmra.mrb[84].mxu1 %v6975_v17 }
 0x4fd   : > { %10038 = vmatprep.mubr.bf16.mxu1 %v13397_v23 }
 0x504   : > { %10039 = vmatmul.mubr.bf16.gmra.mrb[88].mxu1 %v6977_v27  ;;  %v13423_v27 = vld [vmem:[#allocation4 + $0xa0] sm:$0xff]  }
 0x505   : > { %10046 = vmatprep.mubr.bf16.mxu1 %v13400_v55  ;;  %v13421_v55 = vld [vmem:[#allocation4 + $0xa4] sm:$0xff]   ;;  %v6994_v26 = vrot.slane %v13423_v27, 1 }
 0x507   : > { %v6995_v44 = vsel %vm1478_vm1, %v6992_v54, %v6994_v26  ;;  %v7443_v54 = vshll.u32 %v13437_v43, 16 }
 0x50c   : > { %v14900_v6 = vpop.f32.mrb[108].mxu0  ;;  %10047 = vmatmul.mubr.bf16.gmra.mrb[92].mxu1 %v6979_v10  ;;  %v13426_v10 = vld [vmem:[#allocation4 + $0xa8] sm:$0xff]  }
 0x50d   : > { %v14902_v60 = vpop.f32.mrb[109].mxu0  ;;  %10054 = vmatprep.mubr.bf16.mxu1 %v13403_v35  ;;  %v13424_v35 = vld [vmem:[#allocation4 + $0xac] sm:$0xff]  }
 0x50e   : > { %v14904_v49 = vpop.f32.mrb[110].mxu0 }
 0x50f   : > { %v14906_v33 = vpop.f32.mrb[111].mxu0 }
 0x514   : > { %10055 = vmatmul.mubr.bf16.gmra.mrb[96].mxu1 %v6981_v47  ;;  %v6996_v47 = vrot.slane %v13426_v10, 1 }
 0x515   : > { %10062 = vmatprep.mubr.bf16.mxu1 %v13405_v45 }
 0x516   : > { %v6997_v31 = vsel %vm1478_vm1, %v6994_v26, %v6996_v47  ;;  %v7445_v26 = vrot.slane %v7443_v54, 1 }
 0x51c   : > { %10063 = vmatmul.mubr.bf16.gmra.mrb[100].mxu1 %v6983_v34  ;;  %v13427_v34 = vld [vmem:[#allocation4 + $0xb4] sm:$0xff]  }
 0x51d   : > { %10070 = vmatprep.mubr.bf16.mxu1 %v13408_v4  ;;  %v14910_v63 = vpop.f32.mrb[112].mxu0  ;;  %v13428_v4 = vld [vmem:[#allocation4 + $0xb0] sm:$0xff]  }
 0x51e   : > { %v14912_v40 = vpop.f32.mrb[113].mxu0 }
 0x51f   : > { %v14914_v56 = vpop.f32.mrb[114].mxu0 }
 0x520   : > { %v14916_v20 = vpop.f32.mrb[115].mxu0 }
 0x524   : > { %10071 = vmatmul.mubr.bf16.gmra.mrb[104].mxu1 %v6985_v39  ;;  %v6998_v39 = vrot.slane %v13428_v4, 1 }
 0x525   : > { %10078 = vmatprep.mubr.bf16.mxu1 %v13411_v28  ;;  %v14919_v25 = vpop.f32.mrb[116].mxu0 }
 0x526   : > { %v14921_v3 = vpop.f32.mrb[117].mxu0  ;;  %v6999_v11 = vsel %vm1478_vm1, %v6996_v47, %v6998_v39  ;;  %v13439_v47 = vld [vmem:[#allocation4 + $0x1c] sm:$0xff]  }
 0x527   : > { %v14923_v61 = vpop.f32.mrb[118].mxu0 }
 0x528   : > { %v14925_v16 = vpop.f32.mrb[119].mxu0 }
 0x52c   : > { %10079 = vmatmul.mubr.bf16.gmra.mrb[108].mxu1 %v6987_v36  ;;  %v13429_v36 = vld [vmem:[#allocation4 + $0xbc] sm:$0xff]  }
 0x52d   : > { %10086 = vmatprep.mubr.bf16.mxu1 %v13413_v15  ;;  %v13431_v15 = vld [vmem:[#allocation4 + $0xb8] sm:$0xff]  }
 0x52e   : > { %v7000_v53 = vrot.slane %v13431_v15, 1  ;;  %v13441_v15 = vld [vmem:[#allocation4 + $0x1c] sm:$0xff]  }
 0x530   : > { %v7001_v12 = vsel %vm1478_vm1, %v6998_v39, %v7000_v53 }
 0x534   : > { %10087 = vmatmul.mubr.bf16.gmra.mrb[112].mxu1 %v6989_v2  ;;  %v13432_v2 = vld [vmem:[#allocation4 + $0xc4] sm:$0xff]  }
 0x535   : > { %10094 = vmatprep.mubr.bf16.mxu1 %v13416_v37  ;;  %v13434_v37 = vld [vmem:[#allocation4 + $0xc0] ss:$0 sps:$4 sm:$0x11]  }
 0x53c   : > { %v14930_v42 = vpop.f32.mrb[120].mxu0  ;;  %10095 = vmatmul.mubr.bf16.gmra.mrb[116].mxu1 %v6991_v52  ;;  %v13435_v52 = vld [vmem:[#allocation4 + $0xc] sm:$0xfe]  }
 0x53d   : > { %v14932_v59 = vpop.f32.mrb[121].mxu0  ;;  %10102 = vmatprep.mubr.bf16.mxu1 %v13419_v30  ;;  %v7002_v30 = vrot.slane %v13434_v37, 1  ;;  %v7456_v37 = vshll.u32 %v13441_v15, 16 }
 0x53e   : > { %v14934_v23 = vpop.f32.mrb[122].mxu0 }
 0x53f   : > { %v14936_v17 = vpop.f32.mrb[123].mxu0  ;;  %v7003_v27 = vsel %vm1478_vm1, %v7000_v53, %v7002_v30  ;;  %v7859_v53 = vrot.slane %v13439_v47, 1  ;;  %v13443_v30 = vld [vmem:[#allocation10 + $0x188] sm:$0xff]   ;;  %v7458_v54 = vrot.slane %v7456_v37, 1 }
 0x544   : > { %10103 = vmatmul.mubr.bf16.gmra.mrb[120].mxu1 %v6993_v24  ;;  %v7857_v24 = vrot.slane %v13436_v62, 1 }
 0x545   : > { %10110 = vmatprep.mubr.bf16.mxu1 %v13421_v55  ;;  %v7856_v55 = vrot.slane %v13435_v52, 1  ;;  %v13442_v52 = vld [vmem:[#allocation4 + $0x24] sm:$0xff]  }
 0x546   : > { %v7860_v62 = vsel %vm1478_vm1, %v7857_v24, %v7859_v53 }
 0x547   : > { %v7858_v10 = vsel %vm1478_vm1, %v7856_v55, %v7857_v24  ;;  %v13444_v55 = vld [vmem:[#allocation4 + $0x24] sm:$0xff]  }
 0x548   : > { %v7464_v47 = vshll.u32 %v13444_v55, 16 }
 0x54c   : > { %10111 = vmatmul.mubr.bf16.gmra.mrb[124].mxu1 %v6995_v44  ;;  %v14940_v46 = vpop.f32.mrb[124].mxu0  ;;  %v7448_v44 = vshll.u32 %v13438_v38, 16 }
 0x54d   : > { %10118 = vmatprep.mubr.bf16.mxu1 %v13424_v35  ;;  %v14942_v41 = vpop.f32.mrb[125].mxu0 }
 0x54e   : > { %v14944_v45 = vpop.f32.mrb[126].mxu0 }
 0x54f   : > { %v14946_v58 = vpop.f32.mrb[127].mxu0 }
 0x554   : > { %10119 = vmatmul.mubr.bf16.gmra.mrb[128].mxu1 %v6997_v31  ;;  %v14949_v1 = vpop.f32.mrb[128].mxu0 }
 0x555   : > { %10126 = vmatprep.mubr.bf16.mxu1 %v13427_v34  ;;  %v14951_v8 = vpop.f32.mrb[129].mxu0  ;;  %v7441_v34 = vshrl.u32 %v13437_v43, 16  ;;  %v7452_v43 = vshrl.u32 %v13438_v38, 16  ;;  %v7460_v38 = vshrl.u32 %v13441_v15, 16  ;;  %v7468_v15 = vshrl.u32 %v13444_v55, 16 }
 0x556   : > { %v14953_v28 = vpop.f32.mrb[130].mxu0 }
 0x557   : > { %v14955_v7 = vpop.f32.mrb[131].mxu0  ;;  %v7462_v37 = vor.u32 %v7460_v38, %v7458_v54  ;;  %v13450_v38 = vld [vmem:[#allocation4 + $0x3c] sm:$0xff]  }
 0x55c   : > { %10127 = vmatmul.mubr.bf16.gmra.mrb[132].mxu1 %v6999_v11  ;;  %v7446_v11 = vor.u32 %v7445_v26, %v7441_v34  ;;  %v13445_v34 = vld [vmem:[#allocation4 + $0x2c] sm:$0xff]  }
 0x55d   : > { %10134 = vmatprep.mubr.bf16.mxu1 %v13429_v36  ;;  %v7450_v36 = vrot.slane %v7448_v44, 1  ;;  %v13448_v44 = vld [vmem:[#allocation10 + $0x190] sm:$0xff]  }
 0x55f   : > { %v7454_v26 = vor.u32 %v7452_v43, %v7450_v36  ;;  %v13447_v43 = vld [vmem:[#allocation4 + $0x34] sm:$0xff]  }
 0x564   : > { %10135 = vmatmul.mubr.bf16.gmra.mrb[136].mxu1 %v7001_v12  ;;  %v13440_v12 = vld [vmem:[#allocation10 + $0x180] sm:$0xff]  }
 0x565   : > { %10142 = vmatprep.mubr.bf16.mxu1 %v13432_v2  ;;  %v7451_v2 = vsel %vm1061_vm0, %v7446_v11, %v7450_v36  ;;  %v13451_v11 = vld [vmem:[#allocation10 + $0x198] sm:$0xff]   ;;  %v7863_v36 = vrot.slane %v13445_v34, 1 }
 0x56a   : > { %v14960_v35 = vpop.f32.mrb[132].mxu0 }
 0x56b   : > { %15334 = vst [vmem:[#allocation15_spill] sm:$0xff] %v14960_v35  ;;  %v14963_v31 = vpop.f32.mrb[133].mxu0 }
 0x56c   : > { %10143 = vmatmul.mubr.bf16.gmra.mrb[140].mxu1 %v7003_v27  ;;  %v14965_v4 = vpop.f32.mrb[134].mxu0  ;;  %v7861_v27 = vrot.slane %v13442_v52, 1 }
 0x56d   : > { %10183 = vmatprep.mubr.bf16.mxu1 %v7858_v10  ;;  %15335 = vst [vmem:[#allocation16_spill] sm:$0xff] %v14965_v4  ;;  %v14967_v39 = vpop.f32.mrb[135].mxu0  ;;  %v7459_v10 = vsel %vm1061_vm0, %v7454_v26, %v7458_v54  ;;  %v13459_v26 = vld [vmem:[#allocation10 + $0x1a8] sm:$0xff]   ;;  %v7865_v54 = vrot.slane %v13447_v43, 1 }
 0x56e   : > { %v7862_v24 = vsel %vm1478_vm1, %v7859_v53, %v7861_v27  ;;  %v7864_v53 = vsel %vm1478_vm1, %v7861_v27, %v7863_v36 }
 0x56f   : > { %v7866_v27 = vsel %vm1478_vm1, %v7863_v36, %v7865_v54 }
 0x574   : > { %10184 = vmatmul.mubr.bf16.vlgmr.msra.gmra.mrb[48].mxu1 %v7451_v2  ;;  %v13446_v2 = vld [vmem:[#allocation4 + $0x2c] sm:$0xff]  }
 0x575   : > { %10191 = vmatprep.mubr.bf16.mxu1 %v7860_v62  ;;  %10377 = vmatpush1.bf16.msra.mxu1 %v13440_v12  ;;  %v7466_v12 = vrot.slane %v7464_v47, 1  ;;  %v13456_v62 = vld [vmem:[#allocation10 + $0x1a0] sm:$0xff]   ;;  %v7476_v55 = vshrl.u32 %v13446_v2, 16 }
 0x576   : > { %10378 = vmatprep.subr.bf16.mxu1 %v13729_v0 }
 0x577   : > { %v7467_v52 = vsel %vm1061_vm0, %v7462_v37, %v7466_v12  ;;  %v7470_v47 = vor.u32 %v7468_v15, %v7466_v12  ;;  %v13467_v37 = vld [vmem:[#allocation10 + $0x1b8] sm:$0xff]   ;;  %v7867_v12 = vrot.slane %v13450_v38, 1  ;;  %v13453_v15 = vld [vmem:[#allocation4 + $0x44] sm:$0xff]  }
 0x579   : > { %10379 = vmatpush1.bf16.msra.mxu1 %v13443_v30  ;;  %v7472_v30 = vshll.u32 %v13446_v2, 16  ;;  %v7868_v36 = vsel %vm1478_vm1, %v7865_v54, %v7867_v12 }
 0x57a   : > { %10380 = vmatprep.subr.bf16.mxu1 %v13729_v0 }
 0x57c   : > { %10192 = vmatmul.mubr.bf16.gmra.mrb[52].mxu1 %v7459_v10  ;;  %v13449_v10 = vld [vmem:[#allocation4 + $0x34] sm:$0xff]  }
 0x57d   : > { %10199 = vmatprep.mubr.bf16.mxu1 %v7862_v24  ;;  %10381 = vmatpush1.bf16.msra.mxu1 %v13448_v44  ;;  %v7474_v44 = vrot.slane %v7472_v30, 1  ;;  %v13464_v24 = vld [vmem:[#allocation10 + $0x1b0] sm:$0xff]   ;;  %v7484_v2 = vshrl.u32 %v13449_v10, 16 }
 0x57e   : > { %10382 = vmatprep.subr.bf16.mxu1 %v13729_v0 }
 0x57f   : > { %v7475_v34 = vsel %vm1061_vm0, %v7470_v47, %v7474_v44  ;;  %v7478_v30 = vor.u32 %v7476_v55, %v7474_v44  ;;  %v13475_v47 = vld [vmem:[#allocation10 + $0x1c8] sm:$0xff]   ;;  %v7869_v44 = vrot.slane %v13453_v15, 1  ;;  %v13455_v55 = vld [vmem:[#allocation4 + $0x4c] sm:$0xff]  }
 0x581   : > { %10383 = vmatpush1.bf16.msra.mxu1 %v13451_v11  ;;  %v7480_v11 = vshll.u32 %v13449_v10, 16  ;;  %v7870_v54 = vsel %vm1478_vm1, %v7867_v12, %v7869_v44 }
 0x582   : > { %10384 = vmatprep.subr.bf16.mxu1 %v13729_v0 }
 0x584   : > { %10200 = vmatmul.mubr.bf16.gmra.mrb[56].mxu1 %v7467_v52  ;;  %v13452_v52 = vld [vmem:[#allocation4 + $0x3c] sm:$0xff]  }
 0x585   : > { %10207 = vmatprep.mubr.bf16.mxu1 %v7864_v53  ;;  %10385 = vmatpush1.bf16.msra.mxu1 %v13456_v62  ;;  %v7482_v62 = vrot.slane %v7480_v11, 1  ;;  %v13472_v53 = vld [vmem:[#allocation10 + $0x1c0] sm:$0xff]   ;;  %v7492_v10 = vshrl.u32 %v13452_v52, 16 }
 0x586   : > { %10386 = vmatprep.subr.bf16.mxu1 %v13729_v0 }
 0x587   : > { %v7483_v43 = vsel %vm1061_vm0, %v7478_v30, %v7482_v62  ;;  %v7486_v11 = vor.u32 %v7484_v2, %v7482_v62  ;;  %v13483_v30 = vld [vmem:[#allocation10 + $0x1d8] sm:$0xff]   ;;  %v7871_v62 = vrot.slane %v13455_v55, 1  ;;  %v13458_v2 = vld [vmem:[#allocation4 + $0x54] sm:$0xff]  }
 0x589   : > { %10387 = vmatpush1.bf16.msra.mxu1 %v13459_v26  ;;  %v7488_v26 = vshll.u32 %v13452_v52, 16  ;;  %v7872_v12 = vsel %vm1478_vm1, %v7869_v44, %v7871_v62 }
 0x58a   : > { %10388 = vmatprep.subr.bf16.mxu1 %v13729_v0 }
 0x58c   : > { %10208 = vmatmul.mubr.bf16.gmra.mrb[60].mxu1 %v7475_v34  ;;  %v13454_v34 = vld [vmem:[#allocation4 + $0x44] sm:$0xff]  }
 0x58d   : > { %10215 = vmatprep.mubr.bf16.mxu1 %v7866_v27  ;;  %10389 = vmatpush1.bf16.msra.mxu1 %v13464_v24  ;;  %v7490_v24 = vrot.slane %v7488_v26, 1  ;;  %v13480_v27 = vld [vmem:[#allocation10 + $0x1d0] sm:$0xff]   ;;  %v7500_v52 = vshrl.u32 %v13454_v34, 16 }
 0x58e   : > { %10390 = vmatprep.subr.bf16.mxu1 %v13729_v0 }
 0x58f   : > { %v7491_v38 = vsel %vm1061_vm0, %v7486_v11, %v7490_v24  ;;  %v7494_v26 = vor.u32 %v7492_v10, %v7490_v24  ;;  %v13491_v11 = vld [vmem:[#allocation10 + $0x1e8] sm:$0xff]   ;;  %v7873_v24 = vrot.slane %v13458_v2, 1 }
 0x590   : > { %v13461_v10 = vld [vmem:[#allocation4 + $0x5c] sm:$0xff]  }
 0x591   : > { %10391 = vmatpush1.bf16.msra.mxu1 %v13467_v37  ;;  %v7496_v37 = vshll.u32 %v13454_v34, 16  ;;  %v7874_v44 = vsel %vm1478_vm1, %v7871_v62, %v7873_v24 }
 0x592   : > { %10392 = vmatprep.subr.bf16.mxu1 %v13729_v0 }
 0x594   : > { %10216 = vmatmul.mubr.bf16.gmra.mrb[64].mxu1 %v7483_v43  ;;  %v13457_v43 = vld [vmem:[#allocation4 + $0x4c] sm:$0xff]  }
 0x595   : > { %10223 = vmatprep.mubr.bf16.mxu1 %v7868_v36  ;;  %10393 = vmatpush1.bf16.msra.mxu1 %v13472_v53  ;;  %v7498_v53 = vrot.slane %v7496_v37, 1  ;;  %v13488_v36 = vld [vmem:[#allocation10 + $0x1e0] sm:$0xff]   ;;  %v7508_v34 = vshrl.u32 %v13457_v43, 16 }
 0x596   : > { %10394 = vmatprep.subr.bf16.mxu1 %v13729_v0 }
 0x597   : > { %v7499_v15 = vsel %vm1061_vm0, %v7494_v26, %v7498_v53  ;;  %v7502_v37 = vor.u32 %v7500_v52, %v7498_v53  ;;  %v13499_v26 = vld [vmem:[#allocation10 + $0x1f8] sm:$0xff]   ;;  %v7875_v53 = vrot.slane %v13461_v10, 1  ;;  %v13463_v52 = vld [vmem:[#allocation4 + $0x64] sm:$0xff]  }
 0x598   : > { %v13466_v10 = vld [vmem:[#allocation4 + $0x6c] sm:$0xff]  }
 0x599   : > { %10395 = vmatpush1.bf16.msra.mxu1 %v13475_v47  ;;  %v7504_v47 = vshll.u32 %v13457_v43, 16  ;;  %v7876_v62 = vsel %vm1478_vm1, %v7873_v24, %v7875_v53  ;;  %v13465_v43 = vld [vmem:[#allocation4 + $0x64] sm:$0xff]  }
 0x59a   : > { %10396 = vmatprep.subr.bf16.mxu1 %v13729_v0 }
 0x59c   : > { %10224 = vmatmul.mubr.bf16.gmra.mrb[68].mxu1 %v7491_v38  ;;  %v13460_v38 = vld [vmem:[#allocation4 + $0x54] sm:$0xff]  }
 0x59d   : > { %10231 = vmatprep.mubr.bf16.mxu1 %v7870_v54  ;;  %10397 = vmatpush1.bf16.msra.mxu1 %v13480_v27  ;;  %v7506_v27 = vrot.slane %v7504_v47, 1  ;;  %v13496_v54 = vld [vmem:[#allocation10 + $0x1f0] sm:$0xff]  }
 0x59e   : > { %10398 = vmatprep.subr.bf16.mxu1 %v13729_v0 }
 0x59f   : > { %v7507_v55 = vsel %vm1061_vm0, %v7502_v37, %v7506_v27  ;;  %v7510_v47 = vor.u32 %v7508_v34, %v7506_v27  ;;  %v7516_v37 = vshrl.u32 %v13460_v38, 16 }
 0x5a1   : > { %10399 = vmatpush1.bf16.msra.mxu1 %v13483_v30  ;;  %v7512_v30 = vshll.u32 %v13460_v38, 16 }
 0x5a2   : > { %10400 = vmatprep.subr.bf16.mxu1 %v13729_v0 }
 0x5a4   : > { %10232 = vmatmul.mubr.bf16.gmra.mrb[72].mxu1 %v7499_v15  ;;  %v13462_v15 = vld [vmem:[#allocation4 + $0x5c] sm:$0xff]  }
 0x5a5   : > { %10239 = vmatprep.mubr.bf16.mxu1 %v7872_v12  ;;  %10401 = vmatpush1.bf16.msra.mxu1 %v13488_v36  ;;  %v7514_v36 = vrot.slane %v7512_v30, 1  ;;  %v15000_v12 = vld [vmem:[#allocation10 + $0x200] sm:$0xff]   ;;  %v7528_v30 = vshll.u32 %v13465_v43, 16 }
 0x5a6   : > { %10402 = vmatprep.subr.bf16.mxu1 %v13729_v0 }
 0x5a7   : > { %v7515_v2 = vsel %vm1061_vm0, %v7510_v47, %v7514_v36  ;;  %v7530_v34 = vrot.slane %v7528_v30, 1  ;;  %v13468_v47 = vld [vmem:[#allocation4 + $0x6c] sm:$0xff]  }
 0x5a8   : > { %v7536_v38 = vshll.u32 %v13468_v47, 16 }
 0x5a9   : > { %10403 = vmatpush1.bf16.msra.mxu1 %v13491_v11  ;;  %v7520_v11 = vshll.u32 %v13462_v15, 16 }
 0x5aa   : > { %10404 = vmatprep.subr.bf16.mxu1 %v13729_v0 }
 0x5ac   : > { %10240 = vmatmul.mubr.bf16.gmra.mrb[76].mxu1 %v7507_v55  ;;  %v7518_v55 = vor.u32 %v7516_v37, %v7514_v36  ;;  %v13469_v36 = vld [vmem:[#allocation4 + $0x74] sm:$0xff]   ;;  %v7538_v37 = vrot.slane %v7536_v38, 1 }
 0x5ad   : > { %10247 = vmatprep.mubr.bf16.mxu1 %v7874_v44  ;;  %10405 = vmatpush1.bf16.msra.mxu1 %v13496_v54  ;;  %v7877_v54 = vrot.slane %v13463_v52, 1  ;;  %v7532_v52 = vshrl.u32 %v13465_v43, 16 }
 0x5ae   : > { %10406 = vmatprep.subr.bf16.mxu1 %v13729_v0  ;;  %v7522_v0 = vrot.slane %v7520_v11, 1 }
 0x5af   : > { %v7878_v44 = vsel %vm1478_vm1, %v7875_v53, %v7877_v54  ;;  %v7534_v53 = vor.u32 %v7532_v52, %v7530_v34 }
 0x5b0   : > { %v7523_v27 = vsel %vm1061_vm0, %v7518_v55, %v7522_v0  ;;  %v13470_v55 = vld [vmem:[#allocation4 + $0x74] sm:$0xff]  }
 0x5b1   : > { %10407 = vmatpush1.bf16.msra.mxu1 %v13499_v26  ;;  %v7524_v26 = vshrl.u32 %v13462_v15, 16  ;;  %v7544_v15 = vshll.u32 %v13470_v55, 16 }
 0x5b2   : > { %12199 = vmatprep.subr.bf16.mxu1 %v15000_v12 }
 0x5b3   : > { %v7526_v24 = vor.u32 %v7524_v26, %v7522_v0  ;;  %v13471_v0 = vld [vmem:[#allocation4 + $0x7c] sm:$0xff]   ;;  %v7546_v26 = vrot.slane %v7544_v15, 1 }
 0x5b4   : > { %10248 = vmatmul.mubr.bf16.gmra.mrb[80].mxu1 %v7515_v2  ;;  %v7879_v2 = vrot.slane %v13466_v10, 1  ;;  %v7540_v10 = vshrl.u32 %v13468_v47, 16 }
 0x5b5   : > { %10255 = vmatprep.mubr.bf16.mxu1 %v7876_v62  ;;  %v7531_v62 = vsel %vm1061_vm0, %v7526_v24, %v7530_v34  ;;  %v13473_v24 = vld [vmem:[#allocation4 + $0x7c] sm:$0xff]   ;;  %v13474_v34 = vld [vmem:[#allocation4 + $0x84] sm:$0xff]  }
 0x5b6   : > { %v7880_v11 = vsel %vm1478_vm1, %v7877_v54, %v7879_v2  ;;  %v7542_v54 = vor.u32 %v7540_v10, %v7538_v37  ;;  %v7552_v43 = vshll.u32 %v13473_v24, 16 }
 0x5b8   : > { %v7554_v52 = vrot.slane %v7552_v43, 1 }
 0x5bc   : > { %10256 = vmatmul.mubr.bf16.gmra.mrb[84].mxu1 %v7523_v27  ;;  %v7881_v27 = vrot.slane %v13469_v36, 1  ;;  %v7548_v36 = vshrl.u32 %v13470_v55, 16 }
 0x5bd   : > { %10263 = vmatprep.mubr.bf16.mxu1 %v7878_v44  ;;  %v7539_v44 = vsel %vm1061_vm0, %v7534_v53, %v7538_v37  ;;  %v13476_v53 = vld [vmem:[#allocation4 + $0x84] sm:$0xff]   ;;  %v13477_v37 = vld [vmem:[#allocation4 + $0x8c] sm:$0xff]  }
 0x5be   : > { %v7882_v30 = vsel %vm1478_vm1, %v7879_v2, %v7881_v27  ;;  %v7550_v2 = vor.u32 %v7548_v36, %v7546_v26  ;;  %v7560_v47 = vshll.u32 %v13476_v53, 16 }
 0x5c0   : > { %v7562_v10 = vrot.slane %v7560_v47, 1 }
 0x5c4   : > { %10264 = vmatmul.mubr.bf16.gmra.mrb[88].mxu1 %v7531_v62  ;;  %v7883_v62 = vrot.slane %v13471_v0, 1  ;;  %v7556_v0 = vshrl.u32 %v13473_v24, 16 }
 0x5c5   : > { %10271 = vmatprep.mubr.bf16.mxu1 %v7880_v11  ;;  %v7547_v11 = vsel %vm1061_vm0, %v7542_v54, %v7546_v26  ;;  %v13478_v54 = vld [vmem:[#allocation4 + $0x8c] sm:$0xff]   ;;  %v13479_v26 = vld [vmem:[#allocation4 + $0x94] sm:$0xff]  }
 0x5c6   : > { %v7884_v38 = vsel %vm1478_vm1, %v7881_v27, %v7883_v62  ;;  %v7558_v27 = vor.u32 %v7556_v0, %v7554_v52  ;;  %v7568_v55 = vshll.u32 %v13478_v54, 16 }
 0x5c8   : > { %v7570_v36 = vrot.slane %v7568_v55, 1 }
 0x5cc   : > { %10272 = vmatmul.mubr.bf16.gmra.mrb[92].mxu1 %v7539_v44  ;;  %v7885_v44 = vrot.slane %v13474_v34, 1  ;;  %v7564_v34 = vshrl.u32 %v13476_v53, 16 }
 0x5cd   : > { %10279 = vmatprep.mubr.bf16.mxu1 %v7882_v30  ;;  %v7555_v30 = vsel %vm1061_vm0, %v7550_v2, %v7554_v52  ;;  %v13481_v2 = vld [vmem:[#allocation4 + $0x94] sm:$0xff]   ;;  %v13482_v52 = vld [vmem:[#allocation4 + $0x9c] sm:$0xff]  }
 0x5ce   : > { %v7886_v15 = vsel %vm1478_vm1, %v7883_v62, %v7885_v44  ;;  %v7566_v62 = vor.u32 %v7564_v34, %v7562_v10  ;;  %v7576_v24 = vshll.u32 %v13481_v2, 16 }
 0x5d0   : > { %v7578_v0 = vrot.slane %v7576_v24, 1 }
 0x5d4   : > { %10280 = vmatmul.mubr.bf16.gmra.mrb[96].mxu1 %v7547_v11  ;;  %v7887_v11 = vrot.slane %v13477_v37, 1  ;;  %v7572_v37 = vshrl.u32 %v13478_v54, 16 }
 0x5d5   : > { %10287 = vmatprep.mubr.bf16.mxu1 %v7884_v38  ;;  %v7563_v38 = vsel %vm1061_vm0, %v7558_v27, %v7562_v10  ;;  %v13484_v27 = vld [vmem:[#allocation4 + $0x9c] sm:$0xff]   ;;  %v13485_v10 = vld [vmem:[#allocation4 + $0xa4] sm:$0xff]  }
 0x5d6   : > { %v7888_v43 = vsel %vm1478_vm1, %v7885_v44, %v7887_v11  ;;  %v7574_v44 = vor.u32 %v7572_v37, %v7570_v36  ;;  %v7584_v53 = vshll.u32 %v13484_v27, 16 }
 0x5d8   : > { %v7586_v34 = vrot.slane %v7584_v53, 1 }
 0x5dc   : > { %10288 = vmatmul.mubr.bf16.gmra.mrb[100].mxu1 %v7555_v30  ;;  %v7889_v30 = vrot.slane %v13479_v26, 1  ;;  %v7580_v26 = vshrl.u32 %v13481_v2, 16 }
 0x5dd   : > { %10295 = vmatprep.mubr.bf16.mxu1 %v7886_v15  ;;  %v7571_v15 = vsel %vm1061_vm0, %v7566_v62, %v7570_v36  ;;  %v13486_v62 = vld [vmem:[#allocation4 + $0xa4] sm:$0xff]   ;;  %v13487_v36 = vld [vmem:[#allocation4 + $0xac] sm:$0xff]  }
 0x5de   : > { %v7890_v47 = vsel %vm1478_vm1, %v7887_v11, %v7889_v30  ;;  %v7582_v11 = vor.u32 %v7580_v26, %v7578_v0  ;;  %v7592_v54 = vshll.u32 %v13486_v62, 16 }
 0x5e0   : > { %v7594_v37 = vrot.slane %v7592_v54, 1 }
 0x5e4   : > { %10296 = vmatmul.mubr.bf16.gmra.mrb[104].mxu1 %v7563_v38  ;;  %v7891_v38 = vrot.slane %v13482_v52, 1  ;;  %v7588_v52 = vshrl.u32 %v13484_v27, 16 }
 0x5e5   : > { %10303 = vmatprep.mubr.bf16.mxu1 %v7888_v43  ;;  %v7579_v43 = vsel %vm1061_vm0, %v7574_v44, %v7578_v0  ;;  %v13489_v44 = vld [vmem:[#allocation4 + $0xac] sm:$0xff]   ;;  %v13490_v0 = vld [vmem:[#allocation4 + $0xb4] sm:$0xff]  }
 0x5e6   : > { %v7892_v55 = vsel %vm1478_vm1, %v7889_v30, %v7891_v38  ;;  %v7590_v30 = vor.u32 %v7588_v52, %v7586_v34  ;;  %v7600_v2 = vshll.u32 %v13489_v44, 16 }
 0x5e8   : > { %v7602_v26 = vrot.slane %v7600_v2, 1 }
 0x5ec   : > { %10304 = vmatmul.mubr.bf16.gmra.mrb[108].mxu1 %v7571_v15  ;;  %v7893_v15 = vrot.slane %v13485_v10, 1  ;;  %v7596_v10 = vshrl.u32 %v13486_v62, 16 }
 0x5ed   : > { %10311 = vmatprep.mubr.bf16.mxu1 %v7890_v47  ;;  %v7587_v47 = vsel %vm1061_vm0, %v7582_v11, %v7586_v34  ;;  %v13492_v11 = vld [vmem:[#allocation4 + $0xb4] sm:$0xff]   ;;  %v13493_v34 = vld [vmem:[#allocation4 + $0xbc] sm:$0xff]  }
 0x5ee   : > { %v7894_v24 = vsel %vm1478_vm1, %v7891_v38, %v7893_v15  ;;  %v7598_v38 = vor.u32 %v7596_v10, %v7594_v37  ;;  %v7608_v27 = vshll.u32 %v13492_v11, 16 }
 0x5f0   : > { %v7610_v52 = vrot.slane %v7608_v27, 1 }
 0x5f4   : > { %10312 = vmatmul.mubr.bf16.gmra.mrb[112].mxu1 %v7579_v43  ;;  %v7895_v43 = vrot.slane %v13487_v36, 1  ;;  %v7604_v36 = vshrl.u32 %v13489_v44, 16 }
 0x5f5   : > { %10319 = vmatprep.mubr.bf16.mxu1 %v7892_v55  ;;  %v7595_v55 = vsel %vm1061_vm0, %v7590_v30, %v7594_v37  ;;  %v13494_v30 = vld [vmem:[#allocation4 + $0xbc] sm:$0xff]   ;;  %v13495_v37 = vld [vmem:[#allocation4 + $0xc4] sm:$0xff]  }
 0x5f6   : > { %v7896_v53 = vsel %vm1478_vm1, %v7893_v15, %v7895_v43  ;;  %v7606_v15 = vor.u32 %v7604_v36, %v7602_v26  ;;  %v7616_v62 = vshll.u32 %v13494_v30, 16  ;;  %v7620_v36 = vshrl.u32 %v13494_v30, 16  ;;  %v13504_v30 = vld [vmem:[#allocation4 + $0x28] sm:$0xff]  }
 0x5f8   : > { %v7618_v10 = vrot.slane %v7616_v62, 1 }
 0x5fc   : > { %10320 = vmatmul.mubr.bf16.gmra.mrb[116].mxu1 %v7587_v47  ;;  %v7897_v47 = vrot.slane %v13490_v0, 1  ;;  %v7612_v0 = vshrl.u32 %v13492_v11, 16 }
 0x5fd   : > { %10327 = vmatprep.mubr.bf16.mxu1 %v7894_v24  ;;  %v7603_v24 = vsel %vm1061_vm0, %v7598_v38, %v7602_v26  ;;  %v13497_v38 = vld [vmem:[#allocation4 + $0xc4] sm:$0xff]   ;;  %v13498_v26 = vld [vmem:[#allocation4 + $0xcc] ss:$0 sps:$4 sm:$0x11]  }
 0x5fe   : > { %v7898_v54 = vsel %vm1478_vm1, %v7895_v43, %v7897_v47  ;;  %v7614_v43 = vor.u32 %v7612_v0, %v7610_v52  ;;  %v7624_v44 = vshll.u32 %v13497_v38, 16  ;;  %v8349_v0 = vshll.u32 %v13502_v29, 16 }
 0x600   : > { %v8351_v4 = vrot.slane %v8349_v0, 1  ;;  %v13505_v0 = vld [vmem:[#allocation4 + $0x20] sm:$0xff]  }
 0x604   : > { %10328 = vmatmul.mubr.bf16.gmra.mrb[120].mxu1 %v7595_v55  ;;  %v7899_v55 = vrot.slane %v13493_v34, 1  ;;  %v13501_v34 = vld [vmem:[#allocation4 + $0x18] sm:$0xff]  }
 0x605   : > { %10335 = vmatprep.mubr.bf16.mxu1 %v7896_v53  ;;  %v7611_v53 = vsel %vm1061_vm0, %v7606_v15, %v7610_v52  ;;  %v7626_v15 = vrot.slane %v7624_v44, 1  ;;  %v8344_v11 = vshll.u32 %v13501_v34, 16 }
 0x606   : > { %v7900_v2 = vsel %vm1478_vm1, %v7897_v47, %v7899_v55  ;;  %v7903_v47 = vrot.slane %v13498_v26, 1 }
 0x60c   : > { %10336 = vmatmul.mubr.bf16.gmra.mrb[124].mxu1 %v7603_v24  ;;  %v7901_v24 = vrot.slane %v13495_v37, 1 }
 0x60d   : > { %10343 = vmatprep.mubr.bf16.mxu1 %v7898_v54  ;;  %v7619_v54 = vsel %vm1061_vm0, %v7614_v43, %v7618_v10  ;;  %v8346_v43 = vrot.slane %v8344_v11, 1  ;;  %v13557_v11 = vld [vmem:[#allocation10 + $0x208] sm:$0xff]  }
 0x60e   : > { %v7902_v27 = vsel %vm1478_vm1, %v7899_v55, %v7901_v24  ;;  %v7904_v52 = vsel %vm1478_vm1, %v7901_v24, %v7903_v47  ;;  %v7628_v55 = vshrl.u32 %v13497_v38, 16  ;;  %v13506_v24 = vld [vmem:[#allocation4 + $0x30] sm:$0xff]   ;;  %v13503_v47 = vld [vmem:[#allocation4 + $0x18] sm:$0xff]  }
 0x610   : > { %v7630_v44 = vor.u32 %v7628_v55, %v7626_v15  ;;  %v13559_v55 = vld [vmem:[#allocation10 + $0x218] sm:$0xff]  }
 0x614   : > { %10344 = vmatmul.mubr.bf16.gmra.mrb[128].mxu1 %v7611_v53  ;;  %v13500_v53 = vld [vmem:[#allocation4 + $0xcc] ss:$0 sps:$4 sm:$0x11]  }
 0x615   : > { %10351 = vmatprep.mubr.bf16.mxu1 %v7900_v2  ;;  %v7622_v2 = vor.u32 %v7620_v36, %v7618_v10  ;;  %v7632_v37 = vshll.u32 %v13500_v53, 16  ;;  %v8357_v36 = vshll.u32 %v13504_v30, 16  ;;  %v8353_v53 = vshrl.u32 %v13502_v29, 16  ;;  %v13558_v29 = vld [vmem:[#allocation10 + $0x210] sm:$0xff]  }
 0x617   : > { %v7627_v62 = vsel %vm1061_vm0, %v7622_v2, %v7626_v15  ;;  %v8359_v2 = vrot.slane %v8357_v36, 1  ;;  %v8361_v15 = vshrl.u32 %v13504_v30, 16  ;;  %v13507_v30 = vld [vmem:[#allocation4 + $0x28] sm:$0xff]  }
 0x61c   : > { %10352 = vmatmul.mubr.bf16.gmra.mrb[132].mxu1 %v7619_v54  ;;  %v7634_v54 = vrot.slane %v7632_v37, 1  ;;  %v8363_v37 = vor.u32 %v8361_v15, %v8359_v2 }
 0x61d   : > { %10359 = vmatprep.mubr.bf16.mxu1 %v7902_v27  ;;  %v8342_v27 = vshrl.u32 %v13501_v34, 16  ;;  %v8365_v34 = vshll.u32 %v13506_v24, 16 }
 0x61e   : > { %v7635_v26 = vsel %vm1061_vm0, %v7630_v44, %v7634_v54  ;;  %v8369_v54 = vshrl.u32 %v13506_v24, 16  ;;  %v13509_v24 = vld [vmem:[#allocation4 + $0x30] sm:$0xff]  }
 0x61f   : > { %v8347_v35 = vor.u32 %v8346_v43, %v8342_v27  ;;  %v13510_v27 = vld [vmem:[#allocation4 + $0x40] sm:$0xff]  }
 0x620   : > { %v8381_v36 = vshll.u32 %v13510_v27, 16 }
 0x621   : > { %v8352_v10 = vsel %vm1061_vm0, %v8347_v35, %v8351_v4  ;;  %v13508_v35 = vld [vmem:[#allocation4 + $0x38] sm:$0xff]  }
 0x622   : > { %v8373_v43 = vshll.u32 %v13508_v35, 16 }
 0x624   : > { %10360 = vmatmul.mubr.bf16.gmra.mrb[136].mxu1 %v7627_v62  ;;  %v8355_v62 = vor.u32 %v8353_v53, %v8351_v4  ;;  %v13561_v53 = vld [vmem:[#allocation10 + $0x228] sm:$0xff]  }
 0x625   : > { %10367 = vmatprep.mubr.bf16.mxu1 %v7904_v52  ;;  %v8367_v52 = vrot.slane %v8365_v34, 1  ;;  %v13562_v34 = vld [vmem:[#allocation10 + $0x230] sm:$0xff]  }
 0x626   : > { %v8360_v38 = vsel %vm1061_vm0, %v8355_v62, %v8359_v2  ;;  %v8377_v2 = vshrl.u32 %v13508_v35, 16  ;;  %v13512_v62 = vld [vmem:[#allocation4 + $0x48] sm:$0xff]   ;;  %v13511_v35 = vld [vmem:[#allocation4 + $0x38] sm:$0xff]  }
 0x627   : > { %v8368_v4 = vsel %vm1061_vm0, %v8363_v37, %v8367_v52  ;;  %v8371_v44 = vor.u32 %v8369_v54, %v8367_v52  ;;  %v8385_v37 = vshrl.u32 %v13510_v27, 16  ;;  %v13563_v52 = vld [vmem:[#allocation10 + $0x238] sm:$0xff]   ;;  %v8393_v54 = vshrl.u32 %v13512_v62, 16 }
 0x62c   : > { %10368 = vmatmul.mubr.bf16.gmra.mrb[140].mxu1 %v7635_v26  ;;  %v13560_v26 = vld [vmem:[#allocation10 + $0x220] sm:$0xff]  }
 0x62d   : > { %10408 = vmatprep.mubr.bf16.mxu1 %v8352_v10 }
 0x634   : > { %10409 = vmatmul.mubr.bf16.vlgmr.msra.gmra.mrb[48].mxu1 %v13503_v47  ;;  %v8383_v47 = vrot.slane %v8381_v36, 1 }
 0x635   : > { %10416 = vmatprep.mubr.bf16.mxu1 %v8360_v38  ;;  %12207 = vmatpush3.bf16.msra.mxu1 %v15000_v12  ;;  %v8375_v12 = vrot.slane %v8373_v43, 1 }
 0x636   : > { %12200 = vmatprep.subr.bf16.mxu1 %v13557_v11 }
 0x637   : > { %v8376_v10 = vsel %vm1061_vm0, %v8371_v44, %v8375_v12  ;;  %v8379_v38 = vor.u32 %v8377_v2, %v8375_v12  ;;  %v13513_v44 = vld [vmem:[#allocation4 + $0x40] sm:$0xff]  }
 0x638   : > { %v13518_v2 = vld [vmem:[#allocation4 + $0x60] sm:$0xff]  }
 0x639   : > { %12208 = vmatpush3.bf16.msra.mxu1 %v13557_v11  ;;  %v8384_v15 = vsel %vm1061_vm0, %v8379_v38, %v8383_v47  ;;  %v8389_v11 = vshll.u32 %v13512_v62, 16 }
 0x63a   : > { %12201 = vmatprep.subr.bf16.mxu1 %v13558_v29 }
 0x63c   : > { %10417 = vmatmul.mubr.bf16.gmra.mrb[52].mxu1 %v13505_v0  ;;  %v8387_v0 = vor.u32 %v8385_v37, %v8383_v47  ;;  %v13515_v47 = vld [vmem:[#allocation4 + $0x48] sm:$0xff]  }
 0x63d   : > { %10424 = vmatprep.mubr.bf16.mxu1 %v8368_v4  ;;  %12209 = vmatpush3.bf16.msra.mxu1 %v13558_v29  ;;  %v8391_v29 = vrot.slane %v8389_v11, 1  ;;  %v13514_v4 = vld [vmem:[#allocation4 + $0x50] sm:$0xff]   ;;  %v13520_v37 = vld [vmem:[#allocation4 + $0x68] sm:$0xff]  }
 0x63e   : > { %12202 = vmatprep.subr.bf16.mxu1 %v13559_v55  ;;  %v8401_v36 = vshrl.u32 %v13514_v4, 16 }
 0x63f   : > { %v8392_v43 = vsel %vm1061_vm0, %v8387_v0, %v8391_v29 }
 0x641   : > { %12210 = vmatpush3.bf16.msra.mxu1 %v13559_v55  ;;  %v8397_v55 = vshll.u32 %v13514_v4, 16  ;;  %v8417_v4 = vshrl.u32 %v13518_v2, 16 }
 0x642   : > { %12203 = vmatprep.subr.bf16.mxu1 %v13560_v26 }
 0x643   : > { %v8399_v12 = vrot.slane %v8397_v55, 1  ;;  %v13519_v55 = vld [vmem:[#allocation4 + $0x58] sm:$0xff]  }
 0x644   : > { %10425 = vmatmul.mubr.bf16.gmra.mrb[56].mxu1 %v13507_v30  ;;  %v13516_v30 = vld [vmem:[#allocation4 + $0x58] sm:$0xff]  }
 0x645   : > { %10432 = vmatprep.mubr.bf16.mxu1 %v8376_v10  ;;  %12211 = vmatpush3.bf16.msra.mxu1 %v13560_v26  ;;  %v8395_v26 = vor.u32 %v8393_v54, %v8391_v29  ;;  %v8405_v10 = vshll.u32 %v13516_v30, 16  ;;  %v8409_v62 = vshrl.u32 %v13516_v30, 16  ;;  %v8421_v29 = vshll.u32 %v13520_v37, 16 }
 0x646   : > { %12204 = vmatprep.subr.bf16.mxu1 %v13561_v53  ;;  %v8425_v30 = vshrl.u32 %v13520_v37, 16 }
 0x647   : > { %v8400_v27 = vsel %vm1061_vm0, %v8395_v26, %v8399_v12 }
 0x649   : > { %12212 = vmatpush3.bf16.msra.mxu1 %v13561_v53  ;;  %v8407_v53 = vrot.slane %v8405_v10, 1  ;;  %v13521_v10 = vld [vmem:[#allocation4 + $0x60] sm:$0xff]  }
 0x64a   : > { %12205 = vmatprep.subr.bf16.mxu1 %v13562_v34 }
 0x64c   : > { %10433 = vmatmul.mubr.bf16.gmra.mrb[60].mxu1 %v13509_v24  ;;  %v8403_v24 = vor.u32 %v8401_v36, %v8399_v12 }
 0x64d   : > { %10440 = vmatprep.mubr.bf16.mxu1 %v8384_v15  ;;  %12213 = vmatpush3.bf16.msra.mxu1 %v13562_v34  ;;  %v8413_v34 = vshll.u32 %v13518_v2, 16  ;;  %v8411_v15 = vor.u32 %v8409_v62, %v8407_v53  ;;  %v13523_v62 = vld [vmem:[#allocation4 + $0x68] sm:$0xff]  }
 0x64e   : > { %12206 = vmatprep.subr.bf16.mxu1 %v13563_v52  ;;  %v8408_v38 = vsel %vm1061_vm0, %v8403_v24, %v8407_v53 }
 0x64f   : > { %v8415_v11 = vrot.slane %v8413_v34, 1  ;;  %v13526_v34 = vld [vmem:[#allocation4 + $0x80] sm:$0xff]  }
 0x651   : > { %12214 = vmatpush3.bf16.msra.mxu1 %v13563_v52  ;;  %v13517_v52 = vld [vmem:[#allocation4 + $0x50] sm:$0xff]   ;;  %v8416_v0 = vsel %vm1061_vm0, %v8411_v15, %v8415_v11  ;;  %v8419_v54 = vor.u32 %v8417_v4, %v8415_v11  ;;  %v8445_v11 = vshll.u32 %v13526_v34, 16 }
 0x654   : > { %10441 = vmatmul.mubr.bf16.gmra.mrb[64].mxu1 %v13511_v35  ;;  %v8423_v35 = vrot.slane %v8421_v29, 1  ;;  %v13525_v29 = vld [vmem:[#allocation4 + $0x70] sm:$0xff]  }
 0x655   : > { %10448 = vmatprep.mubr.bf16.mxu1 %v8392_v43  ;;  %v13522_v43 = vld [vmem:[#allocation4 + $0x70] sm:$0xff]  }
 0x656   : > { %v8424_v12 = vsel %vm1061_vm0, %v8419_v54, %v8423_v35  ;;  %v8427_v36 = vor.u32 %v8425_v30, %v8423_v35  ;;  %v8433_v2 = vshrl.u32 %v13522_v43, 16 }
 0x65c   : > { %10449 = vmatmul.mubr.bf16.gmra.mrb[68].mxu1 %v13513_v44  ;;  %v8429_v44 = vshll.u32 %v13522_v43, 16  ;;  %v8449_v43 = vshrl.u32 %v13526_v34, 16 }
 0x65d   : > { %10456 = vmatprep.mubr.bf16.mxu1 %v8400_v27  ;;  %v13524_v27 = vld [vmem:[#allocation4 + $0x78] sm:$0xff]  }
 0x65e   : > { %v8431_v26 = vrot.slane %v8429_v44, 1  ;;  %v8441_v37 = vshrl.u32 %v13524_v27, 16  ;;  %v13527_v44 = vld [vmem:[#allocation4 + $0x78] sm:$0xff]  }
 0x660   : > { %v8432_v53 = vsel %vm1061_vm0, %v8427_v36, %v8431_v26  ;;  %v8435_v24 = vor.u32 %v8433_v2, %v8431_v26  ;;  %v13529_v2 = vld [vmem:[#allocation4 + $0x80] sm:$0xff]  }
 0x664   : > { %10457 = vmatmul.mubr.bf16.gmra.mrb[72].mxu1 %v13515_v47  ;;  %v8437_v47 = vshll.u32 %v13524_v27, 16 }
 0x665   : > { %10464 = vmatprep.mubr.bf16.mxu1 %v8408_v38 }
 0x666   : > { %v8439_v38 = vrot.slane %v8437_v47, 1  ;;  %v13532_v47 = vld [vmem:[#allocation4 + $0x98] sm:$0xff]  }
 0x668   : > { %v8440_v15 = vsel %vm1061_vm0, %v8435_v24, %v8439_v38  ;;  %v8443_v4 = vor.u32 %v8441_v37, %v8439_v38  ;;  %v8469_v38 = vshll.u32 %v13532_v47, 16 }
 0x66c   : > { %10465 = vmatmul.mubr.bf16.gmra.mrb[76].mxu1 %v13517_v52  ;;  %v8447_v52 = vrot.slane %v8445_v11, 1  ;;  %v13531_v11 = vld [vmem:[#allocation4 + $0x88] sm:$0xff]  }
 0x66d   : > { %10472 = vmatprep.mubr.bf16.mxu1 %v8416_v0  ;;  %v13528_v0 = vld [vmem:[#allocation4 + $0x88] sm:$0xff]  }
 0x66e   : > { %v8448_v35 = vsel %vm1061_vm0, %v8443_v4, %v8447_v52  ;;  %v8451_v30 = vor.u32 %v8449_v43, %v8447_v52  ;;  %v8457_v27 = vshrl.u32 %v13528_v0, 16 }
 0x674   : > { %10473 = vmatmul.mubr.bf16.gmra.mrb[80].mxu1 %v13519_v55  ;;  %v8453_v55 = vshll.u32 %v13528_v0, 16  ;;  %v8473_v0 = vshrl.u32 %v13532_v47, 16 }
 0x675   : > { %10480 = vmatprep.mubr.bf16.mxu1 %v8424_v12  ;;  %v13530_v12 = vld [vmem:[#allocation4 + $0x90] sm:$0xff]  }
 0x676   : > { %v8455_v54 = vrot.slane %v8453_v55, 1  ;;  %v8465_v34 = vshrl.u32 %v13530_v12, 16  ;;  %v13533_v55 = vld [vmem:[#allocation4 + $0x90] sm:$0xff]  }
 0x678   : > { %v8456_v26 = vsel %vm1061_vm0, %v8451_v30, %v8455_v54  ;;  %v8459_v36 = vor.u32 %v8457_v27, %v8455_v54  ;;  %v13535_v27 = vld [vmem:[#allocation4 + $0x98] sm:$0xff]  }
 0x67c   : > { %10481 = vmatmul.mubr.bf16.gmra.mrb[84].mxu1 %v13521_v10  ;;  %v8461_v10 = vshll.u32 %v13530_v12, 16 }
 0x67d   : > { %10488 = vmatprep.mubr.bf16.mxu1 %v8432_v53 }
 0x67e   : > { %v8463_v53 = vrot.slane %v8461_v10, 1  ;;  %v13538_v10 = vld [vmem:[#allocation4 + $0xb0] sm:$0xff]  }
 0x680   : > { %v8464_v24 = vsel %vm1061_vm0, %v8459_v36, %v8463_v53  ;;  %v8467_v37 = vor.u32 %v8465_v34, %v8463_v53  ;;  %v8493_v53 = vshll.u32 %v13538_v10, 16 }
 0x684   : > { %10489 = vmatmul.mubr.bf16.gmra.mrb[88].mxu1 %v13523_v62  ;;  %v8471_v62 = vrot.slane %v8469_v38, 1  ;;  %v13537_v38 = vld [vmem:[#allocation4 + $0xa0] sm:$0xff]  }
 0x685   : > { %10496 = vmatprep.mubr.bf16.mxu1 %v8440_v15  ;;  %v13534_v15 = vld [vmem:[#allocation4 + $0xa0] sm:$0xff]  }
 0x686   : > { %v8472_v52 = vsel %vm1061_vm0, %v8467_v37, %v8471_v62  ;;  %v8475_v43 = vor.u32 %v8473_v0, %v8471_v62  ;;  %v8481_v12 = vshrl.u32 %v13534_v15, 16 }
 0x68c   : > { %10497 = vmatmul.mubr.bf16.gmra.mrb[92].mxu1 %v13525_v29  ;;  %v8477_v29 = vshll.u32 %v13534_v15, 16  ;;  %v8497_v15 = vshrl.u32 %v13538_v10, 16 }
 0x68d   : > { %10504 = vmatprep.mubr.bf16.mxu1 %v8448_v35  ;;  %v13536_v35 = vld [vmem:[#allocation4 + $0xa8] sm:$0xff]  }
 0x68e   : > { %v8479_v4 = vrot.slane %v8477_v29, 1  ;;  %v8489_v47 = vshrl.u32 %v13536_v35, 16  ;;  %v13539_v29 = vld [vmem:[#allocation4 + $0xa8] sm:$0xff]  }
 0x690   : > { %v8480_v54 = vsel %vm1061_vm0, %v8475_v43, %v8479_v4  ;;  %v8483_v30 = vor.u32 %v8481_v12, %v8479_v4  ;;  %v13541_v12 = vld [vmem:[#allocation4 + $0xb0] sm:$0xff]  }
 0x694   : > { %10505 = vmatmul.mubr.bf16.gmra.mrb[96].mxu1 %v13527_v44  ;;  %v8485_v44 = vshll.u32 %v13536_v35, 16 }
 0x695   : > { %10512 = vmatprep.mubr.bf16.mxu1 %v8456_v26 }
 0x696   : > { %v8487_v26 = vrot.slane %v8485_v44, 1  ;;  %v13544_v44 = vld [vmem:[#allocation4 + $0xc8] sm:$0xff]  }
 0x698   : > { %v8488_v36 = vsel %vm1061_vm0, %v8483_v30, %v8487_v26  ;;  %v8491_v34 = vor.u32 %v8489_v47, %v8487_v26  ;;  %v8517_v26 = vshll.u32 %v13544_v44, 16 }
 0x69c   : > { %10513 = vmatmul.mubr.bf16.gmra.mrb[100].mxu1 %v13529_v2  ;;  %v8495_v2 = vrot.slane %v8493_v53, 1  ;;  %v13543_v53 = vld [vmem:[#allocation4 + $0xb8] sm:$0xff]  }
 0x69d   : > { %10520 = vmatprep.mubr.bf16.mxu1 %v8464_v24  ;;  %v13540_v24 = vld [vmem:[#allocation4 + $0xb8] sm:$0xff]  }
 0x69e   : > { %v8496_v62 = vsel %vm1061_vm0, %v8491_v34, %v8495_v2  ;;  %v8499_v0 = vor.u32 %v8497_v15, %v8495_v2  ;;  %v8505_v35 = vshrl.u32 %v13540_v24, 16  ;;  %v13548_v34 = vld [vmem:[#allocation4 + $0xd8] ss:$0 sps:$4 sm:$0x11]   ;;  %v13545_v15 = vld [vmem:[#allocation4 + $0xc0] sm:$0xff]  }
 0x6a4   : > { %10521 = vmatmul.mubr.bf16.gmra.mrb[104].mxu1 %v13531_v11  ;;  %v8501_v11 = vshll.u32 %v13540_v24, 16  ;;  %v8521_v24 = vshrl.u32 %v13544_v44, 16 }
 0x6a5   : > { %10528 = vmatprep.mubr.bf16.mxu1 %v8472_v52  ;;  %v13542_v52 = vld [vmem:[#allocation4 + $0xc0] sm:$0xff]  }
 0x6a6   : > { %v8503_v37 = vrot.slane %v8501_v11, 1  ;;  %v8513_v10 = vshrl.u32 %v13542_v52, 16 }
 0x6a8   : > { %v8504_v4 = vsel %vm1061_vm0, %v8499_v0, %v8503_v37  ;;  %v8507_v43 = vor.u32 %v8505_v35, %v8503_v37 }
 0x6ac   : > { %10529 = vmatmul.mubr.bf16.gmra.mrb[108].mxu1 %v13533_v55  ;;  %v8509_v55 = vshll.u32 %v13542_v52, 16 }
 0x6ad   : > { %10536 = vmatprep.mubr.bf16.mxu1 %v8480_v54 }
 0x6ae   : > { %v8511_v54 = vrot.slane %v8509_v55, 1  ;;  %v13547_v55 = vld [vmem:[#allocation4 + $0xc8] sm:$0xff]  }
 0x6b0   : > { %v8512_v30 = vsel %vm1061_vm0, %v8507_v43, %v8511_v54  ;;  %v8515_v47 = vor.u32 %v8513_v10, %v8511_v54  ;;  %v13550_v43 = vld [vmem:[#allocation4 + $0xc0] sm:$0xff]   ;;  %v13549_v54 = vld [vmem:[#allocation4 + $0xd0] sm:$0xff]  }
 0x6b1   : > { %v8798_v44 = vrot.slane %v13550_v43, 1  ;;  %v13552_v10 = vld [vmem:[#allocation4 + $0xd0] sm:$0xff]  }
 0x6b4   : > { %10537 = vmatmul.mubr.bf16.gmra.mrb[112].mxu1 %v13535_v27  ;;  %v8519_v27 = vrot.slane %v8517_v26, 1 }
 0x6b5   : > { %10544 = vmatprep.mubr.bf16.mxu1 %v8488_v36  ;;  %v13546_v36 = vld [vmem:[#allocation4 + $0xd0] sm:$0xff]  }
 0x6b6   : > { %v8520_v2 = vsel %vm1061_vm0, %v8515_v47, %v8519_v27  ;;  %v8529_v37 = vshrl.u32 %v13546_v36, 16 }
 0x6bc   : > { %10545 = vmatmul.mubr.bf16.gmra.mrb[116].mxu1 %v13537_v38  ;;  %v8525_v38 = vshll.u32 %v13546_v36, 16  ;;  %v8802_v36 = vrot.slane %v13552_v10, 1 }
 0x6bd   : > { %10552 = vmatprep.mubr.bf16.mxu1 %v8496_v62  ;;  %v8523_v62 = vor.u32 %v8521_v24, %v8519_v27 }
 0x6be   : > { %v8527_v11 = vrot.slane %v8525_v38, 1 }
 0x6c0   : > { %v8528_v0 = vsel %vm1061_vm0, %v8523_v62, %v8527_v11  ;;  %v8531_v52 = vor.u32 %v8529_v37, %v8527_v11 }
 0x6c4   : > { %10553 = vmatmul.mubr.bf16.gmra.mrb[120].mxu1 %v13539_v29  ;;  %v8533_v29 = vshll.u32 %v13548_v34, 16 }
 0x6c5   : > { %10560 = vmatprep.mubr.bf16.mxu1 %v8504_v4 }
 0x6c6   : > { %v8535_v4 = vrot.slane %v8533_v29, 1 }
 0x6c8   : > { %v8536_v35 = vsel %vm1061_vm0, %v8531_v52, %v8535_v4  ;;  %v9215_v4 = vld [vmem:[%s13939_s16 + $0x21] sm:$0xff] }
 0x6cc   : > { %10561 = vmatmul.mubr.bf16.gmra.mrb[124].mxu1 %v13541_v12  ;;  %v13551_v12 = vld [vmem:[#allocation4 + $0xc8] sm:$0xff]  }
 0x6cd   : > { %10568 = vmatprep.mubr.bf16.mxu1 %v8512_v30  ;;  %v15336_v30 = vrot.slane %v14838_v13, 1  ;;  %v8800_v27 = vrot.slane %v13551_v12, 1  ;;  %v15068_v13 = vld [vmem:[%s15312_s4] ss:$0 sm:$0xff] }
 0x6ce   : > { %v9216_v12 = vld [vmem:[%s13939_s16 + $0x29] sm:$0xff] }
 0x6cf   : > { %v8799_v26 = vsel %vm1478_vm1, %v15336_v30, %v8798_v44  ;;  %v8801_v47 = vsel %vm1478_vm1, %v8798_v44, %v8800_v27 }
 0x6d4   : > { %10569 = vmatmul.mubr.bf16.gmra.mrb[128].mxu1 %v13543_v53  ;;  %v13553_v53 = vld [vmem:[#allocation4 + $0xd8] ss:$0 sps:$4 sm:$0x11]  }
 0x6d5   : > { %10576 = vmatprep.mubr.bf16.mxu1 %v8520_v2  ;;  %v8803_v2 = vsel %vm1478_vm1, %v8800_v27, %v8802_v36  ;;  %v8804_v38 = vrot.slane %v13553_v53, 1  ;;  %v9217_v27 = vld [vmem:[%s13939_s16 + $0x31] sm:$0xff] }
 0x6d7   : > { %v8805_v24 = vsel %vm1478_vm1, %v8802_v36, %v8804_v38 }
 0x6dc   : > { %10577 = vmatmul.mubr.bf16.gmra.mrb[132].mxu1 %v13545_v15  ;;  %v9214_v15 = vld [vmem:[%s13939_s16 + $0x19] sm:$0xff] }
 0x6dd   : > { %10584 = vmatprep.mubr.bf16.mxu1 %v8528_v0 }
 0x6e4   : > { %10585 = vmatmul.mubr.bf16.gmra.mrb[136].mxu1 %v13547_v55 }
 0x6e5   : > { %10592 = vmatprep.mubr.bf16.mxu1 %v8536_v35 }
 0x6ec   : > { %10593 = vmatmul.mubr.bf16.gmra.mrb[140].mxu1 %v13549_v54 }
 0x6ed   : > { %12191 = vmatprep.mubr.bf16.mxu1 %v8799_v26 }
 0x6f4   : > { %12192 = vmatmul.mubr.bf16.vlgmr.msra.gmra.mrb[144].mxu1 %v8801_v47 }
 0x6f5   : > { %12195 = vmatprep.mubr.bf16.mxu1 %v8803_v2 }
 0x6fc   : > { %12196 = vmatmul.mubr.bf16.gmra.mrb[148].mxu1 %v8805_v24 }
 0x707   : > { %v10410_v34 = vpop.f32.mrb[48].mxu1 }
 0x708   : > { %v12263_v62 = vadd.f32 %v15068_v13, %v10410_v34  ;;  %v10412_v11 = vpop.f32.mrb[49].mxu1  ;;  %v9218_v34 = vld [vmem:[%s13939_s16 + $0x39] sm:$0xff] }
 0x709   : > { %v10413_v37 = vpop.f32.mrb[50].mxu1 }
 0x70a   : > { %v10636_v29 = vadd.f32 %v12263_v62, %v14866_v5  ;;  %v12264_v0 = vadd.f32 %v15068_v13, %v10413_v37  ;;  %v10415_v52 = vpop.f32.mrb[51].mxu1  ;;  %v9219_v37 = vld [vmem:[%s13939_s16 + $0x41] sm:$0xff] }
 0x70c   : > { %v10826_v55 = vadd.f32 %v10636_v29, %v9214_v15  ;;  %v10639_v35 = vadd.f32 %v12264_v0, %v14871_v32 }
 0x70e   : > { %10874 = vst [vmem:[%s15077_s10] sm:$0xff] %v10826_v55  ;;  %v10827_v43 = vadd.f32 %v10639_v35, %v9215_v4  ;;  %v9220_v35 = vld [vmem:[%s13939_s16 + $0x49] sm:$0xff] }
 0x70f   : > { %v10418_v54 = vpop.f32.mrb[52].mxu1 }
 0x710   : > { %10875 = vst [vmem:[%s15077_s10 + $0x8] sm:$0xff] %v10827_v43  ;;  %v12265_v5 = vadd.f32 %v15068_v13, %v10418_v54  ;;  %v10420_v44 = vpop.f32.mrb[53].mxu1 }
 0x711   : > { %v10421_v30 = vpop.f32.mrb[54].mxu1  ;;  %v9221_v44 = vld [vmem:[%s13939_s16 + $0x51] sm:$0xff] }
 0x712   : > { %v10644_v26 = vadd.f32 %v12265_v5, %v14864_v57  ;;  %v12266_v32 = vadd.f32 %v15068_v13, %v10421_v30  ;;  %v10423_v10 = vpop.f32.mrb[55].mxu1 }
 0x714   : > { %v10828_v36 = vadd.f32 %v10644_v26, %v9216_v12  ;;  %v10647_v53 = vadd.f32 %v12266_v32, %v14868_v9 }
 0x716   : > { %10876 = vst [vmem:[%s15077_s10 + $0x10] sm:$0xff] %v10828_v36  ;;  %v10829_v47 = vadd.f32 %v10647_v53, %v9217_v27  ;;  %v9222_v27 = vld [vmem:[%s13939_s16 + $0x59] sm:$0xff] }
 0x717   : > { %v10426_v2 = vpop.f32.mrb[56].mxu1 }
 0x718   : > { %10877 = vst [vmem:[%s15077_s10 + $0x18] sm:$0xff] %v10829_v47  ;;  %v12267_v38 = vadd.f32 %v15068_v13, %v10426_v2  ;;  %v10428_v24 = vpop.f32.mrb[57].mxu1  ;;  %v9223_v2 = vld [vmem:[%s13939_s16 + $0x61] sm:$0xff] }
 0x719   : > { %v10429_v57 = vpop.f32.mrb[58].mxu1 }
 0x71a   : > { %v10652_v62 = vadd.f32 %v12267_v38, %v14881_v18  ;;  %v12268_v11 = vadd.f32 %v15068_v13, %v10429_v57  ;;  %v10431_v15 = vpop.f32.mrb[59].mxu1 }
 0x71c   : > { %v10830_v29 = vadd.f32 %v10652_v62, %v9218_v34  ;;  %v10655_v9 = vadd.f32 %v12268_v11, %v14885_v22  ;;  %v9224_v11 = vld [vmem:[%s13939_s16 + $0x69] sm:$0xff] }
 0x71e   : > { %10878 = vst [vmem:[%s15077_s10 + $0x20] sm:$0xff] %v10830_v29  ;;  %v10831_v0 = vadd.f32 %v10655_v9, %v9219_v37  ;;  %v9225_v9 = vld [vmem:[%s13939_s16 + $0x71] sm:$0xff] }
 0x71f   : > { %v10434_v52 = vpop.f32.mrb[60].mxu1 }
 0x720   : > { %10879 = vst [vmem:[%s15077_s10 + $0x28] sm:$0xff] %v10831_v0  ;;  %v12269_v4 = vadd.f32 %v15068_v13, %v10434_v52  ;;  %v10436_v55 = vpop.f32.mrb[61].mxu1 }
 0x721   : > { %v10437_v18 = vpop.f32.mrb[62].mxu1 }
 0x722   : > { %v10660_v43 = vadd.f32 %v12269_v4, %v14878_v48  ;;  %v12270_v54 = vadd.f32 %v15068_v13, %v10437_v18  ;;  %v10439_v5 = vpop.f32.mrb[63].mxu1  ;;  %v9226_v18 = vld [vmem:[%s13939_s16 + $0x79] sm:$0xff] }
 0x724   : > { %v10832_v12 = vadd.f32 %v10660_v43, %v9220_v35  ;;  %v10663_v22 = vadd.f32 %v12270_v54, %v14883_v21 }
 0x726   : > { %10880 = vst [vmem:[%s15077_s10 + $0x30] sm:$0xff] %v10832_v12  ;;  %v10833_v30 = vadd.f32 %v10663_v22, %v9221_v44  ;;  %v9227_v44 = vld [vmem:[%s13939_s16 + $0x81] sm:$0xff] }
 0x727   : > { %v10442_v26 = vpop.f32.mrb[64].mxu1 }
 0x728   : > { %10881 = vst [vmem:[%s15077_s10 + $0x38] sm:$0xff] %v10833_v30  ;;  %v12271_v32 = vadd.f32 %v15068_v13, %v10442_v26  ;;  %v10444_v10 = vpop.f32.mrb[65].mxu1 }
 0x729   : > { %v10445_v48 = vpop.f32.mrb[66].mxu1  ;;  %v9228_v10 = vld [vmem:[%s13939_s16 + $0x89] sm:$0xff] }
 0x72a   : > { %v10668_v36 = vadd.f32 %v12271_v32, %v14891_v14  ;;  %v12272_v53 = vadd.f32 %v15068_v13, %v10445_v48  ;;  %v10447_v47 = vpop.f32.mrb[67].mxu1 }
 0x72c   : > { %v10834_v38 = vadd.f32 %v10668_v36, %v9222_v27  ;;  %v10671_v21 = vadd.f32 %v12272_v53, %v14895_v51  ;;  %v9229_v53 = vld [vmem:[%s13939_s16 + $0x91] sm:$0xff] }
 0x72e   : > { %10882 = vst [vmem:[%s15077_s10 + $0x40] sm:$0xff] %v10834_v38  ;;  %v10835_v24 = vadd.f32 %v10671_v21, %v9223_v2 }
 0x72f   : > { %v10450_v34 = vpop.f32.mrb[68].mxu1 }
 0x730   : > { %10883 = vst [vmem:[%s15077_s10 + $0x48] sm:$0xff] %v10835_v24  ;;  %v12273_v57 = vadd.f32 %v15068_v13, %v10450_v34  ;;  %v10452_v62 = vpop.f32.mrb[69].mxu1  ;;  %v9230_v34 = vld [vmem:[%s13939_s16 + $0x99] sm:$0xff] }
 0x731   : > { %v10453_v14 = vpop.f32.mrb[70].mxu1 }
 0x732   : > { %v10676_v15 = vadd.f32 %v12273_v57, %v14889_v50  ;;  %v12274_v37 = vadd.f32 %v15068_v13, %v10453_v14  ;;  %v10455_v29 = vpop.f32.mrb[71].mxu1  ;;  %v9231_v14 = vld [vmem:[%s13939_s16 + $0xa1] sm:$0xff] }
 0x734   : > { %v10836_v0 = vadd.f32 %v10676_v15, %v9224_v11  ;;  %v10679_v51 = vadd.f32 %v12274_v37, %v14893_v19 }
 0x736   : > { %10884 = vst [vmem:[%s15077_s10 + $0x50] sm:$0xff] %v10836_v0  ;;  %v10837_v52 = vadd.f32 %v10679_v51, %v9225_v9  ;;  %v9232_v51 = vld [vmem:[%s13939_s16 + $0xa9] sm:$0xff] }
 0x737   : > { %v10458_v4 = vpop.f32.mrb[72].mxu1 }
 0x738   : > { %10885 = vst [vmem:[%s15077_s10 + $0x58] sm:$0xff] %v10837_v52  ;;  %v12275_v55 = vadd.f32 %v15068_v13, %v10458_v4  ;;  %v10460_v35 = vpop.f32.mrb[73].mxu1 }
 0x739   : > { %v10461_v50 = vpop.f32.mrb[74].mxu1  ;;  %v9233_v35 = vld [vmem:[%s13939_s16 + $0xb1] sm:$0xff] }
 0x73a   : > { %v10684_v43 = vadd.f32 %v12275_v55, %v14902_v60  ;;  %v12276_v54 = vadd.f32 %v15068_v13, %v10461_v50  ;;  %v10463_v5 = vpop.f32.mrb[75].mxu1 }
 0x73c   : > { %v10838_v12 = vadd.f32 %v10684_v43, %v9226_v18  ;;  %v10687_v19 = vadd.f32 %v12276_v54, %v14906_v33 }
 0x73e   : > { %10886 = vst [vmem:[%s15077_s10 + $0x60] sm:$0xff] %v10838_v12  ;;  %v10839_v22 = vadd.f32 %v10687_v19, %v9227_v44  ;;  %v9234_v44 = vld [vmem:[%s13939_s16 + $0xb9] sm:$0xff] }
 0x73f   : > { %v10466_v30 = vpop.f32.mrb[76].mxu1 }
 0x740   : > { %10887 = vst [vmem:[%s15077_s10 + $0x68] sm:$0xff] %v10839_v22  ;;  %v12277_v26 = vadd.f32 %v15068_v13, %v10466_v30  ;;  %v10468_v32 = vpop.f32.mrb[77].mxu1  ;;  %v9235_v30 = vld [vmem:[%s13939_s16 + $0xc1] sm:$0xff] }
 0x741   : > { %v10469_v60 = vpop.f32.mrb[78].mxu1 }
 0x742   : > { %v10692_v27 = vadd.f32 %v12277_v26, %v14900_v6  ;;  %v12278_v48 = vadd.f32 %v15068_v13, %v10469_v60  ;;  %v10471_v36 = vpop.f32.mrb[79].mxu1 }
 0x744   : > { %v10840_v47 = vadd.f32 %v10692_v27, %v9228_v10  ;;  %v10695_v33 = vadd.f32 %v12278_v48, %v14904_v49  ;;  %v9236_v48 = vld [vmem:[%s13939_s16 + $0xc9] sm:$0xff] }
 0x746   : > { %10888 = vst [vmem:[%s15077_s10 + $0x70] sm:$0xff] %v10840_v47  ;;  %v10841_v2 = vadd.f32 %v10695_v33, %v9229_v53  ;;  %v9237_v33 = vld [vmem:[%s13939_s16 + $0xd1] sm:$0xff] }
 0x747   : > { %v10474_v38 = vpop.f32.mrb[80].mxu1 }
 0x748   : > { %10889 = vst [vmem:[%s15077_s10 + $0x78] sm:$0xff] %v10841_v2  ;;  %v12279_v21 = vadd.f32 %v15068_v13, %v10474_v38  ;;  %v10476_v24 = vpop.f32.mrb[81].mxu1 }
 0x749   : > { %v10477_v6 = vpop.f32.mrb[82].mxu1 }
 0x74a   : > { %v10700_v57 = vadd.f32 %v12279_v21, %v14912_v40  ;;  %v12280_v62 = vadd.f32 %v15068_v13, %v10477_v6  ;;  %v10479_v11 = vpop.f32.mrb[83].mxu1  ;;  %v9238_v6 = vld [vmem:[%s13939_s16 + $0xd9] sm:$0xff] }
 0x74c   : > { %v10842_v15 = vadd.f32 %v10700_v57, %v9230_v34  ;;  %v10703_v49 = vadd.f32 %v12280_v62, %v14916_v20 }
 0x74e   : > { %10890 = vst [vmem:[%s15077_s10 + $0x80] sm:$0xff] %v10842_v15  ;;  %v10843_v37 = vadd.f32 %v10703_v49, %v9231_v14  ;;  %v9239_v14 = vld [vmem:[%s13939_s16 + $0xe1] sm:$0xff] }
 0x74f   : > { %v10482_v29 = vpop.f32.mrb[84].mxu1 }
 0x750   : > { %10891 = vst [vmem:[%s15077_s10 + $0x88] sm:$0xff] %v10843_v37  ;;  %v12281_v9 = vadd.f32 %v15068_v13, %v10482_v29  ;;  %v10484_v0 = vpop.f32.mrb[85].mxu1 }
 0x751   : > { %v10485_v40 = vpop.f32.mrb[86].mxu1  ;;  %v9240_v0 = vld [vmem:[%s13939_s16 + $0xe9] sm:$0xff] }
 0x752   : > { %v10708_v52 = vadd.f32 %v12281_v9, %v14910_v63  ;;  %v12282_v4 = vadd.f32 %v15068_v13, %v10485_v40  ;;  %v10487_v55 = vpop.f32.mrb[87].mxu1 }
 0x754   : > { %v10844_v18 = vadd.f32 %v10708_v52, %v9232_v51  ;;  %v10711_v20 = vadd.f32 %v12282_v4, %v14914_v56  ;;  %v9241_v4 = vld [vmem:[%s13939_s16 + $0xf1] sm:$0xff] }
 0x756   : > { %10892 = vst [vmem:[%s15077_s10 + $0x90] sm:$0xff] %v10844_v18  ;;  %v10845_v50 = vadd.f32 %v10711_v20, %v9233_v35 }
 0x757   : > { %v10490_v43 = vpop.f32.mrb[88].mxu1 }
 0x758   : > { %10893 = vst [vmem:[%s15077_s10 + $0x98] sm:$0xff] %v10845_v50  ;;  %v12283_v54 = vadd.f32 %v15068_v13, %v10490_v43  ;;  %v10492_v5 = vpop.f32.mrb[89].mxu1  ;;  %v9242_v43 = vld [vmem:[%s13939_s16 + $0xf9] sm:$0xff] }
 0x759   : > { %v10493_v63 = vpop.f32.mrb[90].mxu1 }
 0x75a   : > { %v10716_v12 = vadd.f32 %v12283_v54, %v14921_v3  ;;  %v12284_v19 = vadd.f32 %v15068_v13, %v10493_v63  ;;  %v10495_v22 = vpop.f32.mrb[91].mxu1  ;;  %v9243_v63 = vld [vmem:[%s13939_s16 + $0x101] sm:$0xff] }
 0x75c   : > { %v10846_v26 = vadd.f32 %v10716_v12, %v9234_v44  ;;  %v10719_v56 = vadd.f32 %v12284_v19, %v14925_v16 }
 0x75e   : > { %10894 = vst [vmem:[%s15077_s10 + $0xa0] sm:$0xff] %v10846_v26  ;;  %v10847_v32 = vadd.f32 %v10719_v56, %v9235_v30  ;;  %v9244_v56 = vld [vmem:[%s13939_s16 + $0x109] sm:$0xff] }
 0x75f   : > { %v10498_v10 = vpop.f32.mrb[92].mxu1 }
 0x760   : > { %10895 = vst [vmem:[%s15077_s10 + $0xa8] sm:$0xff] %v10847_v32  ;;  %v12285_v60 = vadd.f32 %v15068_v13, %v10498_v10  ;;  %v10500_v27 = vpop.f32.mrb[93].mxu1 }
 0x761   : > { %v10501_v3 = vpop.f32.mrb[94].mxu1  ;;  %v9245_v27 = vld [vmem:[%s13939_s16 + $0x111] sm:$0xff] }
 0x762   : > { %v10724_v36 = vadd.f32 %v12285_v60, %v14919_v25  ;;  %v12286_v53 = vadd.f32 %v15068_v13, %v10501_v3  ;;  %v10503_v47 = vpop.f32.mrb[95].mxu1 }
 0x764   : > { %v10848_v2 = vadd.f32 %v10724_v36, %v9236_v48  ;;  %v10727_v16 = vadd.f32 %v12286_v53, %v14923_v61 }
 0x766   : > { %10896 = vst [vmem:[%s15077_s10 + $0xb0] sm:$0xff] %v10848_v2  ;;  %v10849_v38 = vadd.f32 %v10727_v16, %v9237_v33  ;;  %v9246_v33 = vld [vmem:[%s13939_s16 + $0x119] sm:$0xff] }
 0x767   : > { %v10506_v21 = vpop.f32.mrb[96].mxu1 }
 0x768   : > { %10897 = vst [vmem:[%s15077_s10 + $0xb8] sm:$0xff] %v10849_v38  ;;  %v12287_v24 = vadd.f32 %v15068_v13, %v10506_v21  ;;  %v10508_v34 = vpop.f32.mrb[97].mxu1  ;;  %v9247_v21 = vld [vmem:[%s13939_s16 + $0x121] sm:$0xff] }
 0x769   : > { %v10509_v25 = vpop.f32.mrb[98].mxu1 }
 0x76a   : > { %v10732_v57 = vadd.f32 %v12287_v24, %v14932_v59  ;;  %v12288_v62 = vadd.f32 %v15068_v13, %v10509_v25  ;;  %v10511_v11 = vpop.f32.mrb[99].mxu1 }
 0x76c   : > { %v10850_v15 = vadd.f32 %v10732_v57, %v9238_v6  ;;  %v10735_v61 = vadd.f32 %v12288_v62, %v14936_v17  ;;  %v9248_v62 = vld [vmem:[%s13939_s16 + $0x129] sm:$0xff] }
 0x76e   : > { %10898 = vst [vmem:[%s15077_s10 + $0xc0] sm:$0xff] %v10850_v15  ;;  %v10851_v49 = vadd.f32 %v10735_v61, %v9239_v14  ;;  %v9249_v61 = vld [vmem:[%s13939_s16 + $0x131] sm:$0xff] }
 0x76f   : > { %v10514_v37 = vpop.f32.mrb[100].mxu1 }
 0x770   : > { %10899 = vst [vmem:[%s15077_s10 + $0xc8] sm:$0xff] %v10851_v49  ;;  %v12289_v29 = vadd.f32 %v15068_v13, %v10514_v37  ;;  %v10516_v9 = vpop.f32.mrb[101].mxu1 }
 0x771   : > { %v10517_v59 = vpop.f32.mrb[102].mxu1 }
 0x772   : > { %v10740_v51 = vadd.f32 %v12289_v29, %v14930_v42  ;;  %v12290_v40 = vadd.f32 %v15068_v13, %v10517_v59  ;;  %v10519_v52 = vpop.f32.mrb[103].mxu1  ;;  %v9250_v59 = vld [vmem:[%s13939_s16 + $0x139] sm:$0xff] }
 0x774   : > { %v10852_v55 = vadd.f32 %v10740_v51, %v9240_v0  ;;  %v10743_v17 = vadd.f32 %v12290_v40, %v14934_v23 }
 0x776   : > { %10900 = vst [vmem:[%s15077_s10 + $0xd0] sm:$0xff] %v10852_v55  ;;  %v10853_v35 = vadd.f32 %v10743_v17, %v9241_v4  ;;  %v9251_v4 = vld [vmem:[%s13939_s16 + $0x141] sm:$0xff] }
 0x777   : > { %v10522_v18 = vpop.f32.mrb[104].mxu1 }
 0x778   : > { %10901 = vst [vmem:[%s15077_s10 + $0xd8] sm:$0xff] %v10853_v35  ;;  %v12291_v20 = vadd.f32 %v15068_v13, %v10522_v18  ;;  %v10524_v50 = vpop.f32.mrb[105].mxu1 }
 0x779   : > { %v10525_v42 = vpop.f32.mrb[106].mxu1  ;;  %v9252_v50 = vld [vmem:[%s13939_s16 + $0x149] sm:$0xff] }
 0x77a   : > { %v10748_v54 = vadd.f32 %v12291_v20, %v14942_v41  ;;  %v12292_v5 = vadd.f32 %v15068_v13, %v10525_v42  ;;  %v10527_v44 = vpop.f32.mrb[107].mxu1 }
 0x77b   : > { %v9253_v44 = vld [vmem:[%s13939_s16 + $0x151] sm:$0xff] }
 0x77c   : > { %v10854_v12 = vadd.f32 %v10748_v54, %v9242_v43  ;;  %v10751_v23 = vadd.f32 %v12292_v5, %v14946_v58 }
 0x77e   : > { %10902 = vst [vmem:[%s15077_s10 + $0xe0] sm:$0xff] %v10854_v12  ;;  %v10855_v19 = vadd.f32 %v10751_v23, %v9243_v63  ;;  %v15338_v12 = vld [vmem:[#allocation16_spill] sm:$0xff] }
 0x77f   : > { %v10530_v22 = vpop.f32.mrb[108].mxu1 }
 0x780   : > { %10903 = vst [vmem:[%s15077_s10 + $0xe8] sm:$0xff] %v10855_v19  ;;  %v12293_v30 = vadd.f32 %v15068_v13, %v10530_v22  ;;  %v10532_v26 = vpop.f32.mrb[109].mxu1 }
 0x781   : > { %v10533_v41 = vpop.f32.mrb[110].mxu1 }
 0x782   : > { %v10756_v32 = vadd.f32 %v12293_v30, %v14940_v46  ;;  %v12294_v10 = vadd.f32 %v15068_v13, %v10533_v41  ;;  %v10535_v60 = vpop.f32.mrb[111].mxu1 }
 0x784   : > { %v10856_v48 = vadd.f32 %v10756_v32, %v9244_v56  ;;  %v10759_v58 = vadd.f32 %v12294_v10, %v14944_v45 }
 0x786   : > { %10904 = vst [vmem:[%s15077_s10 + $0xf0] sm:$0xff] %v10856_v48  ;;  %v10857_v3 = vadd.f32 %v10759_v58, %v9245_v27 }
 0x787   : > { %v10538_v36 = vpop.f32.mrb[112].mxu1 }
 0x788   : > { %10905 = vst [vmem:[%s15077_s10 + $0xf8] sm:$0xff] %v10857_v3  ;;  %v12295_v53 = vadd.f32 %v15068_v13, %v10538_v36  ;;  %v10540_v47 = vpop.f32.mrb[113].mxu1 }
 0x789   : > { %v10541_v46 = vpop.f32.mrb[114].mxu1 }
 0x78a   : > { %v10764_v2 = vadd.f32 %v12295_v53, %v14951_v8  ;;  %v12296_v16 = vadd.f32 %v15068_v13, %v10541_v46  ;;  %v10543_v38 = vpop.f32.mrb[115].mxu1 }
 0x78c   : > { %v10858_v24 = vadd.f32 %v10764_v2, %v9246_v33  ;;  %v10767_v45 = vadd.f32 %v12296_v16, %v14955_v7  ;;  %v9256_v2 = vld [vmem:[%s13939_s16 + $0x169] sm:$0xff] }
 0x78e   : > { %10906 = vst [vmem:[%s15077_s10 + $0x100] sm:$0xff] %v10858_v24  ;;  %v10859_v34 = vadd.f32 %v10767_v45, %v9247_v21  ;;  %v9254_v24 = vld [vmem:[%s13939_s16 + $0x159] sm:$0xff] }
 0x78f   : > { %v10546_v6 = vpop.f32.mrb[116].mxu1 }
 0x790   : > { %10907 = vst [vmem:[%s15077_s10 + $0x108] sm:$0xff] %v10859_v34  ;;  %v12297_v25 = vadd.f32 %v15068_v13, %v10546_v6  ;;  %v10548_v57 = vpop.f32.mrb[117].mxu1 }
 0x791   : > { %v10549_v8 = vpop.f32.mrb[118].mxu1 }
 0x792   : > { %v10772_v11 = vadd.f32 %v12297_v25, %v14949_v1  ;;  %v12298_v14 = vadd.f32 %v15068_v13, %v10549_v8  ;;  %v10551_v15 = vpop.f32.mrb[119].mxu1  ;;  %v9257_v25 = vld [vmem:[%s13939_s16 + $0x171] sm:$0xff] }
 0x794   : > { %v10860_v49 = vadd.f32 %v10772_v11, %v9248_v62  ;;  %v10775_v7 = vadd.f32 %v12298_v14, %v14953_v28  ;;  %v9255_v11 = vld [vmem:[%s13939_s16 + $0x161] sm:$0xff] }
 0x796   : > { %10908 = vst [vmem:[%s15077_s10 + $0x110] sm:$0xff] %v10860_v49  ;;  %v10861_v37 = vadd.f32 %v10775_v7, %v9249_v61 }
 0x797   : > { %v10554_v29 = vpop.f32.mrb[120].mxu1 }
 0x798   : > { %10909 = vst [vmem:[%s15077_s10 + $0x118] sm:$0xff] %v10861_v37  ;;  %v12299_v9 = vadd.f32 %v15068_v13, %v10554_v29  ;;  %v10556_v0 = vpop.f32.mrb[121].mxu1 }
 0x799   : > { %v10557_v1 = vpop.f32.mrb[122].mxu1 }
 0x79a   : > { %v10780_v51 = vadd.f32 %v12299_v9, %v14963_v31  ;;  %v12300_v40 = vadd.f32 %v15068_v13, %v10557_v1  ;;  %v10559_v52 = vpop.f32.mrb[123].mxu1  ;;  %v15337_v31 = vld [vmem:[#allocation15_spill] sm:$0xff] }
 0x79b   : > { %v9260_v9 = vld [vmem:[%s13939_s16 + $0x189] sm:$0xff] }
 0x79c   : > { %v10862_v55 = vadd.f32 %v10780_v51, %v9250_v59  ;;  %v10783_v28 = vadd.f32 %v12300_v40, %v14967_v39  ;;  %v9258_v51 = vld [vmem:[%s13939_s16 + $0x179] sm:$0xff] }
 0x79e   : > { %10910 = vst [vmem:[%s15077_s10 + $0x120] sm:$0xff] %v10862_v55  ;;  %v10863_v17 = vadd.f32 %v10783_v28, %v9251_v4  ;;  %v9261_v55 = vld [vmem:[%s13939_s16 + $0x191] sm:$0xff] }
 0x79f   : > { %v10562_v35 = vpop.f32.mrb[124].mxu1 }
 0x7a0   : > { %10911 = vst [vmem:[%s15077_s10 + $0x128] sm:$0xff] %v10863_v17  ;;  %v12301_v18 = vadd.f32 %v15068_v13, %v10562_v35  ;;  %v10564_v20 = vpop.f32.mrb[125].mxu1 }
 0x7a1   : > { %v10565_v43 = vpop.f32.mrb[126].mxu1 }
 0x7a2   : > { %v10788_v42 = vadd.f32 %v12301_v18, %v15337_v31  ;;  %v12302_v54 = vadd.f32 %v15068_v13, %v10565_v43  ;;  %v10567_v5 = vpop.f32.mrb[127].mxu1  ;;  %v9259_v18 = vld [vmem:[%s13939_s16 + $0x181] sm:$0xff]  ;;  %s10923_s16 = scalar_lea.sflag [#allocation7], %s13935_s29 }
 0x7a4   : > { %v10864_v63 = vadd.f32 %v10788_v42, %v9252_v50  ;;  %v10791_v23 = vadd.f32 %v12302_v54, %v15338_v12 }
 0x7a6   : > { %10912 = vst [vmem:[%s15077_s10 + $0x130] sm:$0xff] %v10864_v63  ;;  %v10865_v39 = vadd.f32 %v10791_v23, %v9253_v44 }
 0x7a7   : > { %v10570_v19 = vpop.f32.mrb[128].mxu1 }
 0x7a8   : > { %10913 = vst [vmem:[%s15077_s10 + $0x138] sm:$0xff] %v10865_v39  ;;  %v10572_v22 = vpop.f32.mrb[129].mxu1  ;;  %v12303_v46 = vadd.f32 %v15068_v13, %v10570_v19 }
 0x7a9   : > { %v10573_v30 = vpop.f32.mrb[130].mxu1 }
 0x7aa   : > { %v10575_v26 = vpop.f32.mrb[131].mxu1  ;;  %v12304_v34 = vadd.f32 %v15068_v13, %v10573_v30 }
 0x7af   : > { %v10578_v56 = vpop.f32.mrb[132].mxu1 }
 0x7b0   : > { %v10580_v41 = vpop.f32.mrb[133].mxu1  ;;  %v12305_v33 = vadd.f32 %v15068_v13, %v10578_v56 }
 0x7b1   : > { %v10581_v32 = vpop.f32.mrb[134].mxu1 }
 0x7b2   : > { %v10583_v10 = vpop.f32.mrb[135].mxu1  ;;  %v12306_v38 = vadd.f32 %v15068_v13, %v10581_v32 }
 0x7b7   : > { %v10586_v60 = vpop.f32.mrb[136].mxu1 }
 0x7b8   : > { %v10588_v27 = vpop.f32.mrb[137].mxu1  ;;  %v12307_v29 = vadd.f32 %v15068_v13, %v10586_v60 }
 0x7b9   : > { %v10589_v48 = vpop.f32.mrb[138].mxu1 }
 0x7ba   : > { %v10591_v58 = vpop.f32.mrb[139].mxu1  ;;  %v12308_v52 = vadd.f32 %v15068_v13, %v10589_v48 }
 0x7bf   : > { %v10594_v3 = vpop.f32.mrb[140].mxu1 }
 0x7c0   : > { %v10596_v36 = vpop.f32.mrb[141].mxu1  ;;  %v12309_v37 = vadd.f32 %v15068_v13, %v10594_v3 }
 0x7c1   : > { %v10597_v53 = vpop.f32.mrb[142].mxu1 }
 0x7c2   : > { %v10599_v47 = vpop.f32.mrb[143].mxu1  ;;  %v12310_v59 = vadd.f32 %v15068_v13, %v10597_v53 }
 0x7c7   : > { %v12193_v16 = vpop.f32.mrb[144].mxu1 }
 0x7c8   : > { %v10804_v21 = vadd.f32 %v12305_v33, %v12193_v16  ;;  %v10795_v45 = vpop.f32.mrb[145].mxu1 }
 0x7c9   : > { %v10796_v6 = vadd.f32 %v12303_v46, %v10795_v45  ;;  %v12194_v57 = vpop.f32.mrb[146].mxu1 }
 0x7ca   : > { %v10868_v62 = vadd.f32 %v10804_v21, %v9256_v2  ;;  %v10807_v8 = vadd.f32 %v12306_v38, %v12194_v57  ;;  %v10798_v14 = vpop.f32.mrb[147].mxu1 }
 0x7cb   : > { %v10866_v15 = vadd.f32 %v10796_v6, %v9254_v24  ;;  %v10799_v61 = vadd.f32 %v12304_v34, %v10798_v14 }
 0x7cc   : > { %10916 = vst [vmem:[%s15077_s10 + $0x150] sm:$0xff] %v10868_v62  ;;  %v10869_v49 = vadd.f32 %v10807_v8, %v9257_v25 }
 0x7cd   : > { %10914 = vst [vmem:[%s15077_s10 + $0x140] sm:$0xff] %v10866_v15  ;;  %v10867_v7 = vadd.f32 %v10799_v61, %v9255_v11 }
 0x7ce   : > { %10917 = vst [vmem:[%s15077_s10 + $0x158] sm:$0xff] %v10869_v49 }
 0x7cf   : > { %10915 = vst [vmem:[%s15077_s10 + $0x148] sm:$0xff] %v10867_v7  ;;  %v12197_v0 = vpop.f32.mrb[148].mxu1 }
 0x7d0   : > { %v10820_v1 = vadd.f32 %v12309_v37, %v12197_v0  ;;  %v10811_v40 = vpop.f32.mrb[149].mxu1 }
 0x7d1   : > { %v10812_v4 = vadd.f32 %v12307_v29, %v10811_v40  ;;  %v12198_v28 = vpop.f32.mrb[150].mxu1 }
 0x7d2   : > { %v10872_v17 = vadd.f32 %v10820_v1, %v9260_v9  ;;  %v10823_v35 = vadd.f32 %v12310_v59, %v12198_v28  ;;  %v10814_v20 = vpop.f32.mrb[151].mxu1 }
 0x7d3   : > { %v10870_v50 = vadd.f32 %v10812_v4, %v9258_v51  ;;  %v10815_v43 = vadd.f32 %v12308_v52, %v10814_v20 }
 0x7d4   : > { %10920 = vst [vmem:[%s15077_s10 + $0x170] sm:$0xff] %v10872_v17  ;;  %v10873_v31 = vadd.f32 %v10823_v35, %v9261_v55 }
 0x7d5   : > { %10918 = vst [vmem:[%s15077_s10 + $0x160] sm:$0xff] %v10870_v50  ;;  %v10871_v13 = vadd.f32 %v10815_v43, %v9259_v18 }
 0x7d6   : > { %10921 = vst [vmem:[%s15077_s10 + $0x178] sm:$0xff] %v10873_v31 }
 0x7d7   : > { %10919 = vst [vmem:[%s15077_s10 + $0x168] sm:$0xff] %v10871_v13 }
 0x7d8   : > { %13663 = shalt.err (!%p13660_p2)
}
 0x7d9   : > { %s13664_s11 = scalar_lea.hbm %s15259_s6, 6144  ;;  %s13668_s7 = scalar_lea.hbm %s15313_s5, 12288 }
 0x7da   : > { %p13665_p13 = scmp.ne.s32.totalorder %s15259_s6, %s13664_s11  ;;  %p13669_p4 = scmp.lt.u32.totalorder %s15259_s6, %s15313_s5 }
 0x7db   : > { %p13670_p5 = scmp.lt.u32.totalorder %s13668_s7, %s13664_s11  ;;  %p13672_p11 = scmp.lt.u32.totalorder %s13664_s11, %s15259_s6 }
 0x7dc   : > { %p13666_p6 = pnand %p13665_p13, %p15339_p0 }
 0x7dd   : > { %p13671_p8 = por %p13670_p5, %p13669_p4 }
 0x7de   : > { %p13667_p10 = pneg %p13666_p6 }
 0x7df   : > { %p13673_p1 = por %p13672_p11, %p13671_p8 }
 0x7e1   : > { %p13674_p3 = pnand %p13673_p1, %p13667_p10 }
 0x7e3   : > { %13677 = shalt.err (!%p13674_p3)
}
 0x7e4   : > { %s13731_s12 = smov 128   ;;  %s13732_s17 = smov 8  }
 0x7e5   : > { %12902 = dma.vmem_to_hbm [thread:$0]  (%p15339_p0), %s15262_s13, 6144, %s15259_s6, %s10923_s16, %s13731_s12, %s13731_s12, %s13732_s17  }
 0x7e6 PF: > { %s10951_s22 = sand.u32 1, %s13708_s18   ;;  %p15340_p7 = scmp.ne.s32.totalorder %s15319_s25, 0 }
 0x7e7   : > { %p15341_p9 = scmp.ge.s32.totalorder %s13720_s21, 2  ;;  %s10952_s24 = scalar_lea.sflag [#allocation7], %s10951_s22 }
 0x7e9   : > { %p12916_p12 = pnand %p15341_p9, %p15340_p7 }
 0x7eb   : > { %13703 = dma.done.wait (!%p12916_p12), %s10952_s24, 6144  }
 0x7ec   : > { %13705 = vsyncadd (!%p12916_p12), %s10952_s24, 4294961152  ;;  %p19_p2 = scmp.ge.s32.totalorder %s13873_s14, 4   ;;  %s15342_s18 = smov %s13712_s19 }
 0x7ed   : > { %s15343_s19 = smov %s13716_s20  ;;  %s15344_s20 = smov %s13889_s27 }
 0x7ee   : > { %s15345_s21 = smov %s13873_s14  ;;  %21 = sbr.rel (!%p19_p2) target bundleno = 6 (0x6), region = 93 }
 0x7f5   :  { %10957 = vsyncpa [#allocation6], 1 }
 0x7f6   :  { %10959 = vsyncpa [#allocation6 + $0x1], 1 }
 0x7f7   :  { %10960 = vsyncpa [#allocation9], 1 }
 0x7f8   :  { %10961 = vsyncpa [#allocation7], 1 }
 0x7f9   :  { %10963 = vsyncpa [#allocation7 + $0x1], 1 }

</bundles_post_ra>
